<compile_context>
chip_gen: v7x
topology: tpu7x:2x2x1
jax: 0.10.0
libtpu: 0.0.40
codegen_flags: <defaults>
</compile_context>

<pallas_src>
import functools

import jax
import jax.numpy as jnp
from jax import lax
from jax.experimental import pallas as pl
from jax.experimental.pallas import tpu as pltpu


_VMEM_LIMIT_BYTES = 32 * 1024 * 1024  # explicit scoped-VMEM limit; safe on v5e/v6e/v7x


def _pick_tile(dim, cap):
    """Largest multiple of 128 that divides `dim` and is <= cap; else the full dim."""
    best = dim
    t = 128
    while t <= min(dim, cap):
        if dim % t == 0:
            best = t
        t += 128
    return best


# ----------------------------- Pallas kernels ------------------------------ #

def _matmul_bias_kernel(x_ref, w_ref, b_ref, o_ref, acc_ref, *, activation):
    """Tiled (tm,tk)@(tk,tn) with f32 accumulator; bias (+ optional GELU) epilogue."""
    k = pl.program_id(2)

    @pl.when(k == 0)
    def _():
        acc_ref[...] = jnp.zeros_like(acc_ref)

    # bf16 x bf16 operands -> f32 accumulation on the MXU.
    acc_ref[...] += jnp.dot(x_ref[...], w_ref[...], preferred_element_type=jnp.float32)

    @pl.when(k == pl.num_programs(2) - 1)
    def _():
        y = acc_ref[...] + b_ref[...].astype(jnp.float32)  # (1, tn) broadcasts over rows
        if activation == "gelu":
            c = jnp.float32(0.7978845608028654)  # sqrt(2/pi), tanh-approx GELU (f32 epilogue)
            y = 0.5 * y * (1.0 + jnp.tanh(c * (y + 0.044715 * y * y * y)))
        o_ref[...] = y.astype(o_ref.dtype)


def _add_layernorm_kernel(x_ref, r_ref, g_ref, b_ref, o_ref, *, eps):
    """LayerNorm(x + r) — residual add fused into the LN kernel (one HBM round trip)."""
    x = x_ref[...].astype(jnp.float32) + r_ref[...].astype(jnp.float32)
    mu = jnp.mean(x, axis=-1, keepdims=True)
    xc = x - mu
    var = jnp.mean(xc * xc, axis=-1, keepdims=True)
    y = xc * lax.rsqrt(var + eps)
    y = y * g_ref[...].astype(jnp.float32) + b_ref[...].astype(jnp.float32)
    o_ref[...] = y.astype(o_ref.dtype)


def _flash_attn_kernel(q_ref, k_ref, v_ref, o_ref, m_sc, l_sc, acc_sc):
    """Flash attention: online softmax over KV blocks. Blocks are (1, tile, Dh)."""
    ki = pl.program_id(3)

    @pl.when(ki == 0)
    def _():
        m_sc[...] = jnp.full_like(m_sc, -jnp.inf)
        l_sc[...] = jnp.zeros_like(l_sc)
        acc_sc[...] = jnp.zeros_like(acc_sc)

    q = q_ref[0]  # (tq, Dh)  bf16 (already scaled by 1/sqrt(Dh) via wq folding)
    k = k_ref[0]  # (tkv, Dh) bf16
    v = v_ref[0]  # (tkv, Dh) bf16

    # Contract on dim 1 of both q and k: MXU handles the transposed contraction,
    # no XLU transpose of the K tile.
    s = lax.dot_general(q, k, (((1,), (1,)), ((), ())),
                        preferred_element_type=jnp.float32)          # (tq, tkv)

    m_new = jnp.maximum(m_sc[...], jnp.max(s, axis=-1, keepdims=True))
    alpha = jnp.exp(m_sc[...] - m_new)
    p = jnp.exp(s - m_new)
    l_sc[...] = alpha * l_sc[...] + jnp.sum(p, axis=-1, keepdims=True)
    acc_sc[...] = alpha * acc_sc[...] + jnp.dot(p.astype(v.dtype), v,
                                                preferred_element_type=jnp.float32)
    m_sc[...] = m_new

    @pl.when(ki == pl.num_programs(3) - 1)
    def _():
        inv_l = pl.reciprocal(l_sc[...], approx=True)  # EUP slot, ~free
        o_ref[0] = (acc_sc[...] * inv_l).astype(o_ref.dtype)


# ------------------------------ Pallas wrappers ----------------------------- #

def matmul_bias(x, w, b, activation=None, out_dtype=None):
    """Tiled (M,K)@(K,N)+b with optional GELU epilogue."""
    M, K = x.shape
    N = w.shape[1]
    out_dtype = out_dtype or x.dtype
    tm = _pick_tile(M, 256)
    tn = _pick_tile(N, 512)
    tk = _pick_tile(K, 512)
    kernel = functools.partial(_matmul_bias_kernel, activation=activation)
    return pl.pallas_call(
        kernel,
        out_shape=jax.ShapeDtypeStruct((M, N), out_dtype),
        grid=(M // tm, N // tn, K // tk),
        in_specs=[
            pl.BlockSpec((tm, tk), lambda i, j, k: (i, k)),
            pl.BlockSpec((tk, tn), lambda i, j, k: (k, j)),
            pl.BlockSpec((1, tn), lambda i, j, k: (0, j)),
        ],
        out_specs=pl.BlockSpec((tm, tn), lambda i, j, k: (i, j)),
        scratch_shapes=[pltpu.VMEM((tm, tn), jnp.float32)],
        compiler_params=pltpu.CompilerParams(
            dimension_semantics=("parallel", "parallel", "arbitrary"),
            vmem_limit_bytes=_VMEM_LIMIT_BYTES),
    )(x, w, b.reshape(1, N))


def add_layernorm(x, r, g, b, eps=1e-5):
    """LayerNorm(x + r) over the last dim, tiled along rows."""
    M, D = x.shape
    tm = _pick_tile(M, 512)
    return pl.pallas_call(
        functools.partial(_add_layernorm_kernel, eps=eps),
        out_shape=jax.ShapeDtypeStruct((M, D), x.dtype),
        grid=(M // tm,),
        in_specs=[
            pl.BlockSpec((tm, D), lambda i: (i, 0)),
            pl.BlockSpec((tm, D), lambda i: (i, 0)),
            pl.BlockSpec((1, D), lambda i: (0, 0)),
            pl.BlockSpec((1, D), lambda i: (0, 0)),
        ],
        out_specs=pl.BlockSpec((tm, D), lambda i: (i, 0)),
        compiler_params=pltpu.CompilerParams(
            dimension_semantics=("parallel",),
            vmem_limit_bytes=_VMEM_LIMIT_BYTES),
    )(x, r, g.reshape(1, D), b.reshape(1, D))


def attention(qkv, n_heads, head_dim):
    """qkv: (B, S, 3*D) fused projection slab -> (B, S, D) attention output.

    Head slicing (and the q/k/v split) is done entirely by BlockSpec index_maps —
    no JAX-side reshape/transpose of activations. KV axis is tiled with online
    softmax (flash-style), so VMEM stays O(tile * Dh) regardless of S.
    """
    B, S, D3 = qkv.shape
    D = D3 // 3
    tq = _pick_tile(S, 256)
    tkv = _pick_tile(S, 256)
    q_spec = pl.BlockSpec((1, tq, head_dim), lambda b, h, qi, ki: (b, qi, h))
    k_spec = pl.BlockSpec((1, tkv, head_dim), lambda b, h, qi, ki: (b, ki, n_heads + h))
    v_spec = pl.BlockSpec((1, tkv, head_dim), lambda b, h, qi, ki: (b, ki, 2 * n_heads + h))
    o_spec = pl.BlockSpec((1, tq, head_dim), lambda b, h, qi, ki: (b, qi, h))
    return pl.pallas_call(
        _flash_attn_kernel,
        out_shape=jax.ShapeDtypeStruct((B, S, D), qkv.dtype),
        grid=(B, n_heads, S // tq, S // tkv),
        in_specs=[q_spec, k_spec, v_spec],
        out_specs=o_spec,
        scratch_shapes=[
            pltpu.VMEM((tq, 1), jnp.float32),          # running max
            pltpu.VMEM((tq, 1), jnp.float32),          # running sum
            pltpu.VMEM((tq, head_dim), jnp.float32),   # output accumulator
        ],
        compiler_params=pltpu.CompilerParams(
            dimension_semantics=("parallel", "parallel", "parallel", "arbitrary"),
            vmem_limit_bytes=_VMEM_LIMIT_BYTES),
    )(qkv, qkv, qkv)


# ------------------------------- Model forward ------------------------------ #

def encoder_layer(x, p, n_heads):
    B, S, D = x.shape
    Dh = D // n_heads
    M = B * S
    x2 = x.reshape(M, D)

    # Fused Q/K/V projection: one pallas_call, x read from HBM once.
    qkv = matmul_bias(x2, p["wqkv"], p["bqkv"])                    # (M, 3D) bf16
    a = attention(qkv.reshape(B, S, 3 * D), n_heads, Dh)           # (B, S, D) bf16
    a = matmul_bias(a.reshape(M, D), p["wo"], p["bo"])             # output projection

    # post-LN residual blocks (PyTorch nn.TransformerEncoderLayer, norm_first=False),
    # residual add fused into the LN kernel.
    x2 = add_layernorm(x2, a, p["ln1_g"], p["ln1_b"])
    f = matmul_bias(x2, p["w1"], p["b1"], activation="gelu")
    f = matmul_bias(f, p["w2"], p["b2"])
    x2 = add_layernorm(x2, f, p["ln2_g"], p["ln2_b"])
    return x2.reshape(B, S, D)


def pretrained_encoder_with_head(token_ids, params, *, n_heads, n_classes):
    """Returns (logits, additional_losses) like PretrainedEncoderWithHead.forward."""
    B, S = token_ids.shape
    D = params["tok_emb"].shape[1]

    # embedding gather is glue (plain JAX); everything downstream runs in Pallas.
    x = jnp.take(params["tok_emb"], token_ids, axis=0) * jnp.sqrt(jnp.float32(D))
    x = x + params["pos_emb"][:S][None, :, :]
    x = x.astype(jnp.bfloat16)

    for p in params["layers"]:
        x = encoder_layer(x, p, n_heads)

    # Head: lane-dense padded classifier (padded to 128 cols), sliced back to n_classes.
    logits = matmul_bias(x.reshape(B * S, D), params["head_w"], params["head_b"],
                         out_dtype=jnp.float32)
    logits = logits[:, :n_classes].reshape(B, S, n_classes)

    additional_losses = {}  # this encoder has no auxiliary losses
    return logits, additional_losses


# ------------------------------ Parameter init ------------------------------ #

def init_params(key, *, vocab_size, max_len, d_model, n_heads, d_ff, n_layers, n_classes):
    head_dim = d_model // n_heads
    q_scale = 1.0 / (head_dim ** 0.5)       # folded into wq (and bq) at init
    n_cls_pad = ((n_classes + 127) // 128) * 128  # lane-dense head output width
    keys = jax.random.split(key, 3 + n_layers)

    def dense(k, fan_in, shape):
        return jax.random.normal(k, shape, jnp.float32) * (1.0 / jnp.sqrt(jnp.float32(fan_in)))

    head_w = jnp.zeros((d_model, n_cls_pad), jnp.float32)
    head_w = head_w.at[:, :n_classes].set(dense(keys[2], d_model, (d_model, n_classes)))

    params = {
        "tok_emb": jax.random.normal(keys[0], (vocab_size, d_model), jnp.float32) * 0.02,
        "pos_emb": jax.random.normal(keys[1], (max_len, d_model), jnp.float32) * 0.02,
        "head_w": head_w.astype(jnp.bfloat16),
        "head_b": jnp.zeros((n_cls_pad,), jnp.float32),
        "layers": [],
    }
    for li in range(n_layers):
        lk = jax.random.split(keys[3 + li], 6)
        wq = dense(lk[0], d_model, (d_model, d_model))
        wk = dense(lk[1], d_model, (d_model, d_model))
        wv = dense(lk[2], d_model, (d_model, d_model))
        # fused QKV weight; 1/sqrt(Dh) folded into the Q slice (bias is zero, but the
        # Q-bias slice would also be scaled if nonzero).
        wqkv = jnp.concatenate([wq * q_scale, wk, wv], axis=1).astype(jnp.bfloat16)
        bqkv = jnp.zeros((3 * d_model,), jnp.float32)
        params["layers"].append({
            "wqkv": wqkv, "bqkv": bqkv,
            "wo": dense(lk[3], d_model, (d_model, d_model)).astype(jnp.bfloat16),
            "bo": jnp.zeros((d_model,), jnp.float32),
            "w1": dense(lk[4], d_model, (d_model, d_ff)).astype(jnp.bfloat16),
            "b1": jnp.zeros((d_ff,), jnp.float32),
            "w2": dense(lk[5], d_ff, (d_ff, d_model)).astype(jnp.bfloat16),
            "b2": jnp.zeros((d_model,), jnp.float32),
            "ln1_g": jnp.ones((d_model,), jnp.float32), "ln1_b": jnp.zeros((d_model,), jnp.float32),
            "ln2_g": jnp.ones((d_model,), jnp.float32), "ln2_b": jnp.zeros((d_model,), jnp.float32),
        })
    return params


# ----------------------------------- Main ----------------------------------- #

if __name__ == "__main__":
    VOCAB = 100
    MAX_LEN = 256
    B, S = 2, 128
    D, H, FF = 256, 2, 512
    N_LAYERS = 2
    N_CLASSES = 3  # whitespace correction: keep / insert / delete

    key = jax.random.PRNGKey(0)
    k_tok, k_params = jax.random.split(key)

    params = init_params(
        k_params, vocab_size=VOCAB, max_len=MAX_LEN, d_model=D,
        n_heads=H, d_ff=FF, n_layers=N_LAYERS, n_classes=N_CLASSES,
    )
    token_ids = jax.random.randint(k_tok, (B, S), 0, VOCAB, dtype=jnp.int32)

    fwd = jax.jit(functools.partial(pretrained_encoder_with_head,
                                    n_heads=H, n_classes=N_CLASSES))
    logits, extra_losses = fwd(token_ids, params)
    logits = jax.block_until_ready(logits)

    assert logits.shape == (B, S, N_CLASSES), logits.shape
    assert logits.dtype == jnp.float32
    assert extra_losses == {}
    print("KERNEL_OK")
</pallas_src>

<mosaic_0001>
module attributes {stable_mosaic.version = 11 : i64} {
  func.func @_matmul_bias_kernel(%arg0: i32, %arg1: i32, %arg2: i32, %arg3: memref<256x256xbf16, #tpu.memory_space<vmem>>, %arg4: memref<256x384xbf16, #tpu.memory_space<vmem>>, %arg5: memref<1x384xf32, #tpu.memory_space<vmem>>, %arg6: memref<256x384xbf16, #tpu.memory_space<vmem>>, %arg7: memref<256x384xf32, #tpu.memory_space<vmem>>) attributes {dimension_semantics = [#tpu.dimension_semantics<parallel>, #tpu.dimension_semantics<parallel>, #tpu.dimension_semantics<arbitrary>], iteration_bounds = array<i64: 1, 2, 1>, scalar_prefetch = 0 : i64, scratch_operands = 1 : i64, tpu.core_type = #tpu.core_type<tc>, window_params = [{transform_indices = @transform_0, window_bounds = array<i64: 256, 256>}, {transform_indices = @transform_1, window_bounds = array<i64: 256, 384>}, {transform_indices = @transform_2, window_bounds = array<i64: 1, 384>}, {transform_indices = @transform_3, window_bounds = array<i64: 256, 384>}]} {
    %c0_i32 = arith.constant 0 : i32
    %0 = arith.cmpi eq, %arg2, %c0_i32 : i32
    %1 = arith.extui %0 : i1 to i32
    %c0_i32_0 = arith.constant 0 : i32
    %2 = arith.cmpi ne, %1, %c0_i32_0 : i32
    scf.if %2 {
      %cst_10 = arith.constant 0.000000e+00 : f32
      %12 = vector.broadcast %cst_10 : f32 to vector<256x384xf32>
      %c0_11 = arith.constant 0 : index
      %c0_12 = arith.constant 0 : index
      %13 = vector.load %arg7[%c0_11, %c0_12] : memref<256x384xf32, #tpu.memory_space<vmem>>, vector<256x384xf32>
      tpu.vector_store %arg7[%c0_11, %c0_12], %12 {strides = array<i32>} : memref<256x384xf32, #tpu.memory_space<vmem>>, vector<256x384xf32>,
    } else {
    }
    %c0 = arith.constant 0 : index
    %c0_1 = arith.constant 0 : index
    %3 = vector.load %arg7[%c0, %c0_1] : memref<256x384xf32, #tpu.memory_space<vmem>>, vector<256x384xf32>
    %c0_2 = arith.constant 0 : index
    %c0_3 = arith.constant 0 : index
    %4 = vector.load %arg3[%c0_2, %c0_3] : memref<256x256xbf16, #tpu.memory_space<vmem>>, vector<256x256xbf16>
    %c0_4 = arith.constant 0 : index
    %c0_5 = arith.constant 0 : index
    %5 = vector.load %arg4[%c0_4, %c0_5] : memref<256x384xbf16, #tpu.memory_space<vmem>>, vector<256x384xbf16>
    %cst = arith.constant dense<0.000000e+00> : vector<256x384xf32>
    %6 = tpu.matmul %4, %5, %cst {dimension_numbers = #tpu.dot_dimension_numbers<[1], [0], [0], [1], [0, 0, 1, 1], [], []>} : vector<256x256xbf16>, vector<256x384xbf16>, vector<256x384xf32> -> vector<256x384xf32>
    %7 = arith.addf %3, %6 : vector<256x384xf32>
    %c0_6 = arith.constant 0 : index
    %c0_7 = arith.constant 0 : index
    %8 = vector.load %arg7[%c0_6, %c0_7] : memref<256x384xf32, #tpu.memory_space<vmem>>, vector<256x384xf32>
    tpu.vector_store %arg7[%c0_6, %c0_7], %7 {strides = array<i32>} : memref<256x384xf32, #tpu.memory_space<vmem>>, vector<256x384xf32>,
    %c0_i32_8 = arith.constant 0 : i32
    %9 = arith.cmpi eq, %arg2, %c0_i32_8 : i32
    %10 = arith.extui %9 : i1 to i32
    %c0_i32_9 = arith.constant 0 : i32
    %11 = arith.cmpi ne, %10, %c0_i32_9 : i32
    scf.if %11 {
      %c0_10 = arith.constant 0 : index
      %c0_11 = arith.constant 0 : index
      %12 = vector.load %arg7[%c0_10, %c0_11] : memref<256x384xf32, #tpu.memory_space<vmem>>, vector<256x384xf32>
      %c0_12 = arith.constant 0 : index
      %c0_13 = arith.constant 0 : index
      %13 = vector.load %arg5[%c0_12, %c0_13] : memref<1x384xf32, #tpu.memory_space<vmem>>, vector<1x384xf32>
      %14 = vector.broadcast %13 : vector<1x384xf32> to vector<256x384xf32>
      %15 = arith.addf %12, %14 : vector<256x384xf32>
      %16 = arith.truncf %15 : vector<256x384xf32> to vector<256x384xbf16>
      %c0_14 = arith.constant 0 : index
      %c0_15 = arith.constant 0 : index
      %17 = vector.load %arg6[%c0_14, %c0_15] : memref<256x384xbf16, #tpu.memory_space<vmem>>, vector<256x384xbf16>
      tpu.vector_store %arg6[%c0_14, %c0_15], %16 {strides = array<i32>} : memref<256x384xbf16, #tpu.memory_space<vmem>>, vector<256x384xbf16>,
    } else {
    }
    return
  }
  func.func @transform_0(%arg0: i32, %arg1: i32, %arg2: i32) -> (i32, i32) {
    %c0_i32 = arith.constant 0 : i32
    return %arg0, %arg2 : i32, i32
  }
  func.func @transform_1(%arg0: i32, %arg1: i32, %arg2: i32) -> (i32, i32) {
    %c0_i32 = arith.constant 0 : i32
    return %arg2, %arg1 : i32, i32
  }
  func.func @transform_2(%arg0: i32, %arg1: i32, %arg2: i32) -> (i32, i32) {
    %c0_i32 = arith.constant 0 : i32
    %c0_i32_0 = arith.constant 0 : i32
    return %c0_i32, %arg1 : i32, i32
  }
  func.func @transform_3(%arg0: i32, %arg1: i32, %arg2: i32) -> (i32, i32) {
    %c0_i32 = arith.constant 0 : i32
    return %arg0, %arg1 : i32, i32
  }
}

module attributes {stable_mosaic.version = 11 : i64} {
  func.func @_flash_attn_kernel(%arg0: i32, %arg1: i32, %arg2: i32, %arg3: i32, %arg4: memref<1x128x128xbf16, #tpu.memory_space<vmem>>, %arg5: memref<1x128x128xbf16, #tpu.memory_space<vmem>>, %arg6: memref<1x128x128xbf16, #tpu.memory_space<vmem>>, %arg7: memref<1x128x128xbf16, #tpu.memory_space<vmem>>, %arg8: memref<128x1xf32, #tpu.memory_space<vmem>>, %arg9: memref<128x1xf32, #tpu.memory_space<vmem>>, %arg10: memref<128x128xf32, #tpu.memory_space<vmem>>) attributes {dimension_semantics = [#tpu.dimension_semantics<parallel>, #tpu.dimension_semantics<parallel>, #tpu.dimension_semantics<parallel>, #tpu.dimension_semantics<arbitrary>], iteration_bounds = array<i64: 2, 2, 1, 1>, scalar_prefetch = 0 : i64, scratch_operands = 3 : i64, tpu.core_type = #tpu.core_type<tc>, window_params = [{transform_indices = @transform_0, window_bounds = array<i64: 1, 128, 128>}, {transform_indices = @transform_1, window_bounds = array<i64: 1, 128, 128>}, {transform_indices = @transform_2, window_bounds = array<i64: 1, 128, 128>}, {transform_indices = @transform_3, window_bounds = array<i64: 1, 128, 128>}]} {
    %c0_i32 = arith.constant 0 : i32
    %0 = arith.cmpi eq, %arg3, %c0_i32 : i32
    %1 = arith.extui %0 : i1 to i32
    %c0_i32_0 = arith.constant 0 : i32
    %2 = arith.cmpi ne, %1, %c0_i32_0 : i32
    scf.if %2 {
      %cst_28 = arith.constant 0xFF800000 : f32
      %37 = vector.broadcast %cst_28 : f32 to vector<128x1xf32>
      %c0_29 = arith.constant 0 : index
      %c0_30 = arith.constant 0 : index
      %38 = vector.load %arg8[%c0_29, %c0_30] : memref<128x1xf32, #tpu.memory_space<vmem>>, vector<128x1xf32>
      tpu.vector_store %arg8[%c0_29, %c0_30], %37 {strides = array<i32>} : memref<128x1xf32, #tpu.memory_space<vmem>>, vector<128x1xf32>,
      %cst_31 = arith.constant 0.000000e+00 : f32
      %39 = vector.broadcast %cst_31 : f32 to vector<128x1xf32>
      %c0_32 = arith.constant 0 : index
      %c0_33 = arith.constant 0 : index
      %40 = vector.load %arg9[%c0_32, %c0_33] : memref<128x1xf32, #tpu.memory_space<vmem>>, vector<128x1xf32>
      tpu.vector_store %arg9[%c0_32, %c0_33], %39 {strides = array<i32>} : memref<128x1xf32, #tpu.memory_space<vmem>>, vector<128x1xf32>,
      %cst_34 = arith.constant 0.000000e+00 : f32
      %41 = vector.broadcast %cst_34 : f32 to vector<128x128xf32>
      %c0_35 = arith.constant 0 : index
      %c0_36 = arith.constant 0 : index
      %42 = vector.load %arg10[%c0_35, %c0_36] : memref<128x128xf32, #tpu.memory_space<vmem>>, vector<128x128xf32>
      tpu.vector_store %arg10[%c0_35, %c0_36], %41 {strides = array<i32>} : memref<128x128xf32, #tpu.memory_space<vmem>>, vector<128x128xf32>,
    } else {
    }
    %c0 = arith.constant 0 : index
    %c0_1 = arith.constant 0 : index
    %c0_2 = arith.constant 0 : index
    %3 = vector.load %arg4[%c0, %c0_1, %c0_2] : memref<1x128x128xbf16, #tpu.memory_space<vmem>>, vector<1x128x128xbf16>
    %4 = vector.shape_cast %3 : vector<1x128x128xbf16> to vector<128x128xbf16>
    %c0_3 = arith.constant 0 : index
    %c0_4 = arith.constant 0 : index
    %c0_5 = arith.constant 0 : index
    %5 = vector.load %arg5[%c0_3, %c0_4, %c0_5] : memref<1x128x128xbf16, #tpu.memory_space<vmem>>, vector<1x128x128xbf16>
    %6 = vector.shape_cast %5 : vector<1x128x128xbf16> to vector<128x128xbf16>
    %c0_6 = arith.constant 0 : index
    %c0_7 = arith.constant 0 : index
    %c0_8 = arith.constant 0 : index
    %7 = vector.load %arg6[%c0_6, %c0_7, %c0_8] : memref<1x128x128xbf16, #tpu.memory_space<vmem>>, vector<1x128x128xbf16>
    %8 = vector.shape_cast %7 : vector<1x128x128xbf16> to vector<128x128xbf16>
    %cst = arith.constant dense<0.000000e+00> : vector<128x128xf32>
    %9 = tpu.matmul %4, %6, %cst {dimension_numbers = #tpu.dot_dimension_numbers<[1], [1], [0], [0], [0, 0, 1, 0], [], []>} : vector<128x128xbf16>, vector<128x128xbf16>, vector<128x128xf32> -> vector<128x128xf32>
    %c0_9 = arith.constant 0 : index
    %c0_10 = arith.constant 0 : index
    %10 = vector.load %arg8[%c0_9, %c0_10] : memref<128x1xf32, #tpu.memory_space<vmem>>, vector<128x1xf32>
    %cst_11 = arith.constant dense<0xFF800000> : vector<128xf32>
    %11 = vector.multi_reduction <maximumf>, %9, %cst_11 [1] : vector<128x128xf32> to vector<128xf32>
    %12 = vector.shape_cast %11 : vector<128xf32> to vector<128x1xf32>
    %13 = arith.maximumf %10, %12 : vector<128x1xf32>
    %c0_12 = arith.constant 0 : index
    %c0_13 = arith.constant 0 : index
    %14 = vector.load %arg8[%c0_12, %c0_13] : memref<128x1xf32, #tpu.memory_space<vmem>>, vector<128x1xf32>
    %15 = arith.subf %14, %13 : vector<128x1xf32>
    %16 = math.exp %15 : vector<128x1xf32>
    %17 = vector.broadcast %13 : vector<128x1xf32> to vector<128x128xf32>
    %18 = arith.subf %9, %17 : vector<128x128xf32>
    %19 = math.exp %18 : vector<128x128xf32>
    %c0_14 = arith.constant 0 : index
    %c0_15 = arith.constant 0 : index
    %20 = vector.load %arg9[%c0_14, %c0_15] : memref<128x1xf32, #tpu.memory_space<vmem>>, vector<128x1xf32>
    %21 = arith.mulf %16, %20 : vector<128x1xf32>
    %cst_16 = arith.constant dense<0.000000e+00> : vector<128xf32>
    %22 = vector.multi_reduction <add>, %19, %cst_16 [1] : vector<128x128xf32> to vector<128xf32>
    %23 = vector.shape_cast %22 : vector<128xf32> to vector<128x1xf32>
    %24 = arith.addf %21, %23 : vector<128x1xf32>
    %c0_17 = arith.constant 0 : index
    %c0_18 = arith.constant 0 : index
    %25 = vector.load %arg9[%c0_17, %c0_18] : memref<128x1xf32, #tpu.memory_space<vmem>>, vector<128x1xf32>
    tpu.vector_store %arg9[%c0_17, %c0_18], %24 {strides = array<i32>} : memref<128x1xf32, #tpu.memory_space<vmem>>, vector<128x1xf32>,
    %c0_19 = arith.constant 0 : index
    %c0_20 = arith.constant 0 : index
    %26 = vector.load %arg10[%c0_19, %c0_20] : memref<128x128xf32, #tpu.memory_space<vmem>>, vector<128x128xf32>
    %27 = vector.broadcast %16 : vector<128x1xf32> to vector<128x128xf32>
    %28 = arith.mulf %27, %26 : vector<128x128xf32>
    %29 = arith.truncf %19 : vector<128x128xf32> to vector<128x128xbf16>
    %cst_21 = arith.constant dense<0.000000e+00> : vector<128x128xf32>
    %30 = tpu.matmul %29, %8, %cst_21 {dimension_numbers = #tpu.dot_dimension_numbers<[1], [0], [0], [1], [0, 0, 1, 1], [], []>} : vector<128x128xbf16>, vector<128x128xbf16>, vector<128x128xf32> -> vector<128x128xf32>
    %31 = arith.addf %28, %30 : vector<128x128xf32>
    %c0_22 = arith.constant 0 : index
    %c0_23 = arith.constant 0 : index
    %32 = vector.load %arg10[%c0_22, %c0_23] : memref<128x128xf32, #tpu.memory_space<vmem>>, vector<128x128xf32>
    tpu.vector_store %arg10[%c0_22, %c0_23], %31 {strides = array<i32>} : memref<128x128xf32, #tpu.memory_space<vmem>>, vector<128x128xf32>,
    %c0_24 = arith.constant 0 : index
    %c0_25 = arith.constant 0 : index
    %33 = vector.load %arg8[%c0_24, %c0_25] : memref<128x1xf32, #tpu.memory_space<vmem>>, vector<128x1xf32>
    tpu.vector_store %arg8[%c0_24, %c0_25], %13 {strides = array<i32>} : memref<128x1xf32, #tpu.memory_space<vmem>>, vector<128x1xf32>,
    %c0_i32_26 = arith.constant 0 : i32
    %34 = arith.cmpi eq, %arg3, %c0_i32_26 : i32
    %35 = arith.extui %34 : i1 to i32
    %c0_i32_27 = arith.constant 0 : i32
    %36 = arith.cmpi ne, %35, %c0_i32_27 : i32
    scf.if %36 {
      %c0_28 = arith.constant 0 : index
      %c0_29 = arith.constant 0 : index
      %37 = vector.load %arg9[%c0_28, %c0_29] : memref<128x1xf32, #tpu.memory_space<vmem>>, vector<128x1xf32>
      %38 = tpu.reciprocal %37 {approx = true} : vector<128x1xf32> -> vector<128x1xf32>
      %c0_30 = arith.constant 0 : index
      %c0_31 = arith.constant 0 : index
      %39 = vector.load %arg10[%c0_30, %c0_31] : memref<128x128xf32, #tpu.memory_space<vmem>>, vector<128x128xf32>
      %40 = vector.broadcast %38 : vector<128x1xf32> to vector<128x128xf32>
      %41 = arith.mulf %39, %40 : vector<128x128xf32>
      %42 = arith.truncf %41 : vector<128x128xf32> to vector<128x128xbf16>
      %c0_32 = arith.constant 0 : index
      %c0_33 = arith.constant 0 : index
      %c0_34 = arith.constant 0 : index
      %43 = vector.load %arg7[%c0_32, %c0_33, %c0_34] : memref<1x128x128xbf16, #tpu.memory_space<vmem>>, vector<1x128x128xbf16>
      %44 = vector.shape_cast %43 : vector<1x128x128xbf16> to vector<128x128xbf16>
      %45 = vector.shape_cast %42 : vector<128x128xbf16> to vector<1x128x128xbf16>
      tpu.vector_store %arg7[%c0_32, %c0_33, %c0_34], %45 {strides = array<i32>} : memref<1x128x128xbf16, #tpu.memory_space<vmem>>, vector<1x128x128xbf16>,
    } else {
    }
    return
  }
  func.func @transform_0(%arg0: i32, %arg1: i32, %arg2: i32, %arg3: i32) -> (i32, i32, i32) {
    %c0_i32 = arith.constant 0 : i32
    return %arg0, %arg2, %arg1 : i32, i32, i32
  }
  func.func @transform_1(%arg0: i32, %arg1: i32, %arg2: i32, %arg3: i32) -> (i32, i32, i32) {
    %c2_i32 = arith.constant 2 : i32
    %0 = arith.addi %c2_i32, %arg1 : i32
    %c0_i32 = arith.constant 0 : i32
    return %arg0, %arg3, %0 : i32, i32, i32
  }
  func.func @transform_2(%arg0: i32, %arg1: i32, %arg2: i32, %arg3: i32) -> (i32, i32, i32) {
    %c4_i32 = arith.constant 4 : i32
    %0 = arith.addi %c4_i32, %arg1 : i32
    %c0_i32 = arith.constant 0 : i32
    return %arg0, %arg3, %0 : i32, i32, i32
  }
  func.func @transform_3(%arg0: i32, %arg1: i32, %arg2: i32, %arg3: i32) -> (i32, i32, i32) {
    %c0_i32 = arith.constant 0 : i32
    return %arg0, %arg2, %arg1 : i32, i32, i32
  }
}

module attributes {stable_mosaic.version = 11 : i64} {
  func.func @_matmul_bias_kernel(%arg0: i32, %arg1: i32, %arg2: i32, %arg3: memref<256x256xbf16, #tpu.memory_space<vmem>>, %arg4: memref<256x256xbf16, #tpu.memory_space<vmem>>, %arg5: memref<1x256xf32, #tpu.memory_space<vmem>>, %arg6: memref<256x256xbf16, #tpu.memory_space<vmem>>, %arg7: memref<256x256xf32, #tpu.memory_space<vmem>>) attributes {dimension_semantics = [#tpu.dimension_semantics<parallel>, #tpu.dimension_semantics<parallel>, #tpu.dimension_semantics<arbitrary>], iteration_bounds = array<i64: 1, 1, 1>, scalar_prefetch = 0 : i64, scratch_operands = 1 : i64, tpu.core_type = #tpu.core_type<tc>, window_params = [{transform_indices = @transform_0, window_bounds = array<i64: 256, 256>}, {transform_indices = @transform_1, window_bounds = array<i64: 256, 256>}, {transform_indices = @transform_2, window_bounds = array<i64: 1, 256>}, {transform_indices = @transform_3, window_bounds = array<i64: 256, 256>}]} {
    %c0_i32 = arith.constant 0 : i32
    %0 = arith.cmpi eq, %arg2, %c0_i32 : i32
    %1 = arith.extui %0 : i1 to i32
    %c0_i32_0 = arith.constant 0 : i32
    %2 = arith.cmpi ne, %1, %c0_i32_0 : i32
    scf.if %2 {
      %cst_10 = arith.constant 0.000000e+00 : f32
      %12 = vector.broadcast %cst_10 : f32 to vector<256x256xf32>
      %c0_11 = arith.constant 0 : index
      %c0_12 = arith.constant 0 : index
      %13 = vector.load %arg7[%c0_11, %c0_12] : memref<256x256xf32, #tpu.memory_space<vmem>>, vector<256x256xf32>
      tpu.vector_store %arg7[%c0_11, %c0_12], %12 {strides = array<i32>} : memref<256x256xf32, #tpu.memory_space<vmem>>, vector<256x256xf32>,
    } else {
    }
    %c0 = arith.constant 0 : index
    %c0_1 = arith.constant 0 : index
    %3 = vector.load %arg7[%c0, %c0_1] : memref<256x256xf32, #tpu.memory_space<vmem>>, vector<256x256xf32>
    %c0_2 = arith.constant 0 : index
    %c0_3 = arith.constant 0 : index
    %4 = vector.load %arg3[%c0_2, %c0_3] : memref<256x256xbf16, #tpu.memory_space<vmem>>, vector<256x256xbf16>
    %c0_4 = arith.constant 0 : index
    %c0_5 = arith.constant 0 : index
    %5 = vector.load %arg4[%c0_4, %c0_5] : memref<256x256xbf16, #tpu.memory_space<vmem>>, vector<256x256xbf16>
    %cst = arith.constant dense<0.000000e+00> : vector<256x256xf32>
    %6 = tpu.matmul %4, %5, %cst {dimension_numbers = #tpu.dot_dimension_numbers<[1], [0], [0], [1], [0, 0, 1, 1], [], []>} : vector<256x256xbf16>, vector<256x256xbf16>, vector<256x256xf32> -> vector<256x256xf32>
    %7 = arith.addf %3, %6 : vector<256x256xf32>
    %c0_6 = arith.constant 0 : index
    %c0_7 = arith.constant 0 : index
    %8 = vector.load %arg7[%c0_6, %c0_7] : memref<256x256xf32, #tpu.memory_space<vmem>>, vector<256x256xf32>
    tpu.vector_store %arg7[%c0_6, %c0_7], %7 {strides = array<i32>} : memref<256x256xf32, #tpu.memory_space<vmem>>, vector<256x256xf32>,
    %c0_i32_8 = arith.constant 0 : i32
    %9 = arith.cmpi eq, %arg2, %c0_i32_8 : i32
    %10 = arith.extui %9 : i1 to i32
    %c0_i32_9 = arith.constant 0 : i32
    %11 = arith.cmpi ne, %10, %c0_i32_9 : i32
    scf.if %11 {
      %c0_10 = arith.constant 0 : index
      %c0_11 = arith.constant 0 : index
      %12 = vector.load %arg7[%c0_10, %c0_11] : memref<256x256xf32, #tpu.memory_space<vmem>>, vector<256x256xf32>
      %c0_12 = arith.constant 0 : index
      %c0_13 = arith.constant 0 : index
      %13 = vector.load %arg5[%c0_12, %c0_13] : memref<1x256xf32, #tpu.memory_space<vmem>>, vector<1x256xf32>
      %14 = vector.broadcast %13 : vector<1x256xf32> to vector<256x256xf32>
      %15 = arith.addf %12, %14 : vector<256x256xf32>
      %16 = arith.truncf %15 : vector<256x256xf32> to vector<256x256xbf16>
      %c0_14 = arith.constant 0 : index
      %c0_15 = arith.constant 0 : index
      %17 = vector.load %arg6[%c0_14, %c0_15] : memref<256x256xbf16, #tpu.memory_space<vmem>>, vector<256x256xbf16>
      tpu.vector_store %arg6[%c0_14, %c0_15], %16 {strides = array<i32>} : memref<256x256xbf16, #tpu.memory_space<vmem>>, vector<256x256xbf16>,
    } else {
    }
    return
  }
  func.func @transform_0(%arg0: i32, %arg1: i32, %arg2: i32) -> (i32, i32) {
    %c0_i32 = arith.constant 0 : i32
    return %arg0, %arg2 : i32, i32
  }
  func.func @transform_1(%arg0: i32, %arg1: i32, %arg2: i32) -> (i32, i32) {
    %c0_i32 = arith.constant 0 : i32
    return %arg2, %arg1 : i32, i32
  }
  func.func @transform_2(%arg0: i32, %arg1: i32, %arg2: i32) -> (i32, i32) {
    %c0_i32 = arith.constant 0 : i32
    %c0_i32_0 = arith.constant 0 : i32
    return %c0_i32, %arg1 : i32, i32
  }
  func.func @transform_3(%arg0: i32, %arg1: i32, %arg2: i32) -> (i32, i32) {
    %c0_i32 = arith.constant 0 : i32
    return %arg0, %arg1 : i32, i32
  }
}

module attributes {stable_mosaic.version = 11 : i64} {
  func.func @_add_layernorm_kernel(%arg0: i32, %arg1: memref<256x256xbf16, #tpu.memory_space<vmem>>, %arg2: memref<256x256xbf16, #tpu.memory_space<vmem>>, %arg3: memref<1x256xf32, #tpu.memory_space<vmem>>, %arg4: memref<1x256xf32, #tpu.memory_space<vmem>>, %arg5: memref<256x256xbf16, #tpu.memory_space<vmem>>) attributes {dimension_semantics = [#tpu.dimension_semantics<parallel>], iteration_bounds = array<i64: 1>, scalar_prefetch = 0 : i64, scratch_operands = 0 : i64, tpu.core_type = #tpu.core_type<tc>, window_params = [{transform_indices = @transform_0, window_bounds = array<i64: 256, 256>}, {transform_indices = @transform_1, window_bounds = array<i64: 256, 256>}, {pipeline_mode = #tpu.pipeline_mode<synchronous>, transform_indices = @transform_2, window_bounds = array<i64: 1, 256>}, {pipeline_mode = #tpu.pipeline_mode<synchronous>, transform_indices = @transform_3, window_bounds = array<i64: 1, 256>}, {transform_indices = @transform_4, window_bounds = array<i64: 256, 256>}]} {
    %c0 = arith.constant 0 : index
    %c0_0 = arith.constant 0 : index
    %0 = vector.load %arg1[%c0, %c0_0] : memref<256x256xbf16, #tpu.memory_space<vmem>>, vector<256x256xbf16>
    %1 = arith.extf %0 : vector<256x256xbf16> to vector<256x256xf32>
    %c0_1 = arith.constant 0 : index
    %c0_2 = arith.constant 0 : index
    %2 = vector.load %arg2[%c0_1, %c0_2] : memref<256x256xbf16, #tpu.memory_space<vmem>>, vector<256x256xbf16>
    %3 = arith.extf %2 : vector<256x256xbf16> to vector<256x256xf32>
    %4 = arith.addf %1, %3 : vector<256x256xf32>
    %cst = arith.constant dense<0.000000e+00> : vector<256xf32>
    %5 = vector.multi_reduction <add>, %4, %cst [1] : vector<256x256xf32> to vector<256xf32>
    %6 = vector.shape_cast %5 : vector<256xf32> to vector<256x1xf32>
    %cst_3 = arith.constant 2.560000e+02 : f32
    %7 = vector.broadcast %cst_3 : f32 to vector<256x1xf32>
    %8 = arith.divf %6, %7 : vector<256x1xf32>
    %9 = vector.broadcast %8 : vector<256x1xf32> to vector<256x256xf32>
    %10 = arith.subf %4, %9 : vector<256x256xf32>
    %11 = arith.mulf %10, %10 : vector<256x256xf32>
    %cst_4 = arith.constant dense<0.000000e+00> : vector<256xf32>
    %12 = vector.multi_reduction <add>, %11, %cst_4 [1] : vector<256x256xf32> to vector<256xf32>
    %13 = vector.shape_cast %12 : vector<256xf32> to vector<256x1xf32>
    %cst_5 = arith.constant 2.560000e+02 : f32
    %14 = vector.broadcast %cst_5 : f32 to vector<256x1xf32>
    %15 = arith.divf %13, %14 : vector<256x1xf32>
    %cst_6 = arith.constant 9.99999974E-6 : f32
    %16 = vector.broadcast %cst_6 : f32 to vector<256x1xf32>
    %17 = arith.addf %15, %16 : vector<256x1xf32>
    %18 = math.rsqrt %17 : vector<256x1xf32>
    %19 = vector.broadcast %18 : vector<256x1xf32> to vector<256x256xf32>
    %20 = arith.mulf %10, %19 : vector<256x256xf32>
    %c0_7 = arith.constant 0 : index
    %c0_8 = arith.constant 0 : index
    %21 = vector.load %arg3[%c0_7, %c0_8] : memref<1x256xf32, #tpu.memory_space<vmem>>, vector<1x256xf32>
    %22 = vector.broadcast %21 : vector<1x256xf32> to vector<256x256xf32>
    %23 = arith.mulf %20, %22 : vector<256x256xf32>
    %c0_9 = arith.constant 0 : index
    %c0_10 = arith.constant 0 : index
    %24 = vector.load %arg4[%c0_9, %c0_10] : memref<1x256xf32, #tpu.memory_space<vmem>>, vector<1x256xf32>
    %25 = vector.broadcast %24 : vector<1x256xf32> to vector<256x256xf32>
    %26 = arith.addf %23, %25 : vector<256x256xf32>
    %27 = arith.truncf %26 : vector<256x256xf32> to vector<256x256xbf16>
    %c0_11 = arith.constant 0 : index
    %c0_12 = arith.constant 0 : index
    %28 = vector.load %arg5[%c0_11, %c0_12] : memref<256x256xbf16, #tpu.memory_space<vmem>>, vector<256x256xbf16>
    tpu.vector_store %arg5[%c0_11, %c0_12], %27 {strides = array<i32>} : memref<256x256xbf16, #tpu.memory_space<vmem>>, vector<256x256xbf16>,
    return
  }
  func.func @transform_0(%arg0: i32) -> (i32, i32) {
    %c0_i32 = arith.constant 0 : i32
    %c0_i32_0 = arith.constant 0 : i32
    return %arg0, %c0_i32 : i32, i32
  }
  func.func @transform_1(%arg0: i32) -> (i32, i32) {
    %c0_i32 = arith.constant 0 : i32
    %c0_i32_0 = arith.constant 0 : i32
    return %arg0, %c0_i32 : i32, i32
  }
  func.func @transform_2(%arg0: i32) -> (i32, i32) {
    %c0_i32 = arith.constant 0 : i32
    %c0_i32_0 = arith.constant 0 : i32
    %c0_i32_1 = arith.constant 0 : i32
    return %c0_i32, %c0_i32_0 : i32, i32
  }
  func.func @transform_3(%arg0: i32) -> (i32, i32) {
    %c0_i32 = arith.constant 0 : i32
    %c0_i32_0 = arith.constant 0 : i32
    %c0_i32_1 = arith.constant 0 : i32
    return %c0_i32, %c0_i32_0 : i32, i32
  }
  func.func @transform_4(%arg0: i32) -> (i32, i32) {
    %c0_i32 = arith.constant 0 : i32
    %c0_i32_0 = arith.constant 0 : i32
    return %arg0, %c0_i32 : i32, i32
  }
}

module attributes {stable_mosaic.version = 11 : i64} {
  func.func @_matmul_bias_kernel(%arg0: i32, %arg1: i32, %arg2: i32, %arg3: memref<256x256xbf16, #tpu.memory_space<vmem>>, %arg4: memref<256x512xbf16, #tpu.memory_space<vmem>>, %arg5: memref<1x512xf32, #tpu.memory_space<vmem>>, %arg6: memref<256x512xbf16, #tpu.memory_space<vmem>>, %arg7: memref<256x512xf32, #tpu.memory_space<vmem>>) attributes {dimension_semantics = [#tpu.dimension_semantics<parallel>, #tpu.dimension_semantics<parallel>, #tpu.dimension_semantics<arbitrary>], iteration_bounds = array<i64: 1, 1, 1>, scalar_prefetch = 0 : i64, scratch_operands = 1 : i64, tpu.core_type = #tpu.core_type<tc>, window_params = [{transform_indices = @transform_0, window_bounds = array<i64: 256, 256>}, {transform_indices = @transform_1, window_bounds = array<i64: 256, 512>}, {transform_indices = @transform_2, window_bounds = array<i64: 1, 512>}, {transform_indices = @transform_3, window_bounds = array<i64: 256, 512>}]} {
    %c0_i32 = arith.constant 0 : i32
    %0 = arith.cmpi eq, %arg2, %c0_i32 : i32
    %1 = arith.extui %0 : i1 to i32
    %c0_i32_0 = arith.constant 0 : i32
    %2 = arith.cmpi ne, %1, %c0_i32_0 : i32
    scf.if %2 {
      %cst_10 = arith.constant 0.000000e+00 : f32
      %12 = vector.broadcast %cst_10 : f32 to vector<256x512xf32>
      %c0_11 = arith.constant 0 : index
      %c0_12 = arith.constant 0 : index
      %13 = vector.load %arg7[%c0_11, %c0_12] : memref<256x512xf32, #tpu.memory_space<vmem>>, vector<256x512xf32>
      tpu.vector_store %arg7[%c0_11, %c0_12], %12 {strides = array<i32>} : memref<256x512xf32, #tpu.memory_space<vmem>>, vector<256x512xf32>,
    } else {
    }
    %c0 = arith.constant 0 : index
    %c0_1 = arith.constant 0 : index
    %3 = vector.load %arg7[%c0, %c0_1] : memref<256x512xf32, #tpu.memory_space<vmem>>, vector<256x512xf32>
    %c0_2 = arith.constant 0 : index
    %c0_3 = arith.constant 0 : index
    %4 = vector.load %arg3[%c0_2, %c0_3] : memref<256x256xbf16, #tpu.memory_space<vmem>>, vector<256x256xbf16>
    %c0_4 = arith.constant 0 : index
    %c0_5 = arith.constant 0 : index
    %5 = vector.load %arg4[%c0_4, %c0_5] : memref<256x512xbf16, #tpu.memory_space<vmem>>, vector<256x512xbf16>
    %cst = arith.constant dense<0.000000e+00> : vector<256x512xf32>
    %6 = tpu.matmul %4, %5, %cst {dimension_numbers = #tpu.dot_dimension_numbers<[1], [0], [0], [1], [0, 0, 1, 1], [], []>} : vector<256x256xbf16>, vector<256x512xbf16>, vector<256x512xf32> -> vector<256x512xf32>
    %7 = arith.addf %3, %6 : vector<256x512xf32>
    %c0_6 = arith.constant 0 : index
    %c0_7 = arith.constant 0 : index
    %8 = vector.load %arg7[%c0_6, %c0_7] : memref<256x512xf32, #tpu.memory_space<vmem>>, vector<256x512xf32>
    tpu.vector_store %arg7[%c0_6, %c0_7], %7 {strides = array<i32>} : memref<256x512xf32, #tpu.memory_space<vmem>>, vector<256x512xf32>,
    %c0_i32_8 = arith.constant 0 : i32
    %9 = arith.cmpi eq, %arg2, %c0_i32_8 : i32
    %10 = arith.extui %9 : i1 to i32
    %c0_i32_9 = arith.constant 0 : i32
    %11 = arith.cmpi ne, %10, %c0_i32_9 : i32
    scf.if %11 {
      %c0_10 = arith.constant 0 : index
      %c0_11 = arith.constant 0 : index
      %12 = vector.load %arg7[%c0_10, %c0_11] : memref<256x512xf32, #tpu.memory_space<vmem>>, vector<256x512xf32>
      %c0_12 = arith.constant 0 : index
      %c0_13 = arith.constant 0 : index
      %13 = vector.load %arg5[%c0_12, %c0_13] : memref<1x512xf32, #tpu.memory_space<vmem>>, vector<1x512xf32>
      %14 = vector.broadcast %13 : vector<1x512xf32> to vector<256x512xf32>
      %15 = arith.addf %12, %14 : vector<256x512xf32>
      %cst_14 = arith.constant 5.000000e-01 : f32
      %16 = vector.broadcast %cst_14 : f32 to vector<256x512xf32>
      %17 = arith.mulf %16, %15 : vector<256x512xf32>
      %cst_15 = arith.constant 4.471500e-02 : f32
      %18 = vector.broadcast %cst_15 : f32 to vector<256x512xf32>
      %19 = arith.mulf %18, %15 : vector<256x512xf32>
      %20 = arith.mulf %19, %15 : vector<256x512xf32>
      %21 = arith.mulf %20, %15 : vector<256x512xf32>
      %22 = arith.addf %15, %21 : vector<256x512xf32>
      %cst_16 = arith.constant 0.797884583 : f32
      %23 = vector.broadcast %cst_16 : f32 to vector<256x512xf32>
      %24 = arith.mulf %23, %22 : vector<256x512xf32>
      %25 = math.tanh %24 : vector<256x512xf32>
      %cst_17 = arith.constant 1.000000e+00 : f32
      %26 = vector.broadcast %cst_17 : f32 to vector<256x512xf32>
      %27 = arith.addf %26, %25 : vector<256x512xf32>
      %28 = arith.mulf %17, %27 : vector<256x512xf32>
      %29 = arith.truncf %28 : vector<256x512xf32> to vector<256x512xbf16>
      %c0_18 = arith.constant 0 : index
      %c0_19 = arith.constant 0 : index
      %30 = vector.load %arg6[%c0_18, %c0_19] : memref<256x512xbf16, #tpu.memory_space<vmem>>, vector<256x512xbf16>
      tpu.vector_store %arg6[%c0_18, %c0_19], %29 {strides = array<i32>} : memref<256x512xbf16, #tpu.memory_space<vmem>>, vector<256x512xbf16>,
    } else {
    }
    return
  }
  func.func @transform_0(%arg0: i32, %arg1: i32, %arg2: i32) -> (i32, i32) {
    %c0_i32 = arith.constant 0 : i32
    return %arg0, %arg2 : i32, i32
  }
  func.func @transform_1(%arg0: i32, %arg1: i32, %arg2: i32) -> (i32, i32) {
    %c0_i32 = arith.constant 0 : i32
    return %arg2, %arg1 : i32, i32
  }
  func.func @transform_2(%arg0: i32, %arg1: i32, %arg2: i32) -> (i32, i32) {
    %c0_i32 = arith.constant 0 : i32
    %c0_i32_0 = arith.constant 0 : i32
    return %c0_i32, %arg1 : i32, i32
  }
  func.func @transform_3(%arg0: i32, %arg1: i32, %arg2: i32) -> (i32, i32) {
    %c0_i32 = arith.constant 0 : i32
    return %arg0, %arg1 : i32, i32
  }
}

module attributes {stable_mosaic.version = 11 : i64} {
  func.func @_matmul_bias_kernel(%arg0: i32, %arg1: i32, %arg2: i32, %arg3: memref<256x512xbf16, #tpu.memory_space<vmem>>, %arg4: memref<512x256xbf16, #tpu.memory_space<vmem>>, %arg5: memref<1x256xf32, #tpu.memory_space<vmem>>, %arg6: memref<256x256xbf16, #tpu.memory_space<vmem>>, %arg7: memref<256x256xf32, #tpu.memory_space<vmem>>) attributes {dimension_semantics = [#tpu.dimension_semantics<parallel>, #tpu.dimension_semantics<parallel>, #tpu.dimension_semantics<arbitrary>], iteration_bounds = array<i64: 1, 1, 1>, scalar_prefetch = 0 : i64, scratch_operands = 1 : i64, tpu.core_type = #tpu.core_type<tc>, window_params = [{transform_indices = @transform_0, window_bounds = array<i64: 256, 512>}, {transform_indices = @transform_1, window_bounds = array<i64: 512, 256>}, {transform_indices = @transform_2, window_bounds = array<i64: 1, 256>}, {transform_indices = @transform_3, window_bounds = array<i64: 256, 256>}]} {
    %c0_i32 = arith.constant 0 : i32
    %0 = arith.cmpi eq, %arg2, %c0_i32 : i32
    %1 = arith.extui %0 : i1 to i32
    %c0_i32_0 = arith.constant 0 : i32
    %2 = arith.cmpi ne, %1, %c0_i32_0 : i32
    scf.if %2 {
      %cst_10 = arith.constant 0.000000e+00 : f32
      %12 = vector.broadcast %cst_10 : f32 to vector<256x256xf32>
      %c0_11 = arith.constant 0 : index
      %c0_12 = arith.constant 0 : index
      %13 = vector.load %arg7[%c0_11, %c0_12] : memref<256x256xf32, #tpu.memory_space<vmem>>, vector<256x256xf32>
      tpu.vector_store %arg7[%c0_11, %c0_12], %12 {strides = array<i32>} : memref<256x256xf32, #tpu.memory_space<vmem>>, vector<256x256xf32>,
    } else {
    }
    %c0 = arith.constant 0 : index
    %c0_1 = arith.constant 0 : index
    %3 = vector.load %arg7[%c0, %c0_1] : memref<256x256xf32, #tpu.memory_space<vmem>>, vector<256x256xf32>
    %c0_2 = arith.constant 0 : index
    %c0_3 = arith.constant 0 : index
    %4 = vector.load %arg3[%c0_2, %c0_3] : memref<256x512xbf16, #tpu.memory_space<vmem>>, vector<256x512xbf16>
    %c0_4 = arith.constant 0 : index
    %c0_5 = arith.constant 0 : index
    %5 = vector.load %arg4[%c0_4, %c0_5] : memref<512x256xbf16, #tpu.memory_space<vmem>>, vector<512x256xbf16>
    %cst = arith.constant dense<0.000000e+00> : vector<256x256xf32>
    %6 = tpu.matmul %4, %5, %cst {dimension_numbers = #tpu.dot_dimension_numbers<[1], [0], [0], [1], [0, 0, 1, 1], [], []>} : vector<256x512xbf16>, vector<512x256xbf16>, vector<256x256xf32> -> vector<256x256xf32>
    %7 = arith.addf %3, %6 : vector<256x256xf32>
    %c0_6 = arith.constant 0 : index
    %c0_7 = arith.constant 0 : index
    %8 = vector.load %arg7[%c0_6, %c0_7] : memref<256x256xf32, #tpu.memory_space<vmem>>, vector<256x256xf32>
    tpu.vector_store %arg7[%c0_6, %c0_7], %7 {strides = array<i32>} : memref<256x256xf32, #tpu.memory_space<vmem>>, vector<256x256xf32>,
    %c0_i32_8 = arith.constant 0 : i32
    %9 = arith.cmpi eq, %arg2, %c0_i32_8 : i32
    %10 = arith.extui %9 : i1 to i32
    %c0_i32_9 = arith.constant 0 : i32
    %11 = arith.cmpi ne, %10, %c0_i32_9 : i32
    scf.if %11 {
      %c0_10 = arith.constant 0 : index
      %c0_11 = arith.constant 0 : index
      %12 = vector.load %arg7[%c0_10, %c0_11] : memref<256x256xf32, #tpu.memory_space<vmem>>, vector<256x256xf32>
      %c0_12 = arith.constant 0 : index
      %c0_13 = arith.constant 0 : index
      %13 = vector.load %arg5[%c0_12, %c0_13] : memref<1x256xf32, #tpu.memory_space<vmem>>, vector<1x256xf32>
      %14 = vector.broadcast %13 : vector<1x256xf32> to vector<256x256xf32>
      %15 = arith.addf %12, %14 : vector<256x256xf32>
      %16 = arith.truncf %15 : vector<256x256xf32> to vector<256x256xbf16>
      %c0_14 = arith.constant 0 : index
      %c0_15 = arith.constant 0 : index
      %17 = vector.load %arg6[%c0_14, %c0_15] : memref<256x256xbf16, #tpu.memory_space<vmem>>, vector<256x256xbf16>
      tpu.vector_store %arg6[%c0_14, %c0_15], %16 {strides = array<i32>} : memref<256x256xbf16, #tpu.memory_space<vmem>>, vector<256x256xbf16>,
    } else {
    }
    return
  }
  func.func @transform_0(%arg0: i32, %arg1: i32, %arg2: i32) -> (i32, i32) {
    %c0_i32 = arith.constant 0 : i32
    return %arg0, %arg2 : i32, i32
  }
  func.func @transform_1(%arg0: i32, %arg1: i32, %arg2: i32) -> (i32, i32) {
    %c0_i32 = arith.constant 0 : i32
    return %arg2, %arg1 : i32, i32
  }
  func.func @transform_2(%arg0: i32, %arg1: i32, %arg2: i32) -> (i32, i32) {
    %c0_i32 = arith.constant 0 : i32
    %c0_i32_0 = arith.constant 0 : i32
    return %c0_i32, %arg1 : i32, i32
  }
  func.func @transform_3(%arg0: i32, %arg1: i32, %arg2: i32) -> (i32, i32) {
    %c0_i32 = arith.constant 0 : i32
    return %arg0, %arg1 : i32, i32
  }
}

module attributes {stable_mosaic.version = 11 : i64} {
  func.func @_matmul_bias_kernel(%arg0: i32, %arg1: i32, %arg2: i32, %arg3: memref<256x256xbf16, #tpu.memory_space<vmem>>, %arg4: memref<256x128xbf16, #tpu.memory_space<vmem>>, %arg5: memref<1x128xf32, #tpu.memory_space<vmem>>, %arg6: memref<256x128xf32, #tpu.memory_space<vmem>>, %arg7: memref<256x128xf32, #tpu.memory_space<vmem>>) attributes {dimension_semantics = [#tpu.dimension_semantics<parallel>, #tpu.dimension_semantics<parallel>, #tpu.dimension_semantics<arbitrary>], iteration_bounds = array<i64: 1, 1, 1>, scalar_prefetch = 0 : i64, scratch_operands = 1 : i64, tpu.core_type = #tpu.core_type<tc>, window_params = [{transform_indices = @transform_0, window_bounds = array<i64: 256, 256>}, {transform_indices = @transform_1, window_bounds = array<i64: 256, 128>}, {transform_indices = @transform_2, window_bounds = array<i64: 1, 128>}, {transform_indices = @transform_3, window_bounds = array<i64: 256, 128>}]} {
    %c0_i32 = arith.constant 0 : i32
    %0 = arith.cmpi eq, %arg2, %c0_i32 : i32
    %1 = arith.extui %0 : i1 to i32
    %c0_i32_0 = arith.constant 0 : i32
    %2 = arith.cmpi ne, %1, %c0_i32_0 : i32
    scf.if %2 {
      %cst_10 = arith.constant 0.000000e+00 : f32
      %12 = vector.broadcast %cst_10 : f32 to vector<256x128xf32>
      %c0_11 = arith.constant 0 : index
      %c0_12 = arith.constant 0 : index
      %13 = vector.load %arg7[%c0_11, %c0_12] : memref<256x128xf32, #tpu.memory_space<vmem>>, vector<256x128xf32>
      tpu.vector_store %arg7[%c0_11, %c0_12], %12 {strides = array<i32>} : memref<256x128xf32, #tpu.memory_space<vmem>>, vector<256x128xf32>,
    } else {
    }
    %c0 = arith.constant 0 : index
    %c0_1 = arith.constant 0 : index
    %3 = vector.load %arg7[%c0, %c0_1] : memref<256x128xf32, #tpu.memory_space<vmem>>, vector<256x128xf32>
    %c0_2 = arith.constant 0 : index
    %c0_3 = arith.constant 0 : index
    %4 = vector.load %arg3[%c0_2, %c0_3] : memref<256x256xbf16, #tpu.memory_space<vmem>>, vector<256x256xbf16>
    %c0_4 = arith.constant 0 : index
    %c0_5 = arith.constant 0 : index
    %5 = vector.load %arg4[%c0_4, %c0_5] : memref<256x128xbf16, #tpu.memory_space<vmem>>, vector<256x128xbf16>
    %cst = arith.constant dense<0.000000e+00> : vector<256x128xf32>
    %6 = tpu.matmul %4, %5, %cst {dimension_numbers = #tpu.dot_dimension_numbers<[1], [0], [0], [1], [0, 0, 1, 1], [], []>} : vector<256x256xbf16>, vector<256x128xbf16>, vector<256x128xf32> -> vector<256x128xf32>
    %7 = arith.addf %3, %6 : vector<256x128xf32>
    %c0_6 = arith.constant 0 : index
    %c0_7 = arith.constant 0 : index
    %8 = vector.load %arg7[%c0_6, %c0_7] : memref<256x128xf32, #tpu.memory_space<vmem>>, vector<256x128xf32>
    tpu.vector_store %arg7[%c0_6, %c0_7], %7 {strides = array<i32>} : memref<256x128xf32, #tpu.memory_space<vmem>>, vector<256x128xf32>,
    %c0_i32_8 = arith.constant 0 : i32
    %9 = arith.cmpi eq, %arg2, %c0_i32_8 : i32
    %10 = arith.extui %9 : i1 to i32
    %c0_i32_9 = arith.constant 0 : i32
    %11 = arith.cmpi ne, %10, %c0_i32_9 : i32
    scf.if %11 {
      %c0_10 = arith.constant 0 : index
      %c0_11 = arith.constant 0 : index
      %12 = vector.load %arg7[%c0_10, %c0_11] : memref<256x128xf32, #tpu.memory_space<vmem>>, vector<256x128xf32>
      %c0_12 = arith.constant 0 : index
      %c0_13 = arith.constant 0 : index
      %13 = vector.load %arg5[%c0_12, %c0_13] : memref<1x128xf32, #tpu.memory_space<vmem>>, vector<1x128xf32>
      %14 = vector.broadcast %13 : vector<1x128xf32> to vector<256x128xf32>
      %15 = arith.addf %12, %14 : vector<256x128xf32>
      %c0_14 = arith.constant 0 : index
      %c0_15 = arith.constant 0 : index
      %16 = vector.load %arg6[%c0_14, %c0_15] : memref<256x128xf32, #tpu.memory_space<vmem>>, vector<256x128xf32>
      tpu.vector_store %arg6[%c0_14, %c0_15], %15 {strides = array<i32>} : memref<256x128xf32, #tpu.memory_space<vmem>>, vector<256x128xf32>,
    } else {
    }
    return
  }
  func.func @transform_0(%arg0: i32, %arg1: i32, %arg2: i32) -> (i32, i32) {
    %c0_i32 = arith.constant 0 : i32
    return %arg0, %arg2 : i32, i32
  }
  func.func @transform_1(%arg0: i32, %arg1: i32, %arg2: i32) -> (i32, i32) {
    %c0_i32 = arith.constant 0 : i32
    return %arg2, %arg1 : i32, i32
  }
  func.func @transform_2(%arg0: i32, %arg1: i32, %arg2: i32) -> (i32, i32) {
    %c0_i32 = arith.constant 0 : i32
    %c0_i32_0 = arith.constant 0 : i32
    return %c0_i32, %arg1 : i32, i32
  }
  func.func @transform_3(%arg0: i32, %arg1: i32, %arg2: i32) -> (i32, i32) {
    %c0_i32 = arith.constant 0 : i32
    return %arg0, %arg1 : i32, i32
  }
}

</mosaic_0001>

<bundles_post_ra>
// kernel: pretrained_encoder_with_head.16
= control target key start
LH: loop header
LB: loop body
LE: loop exit
PB: predicated region body
PF: predicated region fallthrough
CT: control target
= control target key end

     0   :  { %s3264_s0 = inlined_call_operand.vmem [shape: bf16[2,128,768], index: 0, kind: input, shape index: {}, may-alias: {0,1,2}]   ;;  %s3265_s1 = inlined_call_operand.vmem [shape: bf16[2,128,768], index: 1, kind: input, shape index: {}, may-alias: {0,1,2}]   ;;  %s3266_s2 = inlined_call_operand.vmem [shape: bf16[2,128,768], index: 2, kind: input, shape index: {}, may-alias: {0,1,2}]   ;;  %s3267_s3 = inlined_call_operand.vmem [shape: bf16[2,128,256], index: 3, kind: output, shape index: {}]  }
   0x1   :  { %3269 = sst [smem:[#allocation10_spill]] %s3267_s3 }
   0x2   :  { %s2566_s12 = smov 0   ;;  %s2568_s13 = smov 0  }
   0x3   :  { %s2570_s14 = smov 0   ;;  %s2572_s15 = smov 0  }
   0x4   :  { %s2574_s16 = smov 0   ;;  %s2576_s17 = smov 0  }
   0x5   :  { %s2578_s18 = smov 0   ;;  %s2580_s19 = smov 0  }
   0x6   :  { %s2582_s20 = smov 0   ;;  %s2584_s21 = smov 0  }
   0x7   :  { %s2586_s22 = smov 0  }
   0x8 LB: > { %s35_s24 = sadd.s32 1, %s2533_s20  ;;  %s39_s25 = sadd.s32 1, %s2537_s21  ;;  %s2541_s22 = sphi %s2586_s22, %s13_s22   ;;  %s2537_s21 = sphi %s2584_s21, %s3301_s21   ;;  %s2533_s20 = sphi %s2582_s20, %s3300_s20   ;;  %s2529_s19 = sphi %s2580_s19, %s3299_s19   ;;  %s2525_s18 = sphi %s2578_s18, %s3298_s18   ;;  %s2521_s17 = sphi %s2576_s17, %s3297_s17   ;;  %s2517_s16 = sphi %s2574_s16, %s3296_s16   ;;  %s2513_s15 = sphi %s2572_s15, %s3295_s15   ;;  %s2509_s14 = sphi %s2570_s14, %s3294_s14   ;;  %s2505_s13 = sphi %s2568_s13, %s3293_s13   ;;  %s2501_s12 = sphi %s2566_s12, %s3292_s12  }
   0x9   : > { %p37_p0 = scmp.ge.s32.totalorder %s35_s24, 2  ;;  %s50_s26 = sadd.s32 1, %s2521_s17 }
   0xa   : > { %p57_p1 = scmp.ne.s32.totalorder %s2521_s17, %s2517_s16  ;;  %p58_p2 = scmp.eq.s32.totalorder %s2541_s22, 0 }
   0xb   : > { %s3303_s24 = smov (%p37_p0, %s35_s24), 0  ;;  %s3305_s25 = smov (!%p37_p0, %s39_s25), %s2537_s21 }
   0xc   : > { %s46_s27 = ssub.s32 %s2533_s20, %s3303_s24  ;;  %p41_p3 = scmp.ge.s32.totalorder %s3305_s25, 2 }
   0xd   : > { %s73_s28 = sadd.s32 2, %s2533_s20  ;;  %p2639_p4 = por %p58_p2, %p57_p1 }
   0xe   : > { %s74_s30 = sadd.s32 2, %s3303_s24  ;;  %s3307_s25 = smov (%p41_p3, %s3305_s25), 0 }
   0xf   : > { %3271 = sst [smem:[#allocation9_spill]] %s3307_s25  ;;  %s78_s4 = ssub.s32 %s73_s28, %s74_s30 }
  0x10   : > { %s82_s5 = sadd.s32 1, %s2513_s15  ;;  %s43_s6 = ssub.s32 %s2537_s21, %s3307_s25 }
  0x11   : > { %p89_p5 = scmp.ne.s32.totalorder %s2513_s15, %s2509_s14  ;;  %s47_s7 = sor.u32 %s46_s27, %s43_s6 }
  0x12   : > { %s79_s8 = sor.u32 %s78_s4, %s43_s6  ;;  %p48_p6 = scmp.eq.s32.totalorder %s47_s7, 0 }
  0x13   : > { %p80_p7 = scmp.eq.s32.totalorder %s79_s8, 0  ;;  %p2653_p8 = por %p89_p5, %p58_p2 }
  0x14   : > { %s105_s10 = sadd.s32 4, %s2533_s20  ;;  %s106_s30 = sadd.s32 4, %s3303_s24 }
  0x15   : > { %s2659_s11 = scalar_select %p48_p6, %s2521_s17, %s50_s26  }
  0x16   : > { %s2662_s28 = scalar_select %p80_p7, %s2513_s15, %s82_s5  }
  0x17   : > { %s114_s23 = sadd.s32 1, %s2505_s13  ;;  %s110_s25 = ssub.s32 %s105_s10, %s106_s30 }
  0x18   : > { %p121_p9 = scmp.ne.s32.totalorder %s2505_s13, %s2501_s12  ;;  %s111_s27 = sor.u32 %s110_s25, %s43_s6 }
  0x19   : > { %s3273_s3 = sadd.s32 4294967295, %s2541_s22   ;;  %p112_p11 = scmp.eq.s32.totalorder %s111_s27, 0 }
  0x1a   : > { %p155_p10 = scmp.eq.s32.totalorder %s3273_s3, 3  ;;  %p2672_p12 = por %p121_p9, %p58_p2 }
  0x1b   : > { %s2684_s26 = scalar_select %p112_p11, %s2505_s13, %s114_s23  }
  0x1c   : > { %p2679_p13 = por %p155_p10, %p57_p1  ;;  %p1993_p0 = scmp.ge.s32.totalorder %s2541_s22, 4 }
  0x1e   : > { %177 = sbr.rel (%p1993_p0) target bundleno = 88 (0x58), region = 16 }
  0x25   : > { %180 = sbr.rel (!%p2639_p4) target bundleno = 54 (0x36), region = 20  ;;  %s182_s3 = sand.u32 (%p2639_p4), 1, %s2521_s17  }
  0x26   : > { %s2241_s25 = smul.u32 (%p2639_p4), 96, %s2537_s21  ;;  %s1994_s5 = sshll.u32 (%p2639_p4), %s182_s3, 6 }
  0x27   : > { %s184_s23 = scalar_lea.vmem (%p2639_p4), [#allocation5], %s1994_s5 }
  0x28   : > { %s189_s6 = sadd.s32 (%p2639_p4), %s2533_s20, %s2241_s25 }
  0x29   : > { %s1995_s8 = sshll.u32 (%p2639_p4), %s189_s6, 2 }
  0x2a   : > { %s2695_s27 = scalar_lea.vmem (%p2639_p4), %s3264_s0, %s1995_s8 }
  0x2b   : > { %v207_v0 = vld [vmem:[%s2695_s27] sm:$0xf] (%p2639_p4)  ;;  %v209_v1 = vld [vmem:[%s2695_s27 + $0x18] sm:$0xf] (%p2639_p4)  ;;  %v211_v2 = vld [vmem:[%s2695_s27 + $0x30] sm:$0xf] (%p2639_p4) }
  0x2c   : > { %208 = vst [vmem:[%s184_s23] sm:$0xf] %v207_v0  ;;  %210 = vst [vmem:[%s184_s23 + $0x4] sm:$0xf] %v209_v1  ;;  %v213_v3 = vld [vmem:[%s2695_s27 + $0x48] sm:$0xf] }
  0x2d   : > { %212 = vst [vmem:[%s184_s23 + $0x8] sm:$0xf] %v211_v2  ;;  %v215_v4 = vld [vmem:[%s2695_s27 + $0x60] sm:$0xf]  ;;  %v217_v5 = vld [vmem:[%s2695_s27 + $0x78] sm:$0xf] }
  0x2e   : > { %214 = vst [vmem:[%s184_s23 + $0xc] sm:$0xf] %v213_v3  ;;  %216 = vst [vmem:[%s184_s23 + $0x10] sm:$0xf] %v215_v4  ;;  %v219_v6 = vld [vmem:[%s2695_s27 + $0x90] sm:$0xf] }
  0x2f   : > { %218 = vst [vmem:[%s184_s23 + $0x14] sm:$0xf] %v217_v5  ;;  %v221_v7 = vld [vmem:[%s2695_s27 + $0xa8] sm:$0xf]  ;;  %v223_v8 = vld [vmem:[%s2695_s27 + $0xc0] sm:$0xf] }
  0x30   : > { %220 = vst [vmem:[%s184_s23 + $0x18] sm:$0xf] %v219_v6  ;;  %222 = vst [vmem:[%s184_s23 + $0x1c] sm:$0xf] %v221_v7  ;;  %v225_v9 = vld [vmem:[%s2695_s27 + $0xd8] sm:$0xf] }
  0x31   : > { %224 = vst [vmem:[%s184_s23 + $0x20] sm:$0xf] %v223_v8  ;;  %v227_v10 = vld [vmem:[%s2695_s27 + $0xf0] sm:$0xf]  ;;  %v229_v11 = vld [vmem:[%s2695_s27 + $0x108] sm:$0xf] }
  0x32   : > { %226 = vst [vmem:[%s184_s23 + $0x24] sm:$0xf] %v225_v9  ;;  %228 = vst [vmem:[%s184_s23 + $0x28] sm:$0xf] %v227_v10  ;;  %v231_v12 = vld [vmem:[%s2695_s27 + $0x120] sm:$0xf] }
  0x33   : > { %230 = vst [vmem:[%s184_s23 + $0x2c] sm:$0xf] %v229_v11  ;;  %v233_v13 = vld [vmem:[%s2695_s27 + $0x138] sm:$0xf]  ;;  %v235_v14 = vld [vmem:[%s2695_s27 + $0x150] sm:$0xf] }
  0x34   : > { %232 = vst [vmem:[%s184_s23 + $0x30] sm:$0xf] %v231_v12  ;;  %234 = vst [vmem:[%s184_s23 + $0x34] sm:$0xf] %v233_v13  ;;  %v237_v15 = vld [vmem:[%s2695_s27 + $0x168] sm:$0xf] }
  0x35   : > { %236 = vst [vmem:[%s184_s23 + $0x38] sm:$0xf] %v235_v14  ;;  %238 = vst [vmem:[%s184_s23 + $0x3c] sm:$0xf] %v237_v15 }
  0x36 PF: > { %293 = sbr.rel (!%p2653_p8) target bundleno = 71 (0x47), region = 61  ;;  %s295_s29 = sand.u32 (%p2653_p8), 1, %s2513_s15  }
  0x37   : > { %s1886_s3 = smul.u32 (%p2653_p8), 96, %s2537_s21  ;;  %s1996_s25 = sshll.u32 (%p2653_p8), %s295_s29, 6 }
  0x38   : > { %s297_s9 = scalar_lea.vmem (%p2653_p8), [#allocation6], %s1996_s25 }
  0x39   : > { %s1887_s5 = sadd.s32 (%p2653_p8), %s2533_s20, %s1886_s3 }
  0x3a   : > { %s1997_s6 = sshll.u32 (%p2653_p8), %s1887_s5, 2 }
  0x3b   : > { %s2721_s30 = scalar_lea.vmem (%p2653_p8), %s3265_s1, %s1997_s6 }
  0x3c   : > { %v1998_v16 = vld [vmem:[%s2721_s30 + $0x8] sm:$0xf] (%p2653_p8)  ;;  %v1999_v17 = vld [vmem:[%s2721_s30 + $0x20] sm:$0xf] (%p2653_p8)  ;;  %v2000_v18 = vld [vmem:[%s2721_s30 + $0x38] sm:$0xf] (%p2653_p8) }
  0x3d   : > { %322 = vst [vmem:[%s297_s9] sm:$0xf] %v1998_v16  ;;  %324 = vst [vmem:[%s297_s9 + $0x4] sm:$0xf] %v1999_v17  ;;  %v2001_v19 = vld [vmem:[%s2721_s30 + $0x50] sm:$0xf] }
  0x3e   : > { %326 = vst [vmem:[%s297_s9 + $0x8] sm:$0xf] %v2000_v18  ;;  %v2002_v20 = vld [vmem:[%s2721_s30 + $0x68] sm:$0xf]  ;;  %v2003_v21 = vld [vmem:[%s2721_s30 + $0x80] sm:$0xf] }
  0x3f   : > { %328 = vst [vmem:[%s297_s9 + $0xc] sm:$0xf] %v2001_v19  ;;  %330 = vst [vmem:[%s297_s9 + $0x10] sm:$0xf] %v2002_v20  ;;  %v2004_v22 = vld [vmem:[%s2721_s30 + $0x98] sm:$0xf] }
  0x40   : > { %332 = vst [vmem:[%s297_s9 + $0x14] sm:$0xf] %v2003_v21  ;;  %v2005_v23 = vld [vmem:[%s2721_s30 + $0xb0] sm:$0xf]  ;;  %v2006_v24 = vld [vmem:[%s2721_s30 + $0xc8] sm:$0xf] }
  0x41   : > { %334 = vst [vmem:[%s297_s9 + $0x18] sm:$0xf] %v2004_v22  ;;  %336 = vst [vmem:[%s297_s9 + $0x1c] sm:$0xf] %v2005_v23  ;;  %v2007_v25 = vld [vmem:[%s2721_s30 + $0xe0] sm:$0xf] }
  0x42   : > { %338 = vst [vmem:[%s297_s9 + $0x20] sm:$0xf] %v2006_v24  ;;  %v2008_v26 = vld [vmem:[%s2721_s30 + $0xf8] sm:$0xf]  ;;  %v2009_v27 = vld [vmem:[%s2721_s30 + $0x110] sm:$0xf] }
  0x43   : > { %340 = vst [vmem:[%s297_s9 + $0x24] sm:$0xf] %v2007_v25  ;;  %342 = vst [vmem:[%s297_s9 + $0x28] sm:$0xf] %v2008_v26  ;;  %v2010_v28 = vld [vmem:[%s2721_s30 + $0x128] sm:$0xf] }
  0x44   : > { %344 = vst [vmem:[%s297_s9 + $0x2c] sm:$0xf] %v2009_v27  ;;  %v2011_v29 = vld [vmem:[%s2721_s30 + $0x140] sm:$0xf]  ;;  %v2012_v30 = vld [vmem:[%s2721_s30 + $0x158] sm:$0xf] }
  0x45   : > { %346 = vst [vmem:[%s297_s9 + $0x30] sm:$0xf] %v2010_v28  ;;  %348 = vst [vmem:[%s297_s9 + $0x34] sm:$0xf] %v2011_v29  ;;  %v2013_v31 = vld [vmem:[%s2721_s30 + $0x170] sm:$0xf] }
  0x46   : > { %350 = vst [vmem:[%s297_s9 + $0x38] sm:$0xf] %v2012_v30  ;;  %352 = vst [vmem:[%s297_s9 + $0x3c] sm:$0xf] %v2013_v31 }
  0x47 PF: > { %407 = sbr.rel (!%p2672_p12) target bundleno = 88 (0x58), region = 102  ;;  %s409_s27 = sand.u32 (%p2672_p12), 1, %s2505_s13  }
  0x48   : > { %s1895_s23 = smul.u32 (%p2672_p12), 96, %s2537_s21  ;;  %s2014_s29 = sshll.u32 (%p2672_p12), %s409_s27, 6 }
  0x49   : > { %s411_s4 = scalar_lea.vmem (%p2672_p12), [#allocation7], %s2014_s29 }
  0x4a   : > { %s1896_s3 = sadd.s32 (%p2672_p12), %s2533_s20, %s1895_s23 }
  0x4b   : > { %s2015_s25 = sshll.u32 (%p2672_p12), %s1896_s3, 2 }
  0x4c   : > { %s2747_s8 = scalar_lea.vmem (%p2672_p12), %s3266_s2, %s2015_s25 }
  0x4d   : > { %v2016_v32 = vld [vmem:[%s2747_s8 + $0x10] sm:$0xf] (%p2672_p12)  ;;  %v2017_v33 = vld [vmem:[%s2747_s8 + $0x28] sm:$0xf] (%p2672_p12)  ;;  %v2018_v34 = vld [vmem:[%s2747_s8 + $0x40] sm:$0xf] (%p2672_p12) }
  0x4e   : > { %436 = vst [vmem:[%s411_s4] sm:$0xf] %v2016_v32  ;;  %438 = vst [vmem:[%s411_s4 + $0x4] sm:$0xf] %v2017_v33  ;;  %v2019_v35 = vld [vmem:[%s2747_s8 + $0x58] sm:$0xf] }
  0x4f   : > { %440 = vst [vmem:[%s411_s4 + $0x8] sm:$0xf] %v2018_v34  ;;  %v2020_v36 = vld [vmem:[%s2747_s8 + $0x70] sm:$0xf]  ;;  %v2021_v37 = vld [vmem:[%s2747_s8 + $0x88] sm:$0xf] }
  0x50   : > { %442 = vst [vmem:[%s411_s4 + $0xc] sm:$0xf] %v2019_v35  ;;  %444 = vst [vmem:[%s411_s4 + $0x10] sm:$0xf] %v2020_v36  ;;  %v2022_v38 = vld [vmem:[%s2747_s8 + $0xa0] sm:$0xf] }
  0x51   : > { %446 = vst [vmem:[%s411_s4 + $0x14] sm:$0xf] %v2021_v37  ;;  %v2023_v39 = vld [vmem:[%s2747_s8 + $0xb8] sm:$0xf]  ;;  %v2024_v40 = vld [vmem:[%s2747_s8 + $0xd0] sm:$0xf] }
  0x52   : > { %448 = vst [vmem:[%s411_s4 + $0x18] sm:$0xf] %v2022_v38  ;;  %450 = vst [vmem:[%s411_s4 + $0x1c] sm:$0xf] %v2023_v39  ;;  %v2025_v41 = vld [vmem:[%s2747_s8 + $0xe8] sm:$0xf] }
  0x53   : > { %452 = vst [vmem:[%s411_s4 + $0x20] sm:$0xf] %v2024_v40  ;;  %v2026_v42 = vld [vmem:[%s2747_s8 + $0x100] sm:$0xf]  ;;  %v2027_v43 = vld [vmem:[%s2747_s8 + $0x118] sm:$0xf] }
  0x54   : > { %454 = vst [vmem:[%s411_s4 + $0x24] sm:$0xf] %v2025_v41  ;;  %456 = vst [vmem:[%s411_s4 + $0x28] sm:$0xf] %v2026_v42  ;;  %v2028_v44 = vld [vmem:[%s2747_s8 + $0x130] sm:$0xf] }
  0x55   : > { %458 = vst [vmem:[%s411_s4 + $0x2c] sm:$0xf] %v2027_v43  ;;  %v2029_v45 = vld [vmem:[%s2747_s8 + $0x148] sm:$0xf]  ;;  %v2030_v46 = vld [vmem:[%s2747_s8 + $0x160] sm:$0xf] }
  0x56   : > { %460 = vst [vmem:[%s411_s4 + $0x30] sm:$0xf] %v2028_v44  ;;  %462 = vst [vmem:[%s411_s4 + $0x34] sm:$0xf] %v2029_v45  ;;  %v2031_v47 = vld [vmem:[%s2747_s8 + $0x178] sm:$0xf] }
  0x57   : > { %464 = vst [vmem:[%s411_s4 + $0x38] sm:$0xf] %v2030_v46  ;;  %466 = vst [vmem:[%s411_s4 + $0x3c] sm:$0xf] %v2031_v47 }
  0x58 PF: > { %p2032_p1 = scmp.ge.s32.totalorder %s2541_s22, 1  ;;  %p520_p2 = scmp.lt.s32.totalorder %s2541_s22, 5 }
  0x5a   : > { %p521_p3 = pnand %p2032_p1, %p520_p2 }
  0x5b   : > { %s534_s10 = sand.u32 (!%p521_p3), 1, %s2509_s14   ;;  %s527_s9 = sand.u32 (!%p521_p3), 1, %s2517_s16   ;;  %vm582_vm0 = vcmask (!%p521_p3), 7168   ;;  %v2543_v0 = vmov (!%p521_p3), -inf   ;;  %v2544_v10 = vmov (!%p521_p3), 0   ;;  %v2545_v15 = vmov (!%p521_p3), 0.0  }
  0x5c   : > { %524 = sbr.rel (%p521_p3) target bundleno = 1012 (0x3f4), region = 143  ;;  %s2034_s30 = sshll.u32 (!%p521_p3), %s534_s10, 6  ;;  %585 = vst.msk [vmem:[#allocation2 + $0x10] sm:$0xff] (!%p521_p3), %vm582_vm0, %v2543_v0  ;;  %583 = vst.msk [vmem:[#allocation2] sm:$0xff] (!%p521_p3), %vm582_vm0, %v2543_v0  ;;  %2334 = vset.pattern.permute.xlu1 (!%p521_p3), %v2544_v10  ;;  %2333 = vset.pattern.permute.xlu0 (!%p521_p3), %v2544_v10 }
  0x5d   : > { %s536_s27 = scalar_lea.vmem (!%p521_p3), [#allocation6], %s2034_s30  ;;  %s2769_s23 = sshll.u32 (!%p521_p3), %s527_s9, 6  ;;  %584 = vst.msk [vmem:[#allocation2 + $0x8] sm:$0xff] (!%p521_p3), %vm582_vm0, %v2543_v0  ;;  %586 = vst.msk [vmem:[#allocation2 + $0x18] sm:$0xff] (!%p521_p3), %vm582_vm0, %v2543_v0 }
  0x5e   : > { %v2335_v48 = vld [vmem:[%s536_s27] sm:$0xff] (!%p521_p3)   ;;  %v2336_v49 = vld [vmem:[%s536_s27 + $0x8] sm:$0xff] (!%p521_p3)   ;;  %v2337_v50 = vld [vmem:[%s536_s27 + $0x10] sm:$0xff] (!%p521_p3)   ;;  %s2772_s29 = scalar_lea.vmem (!%p521_p3), [#allocation5], %s2769_s23  ;;  %587 = vst.msk [vmem:[#allocation2 + $0x20] sm:$0xff] (!%p521_p3), %vm582_vm0, %v2543_v0  ;;  %s541_s14 = sand.u32 (!%p521_p3), 1, %s2501_s12  }
  0x5f   : > { %2177 = vmatprep.subr.bf16.mxu0 (!%p521_p3), %v2335_v48  ;;  %v2343_v51 = vld [vmem:[%s2772_s29] sm:$0xff] (!%p521_p3)   ;;  %v2338_v52 = vld [vmem:[%s536_s27 + $0x18] sm:$0xff] (!%p521_p3)   ;;  %v2340_v54 = vld [vmem:[%s536_s27 + $0x28] sm:$0xff] (!%p521_p3)   ;;  %588 = vst.msk [vmem:[#allocation2 + $0x28] sm:$0xff] (!%p521_p3), %vm582_vm0, %v2543_v0  ;;  %s2035_s16 = sshll.u32 (!%p521_p3), %s541_s14, 6  ;;  %s3186_s12 = scalar_lea.vmem (!%p521_p3), [#allocation8], %s2769_s23 }
  0x60   : > { %2178 = vmatpush3.bf16.xpose.msra.mxu0 (!%p521_p3), %v2335_v48  ;;  %2193 = vmatprep.mubr.bf16.mxu0 (!%p521_p3), %v2343_v51  ;;  %v2339_v53 = vld [vmem:[%s536_s27 + $0x20] sm:$0xff] (!%p521_p3)   ;;  %v2341_v55 = vld [vmem:[%s536_s27 + $0x30] sm:$0xff] (!%p521_p3)   ;;  %v2342_v56 = vld [vmem:[%s536_s27 + $0x38] sm:$0xff] (!%p521_p3)   ;;  %589 = vst.msk [vmem:[#allocation2 + $0x30] sm:$0xff] (!%p521_p3), %vm582_vm0, %v2543_v0  ;;  %s2863_s3 = scalar_lea.vmem (!%p521_p3), [#allocation7], %s2035_s16 }
  0x61   : > { %2179 = vmatprep.subr.bf16.mxu0 (!%p521_p3), %v2336_v49  ;;  %v2344_v57 = vld [vmem:[%s2772_s29 + $0x8] sm:$0xff] (!%p521_p3)   ;;  %v2345_v58 = vld [vmem:[%s2772_s29 + $0x10] sm:$0xff] (!%p521_p3)   ;;  %v2346_v59 = vld [vmem:[%s2772_s29 + $0x18] sm:$0xff] (!%p521_p3)   ;;  %590 = vst.msk [vmem:[#allocation2 + $0x38] sm:$0xff] (!%p521_p3), %vm582_vm0, %v2543_v0 }
  0x62   : > { %v2347_v60 = vld [vmem:[%s2772_s29 + $0x20] sm:$0xff] (!%p521_p3)   ;;  %v2348_v61 = vld [vmem:[%s2772_s29 + $0x28] sm:$0xff] (!%p521_p3)   ;;  %v2349_v62 = vld [vmem:[%s2772_s29 + $0x30] sm:$0xff] (!%p521_p3)   ;;  %591 = vst.msk [vmem:[#allocation2 + $0x40] sm:$0xff] (!%p521_p3), %vm582_vm0, %v2543_v0 }
  0x63   : > { %v2350_v63 = vld [vmem:[%s2772_s29 + $0x38] sm:$0xff]   ;;  %592 = vst.msk [vmem:[#allocation2 + $0x48] sm:$0xff] %vm582_vm0, %v2543_v0  ;;  %593 = vst.msk [vmem:[#allocation2 + $0x50] sm:$0xff] %vm582_vm0, %v2543_v0  ;;  %v2351_v19 = vld [vmem:[%s2863_s3] sm:$0xff]   ;;  %s2078_s25 = sshll.u32 (%p2679_p13), %s2529_s19, 5  ;;  %s3290_s4 = sld [smem:[#allocation10_spill]] (%p2679_p13) }
  0x64   : > { %594 = vst.msk [vmem:[#allocation2 + $0x58] sm:$0xff] %vm582_vm0, %v2543_v0  ;;  %595 = vst.msk [vmem:[#allocation2 + $0x60] sm:$0xff] %vm582_vm0, %v2543_v0  ;;  %v2352_v20 = vld [vmem:[%s2863_s3 + $0x8] sm:$0xff]   ;;  %2209 = vmatprep.subr.bf16.mxu1 %v2351_v19  ;;  %v2867_v21 = vld [vmem:[#allocation2 + $0x10] sm:$0xff]  ;;  %s1760_s5 = sadd.s32 (%p2679_p13), %s2525_s18, %s2078_s25 }
  0x65   : > { %596 = vst.msk [vmem:[#allocation2 + $0x68] sm:$0xff] %vm582_vm0, %v2543_v0  ;;  %597 = vst.msk [vmem:[#allocation2 + $0x70] sm:$0xff] %vm582_vm0, %v2543_v0  ;;  %2210 = vmatpush3.bf16.msra.mxu1 %v2351_v19  ;;  %v2869_v22 = vld [vmem:[#allocation2] sm:$0xff]  ;;  %v2877_v27 = vld [vmem:[#allocation2 + $0x18] sm:$0xff]  ;;  %s2079_s7 = sshll.u32 (%p2679_p13), %s1760_s5, 2 }
  0x66   : > { %598 = vst.msk [vmem:[#allocation2 + $0x78] sm:$0xff] %vm582_vm0, %v2543_v0  ;;  %601 = vst.msk [vmem:[#allocation3 + $0x10] sm:$0xff] %vm582_vm0, %v2545_v15  ;;  %2211 = vmatprep.subr.bf16.mxu1 %v2352_v20  ;;  %v2884_v29 = vld [vmem:[#allocation2 + $0x8] sm:$0xff]  ;;  %v2353_v30 = vld [vmem:[%s2863_s3 + $0x10] sm:$0xff]  }
  0x67   : > { %599 = vst.msk [vmem:[#allocation3] sm:$0xff] %vm582_vm0, %v2545_v15  ;;  %600 = vst.msk [vmem:[#allocation3 + $0x8] sm:$0xff] %vm582_vm0, %v2545_v15  ;;  %v2903_v37 = vld [vmem:[#allocation2 + $0x20] sm:$0xff]  ;;  %v2354_v38 = vld [vmem:[%s2863_s3 + $0x18] sm:$0xff]  }
  0x68   : > { %2180 = vmatpush3.bf16.xpose.msra.mxu0 %v2336_v49  ;;  %602 = vst.msk [vmem:[#allocation3 + $0x18] sm:$0xff] %vm582_vm0, %v2545_v15  ;;  %603 = vst.msk [vmem:[#allocation3 + $0x20] sm:$0xff] %vm582_vm0, %v2545_v15  ;;  %v2910_v40 = vld [vmem:[#allocation2 + $0x38] sm:$0xff]  ;;  %v2919_v45 = vld [vmem:[#allocation2 + $0x30] sm:$0xff] }
  0x69   : > { %2181 = vmatprep.subr.bf16.mxu0 %v2337_v50  ;;  %604 = vst.msk [vmem:[#allocation3 + $0x28] sm:$0xff] %vm582_vm0, %v2545_v15  ;;  %605 = vst.msk [vmem:[#allocation3 + $0x30] sm:$0xff] %vm582_vm0, %v2545_v15  ;;  %2212 = vmatpush3.bf16.msra.mxu1 %v2352_v20  ;;  %v2355_v46 = vld [vmem:[%s2863_s3 + $0x20] sm:$0xff]   ;;  %v2926_v48 = vld [vmem:[#allocation2 + $0x28] sm:$0xff]  ;;  %s1762_s10 = scalar_lea.vmem (%p2679_p13), %s3290_s4, %s2079_s7 }
  0x6a   : > { %606 = vst.msk [vmem:[#allocation3 + $0x38] sm:$0xff] %vm582_vm0, %v2545_v15  ;;  %607 = vst.msk [vmem:[#allocation3 + $0x40] sm:$0xff] %vm582_vm0, %v2545_v15  ;;  %2213 = vmatprep.subr.bf16.mxu1 %v2353_v30  ;;  %v2357_v0 = vld [vmem:[%s2863_s3 + $0x30] sm:$0xff]  }
  0x6b   : > { %608 = vst.msk [vmem:[#allocation3 + $0x48] sm:$0xff] %vm582_vm0, %v2545_v15  ;;  %609 = vst.msk [vmem:[#allocation3 + $0x50] sm:$0xff] %vm582_vm0, %v2545_v15 }
  0x6c   : > { %610 = vst.msk [vmem:[#allocation3 + $0x58] sm:$0xff] %vm582_vm0, %v2545_v15  ;;  %611 = vst.msk [vmem:[#allocation3 + $0x60] sm:$0xff] %vm582_vm0, %v2545_v15 }
  0x6d   : > { %612 = vst.msk [vmem:[#allocation3 + $0x68] sm:$0xff] %vm582_vm0, %v2545_v15  ;;  %613 = vst.msk [vmem:[#allocation3 + $0x70] sm:$0xff] %vm582_vm0, %v2545_v15  ;;  %2214 = vmatpush3.bf16.msra.mxu1 %v2353_v30 }
  0x6e   : > { %614 = vst.msk [vmem:[#allocation3 + $0x78] sm:$0xff] %vm582_vm0, %v2545_v15  ;;  %2215 = vmatprep.subr.bf16.mxu1 %v2354_v38  ;;  %v2966_v15 = vld [vmem:[#allocation2 + $0x48] sm:$0xff] }
  0x70   : > { %2182 = vmatpush3.bf16.xpose.msra.mxu0 %v2337_v50 }
  0x71   : > { %2183 = vmatprep.subr.bf16.mxu0 %v2338_v52  ;;  %2216 = vmatpush3.bf16.msra.mxu1 %v2354_v38 }
  0x72   : > { %2217 = vmatprep.subr.bf16.mxu1 %v2355_v46 }
  0x75   : > { %2218 = vmatpush3.bf16.msra.mxu1 %v2355_v46 }
  0x78   : > { %2184 = vmatpush3.bf16.xpose.msra.mxu0 %v2338_v52 }
  0x79   : > { %2185 = vmatprep.subr.bf16.mxu0 %v2339_v53 }
  0x80   : > { %2186 = vmatpush3.bf16.xpose.msra.mxu0 %v2339_v53 }
  0x81   : > { %2187 = vmatprep.subr.bf16.mxu0 %v2340_v54 }
  0x88   : > { %2188 = vmatpush3.bf16.xpose.msra.mxu0 %v2340_v54  ;;  %v2938_v54 = vld [vmem:[#allocation2 + $0x40] sm:$0xff] }
  0x89   : > { %2189 = vmatprep.subr.bf16.mxu0 %v2341_v55 }
  0x90   : > { %2190 = vmatpush3.bf16.xpose.msra.mxu0 %v2341_v55  ;;  %v2356_v55 = vld [vmem:[%s2863_s3 + $0x28] sm:$0xff]  }
  0x91   : > { %2191 = vmatprep.subr.bf16.mxu0 %v2342_v56  ;;  %2219 = vmatprep.subr.bf16.mxu1 %v2356_v55 }
  0x92   : > { %2220 = vmatpush3.bf16.msra.mxu1 %v2356_v55 }
  0x93   : > { %2221 = vmatprep.subr.bf16.mxu1 %v2357_v0 }
  0x96   : > { %2222 = vmatpush3.bf16.msra.mxu1 %v2357_v0  ;;  %v3006_v0 = vld [vmem:[#allocation2 + $0x68] sm:$0xff] }
  0x98   : > { %2192 = vmatpush3.bf16.xpose.msra.mxu0 %v2342_v56 }
  0x9f   : > { %2194 = vmatmul.mubr.bf16.vlgmr.msra.gmra.mrb[0].mxu0 %v2344_v57  ;;  %v2946_v57 = vld [vmem:[#allocation2 + $0x58] sm:$0xff] }
  0xa0   : > { %2197 = vmatprep.mubr.bf16.mxu0 %v2345_v58 }
  0xa7   : > { %2198 = vmatmul.mubr.bf16.gmra.mrb[4].mxu0 %v2346_v59 }
  0xa8   : > { %2201 = vmatprep.mubr.bf16.mxu0 %v2347_v60 }
  0xaf   : > { %2202 = vmatmul.mubr.bf16.gmra.mrb[8].mxu0 %v2348_v61 }
  0xb0   : > { %2205 = vmatprep.mubr.bf16.mxu0 %v2349_v62 }
  0xb7   : > { %2206 = vmatmul.mubr.bf16.gmra.mrb[12].mxu0 %v2350_v63  ;;  %v2958_v63 = vld [vmem:[#allocation2 + $0x50] sm:$0xff] }
 0x172   : > { %v2798_v1 = vpop.f32.mrb[0].mxu0 }
 0x173   : > { %892 = vmax.xlane.f32.xlu1 %v2798_v1  ;;  %v2801_v2 = vpop.f32.mrb[1].mxu0 }
 0x174   : > { %888 = vmax.xlane.f32.xlu0 %v2801_v2  ;;  %v2804_v3 = vpop.f32.mrb[2].mxu0 }
 0x175   : > { %v2806_v4 = vpop.f32.mrb[3].mxu0 }
 0x177   : > { %894 = vmax.xlane.f32.xlu1 %v2804_v3 }
 0x178   : > { %890 = vmax.xlane.f32.xlu0 %v2806_v4 }
 0x17a   : > { %v2810_v5 = vpop.f32.mrb[4].mxu0 }
 0x17b   : > { %v2812_v6 = vpop.f32.mrb[5].mxu0 }
 0x17c   : > { %896 = vmax.xlane.f32.xlu0 %v2812_v6  ;;  %v2815_v7 = vpop.f32.mrb[6].mxu0 }
 0x17d   : > { %902 = vmax.xlane.f32.xlu1 %v2815_v7  ;;  %v2818_v8 = vpop.f32.mrb[7].mxu0 }
 0x180   : > { %900 = vmax.xlane.f32.xlu0 %v2810_v5 }
 0x181   : > { %898 = vmax.xlane.f32.xlu1 %v2818_v8 }
 0x182   : > { %v2822_v9 = vpop.f32.mrb[8].mxu0 }
 0x183   : > { %v2824_v11 = vpop.f32.mrb[9].mxu0 }
 0x184   : > { %v2826_v12 = vpop.f32.mrb[10].mxu0  ;;  %904 = vmax.xlane.f32.xlu0 %v2824_v11 }
 0x185   : > { %910 = vmax.xlane.f32.xlu1 %v2826_v12  ;;  %v2830_v13 = vpop.f32.mrb[11].mxu0 }
 0x188   : > { %908 = vmax.xlane.f32.xlu0 %v2822_v9 }
 0x189   : > { %906 = vmax.xlane.f32.xlu1 %v2830_v13 }
 0x18a   : > { %v2834_v14 = vpop.f32.mrb[12].mxu0 }
 0x18b   : > { %v2852_v16 = vpop.f32.mrb[13].mxu0 }
 0x18c   : > { %v2854_v17 = vpop.f32.mrb[14].mxu0  ;;  %912 = vmax.xlane.f32.xlu0 %v2852_v16 }
 0x18d   : > { %918 = vmax.xlane.f32.xlu1 %v2854_v17  ;;  %v2858_v18 = vpop.f32.mrb[15].mxu0 }
 0x190   : > { %916 = vmax.xlane.f32.xlu0 %v2834_v14 }
 0x191   : > { %914 = vmax.xlane.f32.xlu1 %v2858_v18 }
 0x200   : > { %v893_v23 = vpop.xlane.xlu1 %892 }
 0x201   : > { %v2872_v24 = vmax.f32 %v2867_v21, %v893_v23  ;;  %v889_v25 = vpop.xlane.xlu0 %888 }
 0x202   : > { %v2875_v26 = vmax.f32 %v2869_v22, %v889_v25 }
 0x203   : > { %v938_v28 = vsub.f32 %v2867_v21, %v2872_v24  ;;  %1508 = vst.msk [vmem:[#allocation2 + $0x10] sm:$0xff] %vm582_vm0, %v2872_v24  ;;  %996 = vperm.xlu1 %2334, %v2872_v24  }
 0x204   : > { %1506 = vst.msk [vmem:[#allocation2] sm:$0xff] %vm582_vm0, %v2875_v26  ;;  %v895_v32 = vpop.xlane.xlu1 %894  ;;  %986 = vperm.xlu0 %2333, %v2875_v26  }
 0x205   : > { %v2893_v33 = vmax.f32 %v2877_v27, %v895_v32  ;;  %v891_v34 = vpop.xlane.xlu0 %890  ;;  %v2978_v32 = vld [vmem:[#allocation2 + $0x60] sm:$0xff] }
 0x206   : > { %v2896_v35 = vmax.f32 %v2884_v29, %v891_v34  ;;  %v2358_v34 = vld [vmem:[%s2863_s3 + $0x38] sm:$0xff]  }
 0x207   : > { %1509 = vst.msk [vmem:[#allocation2 + $0x18] sm:$0xff] %vm582_vm0, %v2893_v33  ;;  %1001 = vperm.xlu1 %2334, %v2893_v33   ;;  %2223 = vmatprep.subr.bf16.mxu1 %v2358_v34 }
 0x208   : > { %v937_v39 = vsub.f32 %v2884_v29, %v2896_v35  ;;  %1507 = vst.msk [vmem:[#allocation2 + $0x8] sm:$0xff] %vm582_vm0, %v2896_v35  ;;  %2224 = vmatpush3.bf16.msra.mxu1 %v2358_v34 }
 0x209   : > { %v897_v41 = vpop.xlane.xlu0 %896 }
 0x20a   : > { %v2913_v42 = vmax.f32 %v2903_v37, %v897_v41  ;;  %v903_v43 = vpop.xlane.xlu1 %902  ;;  %v2986_v41 = vld [vmem:[#allocation2 + $0x78] sm:$0xff] }
 0x20b   : > { %v2916_v44 = vmax.f32 %v2910_v40, %v903_v43  ;;  %991 = vperm.xlu1 %2334, %v2896_v35  }
 0x20c   : > { %1510 = vst.msk [vmem:[#allocation2 + $0x20] sm:$0xff] %vm582_vm0, %v2913_v42 }
 0x20d   : > { %1513 = vst.msk [vmem:[#allocation2 + $0x38] sm:$0xff] %vm582_vm0, %v2916_v44  ;;  %v901_v50 = vpop.xlane.xlu0 %900 }
 0x20e   : > { %v2933_v51 = vmax.f32 %v2919_v45, %v901_v50  ;;  %v899_v52 = vpop.xlane.xlu1 %898 }
 0x20f   : > { %v2936_v53 = vmax.f32 %v2926_v48, %v899_v52 }
 0x210   : > { %1512 = vst.msk [vmem:[#allocation2 + $0x30] sm:$0xff] %vm582_vm0, %v2933_v51  ;;  %1016 = vperm.xlu1 %2334, %v2933_v51   ;;  %v3279_v21 = vsub.f32 %v2919_v45, %v2933_v51 }
 0x211   : > { %1511 = vst.msk [vmem:[#allocation2 + $0x28] sm:$0xff] %vm582_vm0, %v2936_v53  ;;  %v905_v59 = vpop.xlane.xlu0 %904 }
 0x212   : > { %v911_v60 = vpop.xlane.xlu1 %910  ;;  %v2953_v61 = vmax.f32 %v2938_v54, %v905_v59  ;;  %v2999_v59 = vld [vmem:[#allocation2 + $0x70] sm:$0xff]  ;;  %v964_v24 = vmul.f32 1.442695, %v3279_v21 }
 0x213   : > { %v2956_v62 = vmax.f32 %v2946_v57, %v911_v60 }
 0x214   : > { %1514 = vst.msk [vmem:[#allocation2 + $0x40] sm:$0xff] %vm582_vm0, %v2953_v61  ;;  %1006 = vperm.xlu1 %2334, %v2913_v42   ;;  %v3281_v35 = vsub.f32 %v2938_v54, %v2953_v61 }
 0x215   : > { %1517 = vst.msk [vmem:[#allocation2 + $0x58] sm:$0xff] %vm582_vm0, %v2956_v62  ;;  %v909_v20 = vpop.xlane.xlu0 %908 }
 0x216   : > { %v907_v23 = vpop.xlane.xlu1 %906  ;;  %v2973_v25 = vmax.f32 %v2958_v63, %v909_v20 }
 0x217   : > { %v2976_v30 = vmax.f32 %v2966_v15, %v907_v23 }
 0x218   : > { %1516 = vst.msk [vmem:[#allocation2 + $0x50] sm:$0xff] %vm582_vm0, %v2973_v25  ;;  %1011 = vperm.xlu1 %2334, %v2936_v53   ;;  %v3283_v45 = vsub.f32 %v2958_v63, %v2973_v25  ;;  %v3286_v63 = vsub.f32 %v2946_v57, %v2956_v62 }
 0x219   : > { %1515 = vst.msk [vmem:[#allocation2 + $0x48] sm:$0xff] %vm582_vm0, %v2976_v30  ;;  %1031 = vperm.xlu0 %2333, %v2976_v30   ;;  %v913_v46 = vpop.xlane.xlu0 %912  ;;  %v3284_v51 = vsub.f32 %v2966_v15, %v2976_v30 }
 0x21a   : > { %v919_v50 = vpop.xlane.xlu1 %918  ;;  %v2994_v52 = vmax.f32 %v2978_v32, %v913_v46 }
 0x21b   : > { %v2997_v55 = vmax.f32 %v2986_v41, %v919_v50 }
 0x21c   : > { %1518 = vst.msk [vmem:[#allocation2 + $0x60] sm:$0xff] %vm582_vm0, %v2994_v52  ;;  %1021 = vperm.xlu1 %2334, %v2916_v44  }
 0x21d   : > { %1521 = vst.msk [vmem:[#allocation2 + $0x78] sm:$0xff] %vm582_vm0, %v2997_v55  ;;  %1041 = vperm.xlu0 %2333, %v2956_v62   ;;  %v917_v23 = vpop.xlane.xlu0 %916  ;;  %v3289_v62 = vsub.f32 %v2986_v41, %v2997_v55 }
 0x21e   : > { %v915_v34 = vpop.xlane.xlu1 %914  ;;  %v3014_v46 = vmax.f32 %v2999_v59, %v917_v23 }
 0x21f   : > { %v3017_v50 = vmax.f32 %v3006_v0, %v915_v34 }
 0x220   : > { %1520 = vst.msk [vmem:[#allocation2 + $0x70] sm:$0xff] %vm582_vm0, %v3014_v46  ;;  %1026 = vperm.xlu1 %2334, %v2953_v61   ;;  %v3287_v15 = vsub.f32 %v2999_v59, %v3014_v46  ;;  %v982_v59 = vmul.f32 1.442695, %v3289_v62 }
 0x221   : > { %1519 = vst.msk [vmem:[#allocation2 + $0x68] sm:$0xff] %vm582_vm0, %v3017_v50  ;;  %1051 = vperm.xlu0 %2333, %v3017_v50  }
 0x222   : > { %v980_v30 = vmul.f32 1.442695, %v3287_v15  ;;  %v1120_v15 = vld [vmem:[#allocation3 + $0x40] sm:$0xff] }
 0x224   : > { %1036 = vperm.xlu1 %2334, %v2973_v25   ;;  %v974_v25 = vmul.f32 1.442695, %v3286_v63 }
 0x225   : > { %1061 = vperm.xlu0 %2333, %v2997_v55  }
 0x228   : > { %1046 = vperm.xlu1 %2334, %v2994_v52  }
 0x22c   : > { %1056 = vperm.xlu1 %2334, %v3014_v46  }
 0x282   : > { %v997_v23 = vpop.permute.xlu1 %996 }
 0x283   : > { %v1066_v34 = vsub.f32 %v2798_v1, %v997_v23  ;;  %v987_v19 = vpop.permute.xlu0 %986 }
 0x284   : > { %v1064_v60 = vsub.f32 %v2801_v2, %v987_v19 }
 0x285   : > { %v1084_v20 = vmul.f32 1.442695, %v1066_v34 }
 0x286   : > { %v1080_v43 = vmul.f32 1.442695, %v1064_v60  ;;  %v1002_v38 = vpop.permute.xlu1 %1001 }
 0x287   : > { %2359 = vpow2.f32 %v1084_v20  ;;  %v1067_v49 = vsub.f32 %v2804_v3, %v1002_v38 }
 0x288   : > { %2361 = vpow2.f32 %v1080_v43 }
 0x289   : > { %v1086_v10 = vmul.f32 1.442695, %v1067_v49 }
 0x28a   : > { %v992_v58 = vpop.permute.xlu1 %991 }
 0x28b   : > { %2363 = vpow2.f32 %v1086_v10  ;;  %v1065_v56 = vsub.f32 %v2806_v4, %v992_v58 }
 0x28d   : > { %v1082_v36 = vmul.f32 1.442695, %v1065_v56 }
 0x28f   : > { %2365 = vpow2.f32 %v1082_v36  ;;  %v1017_v47 = vpop.permute.xlu1 %1016 }
 0x290   : > { %v1070_v1 = vsub.f32 %v2810_v5, %v1017_v47 }
 0x291   : > { %v2360_v23 = vpop.eup %2359 }
 0x292   : > { %v2362_v31 = vpop.eup %2361  ;;  %v1092_v2 = vmul.f32 1.442695, %v1070_v1  ;;  %1148 = vadd.xlane.f32.xlu0 %v2360_v23 }
 0x293   : > { %1144 = vadd.xlane.f32.xlu1 %v2362_v31  ;;  %v1007_v19 = vpop.permute.xlu1 %1006 }
 0x294   : > { %2367 = vpow2.f32 %v1092_v2  ;;  %v1068_v3 = vsub.f32 %v2812_v6, %v1007_v19 }
 0x295   : > { %v2364_v38 = vpop.eup %2363 }
 0x296   : > { %v1088_v49 = vmul.f32 1.442695, %v1068_v3  ;;  %v1322_v43 = vpack.c.bf16 %v2364_v38, %v2360_v23 }
 0x297   : > { %1150 = vadd.xlane.f32.xlu1 %v2364_v38  ;;  %v1012_v10 = vpop.permute.xlu1 %1011 }
 0x298   : > { %2369 = vpow2.f32 %v1088_v49  ;;  %v1069_v4 = vsub.f32 %v2818_v8, %v1012_v10  ;;  %v1032_v36 = vpop.permute.xlu0 %1031 }
 0x299   : > { %v2366_v56 = vpop.eup %2365  ;;  %v1073_v58 = vsub.f32 %v2830_v13, %v1032_v36 }
 0x29a   : > { %v1090_v5 = vmul.f32 1.442695, %v1069_v4  ;;  %1146 = vadd.xlane.f32.xlu0 %v2366_v56  ;;  %v1321_v47 = vpack.c.bf16 %v2366_v56, %v2362_v31 }
 0x29b   : > { %v1022_v60 = vpop.permute.xlu1 %1021  ;;  %v1098_v23 = vmul.f32 1.442695, %v1073_v58 }
 0x29c   : > { %2371 = vpow2.f32 %v1090_v5  ;;  %v1071_v20 = vsub.f32 %v2815_v7, %v1022_v60  ;;  %v1042_v6 = vpop.permute.xlu0 %1041  ;;  %2225 = vmatprep.mubr.bf16.mxu1 %v1321_v47 }
 0x29d   : > { %2226 = vmatmul.mubr.bf16.vlgmr.msra.gmra.mrb[0].mxu1 %v1322_v43  ;;  %v1075_v2 = vsub.f32 %v2826_v12, %v1042_v6 }
 0x29e   : > { %v2368_v34 = vpop.eup %2367  ;;  %v1094_v1 = vmul.f32 1.442695, %v1071_v20 }
 0x29f   : > { %1156 = vadd.xlane.f32.xlu0 %v2368_v34  ;;  %v1027_v8 = vpop.permute.xlu1 %1026  ;;  %v1102_v38 = vmul.f32 1.442695, %v1075_v2 }
 0x2a0   : > { %2373 = vpow2.f32 %v1094_v1  ;;  %v1072_v19 = vsub.f32 %v2824_v11, %v1027_v8  ;;  %v1052_v31 = vpop.permute.xlu0 %1051 }
 0x2a1   : > { %2375 = vpow2.f32 %v1098_v23  ;;  %v1077_v7 = vsub.f32 %v2858_v18, %v1052_v31 }
 0x2a2   : > { %v2370_v3 = vpop.eup %2369  ;;  %v1096_v13 = vmul.f32 1.442695, %v1072_v19 }
 0x2a3   : > { %1152 = vadd.xlane.f32.xlu0 %v2370_v3  ;;  %v1037_v49 = vpop.permute.xlu1 %1036  ;;  %v1106_v36 = vmul.f32 1.442695, %v1077_v7  ;;  %v954_v7 = vmul.f32 1.442695, %v937_v39 }
 0x2a4   : > { %2377 = vpow2.f32 %v1096_v13  ;;  %v1074_v43 = vsub.f32 %v2822_v9, %v1037_v49  ;;  %v1062_v10 = vpop.permute.xlu0 %1061  ;;  %v956_v49 = vmul.f32 1.442695, %v938_v28 }
 0x2a5   : > { %2379 = vpow2.f32 %v1102_v38  ;;  %v1079_v56 = vsub.f32 %v2854_v17, %v1062_v10 }
 0x2a6   : > { %v2372_v4 = vpop.eup %2371  ;;  %v1100_v12 = vmul.f32 1.442695, %v1074_v43  ;;  %v3276_v43 = vsub.f32 %v2869_v22, %v2875_v26  ;;  %v3280_v22 = vsub.f32 %v2926_v48, %v2936_v53  ;;  %v972_v48 = vmul.f32 1.442695, %v3283_v45 }
 0x2a7   : > { %v1047_v11 = vpop.permute.xlu1 %1046  ;;  %v1323_v5 = vpack.c.bf16 %v2372_v4, %v2370_v3  ;;  %v1110_v60 = vmul.f32 1.442695, %v1079_v56  ;;  %v970_v53 = vmul.f32 1.442695, %v3284_v51 }
 0x2a8   : > { %2381 = vpow2.f32 %v1100_v12  ;;  %v1076_v47 = vsub.f32 %v2852_v16, %v1047_v11  ;;  %v952_v10 = vmul.f32 1.442695, %v3276_v43  ;;  %v962_v26 = vmul.f32 1.442695, %v3280_v22 }
 0x2a9   : > { %2229 = vmatprep.mubr.bf16.mxu1 %v1323_v5  ;;  %2383 = vpow2.f32 %v1106_v36  ;;  %v3278_v36 = vsub.f32 %v2877_v27, %v2893_v33  ;;  %v968_v27 = vmul.f32 1.442695, %v3281_v35  ;;  %v3282_v33 = vsub.f32 %v2910_v40, %v2916_v44 }
 0x2aa   : > { %v2374_v58 = vpop.eup %2373  ;;  %v1104_v18 = vmul.f32 1.442695, %v1076_v47  ;;  %v3285_v40 = vsub.f32 %v2978_v32, %v2994_v52  ;;  %v3288_v32 = vsub.f32 %v3006_v0, %v3017_v50 }
 0x2ab   : > { %1158 = vadd.xlane.f32.xlu1 %v2374_v58  ;;  %v1057_v20 = vpop.permute.xlu1 %1056  ;;  %v1324_v9 = vpack.c.bf16 %v2374_v58, %v2368_v34  ;;  %v2376_v1 = vpop.eup %2375  ;;  %v958_v29 = vmul.f32 1.442695, %v3278_v36 }
 0x2ac   : > { %2385 = vpow2.f32 %v1104_v18  ;;  %v1078_v6 = vsub.f32 %v2834_v14, %v1057_v20  ;;  %v976_v44 = vmul.f32 1.442695, %v3285_v40  ;;  %v978_v52 = vmul.f32 1.442695, %v3288_v32  ;;  %v1114_v18 = vld [vmem:[#allocation3 + $0x10] sm:$0xff] }
 0x2ad   : > { %2230 = vmatmul.mubr.bf16.gmra.mrb[4].mxu1 %v1324_v9  ;;  %2387 = vpow2.f32 %v1110_v60  ;;  %v1112_v60 = vld [vmem:[#allocation3] sm:$0xff] }
 0x2ae   : > { %v2378_v23 = vpop.eup %2377  ;;  %v1108_v17 = vmul.f32 1.442695, %v1078_v6 }
 0x2af   : > { %1154 = vadd.xlane.f32.xlu1 %v2372_v4  ;;  %v1325_v2 = vpack.c.bf16 %v2376_v1, %v2378_v23  ;;  %v2380_v16 = vpop.eup %2379  ;;  %v3277_v4 = vsub.f32 %v2903_v37, %v2913_v42  ;;  %v966_v37 = vmul.f32 1.442695, %v3282_v33 }
 0x2b0   : > { %2389 = vpow2.f32 %v1108_v17  ;;  %v1115_v17 = vld [vmem:[#allocation3 + $0x18] sm:$0xff] }
 0x2b1   : > { %2233 = vmatprep.mubr.bf16.mxu1 %v1325_v2  ;;  %2391 = vpow2.f32 %v954_v7  ;;  %v960_v12 = vmul.f32 1.442695, %v3277_v4 }
 0x2b2   : > { %v2382_v8 = vpop.eup %2381  ;;  %2393 = vpow2.f32 %v956_v49 }
 0x2b3   : > { %1166 = vadd.xlane.f32.xlu1 %v2380_v16  ;;  %1164 = vadd.xlane.f32.xlu0 %v2382_v8  ;;  %v1326_v19 = vpack.c.bf16 %v2380_v16, %v2382_v8  ;;  %v2384_v31 = vpop.eup %2383  ;;  %2395 = vpow2.f32 %v952_v10  ;;  %v1113_v8 = vld [vmem:[#allocation3 + $0x8] sm:$0xff]  ;;  %v1116_v10 = vld [vmem:[#allocation3 + $0x20] sm:$0xff] }
 0x2b4   : > { %2397 = vpow2.f32 %v960_v12 }
 0x2b5   : > { %2234 = vmatmul.mubr.bf16.gmra.mrb[8].mxu1 %v1326_v19  ;;  %2399 = vpow2.f32 %v958_v29 }
 0x2b6   : > { %v2386_v34 = vpop.eup %2385  ;;  %2401 = vpow2.f32 %v964_v24 }
 0x2b7   : > { %1162 = vadd.xlane.f32.xlu1 %v2376_v1  ;;  %1160 = vadd.xlane.f32.xlu0 %v2378_v23  ;;  %v1327_v14 = vpack.c.bf16 %v2384_v31, %v2386_v34  ;;  %v2388_v3 = vpop.eup %2387  ;;  %2403 = vpow2.f32 %v962_v26  ;;  %v1119_v26 = vld [vmem:[#allocation3 + $0x38] sm:$0xff] }
 0x2b8   : > { %2405 = vpow2.f32 %v968_v27 }
 0x2b9   : > { %2237 = vmatprep.mubr.bf16.mxu1 %v1327_v14  ;;  %2407 = vpow2.f32 %v966_v37  ;;  %v1117_v37 = vld [vmem:[#allocation3 + $0x28] sm:$0xff] }
 0x2ba   : > { %v2390_v13 = vpop.eup %2389  ;;  %2409 = vpow2.f32 %v972_v48 }
 0x2bb   : > { %1174 = vadd.xlane.f32.xlu1 %v2388_v3  ;;  %1168 = vadd.xlane.f32.xlu0 %v2386_v34  ;;  %v1328_v38 = vpack.c.bf16 %v2388_v3, %v2390_v13  ;;  %v3070_v28 = vpop.eup %2391  ;;  %2411 = vpow2.f32 %v970_v53 }
 0x2bc   : > { %v2394_v39 = vpop.eup %2393  ;;  %2413 = vpow2.f32 %v976_v44  ;;  %v1129_v34 = vmul.f32 %v3070_v28, %v1113_v8 }
 0x2bd   : > { %2238 = vmatmul.mubr.bf16.gmra.mrb[12].mxu1 %v1328_v38  ;;  %v2396_v42 = vpop.eup %2395  ;;  %2415 = vpow2.f32 %v974_v25  ;;  %v1130_v20 = vmul.f32 %v2394_v39, %v1114_v18  ;;  %v1124_v18 = vld [vmem:[#allocation3 + $0x60] sm:$0xff] }
 0x2be   : > { %v3085_v54 = vpop.eup %2397  ;;  %2417 = vpow2.f32 %v980_v30  ;;  %v1128_v6 = vmul.f32 %v2396_v42, %v1112_v60  ;;  %v1121_v30 = vld [vmem:[#allocation3 + $0x48] sm:$0xff]  ;;  %v1127_v60 = vld [vmem:[#allocation3 + $0x78] sm:$0xff] }
 0x2bf   : > { %1170 = vadd.xlane.f32.xlu1 %v2384_v31  ;;  %1172 = vadd.xlane.f32.xlu0 %v2390_v13  ;;  %v2400_v61 = vpop.eup %2399  ;;  %2419 = vpow2.f32 %v978_v52  ;;  %v1118_v13 = vld [vmem:[#allocation3 + $0x30] sm:$0xff]  ;;  %v1132_v36 = vmul.f32 %v3085_v54, %v1116_v10 }
 0x2c0   : > { %v2402_v56 = vpop.eup %2401  ;;  %2421 = vpow2.f32 %v982_v59  ;;  %v1131_v16 = vmul.f32 %v2400_v61, %v1115_v17 }
 0x2c1   : > { %v3094_v11 = vpop.eup %2403  ;;  %v1134_v7 = vmul.f32 %v2402_v56, %v1118_v13 }
 0x2c2   : > { %v3103_v5 = vpop.eup %2405  ;;  %v1133_v48 = vmul.f32 %v3094_v11, %v1117_v37 }
 0x2c3   : > { %v3105_v57 = vpop.eup %2407  ;;  %v1136_v62 = vmul.f32 %v3103_v5, %v1120_v15 }
 0x2c4   : > { %v3112_v46 = vpop.eup %2409  ;;  %v1135_v35 = vmul.f32 %v3105_v57, %v1119_v26 }
 0x2c5   : > { %v3114_v47 = vpop.eup %2411 }
 0x2c6   : > { %v3118_v0 = vpop.eup %2413  ;;  %v1137_v59 = vmul.f32 %v3114_v47, %v1121_v30 }
 0x2c7   : > { %v3120_v50 = vpop.eup %2415 }
 0x2c8   : > { %v3124_v41 = vpop.eup %2417 }
 0x2c9   : > { %v3126_v55 = vpop.eup %2419 }
 0x2ca   : > { %v3130_v58 = vpop.eup %2421 }
 0x2d0   : > { %1232 = vperm.xlu1 %2334, %v3070_v28  }
 0x2d4   : > { %1237 = vperm.xlu1 %2334, %v2394_v39  }
 0x2d5   : > { %1227 = vperm.xlu0 %2333, %v2396_v42  }
 0x2d8   : > { %1247 = vperm.xlu1 %2334, %v3085_v54   ;;  %v1122_v54 = vld [vmem:[#allocation3 + $0x50] sm:$0xff] }
 0x2d9   : > { %1242 = vperm.xlu0 %2333, %v2400_v61   ;;  %v1123_v61 = vld [vmem:[#allocation3 + $0x58] sm:$0xff]  ;;  %v1138_v44 = vmul.f32 %v3112_v46, %v1122_v54 }
 0x2da   : > { %v1139_v63 = vmul.f32 %v3120_v50, %v1123_v61 }
 0x2dc   : > { %1257 = vperm.xlu1 %2334, %v2402_v56  }
 0x2dd   : > { %1252 = vperm.xlu0 %2333, %v3094_v11  }
 0x2e0   : > { %1267 = vperm.xlu1 %2334, %v3103_v5   ;;  %v1143_v5 = vmul.f32 %v3130_v58, %v1127_v60 }
 0x2e1   : > { %1262 = vperm.xlu0 %2333, %v3105_v57  }
 0x2e4   : > { %1277 = vperm.xlu1 %2334, %v3112_v46  }
 0x2e5   : > { %1272 = vperm.xlu0 %2333, %v3114_v47  }
 0x2e8   : > { %1287 = vperm.xlu1 %2334, %v3118_v0  }
 0x2e9   : > { %1282 = vperm.xlu0 %2333, %v3120_v50  }
 0x2ec   : > { %1297 = vperm.xlu1 %2334, %v3124_v41  }
 0x2ed   : > { %1292 = vperm.xlu0 %2333, %v3126_v55  }
 0x2f1   : > { %1302 = vperm.xlu0 %2333, %v3130_v58  }
 0x31f   : > { %v1149_v9 = vpop.xlane.xlu0 %1148 }
 0x320   : > { %v1178_v1 = vadd.f32 %v1149_v9, %v1130_v20  ;;  %v1145_v23 = vpop.xlane.xlu1 %1144 }
 0x321   : > { %v1176_v2 = vadd.f32 %v1145_v23, %v1128_v6  ;;  %v1140_v23 = vmul.f32 %v3118_v0, %v1124_v18 }
 0x322   : > { %1195 = vst.msk [vmem:[#allocation3 + $0x10] sm:$0xff] %vm582_vm0, %v1178_v1 }
 0x323   : > { %1193 = vst.msk [vmem:[#allocation3] sm:$0xff] %vm582_vm0, %v1176_v2  ;;  %v1126_v2 = vld [vmem:[#allocation3 + $0x70] sm:$0xff] }
 0x324   : > { %v1151_v19 = vpop.xlane.xlu1 %1150 }
 0x325   : > { %v1179_v31 = vadd.f32 %v1151_v19, %v1131_v16  ;;  %v1125_v16 = vld [vmem:[#allocation3 + $0x68] sm:$0xff] }
 0x327   : > { %1196 = vst.msk [vmem:[#allocation3 + $0x18] sm:$0xff] %vm582_vm0, %v1179_v31  ;;  %v1147_v14 = vpop.xlane.xlu0 %1146 }
 0x328   : > { %v1177_v3 = vadd.f32 %v1147_v14, %v1129_v34  ;;  %v1142_v14 = vmul.f32 %v3124_v41, %v1126_v2 }
 0x329   : > { %v1527_v38 = vld [vmem:[#allocation3 + $0x10] sm:$0xff] }
 0x32a   : > { %1194 = vst.msk [vmem:[#allocation3 + $0x8] sm:$0xff] %vm582_vm0, %v1177_v3  ;;  %2423 = vrcp.f32 %v1527_v38  ;;  %v1525_v49 = vld [vmem:[#allocation3] sm:$0xff]  ;;  %v1141_v3 = vmul.f32 %v3126_v55, %v1125_v16 }
 0x32b   : > { %2425 = vrcp.f32 %v1525_v49 }
 0x32c   : > { %v1157_v43 = vpop.xlane.xlu0 %1156 }
 0x32d   : > { %v1182_v4 = vadd.f32 %v1157_v43, %v1134_v7 }
 0x32e   : > { %v1528_v12 = vld [vmem:[#allocation3 + $0x18] sm:$0xff] }
 0x32f   : > { %1199 = vst.msk [vmem:[#allocation3 + $0x30] sm:$0xff] %vm582_vm0, %v1182_v4  ;;  %2427 = vrcp.f32 %v1528_v12 }
 0x330   : > { %v1153_v29 = vpop.xlane.xlu0 %1152 }
 0x331   : > { %v1180_v21 = vadd.f32 %v1153_v29, %v1132_v36  ;;  %v1526_v24 = vld [vmem:[#allocation3 + $0x8] sm:$0xff] }
 0x332   : > { %2429 = vrcp.f32 %v1526_v24 }
 0x333   : > { %1197 = vst.msk [vmem:[#allocation3 + $0x20] sm:$0xff] %vm582_vm0, %v1180_v21 }
 0x334   : > { %v2424_v22 = vpop.eup %2423 }
 0x335   : > { %1585 = vperm.xlu1 %2334, %v2424_v22   ;;  %v2426_v27 = vpop.eup %2425 }
 0x336   : > { %v1531_v28 = vld [vmem:[#allocation3 + $0x30] sm:$0xff] }
 0x337   : > { %2431 = vrcp.f32 %v1531_v28 }
 0x338   : > { %v1159_v33 = vpop.xlane.xlu1 %1158 }
 0x339   : > { %v2428_v39 = vpop.eup %2427  ;;  %v1183_v42 = vadd.f32 %v1159_v33, %v1135_v35  ;;  %1575 = vperm.xlu1 %2334, %v2426_v27  }
 0x33a   : > { %1590 = vperm.xlu0 %2333, %v2428_v39   ;;  %v1529_v45 = vld [vmem:[#allocation3 + $0x20] sm:$0xff] }
 0x33b   : > { %1200 = vst.msk [vmem:[#allocation3 + $0x38] sm:$0xff] %vm582_vm0, %v1183_v42  ;;  %2433 = vrcp.f32 %v1529_v45 }
 0x33c   : > { %v2430_v51 = vpop.eup %2429  ;;  %v1155_v53 = vpop.xlane.xlu1 %1154 }
 0x33d   : > { %v1181_v40 = vadd.f32 %v1155_v53, %v1133_v48 }
 0x33e   : > { %1580 = vperm.xlu0 %2333, %v2430_v51  }
 0x33f   : > { %1198 = vst.msk [vmem:[#allocation3 + $0x28] sm:$0xff] %vm582_vm0, %v1181_v40 }
 0x340   : > { %v1165_v25 = vpop.xlane.xlu0 %1164  ;;  %v1167_v56 = vpop.xlane.xlu1 %1166 }
 0x341   : > { %v2432_v32 = vpop.eup %2431  ;;  %v1186_v52 = vadd.f32 %v1165_v25, %v1138_v44  ;;  %v1187_v11 = vadd.f32 %v1167_v56, %v1139_v63 }
 0x342   : > { %1605 = vperm.xlu1 %2334, %v2432_v32   ;;  %v1532_v57 = vld [vmem:[#allocation3 + $0x38] sm:$0xff] }
 0x343   : > { %1203 = vst.msk [vmem:[#allocation3 + $0x50] sm:$0xff] %vm582_vm0, %v1186_v52  ;;  %1204 = vst.msk [vmem:[#allocation3 + $0x58] sm:$0xff] %vm582_vm0, %v1187_v11  ;;  %2435 = vrcp.f32 %v1532_v57 }
 0x344   : > { %v1161_v46 = vpop.xlane.xlu0 %1160  ;;  %v1163_v50 = vpop.xlane.xlu1 %1162 }
 0x345   : > { %v2434_v20 = vpop.eup %2433  ;;  %v1184_v9 = vadd.f32 %v1161_v46, %v1136_v62  ;;  %v1185_v6 = vadd.f32 %v1163_v50, %v1137_v59 }
 0x346   : > { %1595 = vperm.xlu1 %2334, %v2434_v20   ;;  %v1530_v1 = vld [vmem:[#allocation3 + $0x28] sm:$0xff] }
 0x347   : > { %1201 = vst.msk [vmem:[#allocation3 + $0x40] sm:$0xff] %vm582_vm0, %v1184_v9  ;;  %1202 = vst.msk [vmem:[#allocation3 + $0x48] sm:$0xff] %vm582_vm0, %v1185_v6  ;;  %2437 = vrcp.f32 %v1530_v1 }
 0x348   : > { %v1169_v47 = vpop.xlane.xlu0 %1168  ;;  %v1175_v17 = vpop.xlane.xlu1 %1174 }
 0x349   : > { %v1188_v8 = vadd.f32 %v1169_v47, %v1140_v23  ;;  %v1191_v19 = vadd.f32 %v1175_v17, %v1143_v5 }
 0x34a   : > { %v1535_v31 = vld [vmem:[#allocation3 + $0x50] sm:$0xff]  ;;  %v1536_v34 = vld [vmem:[#allocation3 + $0x58] sm:$0xff] }
 0x34b   : > { %1205 = vst.msk [vmem:[#allocation3 + $0x60] sm:$0xff] %vm582_vm0, %v1188_v8  ;;  %1208 = vst.msk [vmem:[#allocation3 + $0x78] sm:$0xff] %vm582_vm0, %v1191_v19  ;;  %2439 = vrcp.f32 %v1535_v31 }
 0x34c   : > { %v1173_v0 = vpop.xlane.xlu0 %1172  ;;  %v1171_v58 = vpop.xlane.xlu1 %1170  ;;  %2441 = vrcp.f32 %v1536_v34 }
 0x34d   : > { %v2436_v13 = vpop.eup %2435  ;;  %v1190_v38 = vadd.f32 %v1173_v0, %v1142_v14  ;;  %v1189_v7 = vadd.f32 %v1171_v58, %v1141_v3 }
 0x34e   : > { %1610 = vperm.xlu0 %2333, %v2436_v13   ;;  %v1533_v49 = vld [vmem:[#allocation3 + $0x40] sm:$0xff]  ;;  %v1534_v43 = vld [vmem:[#allocation3 + $0x48] sm:$0xff] }
 0x34f   : > { %1207 = vst.msk [vmem:[#allocation3 + $0x70] sm:$0xff] %vm582_vm0, %v1190_v38  ;;  %1206 = vst.msk [vmem:[#allocation3 + $0x68] sm:$0xff] %vm582_vm0, %v1189_v7  ;;  %2443 = vrcp.f32 %v1533_v49 }
 0x350   : > { %2445 = vrcp.f32 %v1534_v43  ;;  %v1233_v53 = vpop.permute.xlu1 %1232 }
 0x351   : > { %v2438_v10 = vpop.eup %2437  ;;  %v1306_v8 = vmul.f32 0.0, %v1233_v53 }
 0x352   : > { %1600 = vperm.xlu0 %2333, %v2438_v10   ;;  %v1537_v41 = vld [vmem:[#allocation3 + $0x60] sm:$0xff]  ;;  %v1540_v21 = vld [vmem:[#allocation3 + $0x78] sm:$0xff] }
 0x353   : > { %2447 = vrcp.f32 %v1537_v41 }
 0x354   : > { %v1228_v44 = vpop.permute.xlu0 %1227  ;;  %v1238_v25 = vpop.permute.xlu1 %1237 }
 0x355   : > { %v2440_v55 = vpop.eup %2439  ;;  %v1307_v5 = vmul.f32 0.0, %v1238_v25  ;;  %v1305_v19 = vmul.f32 0.0, %v1228_v44 }
 0x356   : > { %v2442_v4 = vpop.eup %2441  ;;  %1625 = vperm.xlu1 %2334, %v2440_v55   ;;  %v1539_v12 = vld [vmem:[#allocation3 + $0x70] sm:$0xff]  ;;  %v1538_v36 = vld [vmem:[#allocation3 + $0x68] sm:$0xff] }
 0x357   : > { %1630 = vperm.xlu0 %2333, %v2442_v4   ;;  %2449 = vrcp.f32 %v1539_v12 }
 0x358   : > { %2451 = vrcp.f32 %v1538_v36  ;;  %v1243_v15 = vpop.permute.xlu0 %1242  ;;  %v1248_v52 = vpop.permute.xlu1 %1247 }
 0x359   : > { %v2444_v29 = vpop.eup %2443  ;;  %2453 = vrcp.f32 %v1540_v21  ;;  %v1308_v47 = vmul.f32 0.0, %v1243_v15  ;;  %v1309_v36 = vmul.f32 0.0, %v1248_v52 }
 0x35a   : > { %v2446_v24 = vpop.eup %2445  ;;  %1615 = vperm.xlu1 %2334, %v2444_v29  }
 0x35b   : > { %1620 = vperm.xlu0 %2333, %v2446_v24  }
 0x35c   : > { %v1253_v57 = vpop.permute.xlu0 %1252  ;;  %v1258_v62 = vpop.permute.xlu1 %1257 }
 0x35d   : > { %v2448_v22 = vpop.eup %2447  ;;  %v1311_v10 = vmul.f32 0.0, %v1258_v62  ;;  %v1310_v29 = vmul.f32 0.0, %v1253_v57 }
 0x35e   : > { %1635 = vperm.xlu1 %2334, %v2448_v22  }
 0x360   : > { %v1263_v59 = vpop.permute.xlu0 %1262  ;;  %v1268_v46 = vpop.permute.xlu1 %1267 }
 0x361   : > { %v2450_v26 = vpop.eup %2449  ;;  %v1312_v41 = vmul.f32 0.0, %v1263_v59  ;;  %v1313_v15 = vmul.f32 0.0, %v1268_v46 }
 0x362   : > { %v2452_v28 = vpop.eup %2451  ;;  %1645 = vperm.xlu1 %2334, %v2450_v26  }
 0x363   : > { %1640 = vperm.xlu0 %2333, %v2452_v28   ;;  %v2454_v35 = vpop.eup %2453 }
 0x364   : > { %v1273_v50 = vpop.permute.xlu0 %1272  ;;  %v1278_v18 = vpop.permute.xlu1 %1277 }
 0x367   : > { %1650 = vperm.xlu0 %2333, %v2454_v35  }
 0x368   : > { %v1283_v60 = vpop.permute.xlu0 %1282  ;;  %v3177_v20 = vpop.permute.xlu1 %1287 }
 0x369   : > { %v1316_v53 = vmul.f32 0.0, %v1283_v60  ;;  %v1317_v46 = vmul.f32 0.0, %v3177_v20 }
 0x36c   : > { %v3179_v9 = vpop.permute.xlu0 %1292  ;;  %v3181_v6 = vpop.permute.xlu1 %1297 }
 0x370   : > { %v2227_v27 = vpop.f32.mrb[0].mxu1  ;;  %v3183_v1 = vpop.permute.xlu0 %1302 }
 0x371   : > { %v1411_v33 = vpop.f32.mrb[1].mxu1  ;;  %v1476_v17 = vadd.f32 %v2227_v27, %v1307_v5 }
 0x372   : > { %v2228_v37 = vpop.f32.mrb[2].mxu1  ;;  %v1474_v3 = vadd.f32 %v1411_v33, %v1305_v19  ;;  %v1315_v33 = vmul.f32 0.0, %v1278_v18 }
 0x373   : > { %v1414_v39 = vpop.f32.mrb[3].mxu1  ;;  %v1477_v2 = vadd.f32 %v2228_v37, %v1308_v47 }
 0x374   : > { %v1475_v0 = vadd.f32 %v1414_v39, %v1306_v8 }
 0x380   : > { %v2231_v42 = vpop.f32.mrb[4].mxu1 }
 0x381   : > { %v1427_v45 = vpop.f32.mrb[5].mxu1  ;;  %v1480_v55 = vadd.f32 %v2231_v42, %v1311_v10 }
 0x382   : > { %v2232_v48 = vpop.f32.mrb[6].mxu1  ;;  %v1478_v26 = vadd.f32 %v1427_v45, %v1309_v36 }
 0x383   : > { %v1430_v51 = vpop.f32.mrb[7].mxu1  ;;  %v1481_v4 = vadd.f32 %v2232_v48, %v1312_v41 }
 0x384   : > { %v1479_v28 = vadd.f32 %v1430_v51, %v1310_v29  ;;  %v1314_v51 = vmul.f32 0.0, %v1273_v50 }
 0x388   : > { %v3161_v54 = vpop.f32.mrb[8].mxu1 }
 0x389   : > { %v3163_v61 = vpop.f32.mrb[9].mxu1  ;;  %v1484_v44 = vadd.f32 %v3161_v54, %v1315_v33 }
 0x38a   : > { %v3165_v40 = vpop.f32.mrb[10].mxu1  ;;  %v1482_v62 = vadd.f32 %v3163_v61, %v1313_v15 }
 0x38b   : > { %v3167_v63 = vpop.f32.mrb[11].mxu1  ;;  %v1485_v48 = vadd.f32 %v3165_v40, %v1316_v53 }
 0x38c   : > { %v1483_v59 = vadd.f32 %v3167_v63, %v1314_v51 }
 0x390   : > { %v3169_v56 = vpop.f32.mrb[12].mxu1 }
 0x391   : > { %v3171_v30 = vpop.f32.mrb[13].mxu1 }
 0x392   : > { %v3173_v32 = vpop.f32.mrb[14].mxu1  ;;  %v1486_v50 = vadd.f32 %v3171_v30, %v1317_v46 }
 0x393   : > { %v3175_v11 = vpop.f32.mrb[15].mxu1 }
 0x3b4   : > { %v1586_v23 = vpop.permute.xlu1 %1585 }
 0x3b5   : > { %v1655_v31 = vmul.f32 %v1586_v23, %v1476_v17  ;;  %v1318_v17 = vmul.f32 0.0, %v3179_v9 }
 0x3b7   : > { %v1487_v61 = vadd.f32 %v3175_v11, %v1318_v17 }
 0x3b8   : > { %v1576_v14 = vpop.permute.xlu1 %1575 }
 0x3b9   : > { %v1591_v16 = vpop.permute.xlu0 %1590  ;;  %v1653_v38 = vmul.f32 %v1576_v14, %v1474_v3 }
 0x3ba   : > { %v1656_v34 = vmul.f32 %v1591_v16, %v1477_v2  ;;  %v1319_v2 = vmul.f32 0.0, %v3181_v6  ;;  %v1320_v16 = vmul.f32 0.0, %v3183_v1 }
 0x3bc   : > { %v2106_v58 = vpack.c.bf16 %v1656_v34, %v1655_v31  ;;  %v1488_v34 = vadd.f32 %v3169_v56, %v1319_v2  ;;  %v1489_v20 = vadd.f32 %v3173_v32, %v1320_v16 }
 0x3bd   : > { %v1581_v13 = vpop.permute.xlu0 %1580 }
 0x3be   : > { %2138 = vst [vmem:[%s3186_s12 + $0x8] sm:$0xff] %v2106_v58   ;;  %v1654_v7 = vmul.f32 %v1581_v13, %v1475_v0 }
 0x3c0   : > { %v2101_v49 = vpack.c.bf16 %v1654_v7, %v1653_v38 }
 0x3c1   : > { %v1606_v43 = vpop.permute.xlu1 %1605 }
 0x3c2   : > { %2102 = vst [vmem:[%s3186_s12] sm:$0xff] %v2101_v49   ;;  %v1659_v21 = vmul.f32 %v1606_v43, %v1480_v55 }
 0x3c5   : > { %v1596_v22 = vpop.permute.xlu1 %1595  ;;  %v1782_v11 = vld [vmem:[%s3186_s12 + $0x8] sm:$0xf] (%p2679_p13)  ;;  %v1784_v6 = vld [vmem:[%s3186_s12 + $0xc] sm:$0xf] (%p2679_p13) }
 0x3c6   : > { %v1657_v37 = vmul.f32 %v1596_v22, %v1478_v26  ;;  %1783 = vst [vmem:[%s1762_s10 + $0x10] sm:$0xf] (%p2679_p13), %v1782_v11  ;;  %1785 = vst [vmem:[%s1762_s10 + $0x18] sm:$0xf] (%p2679_p13), %v1784_v6 }
 0x3c9   : > { %v1778_v56 = vld [vmem:[%s3186_s12] sm:$0xf] (%p2679_p13)  ;;  %v1780_v32 = vld [vmem:[%s3186_s12 + $0x4] sm:$0xf] (%p2679_p13) }
 0x3ca   : > { %1779 = vst [vmem:[%s1762_s10] sm:$0xf] (%p2679_p13), %v1778_v56  ;;  %1781 = vst [vmem:[%s1762_s10 + $0x8] sm:$0xf] (%p2679_p13), %v1780_v32 }
 0x3cd   : > { %v1611_v12 = vpop.permute.xlu0 %1610 }
 0x3ce   : > { %v1660_v24 = vmul.f32 %v1611_v12, %v1481_v4 }
 0x3d0   : > { %v2116_v35 = vpack.c.bf16 %v1660_v24, %v1659_v21 }
 0x3d1   : > { %v1601_v27 = vpop.permute.xlu0 %1600 }
 0x3d2   : > { %2140 = vst [vmem:[%s3186_s12 + $0x18] sm:$0xff] %v2116_v35   ;;  %v1658_v39 = vmul.f32 %v1601_v27, %v1479_v28 }
 0x3d4   : > { %v2111_v42 = vpack.c.bf16 %v1658_v39, %v1657_v37 }
 0x3d5   : > { %v1626_v25 = vpop.permute.xlu1 %1625 }
 0x3d6   : > { %2139 = vst [vmem:[%s3186_s12 + $0x10] sm:$0xff] %v2111_v42   ;;  %v1631_v52 = vpop.permute.xlu0 %1630  ;;  %v1663_v45 = vmul.f32 %v1626_v25, %v1484_v44 }
 0x3d7   : > { %v1664_v57 = vmul.f32 %v1631_v52, %v1485_v48 }
 0x3d9   : > { %v2126_v18 = vpack.c.bf16 %v1664_v57, %v1663_v45  ;;  %v1616_v60 = vpop.permute.xlu1 %1615  ;;  %v1790_v13 = vld [vmem:[%s3186_s12 + $0x18] sm:$0xf] (%p2679_p13)  ;;  %v1792_v38 = vld [vmem:[%s3186_s12 + $0x1c] sm:$0xf] (%p2679_p13) }
 0x3da   : > { %v1621_v23 = vpop.permute.xlu0 %1620  ;;  %v1661_v54 = vmul.f32 %v1616_v60, %v1482_v62  ;;  %1791 = vst [vmem:[%s1762_s10 + $0x30] sm:$0xf] (%p2679_p13), %v1790_v13  ;;  %1793 = vst [vmem:[%s1762_s10 + $0x38] sm:$0xf] (%p2679_p13), %v1792_v38 }
 0x3db   : > { %2142 = vst [vmem:[%s3186_s12 + $0x28] sm:$0xff] %v2126_v18   ;;  %v1662_v5 = vmul.f32 %v1621_v23, %v1483_v59 }
 0x3dd   : > { %v2121_v47 = vpack.c.bf16 %v1662_v5, %v1661_v54  ;;  %v1636_v40 = vpop.permute.xlu1 %1635  ;;  %v1786_v1 = vld [vmem:[%s3186_s12 + $0x10] sm:$0xf] (%p2679_p13)  ;;  %v1788_v58 = vld [vmem:[%s3186_s12 + $0x14] sm:$0xf] (%p2679_p13) }
 0x3de   : > { %v1665_v8 = vmul.f32 %v1636_v40, %v1486_v50  ;;  %1787 = vst [vmem:[%s1762_s10 + $0x20] sm:$0xf] (%p2679_p13), %v1786_v1  ;;  %1789 = vst [vmem:[%s1762_s10 + $0x28] sm:$0xf] (%p2679_p13), %v1788_v58 }
 0x3df   : > { %2141 = vst [vmem:[%s3186_s12 + $0x20] sm:$0xff] %v2121_v47  }
 0x3e1   : > { %v1646_v31 = vpop.permute.xlu1 %1645 }
 0x3e2   : > { %v1641_v63 = vpop.permute.xlu0 %1640  ;;  %v1667_v3 = vmul.f32 %v1646_v31, %v1488_v34  ;;  %v1798_v43 = vld [vmem:[%s3186_s12 + $0x28] sm:$0xf] (%p2679_p13)  ;;  %v1800_v10 = vld [vmem:[%s3186_s12 + $0x2c] sm:$0xf] (%p2679_p13) }
 0x3e3   : > { %v1666_v19 = vmul.f32 %v1641_v63, %v1487_v61  ;;  %1799 = vst [vmem:[%s1762_s10 + $0x50] sm:$0xf] (%p2679_p13), %v1798_v43  ;;  %1801 = vst [vmem:[%s1762_s10 + $0x58] sm:$0xf] (%p2679_p13), %v1800_v10 }
 0x3e5   : > { %v2131_v14 = vpack.c.bf16 %v1666_v19, %v1665_v8  ;;  %1755 = sbr.rel (!%p2679_p13) target bundleno = 1012 (0x3f4), region = 167 }
 0x3e6   : > { %v1651_v9 = vpop.permute.xlu0 %1650  ;;  %v1794_v7 = vld [vmem:[%s3186_s12 + $0x20] sm:$0xf] (%p2679_p13)  ;;  %v1796_v49 = vld [vmem:[%s3186_s12 + $0x24] sm:$0xf] (%p2679_p13) }
 0x3e7   : > { %2143 = vst [vmem:[%s3186_s12 + $0x30] sm:$0xff] %v2131_v14   ;;  %v1668_v30 = vmul.f32 %v1651_v9, %v1489_v20  ;;  %1795 = vst [vmem:[%s1762_s10 + $0x40] sm:$0xf] (%p2679_p13), %v1794_v7 }
 0x3e8   : > { %1797 = vst [vmem:[%s1762_s10 + $0x48] sm:$0xf] (%p2679_p13), %v1796_v49 }
 0x3e9   : > { %v2136_v0 = vpack.c.bf16 %v1668_v30, %v1667_v3 }
 0x3eb   : > { %2144 = vst [vmem:[%s3186_s12 + $0x38] sm:$0xff] %v2136_v0  }
 0x3ee   : > { %v1802_v41 = vld [vmem:[%s3186_s12 + $0x30] sm:$0xf]  ;;  %v1804_v55 = vld [vmem:[%s3186_s12 + $0x34] sm:$0xf] }
 0x3ef   : > { %1803 = vst [vmem:[%s1762_s10 + $0x60] sm:$0xf] %v1802_v41  ;;  %1805 = vst [vmem:[%s1762_s10 + $0x68] sm:$0xf] %v1804_v55 }
 0x3f2   : > { %v1806_v4 = vld [vmem:[%s3186_s12 + $0x38] sm:$0xf]  ;;  %v1808_v12 = vld [vmem:[%s3186_s12 + $0x3c] sm:$0xf] }
 0x3f3   : > { %1807 = vst [vmem:[%s1762_s10 + $0x70] sm:$0xf] %v1806_v4  ;;  %1809 = vst [vmem:[%s1762_s10 + $0x78] sm:$0xf] %v1808_v12 }
 0x3f4 PF: > { %s13_s22 = sadd.s32 1, %s2541_s22   ;;  %s3291_s30 = sld [smem:[#allocation9_spill]] }
 0x3f5   : > { %p10_p4 = scmp.ge.s32.totalorder %s13_s22, 6   ;;  %s3292_s12 = smov %s2505_s13 }
 0x3f6   : > { %s3293_s13 = smov %s2684_s26  ;;  %s3294_s14 = smov %s2513_s15 }
 0x3f7   : > { %s3295_s15 = smov %s2662_s28  ;;  %s3296_s16 = smov %s2521_s17 }
 0x3f8   : > { %s3297_s17 = smov %s2659_s11  ;;  %s3298_s18 = smov %s2533_s20 }
 0x3f9   : > { %s3299_s19 = smov %s2537_s21  ;;  %s3300_s20 = smov %s3303_s24 }
 0x3fa   : > { %s3301_s21 = smov %s3291_s30  ;;  %12 = sbr.rel (!%p10_p4) target bundleno = 8 (0x8), region = 255 }

// kernel: pretrained_encoder_with_head.17
= control target key start
LH: loop header
LB: loop body
LE: loop exit
PB: predicated region body
PF: predicated region fallthrough
CT: control target
= control target key end

     0   :  { %s1857_s1 = inlined_call_operand.vmem [shape: bf16[256,256], index: 1, kind: input, shape index: {}]   ;;  %s1858_s0 = inlined_call_operand.vmem [shape: bf16[256,256], index: 0, kind: input, shape index: {}]   ;;  %s1859_s2 = inlined_call_operand.vmem [shape: f32[1,256], index: 2, kind: input, shape index: {}]   ;;  %s1860_s3 = inlined_call_operand.vmem [shape: bf16[256,256], index: 3, kind: output, shape index: {}]  }
   0x1   :  { %v1382_v0 = vld [vmem:[%s1857_s1 + $0x4] ss:$8 sps:$4 sm:$0xff]   ;;  %v1384_v1 = vld [vmem:[%s1857_s1] ss:$8 sps:$4 sm:$0xff]   ;;  %v1385_v2 = vld [vmem:[%s1857_s1 + $0x14] ss:$8 sps:$4 sm:$0xff]  }
   0x2   :  { %530 = vmatprep.subr.bf16.mxu0 %v1382_v0  ;;  %1350 = vmatprep.subr.bf16.mxu1 %v1382_v0  ;;  %v1387_v3 = vld [vmem:[%s1857_s1 + $0x10] ss:$8 sps:$4 sm:$0xff]   ;;  %v1388_v4 = vld [vmem:[%s1857_s1 + $0x24] ss:$8 sps:$4 sm:$0xff]   ;;  %v1390_v5 = vld [vmem:[%s1857_s1 + $0x20] ss:$8 sps:$4 sm:$0xff]   ;;  %v920_v0 = vlaneseq }
   0x3   :  { %531 = vmatpush1.bf16.msra.mxu0 %v1384_v1  ;;  %1366 = vmatpush1.bf16.msra.mxu1 %v1384_v1  ;;  %v1391_v6 = vld [vmem:[%s1857_s1 + $0x34] ss:$8 sps:$4 sm:$0xff]   ;;  %v1393_v7 = vld [vmem:[%s1857_s1 + $0x30] ss:$8 sps:$4 sm:$0xff]   ;;  %v1394_v8 = vld [vmem:[%s1857_s1 + $0x44] ss:$8 sps:$4 sm:$0xff]  }
   0x4   :  { %532 = vmatprep.subr.bf16.mxu0 %v1385_v2  ;;  %1351 = vmatprep.subr.bf16.mxu1 %v1385_v2  ;;  %v1396_v9 = vld [vmem:[%s1857_s1 + $0x40] ss:$8 sps:$4 sm:$0xff]   ;;  %v1397_v10 = vld [vmem:[%s1857_s1 + $0x54] ss:$8 sps:$4 sm:$0xff]   ;;  %v1399_v11 = vld [vmem:[%s1857_s1 + $0x50] ss:$8 sps:$4 sm:$0xff]  }
   0x5   :  { %v1400_v12 = vld [vmem:[%s1857_s1 + $0x64] ss:$8 sps:$4 sm:$0xff]   ;;  %v1402_v14 = vld [vmem:[%s1857_s1 + $0x60] ss:$8 sps:$4 sm:$0xff]   ;;  %v1403_v16 = vld [vmem:[%s1857_s1 + $0x74] ss:$8 sps:$4 sm:$0xff]  }
   0x6   :  { %v1432_v13 = vld [vmem:[%s1858_s0 + $0x4] ss:$8 sps:$4 sm:$0xff]   ;;  %v1405_v17 = vld [vmem:[%s1857_s1 + $0x70] ss:$8 sps:$4 sm:$0xff]   ;;  %v1408_v19 = vld [vmem:[%s1857_s1 + $0x80] ss:$8 sps:$4 sm:$0xff]  }
   0x7   :  { %533 = vmatpush1.bf16.msra.mxu0 %v1387_v3  ;;  %1367 = vmatpush1.bf16.msra.mxu1 %v1387_v3  ;;  %v1435_v15 = vld [vmem:[%s1858_s0 + $0x84] ss:$8 sps:$4 sm:$0xff]   ;;  %v1409_v20 = vld [vmem:[%s1857_s1 + $0x94] ss:$8 sps:$4 sm:$0xff]   ;;  %v1411_v21 = vld [vmem:[%s1857_s1 + $0x90] ss:$8 sps:$4 sm:$0xff]  }
   0x8   :  { %534 = vmatprep.subr.bf16.mxu0 %v1388_v4  ;;  %1352 = vmatprep.subr.bf16.mxu1 %v1388_v4  ;;  %v1406_v18 = vld [vmem:[%s1857_s1 + $0x84] ss:$8 sps:$4 sm:$0xff]   ;;  %v1414_v23 = vld [vmem:[%s1857_s1 + $0xa0] ss:$8 sps:$4 sm:$0xff]   ;;  %v1415_v24 = vld [vmem:[%s1857_s1 + $0xb4] ss:$8 sps:$4 sm:$0xff]  }
   0x9   :  { %562 = vmatprep.mubr.bf16.mxu0 %v1432_v13  ;;  %642 = vmatprep.mubr.bf16.mxu1 %v1435_v15  ;;  %v1412_v22 = vld [vmem:[%s1857_s1 + $0xa4] ss:$8 sps:$4 sm:$0xff]   ;;  %v1417_v25 = vld [vmem:[%s1857_s1 + $0xb0] ss:$8 sps:$4 sm:$0xff]   ;;  %v1420_v27 = vld [vmem:[%s1857_s1 + $0xc0] ss:$8 sps:$4 sm:$0xff]  }
   0xa   :  { %v1418_v26 = vld [vmem:[%s1857_s1 + $0xc4] ss:$8 sps:$4 sm:$0xff]   ;;  %v1421_v28 = vld [vmem:[%s1857_s1 + $0xd4] ss:$8 sps:$4 sm:$0xff]   ;;  %v1423_v29 = vld [vmem:[%s1857_s1 + $0xd0] ss:$8 sps:$4 sm:$0xff]  }
   0xb   :  { %535 = vmatpush1.bf16.msra.mxu0 %v1390_v5  ;;  %1368 = vmatpush1.bf16.msra.mxu1 %v1390_v5  ;;  %v1424_v30 = vld [vmem:[%s1857_s1 + $0xe4] ss:$8 sps:$4 sm:$0xff]   ;;  %v1426_v31 = vld [vmem:[%s1857_s1 + $0xe0] ss:$8 sps:$4 sm:$0xff]   ;;  %v1427_v32 = vld [vmem:[%s1857_s1 + $0xf4] ss:$8 sps:$4 sm:$0xff]  }
   0xc   :  { %536 = vmatprep.subr.bf16.mxu0 %v1391_v6  ;;  %1353 = vmatprep.subr.bf16.mxu1 %v1391_v6  ;;  %v1429_v33 = vld [vmem:[%s1857_s1 + $0xf0] ss:$8 sps:$4 sm:$0xff]   ;;  %v1430_v34 = vld [vmem:[%s1858_s0] ss:$8 sps:$4 sm:$0xff]   ;;  %v1436_v36 = vld [vmem:[%s1858_s0 + $0x14] ss:$8 sps:$4 sm:$0xff]  }
   0xd   :  { %v1433_v35 = vld [vmem:[%s1858_s0 + $0x80] ss:$8 sps:$4 sm:$0xff]   ;;  %v1438_v37 = vld [vmem:[%s1858_s0 + $0x94] ss:$8 sps:$4 sm:$0xff]   ;;  %v1440_v38 = vld [vmem:[%s1858_s0 + $0x10] ss:$8 sps:$4 sm:$0xff]  }
   0xe   :  { %v1441_v39 = vld [vmem:[%s1858_s0 + $0x90] ss:$8 sps:$4 sm:$0xff]   ;;  %v1442_v40 = vld [vmem:[%s1858_s0 + $0x24] ss:$8 sps:$4 sm:$0xff]   ;;  %v1446_v42 = vld [vmem:[%s1858_s0 + $0x20] ss:$8 sps:$4 sm:$0xff]  }
   0xf   :  { %537 = vmatpush1.bf16.msra.mxu0 %v1393_v7  ;;  %1369 = vmatpush1.bf16.msra.mxu1 %v1393_v7  ;;  %v1444_v41 = vld [vmem:[%s1858_s0 + $0xa4] ss:$8 sps:$4 sm:$0xff]   ;;  %v1447_v43 = vld [vmem:[%s1858_s0 + $0xa0] ss:$8 sps:$4 sm:$0xff]   ;;  %v1448_v44 = vld [vmem:[%s1858_s0 + $0x34] ss:$8 sps:$4 sm:$0xff]  }
  0x10   :  { %538 = vmatprep.subr.bf16.mxu0 %v1394_v8  ;;  %1354 = vmatprep.subr.bf16.mxu1 %v1394_v8  ;;  %v1450_v45 = vld [vmem:[%s1858_s0 + $0xb4] ss:$8 sps:$4 sm:$0xff]   ;;  %v1452_v46 = vld [vmem:[%s1858_s0 + $0x30] ss:$8 sps:$4 sm:$0xff]   ;;  %v1454_v48 = vld [vmem:[%s1858_s0 + $0x44] ss:$8 sps:$4 sm:$0xff]  }
  0x11   :  { %v1453_v47 = vld [vmem:[%s1858_s0 + $0xb0] ss:$8 sps:$4 sm:$0xff]   ;;  %v1456_v49 = vld [vmem:[%s1858_s0 + $0xc4] ss:$8 sps:$4 sm:$0xff]   ;;  %v1458_v50 = vld [vmem:[%s1858_s0 + $0x40] ss:$8 sps:$4 sm:$0xff]  }
  0x12   :  { %v1459_v51 = vld [vmem:[%s1858_s0 + $0xc0] ss:$8 sps:$4 sm:$0xff]   ;;  %v1460_v52 = vld [vmem:[%s1858_s0 + $0x54] ss:$8 sps:$4 sm:$0xff]   ;;  %v1464_v54 = vld [vmem:[%s1858_s0 + $0x50] ss:$8 sps:$4 sm:$0xff]  }
  0x13   :  { %539 = vmatpush1.bf16.msra.mxu0 %v1396_v9  ;;  %1370 = vmatpush1.bf16.msra.mxu1 %v1396_v9  ;;  %v1462_v53 = vld [vmem:[%s1858_s0 + $0xd4] ss:$8 sps:$4 sm:$0xff]   ;;  %v1465_v55 = vld [vmem:[%s1858_s0 + $0xd0] ss:$8 sps:$4 sm:$0xff]   ;;  %v1466_v56 = vld [vmem:[%s1858_s0 + $0x64] ss:$8 sps:$4 sm:$0xff]  }
  0x14   :  { %540 = vmatprep.subr.bf16.mxu0 %v1397_v10  ;;  %1355 = vmatprep.subr.bf16.mxu1 %v1397_v10  ;;  %v1468_v57 = vld [vmem:[%s1858_s0 + $0xe4] ss:$8 sps:$4 sm:$0xff]   ;;  %v1470_v58 = vld [vmem:[%s1858_s0 + $0x60] ss:$8 sps:$4 sm:$0xff]   ;;  %v1472_v60 = vld [vmem:[%s1858_s0 + $0x74] ss:$8 sps:$4 sm:$0xff]  }
  0x15   :  { %v1471_v59 = vld [vmem:[%s1858_s0 + $0xe0] ss:$8 sps:$4 sm:$0xff]   ;;  %v1474_v61 = vld [vmem:[%s1858_s0 + $0xf4] ss:$8 sps:$4 sm:$0xff]   ;;  %v1476_v62 = vld [vmem:[%s1858_s0 + $0x70] ss:$8 sps:$4 sm:$0xff]  }
  0x16   :  { %v1477_v63 = vld [vmem:[%s1858_s0 + $0xf0] ss:$8 sps:$4 sm:$0xff]   ;;  %v921_v1 = vshrl.u32 %v920_v0, 7  ;;  %v918_v3 = vld [vmem:[%s1859_s2] sm:$0x3] }
  0x17   :  { %541 = vmatpush1.bf16.msra.mxu0 %v1399_v11  ;;  %1371 = vmatpush1.bf16.msra.mxu1 %v1399_v11 }
  0x18   :  { %542 = vmatprep.subr.bf16.mxu0 %v1400_v12  ;;  %1356 = vmatprep.subr.bf16.mxu1 %v1400_v12  ;;  %v922_v2 = vsub.s32 0, %v921_v1  ;;  %v926_v4 = vsub.s32 1, %v921_v1 }
  0x1a   :  { %v1693_v5 = vrot.slane %v918_v3, %v922_v2  ;;  %v1695_v6 = vrot.slane %v918_v3, %v926_v4 }
  0x1b   :  { %543 = vmatpush1.bf16.msra.mxu0 %v1402_v14  ;;  %1372 = vmatpush1.bf16.msra.mxu1 %v1402_v14 }
  0x1c   :  { %544 = vmatprep.subr.bf16.mxu0 %v1403_v16  ;;  %1357 = vmatprep.subr.bf16.mxu1 %v1403_v16 }
  0x1f   :  { %545 = vmatpush1.bf16.msra.mxu0 %v1405_v17  ;;  %1373 = vmatpush1.bf16.msra.mxu1 %v1405_v17 }
  0x20   :  { %546 = vmatprep.subr.bf16.mxu0 %v1406_v18  ;;  %1358 = vmatprep.subr.bf16.mxu1 %v1406_v18 }
  0x23   :  { %547 = vmatpush1.bf16.msra.mxu0 %v1408_v19  ;;  %1374 = vmatpush1.bf16.msra.mxu1 %v1408_v19 }
  0x24   :  { %548 = vmatprep.subr.bf16.mxu0 %v1409_v20  ;;  %1359 = vmatprep.subr.bf16.mxu1 %v1409_v20 }
  0x27   :  { %549 = vmatpush1.bf16.msra.mxu0 %v1411_v21  ;;  %1375 = vmatpush1.bf16.msra.mxu1 %v1411_v21 }
  0x28   :  { %550 = vmatprep.subr.bf16.mxu0 %v1412_v22  ;;  %1360 = vmatprep.subr.bf16.mxu1 %v1412_v22 }
  0x2b   :  { %551 = vmatpush1.bf16.msra.mxu0 %v1414_v23  ;;  %1376 = vmatpush1.bf16.msra.mxu1 %v1414_v23 }
  0x2c   :  { %552 = vmatprep.subr.bf16.mxu0 %v1415_v24  ;;  %1361 = vmatprep.subr.bf16.mxu1 %v1415_v24 }
  0x2f   :  { %553 = vmatpush1.bf16.msra.mxu0 %v1417_v25  ;;  %1377 = vmatpush1.bf16.msra.mxu1 %v1417_v25 }
  0x30   :  { %554 = vmatprep.subr.bf16.mxu0 %v1418_v26  ;;  %1362 = vmatprep.subr.bf16.mxu1 %v1418_v26 }
  0x33   :  { %555 = vmatpush1.bf16.msra.mxu0 %v1420_v27  ;;  %1378 = vmatpush1.bf16.msra.mxu1 %v1420_v27 }
  0x34   :  { %556 = vmatprep.subr.bf16.mxu0 %v1421_v28  ;;  %1363 = vmatprep.subr.bf16.mxu1 %v1421_v28 }
  0x37   :  { %557 = vmatpush1.bf16.msra.mxu0 %v1423_v29  ;;  %1379 = vmatpush1.bf16.msra.mxu1 %v1423_v29 }
  0x38   :  { %558 = vmatprep.subr.bf16.mxu0 %v1424_v30  ;;  %1364 = vmatprep.subr.bf16.mxu1 %v1424_v30 }
  0x3b   :  { %559 = vmatpush1.bf16.msra.mxu0 %v1426_v31  ;;  %1380 = vmatpush1.bf16.msra.mxu1 %v1426_v31 }
  0x3c   :  { %560 = vmatprep.subr.bf16.mxu0 %v1427_v32  ;;  %1365 = vmatprep.subr.bf16.mxu1 %v1427_v32 }
  0x3f   :  { %561 = vmatpush1.bf16.msra.mxu0 %v1429_v33  ;;  %1381 = vmatpush1.bf16.msra.mxu1 %v1429_v33 }
  0x42   :  { %563 = vmatmul.mubr.bf16.vlgmr.msra.gmra.mrb[0].mxu0 %v1430_v34  ;;  %643 = vmatmul.mubr.bf16.vlgmr.msra.gmra.mrb[0].mxu1 %v1433_v35 }
  0x43   :  { %572 = vmatprep.mubr.bf16.mxu0 %v1436_v36  ;;  %652 = vmatprep.mubr.bf16.mxu1 %v1438_v37 }
  0x4a   :  { %573 = vmatmul.mubr.bf16.gmra.mrb[4].mxu0 %v1440_v38  ;;  %653 = vmatmul.mubr.bf16.gmra.mrb[4].mxu1 %v1441_v39 }
  0x4b   :  { %582 = vmatprep.mubr.bf16.mxu0 %v1442_v40  ;;  %662 = vmatprep.mubr.bf16.mxu1 %v1444_v41 }
  0x52   :  { %583 = vmatmul.mubr.bf16.gmra.mrb[8].mxu0 %v1446_v42  ;;  %663 = vmatmul.mubr.bf16.gmra.mrb[8].mxu1 %v1447_v43 }
  0x53   :  { %592 = vmatprep.mubr.bf16.mxu0 %v1448_v44  ;;  %672 = vmatprep.mubr.bf16.mxu1 %v1450_v45 }
  0x5a   :  { %593 = vmatmul.mubr.bf16.gmra.mrb[12].mxu0 %v1452_v46  ;;  %673 = vmatmul.mubr.bf16.gmra.mrb[12].mxu1 %v1453_v47 }
  0x5b   :  { %602 = vmatprep.mubr.bf16.mxu0 %v1454_v48  ;;  %682 = vmatprep.mubr.bf16.mxu1 %v1456_v49 }
  0x62   :  { %603 = vmatmul.mubr.bf16.gmra.mrb[16].mxu0 %v1458_v50  ;;  %683 = vmatmul.mubr.bf16.gmra.mrb[16].mxu1 %v1459_v51 }
  0x63   :  { %612 = vmatprep.mubr.bf16.mxu0 %v1460_v52  ;;  %692 = vmatprep.mubr.bf16.mxu1 %v1462_v53 }
  0x6a   :  { %613 = vmatmul.mubr.bf16.gmra.mrb[20].mxu0 %v1464_v54  ;;  %693 = vmatmul.mubr.bf16.gmra.mrb[20].mxu1 %v1465_v55 }
  0x6b   :  { %622 = vmatprep.mubr.bf16.mxu0 %v1466_v56  ;;  %702 = vmatprep.mubr.bf16.mxu1 %v1468_v57 }
  0x72   :  { %623 = vmatmul.mubr.bf16.gmra.mrb[24].mxu0 %v1470_v58  ;;  %703 = vmatmul.mubr.bf16.gmra.mrb[24].mxu1 %v1471_v59 }
  0x73   :  { %632 = vmatprep.mubr.bf16.mxu0 %v1472_v60  ;;  %712 = vmatprep.mubr.bf16.mxu1 %v1474_v61 }
  0x7a   :  { %633 = vmatmul.mubr.bf16.gmra.mrb[28].mxu0 %v1476_v62  ;;  %713 = vmatmul.mubr.bf16.gmra.mrb[28].mxu1 %v1477_v63 }
 0x115   :  { %v564_v7 = vpop.f32.mrb[0].mxu0  ;;  %v644_v8 = vpop.f32.mrb[0].mxu1 }
 0x116   :  { %v930_v9 = vadd.f32 %v1693_v5, %v564_v7  ;;  %v962_v10 = vadd.f32 %v1693_v5, %v644_v8  ;;  %v566_v11 = vpop.f32.mrb[1].mxu0  ;;  %v646_v12 = vpop.f32.mrb[1].mxu1 }
 0x117   :  { %v931_v13 = vadd.f32 %v1695_v6, %v566_v11  ;;  %v963_v14 = vadd.f32 %v1695_v6, %v646_v12  ;;  %v568_v15 = vpop.f32.mrb[2].mxu0  ;;  %v648_v16 = vpop.f32.mrb[2].mxu1 }
 0x118   :  { %v932_v17 = vadd.f32 %v1693_v5, %v568_v15  ;;  %v964_v18 = vadd.f32 %v1693_v5, %v648_v16  ;;  %v570_v19 = vpop.f32.mrb[3].mxu0  ;;  %v650_v20 = vpop.f32.mrb[3].mxu1 }
 0x119   :  { %v1318_v21 = vpack.c.bf16 %v931_v13, %v930_v9  ;;  %v1334_v22 = vpack.c.bf16 %v963_v14, %v962_v10  ;;  %v933_v23 = vadd.f32 %v1695_v6, %v570_v19  ;;  %v965_v24 = vadd.f32 %v1695_v6, %v650_v20 }
 0x11b   :  { %1186 = vst [vmem:[%s1860_s3] sm:$0xff] %v1318_v21  ;;  %1202 = vst [vmem:[%s1860_s3 + $0x80] sm:$0xff] %v1334_v22  ;;  %v1319_v25 = vpack.c.bf16 %v933_v23, %v932_v17  ;;  %v1335_v26 = vpack.c.bf16 %v965_v24, %v964_v18 }
 0x11d   :  { %1187 = vst [vmem:[%s1860_s3 + $0x8] sm:$0xff] %v1319_v25  ;;  %1203 = vst [vmem:[%s1860_s3 + $0x88] sm:$0xff] %v1335_v26  ;;  %v574_v27 = vpop.f32.mrb[4].mxu0  ;;  %v654_v28 = vpop.f32.mrb[4].mxu1 }
 0x11e   :  { %v934_v29 = vadd.f32 %v1693_v5, %v574_v27  ;;  %v966_v30 = vadd.f32 %v1693_v5, %v654_v28  ;;  %v576_v31 = vpop.f32.mrb[5].mxu0  ;;  %v656_v32 = vpop.f32.mrb[5].mxu1 }
 0x11f   :  { %v935_v33 = vadd.f32 %v1695_v6, %v576_v31  ;;  %v967_v34 = vadd.f32 %v1695_v6, %v656_v32  ;;  %v578_v35 = vpop.f32.mrb[6].mxu0  ;;  %v658_v36 = vpop.f32.mrb[6].mxu1 }
 0x120   :  { %v936_v37 = vadd.f32 %v1693_v5, %v578_v35  ;;  %v968_v38 = vadd.f32 %v1693_v5, %v658_v36  ;;  %v580_v39 = vpop.f32.mrb[7].mxu0  ;;  %v660_v40 = vpop.f32.mrb[7].mxu1 }
 0x121   :  { %v1320_v41 = vpack.c.bf16 %v935_v33, %v934_v29  ;;  %v1336_v42 = vpack.c.bf16 %v967_v34, %v966_v30  ;;  %v937_v43 = vadd.f32 %v1695_v6, %v580_v39  ;;  %v969_v44 = vadd.f32 %v1695_v6, %v660_v40 }
 0x123   :  { %1188 = vst [vmem:[%s1860_s3 + $0x10] sm:$0xff] %v1320_v41  ;;  %1204 = vst [vmem:[%s1860_s3 + $0x90] sm:$0xff] %v1336_v42  ;;  %v1321_v45 = vpack.c.bf16 %v937_v43, %v936_v37  ;;  %v1337_v46 = vpack.c.bf16 %v969_v44, %v968_v38 }
 0x125   :  { %1189 = vst [vmem:[%s1860_s3 + $0x18] sm:$0xff] %v1321_v45  ;;  %1205 = vst [vmem:[%s1860_s3 + $0x98] sm:$0xff] %v1337_v46  ;;  %v584_v47 = vpop.f32.mrb[8].mxu0  ;;  %v664_v48 = vpop.f32.mrb[8].mxu1 }
 0x126   :  { %v938_v49 = vadd.f32 %v1693_v5, %v584_v47  ;;  %v970_v50 = vadd.f32 %v1693_v5, %v664_v48  ;;  %v586_v51 = vpop.f32.mrb[9].mxu0  ;;  %v666_v52 = vpop.f32.mrb[9].mxu1 }
 0x127   :  { %v939_v53 = vadd.f32 %v1695_v6, %v586_v51  ;;  %v971_v54 = vadd.f32 %v1695_v6, %v666_v52  ;;  %v588_v55 = vpop.f32.mrb[10].mxu0  ;;  %v668_v56 = vpop.f32.mrb[10].mxu1 }
 0x128   :  { %v940_v57 = vadd.f32 %v1693_v5, %v588_v55  ;;  %v972_v58 = vadd.f32 %v1693_v5, %v668_v56  ;;  %v590_v59 = vpop.f32.mrb[11].mxu0  ;;  %v670_v60 = vpop.f32.mrb[11].mxu1 }
 0x129   :  { %v1322_v61 = vpack.c.bf16 %v939_v53, %v938_v49  ;;  %v1338_v62 = vpack.c.bf16 %v971_v54, %v970_v50  ;;  %v941_v63 = vadd.f32 %v1695_v6, %v590_v59  ;;  %v973_v0 = vadd.f32 %v1695_v6, %v670_v60 }
 0x12b   :  { %1190 = vst [vmem:[%s1860_s3 + $0x20] sm:$0xff] %v1322_v61  ;;  %1206 = vst [vmem:[%s1860_s3 + $0xa0] sm:$0xff] %v1338_v62  ;;  %v1323_v1 = vpack.c.bf16 %v941_v63, %v940_v57  ;;  %v1339_v2 = vpack.c.bf16 %v973_v0, %v972_v58 }
 0x12d   :  { %1191 = vst [vmem:[%s1860_s3 + $0x28] sm:$0xff] %v1323_v1  ;;  %1207 = vst [vmem:[%s1860_s3 + $0xa8] sm:$0xff] %v1339_v2  ;;  %v594_v3 = vpop.f32.mrb[12].mxu0  ;;  %v674_v4 = vpop.f32.mrb[12].mxu1 }
 0x12e   :  { %v942_v7 = vadd.f32 %v1693_v5, %v594_v3  ;;  %v974_v8 = vadd.f32 %v1693_v5, %v674_v4  ;;  %v596_v9 = vpop.f32.mrb[13].mxu0  ;;  %v676_v10 = vpop.f32.mrb[13].mxu1 }
 0x12f   :  { %v943_v11 = vadd.f32 %v1695_v6, %v596_v9  ;;  %v975_v12 = vadd.f32 %v1695_v6, %v676_v10  ;;  %v598_v13 = vpop.f32.mrb[14].mxu0  ;;  %v678_v14 = vpop.f32.mrb[14].mxu1 }
 0x130   :  { %v944_v15 = vadd.f32 %v1693_v5, %v598_v13  ;;  %v976_v16 = vadd.f32 %v1693_v5, %v678_v14  ;;  %v600_v17 = vpop.f32.mrb[15].mxu0  ;;  %v680_v18 = vpop.f32.mrb[15].mxu1 }
 0x131   :  { %v1324_v19 = vpack.c.bf16 %v943_v11, %v942_v7  ;;  %v1340_v20 = vpack.c.bf16 %v975_v12, %v974_v8  ;;  %v945_v21 = vadd.f32 %v1695_v6, %v600_v17  ;;  %v977_v22 = vadd.f32 %v1695_v6, %v680_v18 }
 0x133   :  { %1192 = vst [vmem:[%s1860_s3 + $0x30] sm:$0xff] %v1324_v19  ;;  %1208 = vst [vmem:[%s1860_s3 + $0xb0] sm:$0xff] %v1340_v20  ;;  %v1325_v23 = vpack.c.bf16 %v945_v21, %v944_v15  ;;  %v1341_v24 = vpack.c.bf16 %v977_v22, %v976_v16 }
 0x135   :  { %1193 = vst [vmem:[%s1860_s3 + $0x38] sm:$0xff] %v1325_v23  ;;  %1209 = vst [vmem:[%s1860_s3 + $0xb8] sm:$0xff] %v1341_v24  ;;  %v604_v25 = vpop.f32.mrb[16].mxu0  ;;  %v684_v26 = vpop.f32.mrb[16].mxu1 }
 0x136   :  { %v946_v27 = vadd.f32 %v1693_v5, %v604_v25  ;;  %v978_v28 = vadd.f32 %v1693_v5, %v684_v26  ;;  %v606_v29 = vpop.f32.mrb[17].mxu0  ;;  %v686_v30 = vpop.f32.mrb[17].mxu1 }
 0x137   :  { %v947_v31 = vadd.f32 %v1695_v6, %v606_v29  ;;  %v979_v32 = vadd.f32 %v1695_v6, %v686_v30  ;;  %v608_v33 = vpop.f32.mrb[18].mxu0  ;;  %v688_v34 = vpop.f32.mrb[18].mxu1 }
 0x138   :  { %v948_v35 = vadd.f32 %v1693_v5, %v608_v33  ;;  %v980_v36 = vadd.f32 %v1693_v5, %v688_v34  ;;  %v610_v37 = vpop.f32.mrb[19].mxu0  ;;  %v690_v38 = vpop.f32.mrb[19].mxu1 }
 0x139   :  { %v1326_v39 = vpack.c.bf16 %v947_v31, %v946_v27  ;;  %v1342_v40 = vpack.c.bf16 %v979_v32, %v978_v28  ;;  %v949_v41 = vadd.f32 %v1695_v6, %v610_v37  ;;  %v981_v42 = vadd.f32 %v1695_v6, %v690_v38 }
 0x13b   :  { %1194 = vst [vmem:[%s1860_s3 + $0x40] sm:$0xff] %v1326_v39  ;;  %1210 = vst [vmem:[%s1860_s3 + $0xc0] sm:$0xff] %v1342_v40  ;;  %v1327_v43 = vpack.c.bf16 %v949_v41, %v948_v35  ;;  %v1343_v44 = vpack.c.bf16 %v981_v42, %v980_v36 }
 0x13d   :  { %1195 = vst [vmem:[%s1860_s3 + $0x48] sm:$0xff] %v1327_v43  ;;  %1211 = vst [vmem:[%s1860_s3 + $0xc8] sm:$0xff] %v1343_v44  ;;  %v614_v45 = vpop.f32.mrb[20].mxu0  ;;  %v694_v46 = vpop.f32.mrb[20].mxu1 }
 0x13e   :  { %v950_v47 = vadd.f32 %v1693_v5, %v614_v45  ;;  %v982_v48 = vadd.f32 %v1693_v5, %v694_v46  ;;  %v616_v49 = vpop.f32.mrb[21].mxu0  ;;  %v696_v50 = vpop.f32.mrb[21].mxu1 }
 0x13f   :  { %v951_v51 = vadd.f32 %v1695_v6, %v616_v49  ;;  %v983_v52 = vadd.f32 %v1695_v6, %v696_v50  ;;  %v618_v53 = vpop.f32.mrb[22].mxu0  ;;  %v698_v54 = vpop.f32.mrb[22].mxu1 }
 0x140   :  { %v952_v55 = vadd.f32 %v1693_v5, %v618_v53  ;;  %v984_v56 = vadd.f32 %v1693_v5, %v698_v54  ;;  %v620_v57 = vpop.f32.mrb[23].mxu0  ;;  %v700_v58 = vpop.f32.mrb[23].mxu1 }
 0x141   :  { %v1328_v59 = vpack.c.bf16 %v951_v51, %v950_v47  ;;  %v1344_v60 = vpack.c.bf16 %v983_v52, %v982_v48  ;;  %v953_v61 = vadd.f32 %v1695_v6, %v620_v57  ;;  %v985_v62 = vadd.f32 %v1695_v6, %v700_v58 }
 0x143   :  { %1196 = vst [vmem:[%s1860_s3 + $0x50] sm:$0xff] %v1328_v59  ;;  %1212 = vst [vmem:[%s1860_s3 + $0xd0] sm:$0xff] %v1344_v60  ;;  %v1329_v63 = vpack.c.bf16 %v953_v61, %v952_v55  ;;  %v1345_v0 = vpack.c.bf16 %v985_v62, %v984_v56 }
 0x145   :  { %1197 = vst [vmem:[%s1860_s3 + $0x58] sm:$0xff] %v1329_v63  ;;  %1213 = vst [vmem:[%s1860_s3 + $0xd8] sm:$0xff] %v1345_v0  ;;  %v624_v1 = vpop.f32.mrb[24].mxu0  ;;  %v704_v2 = vpop.f32.mrb[24].mxu1 }
 0x146   :  { %v954_v3 = vadd.f32 %v1693_v5, %v624_v1  ;;  %v986_v4 = vadd.f32 %v1693_v5, %v704_v2  ;;  %v626_v7 = vpop.f32.mrb[25].mxu0  ;;  %v706_v8 = vpop.f32.mrb[25].mxu1 }
 0x147   :  { %v955_v9 = vadd.f32 %v1695_v6, %v626_v7  ;;  %v987_v10 = vadd.f32 %v1695_v6, %v706_v8  ;;  %v628_v11 = vpop.f32.mrb[26].mxu0  ;;  %v708_v12 = vpop.f32.mrb[26].mxu1 }
 0x148   :  { %v956_v13 = vadd.f32 %v1693_v5, %v628_v11  ;;  %v988_v14 = vadd.f32 %v1693_v5, %v708_v12  ;;  %v630_v15 = vpop.f32.mrb[27].mxu0  ;;  %v710_v16 = vpop.f32.mrb[27].mxu1 }
 0x149   :  { %v1330_v17 = vpack.c.bf16 %v955_v9, %v954_v3  ;;  %v1346_v18 = vpack.c.bf16 %v987_v10, %v986_v4  ;;  %v957_v19 = vadd.f32 %v1695_v6, %v630_v15  ;;  %v989_v20 = vadd.f32 %v1695_v6, %v710_v16 }
 0x14b   :  { %1198 = vst [vmem:[%s1860_s3 + $0x60] sm:$0xff] %v1330_v17  ;;  %1214 = vst [vmem:[%s1860_s3 + $0xe0] sm:$0xff] %v1346_v18  ;;  %v1331_v21 = vpack.c.bf16 %v957_v19, %v956_v13  ;;  %v1347_v22 = vpack.c.bf16 %v989_v20, %v988_v14 }
 0x14d   :  { %1199 = vst [vmem:[%s1860_s3 + $0x68] sm:$0xff] %v1331_v21  ;;  %1215 = vst [vmem:[%s1860_s3 + $0xe8] sm:$0xff] %v1347_v22  ;;  %v634_v23 = vpop.f32.mrb[28].mxu0  ;;  %v714_v24 = vpop.f32.mrb[28].mxu1 }
 0x14e   :  { %v958_v25 = vadd.f32 %v1693_v5, %v634_v23  ;;  %v990_v26 = vadd.f32 %v1693_v5, %v714_v24  ;;  %v636_v27 = vpop.f32.mrb[29].mxu0  ;;  %v716_v28 = vpop.f32.mrb[29].mxu1 }
 0x14f   :  { %v959_v29 = vadd.f32 %v1695_v6, %v636_v27  ;;  %v991_v30 = vadd.f32 %v1695_v6, %v716_v28  ;;  %v638_v31 = vpop.f32.mrb[30].mxu0  ;;  %v718_v32 = vpop.f32.mrb[30].mxu1 }
 0x150   :  { %v960_v33 = vadd.f32 %v1693_v5, %v638_v31  ;;  %v992_v34 = vadd.f32 %v1693_v5, %v718_v32  ;;  %v640_v35 = vpop.f32.mrb[31].mxu0  ;;  %v720_v36 = vpop.f32.mrb[31].mxu1 }
 0x151   :  { %v1332_v37 = vpack.c.bf16 %v959_v29, %v958_v25  ;;  %v1348_v38 = vpack.c.bf16 %v991_v30, %v990_v26  ;;  %v961_v39 = vadd.f32 %v1695_v6, %v640_v35  ;;  %v993_v40 = vadd.f32 %v1695_v6, %v720_v36 }
 0x153   :  { %1200 = vst [vmem:[%s1860_s3 + $0x70] sm:$0xff] %v1332_v37  ;;  %1216 = vst [vmem:[%s1860_s3 + $0xf0] sm:$0xff] %v1348_v38  ;;  %v1333_v41 = vpack.c.bf16 %v961_v39, %v960_v33  ;;  %v1349_v42 = vpack.c.bf16 %v993_v40, %v992_v34 }
 0x155   :  { %1201 = vst [vmem:[%s1860_s3 + $0x78] sm:$0xff] %v1333_v41  ;;  %1217 = vst [vmem:[%s1860_s3 + $0xf8] sm:$0xff] %v1349_v42 }

// kernel: pretrained_encoder_with_head.18
= control target key start
LH: loop header
LB: loop body
LE: loop exit
PB: predicated region body
PF: predicated region fallthrough
CT: control target
= control target key end

     0   :  { %s2337_s0 = inlined_call_operand.vmem [shape: bf16[256,256], index: 0, kind: input, shape index: {}]   ;;  %s2338_s1 = inlined_call_operand.vmem [shape: bf16[256,256], index: 1, kind: input, shape index: {}]   ;;  %s2339_s2 = inlined_call_operand.vmem [shape: f32[1,256], index: 2, kind: input, shape index: {}]   ;;  %s2340_s3 = inlined_call_operand.vmem [shape: f32[1,256], index: 3, kind: input, shape index: {}]   ;;  %s2341_s4 = inlined_call_operand.vmem [shape: bf16[256,256], index: 4, kind: output, shape index: {}]  }
   0x1   :  { %v17_v0 = vld [vmem:[%s2337_s0] sm:$0xff]  ;;  %v19_v2 = vld [vmem:[%s2337_s0 + $0x10] sm:$0xff]  ;;  %v18_v8 = vld [vmem:[%s2337_s0 + $0x8] sm:$0xff] }
   0x2   :  { %v113_v1 = vld [vmem:[%s2338_s1] sm:$0xff]  ;;  %v49_v3 = vunpack.c.l.bf16 %v17_v0  ;;  %v50_v4 = vunpack.c.h.bf16 %v17_v0  ;;  %v115_v7 = vld [vmem:[%s2338_s1 + $0x10] sm:$0xff]  ;;  %v114_v9 = vld [vmem:[%s2338_s1 + $0x8] sm:$0xff]  ;;  %v53_v10 = vunpack.c.l.bf16 %v19_v2  ;;  %v54_v11 = vunpack.c.h.bf16 %v19_v2 }
   0x3   :  { %v145_v5 = vunpack.c.l.bf16 %v113_v1  ;;  %v146_v6 = vunpack.c.h.bf16 %v113_v1  ;;  %v149_v12 = vunpack.c.l.bf16 %v115_v7  ;;  %v150_v13 = vunpack.c.h.bf16 %v115_v7  ;;  %v20_v14 = vld [vmem:[%s2337_s0 + $0x18] sm:$0xff]  ;;  %v21_v24 = vld [vmem:[%s2337_s0 + $0x20] sm:$0xff]  ;;  %v22_v30 = vld [vmem:[%s2337_s0 + $0x28] sm:$0xff] }
   0x4   :  { %v116_v15 = vld [vmem:[%s2338_s1 + $0x18] sm:$0xff]  ;;  %v51_v18 = vunpack.c.l.bf16 %v18_v8  ;;  %v52_v19 = vunpack.c.h.bf16 %v18_v8  ;;  %v147_v22 = vunpack.c.l.bf16 %v114_v9  ;;  %v148_v23 = vunpack.c.h.bf16 %v114_v9  ;;  %v117_v25 = vld [vmem:[%s2338_s1 + $0x20] sm:$0xff]  ;;  %v118_v35 = vld [vmem:[%s2338_s1 + $0x28] sm:$0xff] }
   0x5   :  { %v1343_v16 = vadd.f32 %v145_v5, %v49_v3  ;;  %v1345_v17 = vadd.f32 %v146_v6, %v50_v4  ;;  %v1347_v20 = vadd.f32 %v149_v12, %v53_v10  ;;  %v1349_v21 = vadd.f32 %v150_v13, %v54_v11  ;;  %v23_v40 = vld [vmem:[%s2337_s0 + $0x30] sm:$0xff]  ;;  %v24_v50 = vld [vmem:[%s2337_s0 + $0x38] sm:$0xff]  ;;  %v25_v60 = vld [vmem:[%s2337_s0 + $0x40] sm:$0xff] }
   0x6   :  { %v55_v27 = vunpack.c.l.bf16 %v20_v14  ;;  %v56_v28 = vunpack.c.h.bf16 %v20_v14  ;;  %v151_v29 = vunpack.c.l.bf16 %v116_v15  ;;  %v1364_v32 = vadd.f32 %v147_v22, %v51_v18  ;;  %v119_v45 = vld [vmem:[%s2338_s1 + $0x30] sm:$0xff]  ;;  %v120_v51 = vld [vmem:[%s2338_s1 + $0x38] sm:$0xff]  ;;  %v121_v61 = vld [vmem:[%s2338_s1 + $0x40] sm:$0xff] }
   0x7   :  { %v273_v26 = vadd.f32 %v1345_v17, %v1343_v16  ;;  %v279_v31 = vadd.f32 %v1349_v21, %v1347_v20  ;;  %v1366_v33 = vadd.f32 %v148_v23, %v52_v19  ;;  %v152_v34 = vunpack.c.h.bf16 %v116_v15  ;;  %v26_v2 = vld [vmem:[%s2337_s0 + $0x48] sm:$0xff]  ;;  %v27_v12 = vld [vmem:[%s2337_s0 + $0x50] sm:$0xff] }
   0x8   :  { %v1371_v36 = vadd.f32 %v151_v29, %v55_v27  ;;  %v57_v37 = vunpack.c.l.bf16 %v21_v24  ;;  %v58_v38 = vunpack.c.h.bf16 %v21_v24  ;;  %v153_v39 = vunpack.c.l.bf16 %v117_v25  ;;  %v122_v7 = vld [vmem:[%s2338_s1 + $0x48] sm:$0xff]  ;;  %v123_v19 = vld [vmem:[%s2338_s1 + $0x50] sm:$0xff]  ;;  %v124_v27 = vld [vmem:[%s2338_s1 + $0x58] sm:$0xff] }
   0x9   :  { %274 = vadd.xlane.f32.xlu0 %v273_v26  ;;  %280 = vadd.xlane.f32.xlu1 %v279_v31  ;;  %v276_v41 = vadd.f32 %v1366_v33, %v1364_v32  ;;  %v1378_v42 = vadd.f32 %v152_v34, %v56_v28  ;;  %v154_v43 = vunpack.c.h.bf16 %v117_v25  ;;  %v59_v44 = vunpack.c.l.bf16 %v22_v30  ;;  %v28_v26 = vld [vmem:[%s2337_s0 + $0x58] sm:$0xff] }
   0xa   :  { %v1383_v46 = vadd.f32 %v153_v39, %v57_v37  ;;  %v60_v47 = vunpack.c.h.bf16 %v22_v30  ;;  %v155_v48 = vunpack.c.l.bf16 %v118_v35  ;;  %v156_v49 = vunpack.c.h.bf16 %v118_v35  ;;  %v29_v39 = vld [vmem:[%s2337_s0 + $0x60] sm:$0xff] }
   0xb   :  { %v282_v52 = vadd.f32 %v1378_v42, %v1371_v36  ;;  %v1393_v53 = vadd.f32 %v154_v43, %v58_v38  ;;  %v61_v54 = vunpack.c.l.bf16 %v23_v40  ;;  %v62_v55 = vunpack.c.h.bf16 %v23_v40  ;;  %v125_v40 = vld [vmem:[%s2338_s1 + $0x60] sm:$0xff] }
   0xc   :  { %v1395_v56 = vadd.f32 %v155_v48, %v59_v44  ;;  %v1397_v57 = vadd.f32 %v156_v49, %v60_v47  ;;  %v157_v58 = vunpack.c.l.bf16 %v119_v45  ;;  %v158_v59 = vunpack.c.h.bf16 %v119_v45  ;;  %v30_v47 = vld [vmem:[%s2337_s0 + $0x68] sm:$0xff] }
   0xd   :  { %277 = vadd.xlane.f32.xlu0 %v276_v41  ;;  %283 = vadd.xlane.f32.xlu1 %v282_v52  ;;  %v285_v62 = vadd.f32 %v1393_v53, %v1383_v46  ;;  %v63_v63 = vunpack.c.l.bf16 %v24_v50  ;;  %v64_v0 = vunpack.c.h.bf16 %v24_v50  ;;  %v159_v1 = vunpack.c.l.bf16 %v120_v51  ;;  %v126_v52 = vld [vmem:[%s2338_s1 + $0x68] sm:$0xff] }
   0xe   :  { %v288_v3 = vadd.f32 %v1397_v57, %v1395_v56  ;;  %v1412_v4 = vadd.f32 %v157_v58, %v61_v54  ;;  %v1414_v5 = vadd.f32 %v158_v59, %v62_v55  ;;  %v160_v6 = vunpack.c.h.bf16 %v120_v51 }
   0xf   :  { %v1419_v8 = vadd.f32 %v159_v1, %v63_v63  ;;  %v65_v9 = vunpack.c.l.bf16 %v25_v60  ;;  %v66_v10 = vunpack.c.h.bf16 %v25_v60  ;;  %v161_v11 = vunpack.c.l.bf16 %v121_v61  ;;  %v31_v60 = vld [vmem:[%s2337_s0 + $0x70] sm:$0xff] }
  0x10   :  { %v291_v13 = vadd.f32 %v1414_v5, %v1412_v4  ;;  %v1426_v14 = vadd.f32 %v160_v6, %v64_v0  ;;  %v162_v15 = vunpack.c.h.bf16 %v121_v61  ;;  %v67_v18 = vunpack.c.l.bf16 %v26_v2  ;;  %v127_v1 = vld [vmem:[%s2338_s1 + $0x70] sm:$0xff] }
  0x11   :  { %286 = vadd.xlane.f32.xlu0 %v285_v62  ;;  %289 = vadd.xlane.f32.xlu1 %v288_v3  ;;  %v1431_v22 = vadd.f32 %v161_v11, %v65_v9  ;;  %v68_v23 = vunpack.c.h.bf16 %v26_v2  ;;  %v163_v24 = vunpack.c.l.bf16 %v122_v7  ;;  %v164_v25 = vunpack.c.h.bf16 %v122_v7  ;;  %v32_v9 = vld [vmem:[%s2337_s0 + $0x78] sm:$0xff] }
  0x12   :  { %v294_v28 = vadd.f32 %v1426_v14, %v1419_v8  ;;  %v1441_v29 = vadd.f32 %v162_v15, %v66_v10  ;;  %v69_v30 = vunpack.c.l.bf16 %v27_v12  ;;  %v70_v31 = vunpack.c.h.bf16 %v27_v12  ;;  %v128_v10 = vld [vmem:[%s2338_s1 + $0x78] sm:$0xff] }
  0x13   :  { %v1443_v34 = vadd.f32 %v163_v24, %v67_v18  ;;  %v1445_v35 = vadd.f32 %v164_v25, %v68_v23  ;;  %v165_v37 = vunpack.c.l.bf16 %v123_v19  ;;  %v166_v38 = vunpack.c.h.bf16 %v123_v19  ;;  %v33_v25 = vld [vmem:[%s2337_s0 + $0x80] sm:$0xff] }
  0x14   :  { %v297_v41 = vadd.f32 %v1441_v29, %v1431_v22  ;;  %v71_v43 = vunpack.c.l.bf16 %v28_v26  ;;  %v72_v44 = vunpack.c.h.bf16 %v28_v26  ;;  %v167_v45 = vunpack.c.l.bf16 %v124_v27  ;;  %v129_v26 = vld [vmem:[%s2338_s1 + $0x80] sm:$0xff] }
  0x15   :  { %292 = vadd.xlane.f32.xlu0 %v291_v13  ;;  %295 = vadd.xlane.f32.xlu1 %v294_v28  ;;  %v300_v48 = vadd.f32 %v1445_v35, %v1443_v34  ;;  %v1460_v49 = vadd.f32 %v165_v37, %v69_v30  ;;  %v1462_v50 = vadd.f32 %v166_v38, %v70_v31  ;;  %v168_v51 = vunpack.c.h.bf16 %v124_v27  ;;  %v34_v37 = vld [vmem:[%s2337_s0 + $0x88] sm:$0xff] }
  0x16   :  { %v1467_v54 = vadd.f32 %v167_v45, %v71_v43  ;;  %v73_v55 = vunpack.c.l.bf16 %v29_v39  ;;  %v74_v58 = vunpack.c.h.bf16 %v29_v39  ;;  %v169_v59 = vunpack.c.l.bf16 %v125_v40  ;;  %v130_v43 = vld [vmem:[%s2338_s1 + $0x88] sm:$0xff] }
  0x17   :  { %v303_v61 = vadd.f32 %v1462_v50, %v1460_v49  ;;  %v1474_v62 = vadd.f32 %v168_v51, %v72_v44  ;;  %v170_v63 = vunpack.c.h.bf16 %v125_v40  ;;  %v75_v0 = vunpack.c.l.bf16 %v30_v47  ;;  %v35_v51 = vld [vmem:[%s2337_s0 + $0x90] sm:$0xff] }
  0x18   :  { %v1479_v2 = vadd.f32 %v169_v59, %v73_v55  ;;  %v76_v3 = vunpack.c.h.bf16 %v30_v47  ;;  %v171_v6 = vunpack.c.l.bf16 %v126_v52  ;;  %v172_v7 = vunpack.c.h.bf16 %v126_v52 }
  0x19   :  { %298 = vadd.xlane.f32.xlu0 %v297_v41  ;;  %301 = vadd.xlane.f32.xlu1 %v300_v48  ;;  %v306_v11 = vadd.f32 %v1474_v62, %v1467_v54  ;;  %v1489_v12 = vadd.f32 %v170_v63, %v74_v58  ;;  %v77_v13 = vunpack.c.l.bf16 %v31_v60  ;;  %v78_v15 = vunpack.c.h.bf16 %v31_v60  ;;  %v131_v60 = vld [vmem:[%s2338_s1 + $0x90] sm:$0xff] }
  0x1a   :  { %v1491_v18 = vadd.f32 %v171_v6, %v75_v0  ;;  %v1493_v19 = vadd.f32 %v172_v7, %v76_v3  ;;  %v173_v23 = vunpack.c.l.bf16 %v127_v1  ;;  %v174_v24 = vunpack.c.h.bf16 %v127_v1  ;;  %v36_v3 = vld [vmem:[%s2337_s0 + $0x98] sm:$0xff] }
  0x1b   :  { %v309_v27 = vadd.f32 %v1489_v12, %v1479_v2  ;;  %v79_v28 = vunpack.c.l.bf16 %v32_v9  ;;  %v80_v30 = vunpack.c.h.bf16 %v32_v9  ;;  %v175_v31 = vunpack.c.l.bf16 %v128_v10  ;;  %v132_v6 = vld [vmem:[%s2338_s1 + $0x98] sm:$0xff] }
  0x1c   :  { %v312_v38 = vadd.f32 %v1493_v19, %v1491_v18  ;;  %v1508_v39 = vadd.f32 %v173_v23, %v77_v13  ;;  %v1510_v40 = vadd.f32 %v174_v24, %v78_v15  ;;  %v176_v41 = vunpack.c.h.bf16 %v128_v10 }
  0x1d   :  { %304 = vadd.xlane.f32.xlu0 %v303_v61  ;;  %307 = vadd.xlane.f32.xlu1 %v306_v11  ;;  %v1515_v44 = vadd.f32 %v175_v31, %v79_v28  ;;  %v81_v45 = vunpack.c.l.bf16 %v33_v25  ;;  %v82_v47 = vunpack.c.h.bf16 %v33_v25  ;;  %v177_v48 = vunpack.c.l.bf16 %v129_v26  ;;  %v37_v25 = vld [vmem:[%s2337_s0 + $0xa0] sm:$0xff]  ;;  %v38_v31 = vld [vmem:[%s2337_s0 + $0xa8] sm:$0xff] }
  0x1e   :  { %v315_v52 = vadd.f32 %v1510_v40, %v1508_v39  ;;  %v1522_v55 = vadd.f32 %v176_v41, %v80_v30  ;;  %v178_v58 = vunpack.c.h.bf16 %v129_v26  ;;  %v83_v59 = vunpack.c.l.bf16 %v34_v37  ;;  %v133_v26 = vld [vmem:[%s2338_s1 + $0xa0] sm:$0xff] }
  0x1f   :  { %v1527_v61 = vadd.f32 %v177_v48, %v81_v45  ;;  %v84_v63 = vunpack.c.h.bf16 %v34_v37  ;;  %v179_v0 = vunpack.c.l.bf16 %v130_v43  ;;  %v180_v1 = vunpack.c.h.bf16 %v130_v43  ;;  %v134_v45 = vld [vmem:[%s2338_s1 + $0xa8] sm:$0xff] }
  0x20   :  { %v318_v7 = vadd.f32 %v1522_v55, %v1515_v44  ;;  %v1537_v9 = vadd.f32 %v178_v58, %v82_v47  ;;  %v85_v10 = vunpack.c.l.bf16 %v35_v51  ;;  %v86_v11 = vunpack.c.h.bf16 %v35_v51 }
  0x21   :  { %310 = vadd.xlane.f32.xlu0 %v309_v27  ;;  %313 = vadd.xlane.f32.xlu1 %v312_v38  ;;  %v1539_v13 = vadd.f32 %v179_v0, %v83_v59  ;;  %v1541_v15 = vadd.f32 %v180_v1, %v84_v63  ;;  %v181_v23 = vunpack.c.l.bf16 %v131_v60  ;;  %v182_v24 = vunpack.c.h.bf16 %v131_v60  ;;  %v39_v59 = vld [vmem:[%s2337_s0 + $0xb0] sm:$0xff] }
  0x22   :  { %v87_v27 = vunpack.c.l.bf16 %v36_v3  ;;  %v88_v28 = vunpack.c.h.bf16 %v36_v3  ;;  %v183_v30 = vunpack.c.l.bf16 %v132_v6  ;;  %v321_v37 = vadd.f32 %v1537_v9, %v1527_v61 }
  0x23   :  { %2382 = vst [vmem:[#allocation2_spill] sm:$0xff] %v1541_v15  ;;  %v1554_v38 = vadd.f32 %v181_v23, %v85_v10  ;;  %v1556_v41 = vadd.f32 %v182_v24, %v86_v11  ;;  %v184_v43 = vunpack.c.h.bf16 %v132_v6  ;;  %v324_v47 = vadd.f32 %v1541_v15, %v1539_v13  ;;  %v40_v23 = vld [vmem:[%s2337_s0 + $0xb8] sm:$0xff] }
  0x24   :  { %v89_v48 = vunpack.c.l.bf16 %v37_v25  ;;  %v90_v51 = vunpack.c.h.bf16 %v37_v25  ;;  %v185_v58 = vunpack.c.l.bf16 %v133_v26  ;;  %v1566_v60 = vadd.f32 %v183_v30, %v87_v27 }
  0x25   :  { %2383 = vst [vmem:[#allocation3_spill] sm:$0xff] %v1554_v38  ;;  %2384 = vst [vmem:[#allocation4_spill] sm:$0xff] %v1556_v41  ;;  %316 = vadd.xlane.f32.xlu0 %v315_v52  ;;  %319 = vadd.xlane.f32.xlu1 %v318_v7  ;;  %v1568_v63 = vadd.f32 %v184_v43, %v88_v28  ;;  %v186_v0 = vunpack.c.h.bf16 %v133_v26  ;;  %v91_v1 = vunpack.c.l.bf16 %v38_v31  ;;  %v135_v52 = vld [vmem:[%s2338_s1 + $0xb0] sm:$0xff]  ;;  %v92_v6 = vunpack.c.h.bf16 %v38_v31  ;;  %v136_v7 = vld [vmem:[%s2338_s1 + $0xb8] sm:$0xff] }
  0x26   :  { %2385 = vst [vmem:[#allocation5_spill] sm:$0xff] %v1566_v60  ;;  %v1573_v3 = vadd.f32 %v185_v58, %v89_v48  ;;  %v187_v10 = vunpack.c.l.bf16 %v134_v45  ;;  %v188_v11 = vunpack.c.h.bf16 %v134_v45  ;;  %v327_v24 = vadd.f32 %v1556_v41, %v1554_v38  ;;  %v41_v45 = vld [vmem:[%s2337_s0 + $0xc0] sm:$0xff]  ;;  %v43_v41 = vld [vmem:[%s2337_s0 + $0xd0] sm:$0xff]  ;;  %v46_v38 = vld [vmem:[%s2337_s0 + $0xe8] sm:$0xff] }
  0x27   :  { %2386 = vst [vmem:[#allocation6_spill] sm:$0xff] %v1568_v63  ;;  %v1583_v25 = vadd.f32 %v186_v0, %v90_v51  ;;  %v93_v26 = vunpack.c.l.bf16 %v39_v59  ;;  %v94_v27 = vunpack.c.h.bf16 %v39_v59  ;;  %v189_v31 = vunpack.c.l.bf16 %v135_v52  ;;  %v137_v48 = vld [vmem:[%s2338_s1 + $0xc0] sm:$0xff]  ;;  %v42_v0 = vld [vmem:[%s2337_s0 + $0xc8] sm:$0xff] }
  0x28   :  { %2387 = vst [vmem:[#allocation7_spill] sm:$0xff] %v1573_v3  ;;  %v1585_v28 = vadd.f32 %v187_v10, %v91_v1  ;;  %v1587_v30 = vadd.f32 %v188_v11, %v92_v6  ;;  %v190_v43 = vunpack.c.h.bf16 %v135_v52  ;;  %v330_v51 = vadd.f32 %v1568_v63, %v1566_v60 }
  0x29   :  { %2388 = vst [vmem:[#allocation8_spill] sm:$0xff] %v1583_v25  ;;  %322 = vadd.xlane.f32.xlu0 %v321_v37  ;;  %325 = vadd.xlane.f32.xlu1 %v324_v47  ;;  %v95_v58 = vunpack.c.l.bf16 %v40_v23  ;;  %v96_v37 = vunpack.c.h.bf16 %v40_v23  ;;  %v191_v59 = vunpack.c.l.bf16 %v136_v7  ;;  %v333_v1 = vadd.f32 %v1583_v25, %v1573_v3  ;;  %v138_v47 = vld [vmem:[%s2338_s1 + $0xc8] sm:$0xff] }
  0x2a   :  { %2389 = vst [vmem:[#allocation9_spill] sm:$0xff] %v1585_v28  ;;  %2390 = vst [vmem:[#allocation10_spill] sm:$0xff] %v1587_v30  ;;  %v336_v52 = vadd.f32 %v1587_v30, %v1585_v28  ;;  %v1604_v6 = vadd.f32 %v189_v31, %v93_v26  ;;  %v192_v10 = vunpack.c.h.bf16 %v136_v7  ;;  %v1609_v11 = vadd.f32 %v190_v43, %v94_v27  ;;  %v139_v31 = vld [vmem:[%s2338_s1 + $0xd0] sm:$0xff] }
  0x2b   :  { %v97_v23 = vunpack.c.l.bf16 %v41_v45  ;;  %v98_v63 = vunpack.c.h.bf16 %v41_v45  ;;  %v193_v60 = vunpack.c.l.bf16 %v137_v48  ;;  %v1614_v25 = vadd.f32 %v191_v59, %v95_v58  ;;  %v140_v58 = vld [vmem:[%s2338_s1 + $0xd8] sm:$0xff] }
  0x2c   :  { %2391 = vst [vmem:[#allocation11_spill] sm:$0xff] %v1604_v6  ;;  %2392 = vst [vmem:[#allocation12_spill] sm:$0xff] %v1609_v11  ;;  %v1616_v30 = vadd.f32 %v192_v10, %v96_v37  ;;  %v194_v26 = vunpack.c.h.bf16 %v137_v48  ;;  %v99_v7 = vunpack.c.l.bf16 %v42_v0  ;;  %v100_v43 = vunpack.c.h.bf16 %v42_v0  ;;  %v45_v0 = vld [vmem:[%s2337_s0 + $0xe0] sm:$0xff] }
  0x2d   :  { %328 = vadd.xlane.f32.xlu0 %v327_v24  ;;  %2393 = vst [vmem:[#allocation13_spill] sm:$0xff] %v1614_v25  ;;  %331 = vadd.xlane.f32.xlu1 %v330_v51  ;;  %v1621_v27 = vadd.f32 %v193_v60, %v97_v23  ;;  %v195_v45 = vunpack.c.l.bf16 %v138_v47  ;;  %v196_v28 = vunpack.c.h.bf16 %v138_v47  ;;  %v44_v24 = vld [vmem:[%s2337_s0 + $0xd8] sm:$0xff]  ;;  %v101_v37 = vunpack.c.l.bf16 %v43_v41  ;;  %v141_v47 = vld [vmem:[%s2338_s1 + $0xe0] sm:$0xff] }
  0x2e   :  { %2394 = vst [vmem:[#allocation14_spill] sm:$0xff] %v1616_v30  ;;  %v1629_v48 = vadd.f32 %v194_v26, %v98_v63  ;;  %v102_v59 = vunpack.c.h.bf16 %v43_v41  ;;  %v339_v51 = vadd.f32 %v1609_v11, %v1604_v6  ;;  %v197_v60 = vunpack.c.l.bf16 %v139_v31 }
  0x2f   :  { %2395 = vst [vmem:[#allocation15_spill] sm:$0xff] %v1621_v27  ;;  %v198_v10 = vunpack.c.h.bf16 %v139_v31  ;;  %v342_v63 = vadd.f32 %v1616_v30, %v1614_v25  ;;  %v103_v23 = vunpack.c.l.bf16 %v44_v24  ;;  %v104_v26 = vunpack.c.h.bf16 %v44_v24 }
  0x30   :  { %2396 = vst [vmem:[#allocation16_spill] sm:$0xff] %v1629_v48  ;;  %v199_v41 = vunpack.c.l.bf16 %v140_v58  ;;  %v345_v11 = vadd.f32 %v1629_v48, %v1621_v27  ;;  %v1643_v31 = vadd.f32 %v195_v45, %v99_v7  ;;  %v1645_v6 = vadd.f32 %v196_v28, %v100_v43 }
  0x31   :  { %334 = vadd.xlane.f32.xlu0 %v333_v1  ;;  %337 = vadd.xlane.f32.xlu1 %v336_v52  ;;  %v200_v3 = vunpack.c.h.bf16 %v140_v58  ;;  %v142_v1 = vld [vmem:[%s2338_s1 + $0xe8] sm:$0xff]  ;;  %v1653_v30 = vadd.f32 %v197_v60, %v101_v37  ;;  %v1655_v24 = vadd.f32 %v198_v10, %v102_v59  ;;  %v105_v52 = vunpack.c.l.bf16 %v45_v0  ;;  %v47_v37 = vld [vmem:[%s2337_s0 + $0xf0] sm:$0xff]  ;;  %v144_v10 = vld [vmem:[%s2338_s1 + $0xf8] sm:$0xff] }
  0x32   :  { %2397 = vst [vmem:[#allocation17_spill] sm:$0xff] %v1645_v6  ;;  %v201_v25 = vunpack.c.l.bf16 %v141_v47  ;;  %v1657_v48 = vadd.f32 %v199_v41, %v103_v23  ;;  %v106_v28 = vunpack.c.h.bf16 %v45_v0  ;;  %v202_v43 = vunpack.c.h.bf16 %v141_v47 }
  0x33   :  { %2398 = vst [vmem:[#allocation18_spill] sm:$0xff] %v1653_v30  ;;  %2399 = vst [vmem:[#allocation19_spill] sm:$0xff] %v1655_v24  ;;  %v1659_v7 = vadd.f32 %v200_v3, %v104_v26  ;;  %v107_v45 = vunpack.c.l.bf16 %v46_v38  ;;  %v108_v58 = vunpack.c.h.bf16 %v46_v38  ;;  %v203_v27 = vunpack.c.l.bf16 %v142_v1  ;;  %v143_v3 = vld [vmem:[%s2338_s1 + $0xf0] sm:$0xff]  ;;  %v48_v38 = vld [vmem:[%s2337_s0 + $0xf8] sm:$0xff] }
  0x34   :  { %v204_v15 = vunpack.c.h.bf16 %v142_v1  ;;  %v348_v59 = vadd.f32 %v1645_v6, %v1643_v31  ;;  %v351_v60 = vadd.f32 %v1655_v24, %v1653_v30  ;;  %v1681_v47 = vadd.f32 %v202_v43, %v106_v28 }
  0x35   :  { %2400 = vst [vmem:[#allocation20_spill] sm:$0xff] %v1659_v7  ;;  %340 = vadd.xlane.f32.xlu0 %v339_v51  ;;  %343 = vadd.xlane.f32.xlu1 %v342_v63  ;;  %v1671_v51 = vadd.f32 %v201_v25, %v105_v52  ;;  %v354_v0 = vadd.f32 %v1659_v7, %v1657_v48  ;;  %v109_v63 = vunpack.c.l.bf16 %v47_v37  ;;  %v110_v23 = vunpack.c.h.bf16 %v47_v37 }
  0x36   :  { %v1683_v26 = vadd.f32 %v203_v27, %v107_v45  ;;  %v1685_v25 = vadd.f32 %v204_v15, %v108_v58  ;;  %v205_v41 = vunpack.c.l.bf16 %v143_v3  ;;  %v206_v1 = vunpack.c.h.bf16 %v143_v3 }
  0x37   :  { %v111_v52 = vunpack.c.l.bf16 %v48_v38  ;;  %v112_v24 = vunpack.c.h.bf16 %v48_v38  ;;  %v207_v30 = vunpack.c.l.bf16 %v144_v10  ;;  %v208_v6 = vunpack.c.h.bf16 %v144_v10 }
  0x38   :  { %v357_v7 = vadd.f32 %v1681_v47, %v1671_v51  ;;  %v1689_v28 = vadd.f32 %v205_v41, %v109_v63  ;;  %v1691_v43 = vadd.f32 %v206_v1, %v110_v23  ;;  %v360_v15 = vadd.f32 %v1685_v25, %v1683_v26 }
  0x39   :  { %346 = vadd.xlane.f32.xlu0 %v345_v11  ;;  %349 = vadd.xlane.f32.xlu1 %v348_v59  ;;  %v1695_v11 = vadd.f32 %v207_v30, %v111_v52  ;;  %v1697_v27 = vadd.f32 %v208_v6, %v112_v24 }
  0x3a   :  { %v363_v45 = vadd.f32 %v1691_v43, %v1689_v28 }
  0x3b   :  { %v366_v58 = vadd.f32 %v1697_v27, %v1695_v11 }
  0x3d   :  { %352 = vadd.xlane.f32.xlu0 %v351_v60  ;;  %355 = vadd.xlane.f32.xlu1 %v354_v0 }
  0x41   :  { %358 = vadd.xlane.f32.xlu0 %v357_v7  ;;  %361 = vadd.xlane.f32.xlu1 %v360_v15 }
  0x45   :  { %364 = vadd.xlane.f32.xlu0 %v363_v45  ;;  %367 = vadd.xlane.f32.xlu1 %v366_v58 }
  0x96   :  { %v275_v37 = vpop.xlane.xlu0 %274  ;;  %v281_v3 = vpop.xlane.xlu1 %280 }
  0x97   :  { %v370_v59 = vmul.f32 0.00390625, %v275_v37  ;;  %v372_v60 = vmul.f32 0.00390625, %v281_v3 }
  0x99   :  { %v1704_v38 = vsub.f32 %v1343_v16, %v370_v59  ;;  %v1707_v30 = vsub.f32 %v1345_v17, %v370_v59  ;;  %v1710_v6 = vsub.f32 %v1347_v20, %v372_v60  ;;  %v1713_v24 = vsub.f32 %v1349_v21, %v372_v60 }
  0x9a   :  { %v278_v7 = vpop.xlane.xlu0 %277  ;;  %v284_v0 = vpop.xlane.xlu1 %283 }
  0x9b   :  { %v371_v10 = vmul.f32 0.00390625, %v278_v7  ;;  %v466_v63 = vmul.f32 %v1704_v38, %v1704_v38  ;;  %v467_v23 = vmul.f32 %v1707_v30, %v1707_v30  ;;  %v373_v16 = vmul.f32 0.00390625, %v284_v0 }
  0x9c   :  { %v470_v17 = vmul.f32 %v1710_v6, %v1710_v6  ;;  %v471_v20 = vmul.f32 %v1713_v24, %v1713_v24 }
  0x9d   :  { %v1724_v41 = vsub.f32 %v1364_v32, %v371_v10  ;;  %v1727_v21 = vsub.f32 %v1366_v33, %v371_v10  ;;  %v530_v1 = vadd.f32 %v467_v23, %v466_v63  ;;  %v1730_v52 = vsub.f32 %v1371_v36, %v373_v16 }
  0x9e   :  { %v1733_v15 = vsub.f32 %v1378_v42, %v373_v16  ;;  %v287_v45 = vpop.xlane.xlu0 %286  ;;  %v290_v37 = vpop.xlane.xlu1 %289  ;;  %v536_v59 = vadd.f32 %v471_v20, %v470_v17 }
  0x9f   :  { %v374_v58 = vmul.f32 0.00390625, %v287_v45  ;;  %531 = vadd.xlane.f32.xlu0 %v530_v1  ;;  %v468_v3 = vmul.f32 %v1724_v41, %v1724_v41  ;;  %v469_v32 = vmul.f32 %v1727_v21, %v1727_v21  ;;  %v375_v33 = vmul.f32 0.00390625, %v290_v37 }
  0xa0   :  { %v472_v60 = vmul.f32 %v1730_v52, %v1730_v52  ;;  %v473_v36 = vmul.f32 %v1733_v15, %v1733_v15 }
  0xa1   :  { %v1744_v42 = vsub.f32 %v1383_v46, %v374_v58  ;;  %v1747_v7 = vsub.f32 %v1393_v53, %v374_v58  ;;  %v533_v10 = vadd.f32 %v469_v32, %v468_v3  ;;  %v1750_v0 = vsub.f32 %v1395_v56, %v375_v33 }
  0xa2   :  { %v1753_v63 = vsub.f32 %v1397_v57, %v375_v33  ;;  %v293_v23 = vpop.xlane.xlu0 %292  ;;  %v296_v17 = vpop.xlane.xlu1 %295  ;;  %v539_v20 = vadd.f32 %v473_v36, %v472_v60 }
  0xa3   :  { %v376_v16 = vmul.f32 0.00390625, %v293_v23  ;;  %537 = vadd.xlane.f32.xlu0 %v536_v59  ;;  %534 = vadd.xlane.f32.xlu1 %v533_v10  ;;  %v474_v46 = vmul.f32 %v1744_v42, %v1744_v42  ;;  %v475_v53 = vmul.f32 %v1747_v7, %v1747_v7  ;;  %v377_v1 = vmul.f32 0.00390625, %v296_v17 }
  0xa4   :  { %v476_v56 = vmul.f32 %v1750_v0, %v1750_v0  ;;  %v477_v57 = vmul.f32 %v1753_v63, %v1753_v63 }
  0xa5   :  { %v1764_v45 = vsub.f32 %v1412_v4, %v376_v16  ;;  %v1767_v58 = vsub.f32 %v1414_v5, %v376_v16  ;;  %v542_v37 = vadd.f32 %v475_v53, %v474_v46  ;;  %v1770_v59 = vsub.f32 %v1419_v8, %v377_v1 }
  0xa6   :  { %v1773_v3 = vsub.f32 %v1426_v14, %v377_v1  ;;  %v299_v32 = vpop.xlane.xlu0 %298  ;;  %v302_v60 = vpop.xlane.xlu1 %301  ;;  %v545_v36 = vadd.f32 %v477_v57, %v476_v56 }
  0xa7   :  { %v378_v33 = vmul.f32 0.00390625, %v299_v32  ;;  %540 = vadd.xlane.f32.xlu1 %v539_v20  ;;  %543 = vadd.xlane.f32.xlu0 %v542_v37  ;;  %v478_v4 = vmul.f32 %v1764_v45, %v1764_v45  ;;  %v479_v5 = vmul.f32 %v1767_v58, %v1767_v58  ;;  %v379_v10 = vmul.f32 0.00390625, %v302_v60 }
  0xa8   :  { %v480_v8 = vmul.f32 %v1770_v59, %v1770_v59  ;;  %v481_v14 = vmul.f32 %v1773_v3, %v1773_v3 }
  0xa9   :  { %v1784_v23 = vsub.f32 %v1431_v22, %v378_v33  ;;  %v1787_v16 = vsub.f32 %v1441_v29, %v378_v33  ;;  %v548_v17 = vadd.f32 %v479_v5, %v478_v4  ;;  %v1790_v20 = vsub.f32 %v1443_v34, %v379_v10 }
  0xaa   :  { %v1793_v46 = vsub.f32 %v1445_v35, %v379_v10  ;;  %v305_v53 = vpop.xlane.xlu0 %304  ;;  %v308_v56 = vpop.xlane.xlu1 %307  ;;  %v551_v57 = vadd.f32 %v481_v14, %v480_v8 }
  0xab   :  { %v380_v1 = vmul.f32 0.00390625, %v305_v53  ;;  %546 = vadd.xlane.f32.xlu1 %v545_v36  ;;  %549 = vadd.xlane.f32.xlu0 %v548_v17  ;;  %v482_v22 = vmul.f32 %v1784_v23, %v1784_v23  ;;  %v483_v29 = vmul.f32 %v1787_v16, %v1787_v16  ;;  %v381_v37 = vmul.f32 0.00390625, %v308_v56 }
  0xac   :  { %v484_v34 = vmul.f32 %v1790_v20, %v1790_v20  ;;  %v485_v35 = vmul.f32 %v1793_v46, %v1793_v46 }
  0xad   :  { %v1804_v32 = vsub.f32 %v1460_v49, %v380_v1  ;;  %v1807_v33 = vsub.f32 %v1462_v50, %v380_v1  ;;  %v554_v60 = vadd.f32 %v483_v29, %v482_v22  ;;  %v1810_v36 = vsub.f32 %v1467_v54, %v381_v37 }
  0xae   :  { %v1813_v4 = vsub.f32 %v1474_v62, %v381_v37  ;;  %v311_v5 = vpop.xlane.xlu0 %310  ;;  %v314_v8 = vpop.xlane.xlu1 %313  ;;  %v557_v14 = vadd.f32 %v485_v35, %v484_v34 }
  0xaf   :  { %v382_v10 = vmul.f32 0.00390625, %v311_v5  ;;  %552 = vadd.xlane.f32.xlu1 %v551_v57  ;;  %555 = vadd.xlane.f32.xlu0 %v554_v60  ;;  %v486_v49 = vmul.f32 %v1804_v32, %v1804_v32  ;;  %v487_v50 = vmul.f32 %v1807_v33, %v1807_v33  ;;  %v383_v17 = vmul.f32 0.00390625, %v314_v8 }
  0xb0   :  { %v488_v54 = vmul.f32 %v1810_v36, %v1810_v36  ;;  %v489_v62 = vmul.f32 %v1813_v4, %v1813_v4 }
  0xb1   :  { %v1824_v53 = vsub.f32 %v1479_v2, %v382_v10  ;;  %v1827_v1 = vsub.f32 %v1489_v12, %v382_v10  ;;  %v560_v56 = vadd.f32 %v487_v50, %v486_v49  ;;  %v1830_v57 = vsub.f32 %v1491_v18, %v383_v17 }
  0xb2   :  { %v1833_v22 = vsub.f32 %v1493_v19, %v383_v17  ;;  %v317_v29 = vpop.xlane.xlu0 %316  ;;  %v320_v34 = vpop.xlane.xlu1 %319  ;;  %v563_v35 = vadd.f32 %v489_v62, %v488_v54 }
  0xb3   :  { %v384_v37 = vmul.f32 0.00390625, %v317_v29  ;;  %558 = vadd.xlane.f32.xlu1 %v557_v14  ;;  %561 = vadd.xlane.f32.xlu0 %v560_v56  ;;  %v490_v2 = vmul.f32 %v1824_v53, %v1824_v53  ;;  %v491_v12 = vmul.f32 %v1827_v1, %v1827_v1  ;;  %v385_v60 = vmul.f32 0.00390625, %v320_v34 }
  0xb4   :  { %v492_v18 = vmul.f32 %v1830_v57, %v1830_v57  ;;  %v493_v19 = vmul.f32 %v1833_v22, %v1833_v22 }
  0xb5   :  { %v1844_v5 = vsub.f32 %v1508_v39, %v384_v37  ;;  %v1847_v10 = vsub.f32 %v1510_v40, %v384_v37  ;;  %v566_v8 = vadd.f32 %v491_v12, %v490_v2  ;;  %v1850_v14 = vsub.f32 %v1515_v44, %v385_v60  ;;  %v2403_v2 = vld [vmem:[#allocation2_spill] sm:$0xff] }
  0xb6   :  { %v1853_v49 = vsub.f32 %v1522_v55, %v385_v60  ;;  %v323_v50 = vpop.xlane.xlu0 %322  ;;  %v326_v54 = vpop.xlane.xlu1 %325  ;;  %v569_v62 = vadd.f32 %v493_v19, %v492_v18 }
  0xb7   :  { %v386_v17 = vmul.f32 0.00390625, %v323_v50  ;;  %564 = vadd.xlane.f32.xlu1 %v563_v35  ;;  %567 = vadd.xlane.f32.xlu0 %v566_v8  ;;  %v494_v39 = vmul.f32 %v1844_v5, %v1844_v5  ;;  %v495_v40 = vmul.f32 %v1847_v10, %v1847_v10  ;;  %v387_v56 = vmul.f32 0.00390625, %v326_v54  ;;  %v2405_v54 = vld [vmem:[#allocation3_spill] sm:$0xff] }
  0xb8   :  { %v496_v44 = vmul.f32 %v1850_v14, %v1850_v14  ;;  %v497_v55 = vmul.f32 %v1853_v49, %v1853_v49 }
  0xb9   :  { %v1864_v29 = vsub.f32 %v1527_v61, %v386_v17  ;;  %v1867_v37 = vsub.f32 %v1537_v9, %v386_v17  ;;  %v572_v34 = vadd.f32 %v495_v40, %v494_v39  ;;  %v1870_v35 = vsub.f32 %v1539_v13, %v387_v56 }
  0xba   :  { %v1873_v12 = vsub.f32 %v2403_v2, %v387_v56  ;;  %v329_v60 = vpop.xlane.xlu0 %328  ;;  %v332_v19 = vpop.xlane.xlu1 %331  ;;  %v575_v8 = vadd.f32 %v497_v55, %v496_v44  ;;  %v2409_v44 = vld [vmem:[#allocation5_spill] sm:$0xff] }
  0xbb   :  { %2401 = vst [vmem:[#allocation21_spill] sm:$0xff] %v1867_v37  ;;  %2402 = vst [vmem:[#allocation22_spill] sm:$0xff] %v1870_v35  ;;  %v388_v18 = vmul.f32 0.00390625, %v329_v60  ;;  %570 = vadd.xlane.f32.xlu1 %v569_v62  ;;  %573 = vadd.xlane.f32.xlu0 %v572_v34  ;;  %v498_v61 = vmul.f32 %v1864_v29, %v1864_v29  ;;  %v499_v9 = vmul.f32 %v1867_v37, %v1867_v37  ;;  %v2407_v62 = vld [vmem:[#allocation4_spill] sm:$0xff]  ;;  %v2411_v34 = vld [vmem:[#allocation6_spill] sm:$0xff] }
  0xbc   :  { %2404 = vst [vmem:[#allocation2_spill] sm:$0xff] %v1873_v12  ;;  %v389_v50 = vmul.f32 0.00390625, %v332_v19  ;;  %v500_v13 = vmul.f32 %v1870_v35, %v1870_v35  ;;  %v501_v17 = vmul.f32 %v1873_v12, %v1873_v12 }
  0xbd   :  { %v1884_v39 = vsub.f32 %v2405_v54, %v388_v18  ;;  %v1887_v40 = vsub.f32 %v2407_v62, %v388_v18  ;;  %v578_v56 = vadd.f32 %v499_v9, %v498_v61 }
  0xbe   :  { %v1890_v55 = vsub.f32 %v2409_v44, %v389_v50  ;;  %v1893_v2 = vsub.f32 %v2411_v34, %v389_v50  ;;  %v335_v60 = vpop.xlane.xlu0 %334  ;;  %v338_v35 = vpop.xlane.xlu1 %337  ;;  %v581_v37 = vadd.f32 %v501_v17, %v500_v13  ;;  %v2413_v50 = vld [vmem:[#allocation7_spill] sm:$0xff]  ;;  %v2417_v17 = vld [vmem:[#allocation9_spill] sm:$0xff] }
  0xbf   :  { %2406 = vst [vmem:[#allocation3_spill] sm:$0xff] %v1884_v39  ;;  %2408 = vst [vmem:[#allocation4_spill] sm:$0xff] %v1887_v40  ;;  %v390_v19 = vmul.f32 0.00390625, %v335_v60  ;;  %576 = vadd.xlane.f32.xlu1 %v575_v8  ;;  %579 = vadd.xlane.f32.xlu0 %v578_v56  ;;  %v502_v54 = vmul.f32 %v1884_v39, %v1884_v39  ;;  %v503_v18 = vmul.f32 %v1887_v40, %v1887_v40  ;;  %v2415_v8 = vld [vmem:[#allocation8_spill] sm:$0xff]  ;;  %v2419_v60 = vld [vmem:[#allocation10_spill] sm:$0xff] }
  0xc0   :  { %2410 = vst [vmem:[#allocation5_spill] sm:$0xff] %v1890_v55  ;;  %2412 = vst [vmem:[#allocation6_spill] sm:$0xff] %v1893_v2  ;;  %v391_v62 = vmul.f32 0.00390625, %v338_v35  ;;  %v504_v61 = vmul.f32 %v1890_v55, %v1890_v55  ;;  %v505_v9 = vmul.f32 %v1893_v2, %v1893_v2 }
  0xc1   :  { %v1904_v44 = vsub.f32 %v2413_v50, %v390_v19  ;;  %v1907_v56 = vsub.f32 %v2415_v8, %v390_v19  ;;  %v584_v13 = vadd.f32 %v503_v18, %v502_v54 }
  0xc2   :  { %v1910_v34 = vsub.f32 %v2417_v17, %v391_v62  ;;  %v1913_v39 = vsub.f32 %v2419_v60, %v391_v62  ;;  %v341_v35 = vpop.xlane.xlu0 %340  ;;  %v344_v55 = vpop.xlane.xlu1 %343  ;;  %v587_v12 = vadd.f32 %v505_v9, %v504_v61  ;;  %v2420_v62 = vld [vmem:[#allocation11_spill] sm:$0xff]  ;;  %v2424_v9 = vld [vmem:[#allocation13_spill] sm:$0xff] }
  0xc3   :  { %2414 = vst [vmem:[#allocation7_spill] sm:$0xff] %v1904_v44  ;;  %2416 = vst [vmem:[#allocation8_spill] sm:$0xff] %v1907_v56  ;;  %v392_v40 = vmul.f32 0.00390625, %v341_v35  ;;  %582 = vadd.xlane.f32.xlu1 %v581_v37  ;;  %585 = vadd.xlane.f32.xlu0 %v584_v13  ;;  %v506_v50 = vmul.f32 %v1904_v44, %v1904_v44  ;;  %v507_v19 = vmul.f32 %v1907_v56, %v1907_v56  ;;  %v2422_v37 = vld [vmem:[#allocation12_spill] sm:$0xff]  ;;  %v2426_v35 = vld [vmem:[#allocation14_spill] sm:$0xff] }
  0xc4   :  { %2418 = vst [vmem:[#allocation9_spill] sm:$0xff] %v1910_v34  ;;  %v393_v8 = vmul.f32 0.00390625, %v344_v55  ;;  %v508_v54 = vmul.f32 %v1910_v34, %v1910_v34  ;;  %v509_v18 = vmul.f32 %v1913_v39, %v1913_v39 }
  0xc5   :  { %v1924_v17 = vsub.f32 %v2420_v62, %v392_v40  ;;  %v1927_v13 = vsub.f32 %v2422_v37, %v392_v40  ;;  %v590_v61 = vadd.f32 %v507_v19, %v506_v50 }
  0xc6   :  { %v1930_v60 = vsub.f32 %v2424_v9, %v393_v8  ;;  %v1933_v44 = vsub.f32 %v2426_v35, %v393_v8  ;;  %v347_v55 = vpop.xlane.xlu0 %346  ;;  %v350_v34 = vpop.xlane.xlu1 %349  ;;  %v593_v2 = vadd.f32 %v509_v18, %v508_v54  ;;  %v2427_v8 = vld [vmem:[#allocation15_spill] sm:$0xff]  ;;  %v2432_v35 = vld [vmem:[#allocation17_spill] sm:$0xff] }
  0xc7   :  { %2421 = vst [vmem:[#allocation10_spill] sm:$0xff] %v1924_v17  ;;  %2423 = vst [vmem:[#allocation11_spill] sm:$0xff] %v1927_v13  ;;  %v394_v56 = vmul.f32 0.00390625, %v347_v55  ;;  %588 = vadd.xlane.f32.xlu1 %v587_v12  ;;  %591 = vadd.xlane.f32.xlu0 %v590_v61  ;;  %v510_v62 = vmul.f32 %v1924_v17, %v1924_v17  ;;  %v511_v40 = vmul.f32 %v1927_v13, %v1927_v13  ;;  %v2429_v12 = vld [vmem:[#allocation16_spill] sm:$0xff] }
  0xc8   :  { %2425 = vst [vmem:[#allocation12_spill] sm:$0xff] %v1930_v60  ;;  %v395_v37 = vmul.f32 0.00390625, %v350_v34  ;;  %v512_v50 = vmul.f32 %v1930_v60, %v1930_v60  ;;  %v513_v19 = vmul.f32 %v1933_v44, %v1933_v44 }
  0xc9   :  { %v1944_v9 = vsub.f32 %v2427_v8, %v394_v56  ;;  %v1947_v61 = vsub.f32 %v2429_v12, %v394_v56  ;;  %v596_v54 = vadd.f32 %v511_v40, %v510_v62  ;;  %v2433_v40 = vld [vmem:[#allocation18_spill] sm:$0xff] }
  0xca   :  { %v1950_v18 = vsub.f32 %v1643_v31, %v395_v37  ;;  %v1953_v55 = vsub.f32 %v2432_v35, %v395_v37  ;;  %v353_v34 = vpop.xlane.xlu0 %352  ;;  %v356_v60 = vpop.xlane.xlu1 %355  ;;  %v599_v17 = vadd.f32 %v513_v19, %v512_v50  ;;  %v2435_v35 = vld [vmem:[#allocation20_spill] sm:$0xff] }
  0xcb   :  { %2428 = vst [vmem:[#allocation13_spill] sm:$0xff] %v1944_v9  ;;  %2430 = vst [vmem:[#allocation14_spill] sm:$0xff] %v1947_v61  ;;  %v396_v13 = vmul.f32 0.00390625, %v353_v34  ;;  %594 = vadd.xlane.f32.xlu1 %v593_v2  ;;  %597 = vadd.xlane.f32.xlu0 %v596_v54  ;;  %v514_v8 = vmul.f32 %v1944_v9, %v1944_v9  ;;  %v515_v56 = vmul.f32 %v1947_v61, %v1947_v61  ;;  %v2434_v2 = vld [vmem:[#allocation19_spill] sm:$0xff] }
  0xcc   :  { %2431 = vst [vmem:[#allocation15_spill] sm:$0xff] %v1950_v18  ;;  %v397_v12 = vmul.f32 0.00390625, %v356_v60  ;;  %v516_v31 = vmul.f32 %v1950_v18, %v1950_v18  ;;  %v517_v62 = vmul.f32 %v1953_v55, %v1953_v55 }
  0xcd   :  { %v1964_v37 = vsub.f32 %v2433_v40, %v396_v13  ;;  %v1967_v54 = vsub.f32 %v2434_v2, %v396_v13  ;;  %v602_v50 = vadd.f32 %v515_v56, %v514_v8 }
  0xce   :  { %v1970_v19 = vsub.f32 %v1657_v48, %v397_v12  ;;  %v1973_v34 = vsub.f32 %v2435_v35, %v397_v12  ;;  %v359_v60 = vpop.xlane.xlu0 %358  ;;  %v362_v18 = vpop.xlane.xlu1 %361  ;;  %v605_v9 = vadd.f32 %v517_v62, %v516_v31 }
  0xcf   :  { %v398_v61 = vmul.f32 0.00390625, %v359_v60  ;;  %600 = vadd.xlane.f32.xlu1 %v599_v17  ;;  %603 = vadd.xlane.f32.xlu0 %v602_v50  ;;  %v518_v40 = vmul.f32 %v1964_v37, %v1964_v37  ;;  %v519_v13 = vmul.f32 %v1967_v54, %v1967_v54  ;;  %v399_v2 = vmul.f32 0.00390625, %v362_v18 }
  0xd0   :  { %v520_v48 = vmul.f32 %v1970_v19, %v1970_v19  ;;  %v521_v8 = vmul.f32 %v1973_v34, %v1973_v34 }
  0xd1   :  { %v1984_v56 = vsub.f32 %v1671_v51, %v398_v61  ;;  %v1987_v17 = vsub.f32 %v1681_v47, %v398_v61  ;;  %v608_v12 = vadd.f32 %v519_v13, %v518_v40  ;;  %v1990_v31 = vsub.f32 %v1683_v26, %v399_v2 }
  0xd2   :  { %v1993_v62 = vsub.f32 %v1685_v25, %v399_v2  ;;  %v365_v18 = vpop.xlane.xlu0 %364  ;;  %v368_v35 = vpop.xlane.xlu1 %367  ;;  %v611_v60 = vadd.f32 %v521_v8, %v520_v48 }
  0xd3   :  { %v400_v50 = vmul.f32 0.00390625, %v365_v18  ;;  %606 = vadd.xlane.f32.xlu1 %v605_v9  ;;  %609 = vadd.xlane.f32.xlu0 %v608_v12  ;;  %v522_v51 = vmul.f32 %v1984_v56, %v1984_v56  ;;  %v523_v47 = vmul.f32 %v1987_v17, %v1987_v17  ;;  %v401_v61 = vmul.f32 0.00390625, %v368_v35 }
  0xd4   :  { %2436 = vst [vmem:[#allocation16_spill] sm:$0xff] %v1993_v62  ;;  %v524_v26 = vmul.f32 %v1990_v31, %v1990_v31  ;;  %v525_v25 = vmul.f32 %v1993_v62, %v1993_v62 }
  0xd5   :  { %v2004_v40 = vsub.f32 %v1689_v28, %v400_v50  ;;  %v2007_v9 = vsub.f32 %v1691_v43, %v400_v50  ;;  %v614_v13 = vadd.f32 %v523_v47, %v522_v51  ;;  %v2010_v2 = vsub.f32 %v1695_v11, %v401_v61 }
  0xd6   :  { %v2013_v48 = vsub.f32 %v1697_v27, %v401_v61  ;;  %v617_v8 = vadd.f32 %v525_v25, %v524_v26 }
  0xd7   :  { %2437 = vst [vmem:[#allocation17_spill] sm:$0xff] %v2004_v40  ;;  %2438 = vst [vmem:[#allocation18_spill] sm:$0xff] %v2007_v9  ;;  %612 = vadd.xlane.f32.xlu1 %v611_v60  ;;  %615 = vadd.xlane.f32.xlu0 %v614_v13  ;;  %v526_v12 = vmul.f32 %v2004_v40, %v2004_v40  ;;  %v527_v28 = vmul.f32 %v2007_v9, %v2007_v9  ;;  %v788_v60 = vlaneseq }
  0xd8   :  { %2439 = vst [vmem:[#allocation19_spill] sm:$0xff] %v2010_v2  ;;  %2440 = vst [vmem:[#allocation20_spill] sm:$0xff] %v2013_v48  ;;  %v528_v43 = vmul.f32 %v2010_v2, %v2010_v2  ;;  %v529_v18 = vmul.f32 %v2013_v48, %v2013_v48 }
  0xd9   :  { %v620_v11 = vadd.f32 %v527_v28, %v526_v12  ;;  %v789_v13 = vshrl.u32 %v788_v60, 7  ;;  %v862_v60 = vld [vmem:[%s2340_s3] sm:$0x3] }
  0xda   :  { %v623_v27 = vadd.f32 %v529_v18, %v528_v43  ;;  %v786_v18 = vld [vmem:[%s2339_s2] sm:$0x3] }
  0xdb   :  { %618 = vadd.xlane.f32.xlu1 %v617_v8  ;;  %621 = vadd.xlane.f32.xlu0 %v620_v11  ;;  %v790_v28 = vsub.s32 0, %v789_v13  ;;  %v794_v43 = vsub.s32 1, %v789_v13 }
  0xdf   :  { %624 = vadd.xlane.f32.xlu1 %v623_v27 }
 0x12c   :  { %v532_v50 = vpop.xlane.xlu0 %531 }
 0x12d   :  { %v626_v35 = vmul.f32 0.00390625, %v532_v50 }
 0x12f   :  { %v658_v51 = vadd.f32 1e-05, %v626_v35 }
 0x130   :  { %v535_v47 = vpop.xlane.xlu1 %534  ;;  %v538_v61 = vpop.xlane.xlu0 %537 }
 0x131   :  { %1230 = vrsqrt.f32 %v658_v51  ;;  %v627_v26 = vmul.f32 0.00390625, %v535_v47  ;;  %v628_v25 = vmul.f32 0.00390625, %v538_v61 }
 0x133   :  { %v659_v9 = vadd.f32 1e-05, %v627_v26  ;;  %v660_v2 = vadd.f32 1e-05, %v628_v25  ;;  %v2033_v26 = vrot.slane %v862_v60, %v790_v28  ;;  %v2035_v25 = vrot.slane %v862_v60, %v794_v43 }
 0x134   :  { %v541_v40 = vpop.xlane.xlu1 %540  ;;  %v544_v62 = vpop.xlane.xlu0 %543 }
 0x135   :  { %1232 = vrsqrt.f32 %v659_v9  ;;  %v629_v12 = vmul.f32 0.00390625, %v541_v40  ;;  %v630_v8 = vmul.f32 0.00390625, %v544_v62  ;;  %v2029_v40 = vrot.slane %v786_v18, %v790_v28 }
 0x136   :  { %1234 = vrsqrt.f32 %v660_v2  ;;  %v2031_v62 = vrot.slane %v786_v18, %v794_v43 }
 0x137   :  { %v661_v11 = vadd.f32 1e-05, %v629_v12  ;;  %v662_v27 = vadd.f32 1e-05, %v630_v8 }
 0x138   :  { %v547_v50 = vpop.xlane.xlu1 %546  ;;  %v550_v35 = vpop.xlane.xlu0 %549 }
 0x139   :  { %1236 = vrsqrt.f32 %v661_v11  ;;  %v631_v51 = vmul.f32 0.00390625, %v547_v50  ;;  %v632_v9 = vmul.f32 0.00390625, %v550_v35 }
 0x13a   :  { %1238 = vrsqrt.f32 %v662_v27 }
 0x13b   :  { %v1231_v2 = vpop.eup %1230  ;;  %v663_v47 = vadd.f32 1e-05, %v631_v51  ;;  %v664_v61 = vadd.f32 1e-05, %v632_v9 }
 0x13c   :  { %v722_v13 = vmul.f32 %v1231_v2, %v1704_v38  ;;  %v723_v12 = vmul.f32 %v1231_v2, %v1707_v30  ;;  %v553_v8 = vpop.xlane.xlu1 %552  ;;  %v556_v11 = vpop.xlane.xlu0 %555 }
 0x13d   :  { %1240 = vrsqrt.f32 %v663_v47  ;;  %v633_v50 = vmul.f32 0.00390625, %v553_v8  ;;  %v634_v35 = vmul.f32 0.00390625, %v556_v11 }
 0x13e   :  { %v798_v18 = vmul.f32 %v2029_v40, %v722_v13  ;;  %v799_v27 = vmul.f32 %v2031_v62, %v723_v12  ;;  %1242 = vrsqrt.f32 %v664_v61 }
 0x13f   :  { %v1233_v51 = vpop.eup %1232  ;;  %v665_v9 = vadd.f32 1e-05, %v633_v50  ;;  %v666_v28 = vadd.f32 1e-05, %v634_v35 }
 0x140   :  { %v1235_v48 = vpop.eup %1234  ;;  %v874_v43 = vadd.f32 %v2033_v26, %v798_v18  ;;  %v875_v38 = vadd.f32 %v2035_v25, %v799_v27  ;;  %v724_v30 = vmul.f32 %v1233_v51, %v1724_v41  ;;  %v725_v60 = vmul.f32 %v1233_v51, %v1727_v21  ;;  %v559_v2 = vpop.xlane.xlu1 %558 }
 0x141   :  { %v562_v47 = vpop.xlane.xlu0 %561  ;;  %v726_v8 = vmul.f32 %v1235_v48, %v1710_v6  ;;  %v727_v13 = vmul.f32 %v1235_v48, %v1713_v24  ;;  %1244 = vrsqrt.f32 %v665_v9  ;;  %v635_v61 = vmul.f32 0.00390625, %v559_v2 }
 0x142   :  { %v1198_v12 = vpack.c.bf16 %v875_v38, %v874_v43  ;;  %v800_v11 = vmul.f32 %v2029_v40, %v724_v30  ;;  %v801_v50 = vmul.f32 %v2031_v62, %v725_v60  ;;  %1246 = vrsqrt.f32 %v666_v28 }
 0x143   :  { %v1237_v35 = vpop.eup %1236  ;;  %v802_v18 = vmul.f32 %v2029_v40, %v726_v8  ;;  %v803_v41 = vmul.f32 %v2031_v62, %v727_v13  ;;  %v667_v21 = vadd.f32 1e-05, %v635_v61  ;;  %v636_v27 = vmul.f32 0.00390625, %v562_v47 }
 0x144   :  { %v1239_v51 = vpop.eup %1238  ;;  %1130 = vst [vmem:[%s2341_s4] sm:$0xff] %v1198_v12  ;;  %v876_v6 = vadd.f32 %v2033_v26, %v800_v11  ;;  %v877_v24 = vadd.f32 %v2035_v25, %v801_v50  ;;  %v728_v48 = vmul.f32 %v1237_v35, %v1730_v52  ;;  %v729_v9 = vmul.f32 %v1237_v35, %v1733_v15  ;;  %v565_v28 = vpop.xlane.xlu1 %564 }
 0x145   :  { %v568_v43 = vpop.xlane.xlu0 %567  ;;  %v878_v38 = vadd.f32 %v2033_v26, %v802_v18  ;;  %v879_v30 = vadd.f32 %v2035_v25, %v803_v41  ;;  %v730_v60 = vmul.f32 %v1239_v51, %v1744_v42  ;;  %v731_v2 = vmul.f32 %v1239_v51, %v1747_v7 }
 0x146   :  { %v1199_v47 = vpack.c.bf16 %v877_v24, %v876_v6  ;;  %v804_v8 = vmul.f32 %v2029_v40, %v728_v48  ;;  %v805_v13 = vmul.f32 %v2031_v62, %v729_v9  ;;  %1248 = vrsqrt.f32 %v667_v21 }
 0x147   :  { %v1241_v61 = vpop.eup %1240  ;;  %v1200_v52 = vpack.c.bf16 %v879_v30, %v878_v38  ;;  %v806_v15 = vmul.f32 %v2029_v40, %v730_v60  ;;  %v807_v12 = vmul.f32 %v2031_v62, %v731_v2  ;;  %v668_v11 = vadd.f32 1e-05, %v636_v27 }
 0x148   :  { %v1243_v50 = vpop.eup %1242  ;;  %1131 = vst [vmem:[%s2341_s4 + $0x8] sm:$0xff] %v1199_v47  ;;  %v880_v42 = vadd.f32 %v2033_v26, %v804_v8  ;;  %v881_v7 = vadd.f32 %v2035_v25, %v805_v13  ;;  %v732_v35 = vmul.f32 %v1241_v61, %v1750_v0  ;;  %v733_v18 = vmul.f32 %v1241_v61, %v1753_v63  ;;  %v571_v41 = vpop.xlane.xlu1 %570 }
 0x149   :  { %v574_v21 = vpop.xlane.xlu0 %573  ;;  %1132 = vst [vmem:[%s2341_s4 + $0x10] sm:$0xff] %v1200_v52  ;;  %v882_v27 = vadd.f32 %v2033_v26, %v806_v15  ;;  %v883_v51 = vadd.f32 %v2035_v25, %v807_v12  ;;  %v734_v6 = vmul.f32 %v1243_v50, %v1764_v45  ;;  %v735_v24 = vmul.f32 %v1243_v50, %v1767_v58 }
 0x14a   :  { %v1201_v48 = vpack.c.bf16 %v881_v7, %v880_v42  ;;  %v808_v9 = vmul.f32 %v2029_v40, %v732_v35  ;;  %v809_v0 = vmul.f32 %v2031_v62, %v733_v18  ;;  %1250 = vrsqrt.f32 %v668_v11 }
 0x14b   :  { %v1245_v63 = vpop.eup %1244  ;;  %v1202_v38 = vpack.c.bf16 %v883_v51, %v882_v27  ;;  %v810_v30 = vmul.f32 %v2029_v40, %v734_v6  ;;  %v811_v60 = vmul.f32 %v2031_v62, %v735_v24  ;;  %v637_v2 = vmul.f32 0.00390625, %v565_v28 }
 0x14c   :  { %v1247_v47 = vpop.eup %1246  ;;  %1133 = vst [vmem:[%s2341_s4 + $0x18] sm:$0xff] %v1201_v48  ;;  %v884_v45 = vadd.f32 %v2033_v26, %v808_v9  ;;  %v885_v58 = vadd.f32 %v2035_v25, %v809_v0  ;;  %v736_v8 = vmul.f32 %v1245_v63, %v1770_v59  ;;  %v737_v13 = vmul.f32 %v1245_v63, %v1773_v3  ;;  %v577_v61 = vpop.xlane.xlu1 %576 }
 0x14d   :  { %v580_v52 = vpop.xlane.xlu0 %579  ;;  %1134 = vst [vmem:[%s2341_s4 + $0x20] sm:$0xff] %v1202_v38  ;;  %v886_v28 = vadd.f32 %v2033_v26, %v810_v30  ;;  %v887_v15 = vadd.f32 %v2035_v25, %v811_v60  ;;  %v738_v12 = vmul.f32 %v1247_v47, %v1784_v23  ;;  %v739_v11 = vmul.f32 %v1247_v47, %v1787_v16 }
 0x14e   :  { %v1203_v50 = vpack.c.bf16 %v885_v58, %v884_v45  ;;  %v812_v42 = vmul.f32 %v2029_v40, %v736_v8  ;;  %v813_v59 = vmul.f32 %v2031_v62, %v737_v13  ;;  %v669_v3 = vadd.f32 1e-05, %v637_v2 }
 0x14f   :  { %v1204_v7 = vpack.c.bf16 %v887_v15, %v886_v28  ;;  %v814_v35 = vmul.f32 %v2029_v40, %v738_v12  ;;  %v815_v18 = vmul.f32 %v2031_v62, %v739_v11  ;;  %v638_v27 = vmul.f32 0.00390625, %v568_v43 }
 0x150   :  { %v1249_v51 = vpop.eup %1248  ;;  %1135 = vst [vmem:[%s2341_s4 + $0x28] sm:$0xff] %v1203_v50  ;;  %v888_v23 = vadd.f32 %v2033_v26, %v812_v42  ;;  %v889_v16 = vadd.f32 %v2035_v25, %v813_v59  ;;  %1252 = vrsqrt.f32 %v669_v3  ;;  %v639_v6 = vmul.f32 0.00390625, %v571_v41  ;;  %v583_v24 = vpop.xlane.xlu1 %582 }
 0x151   :  { %v586_v48 = vpop.xlane.xlu0 %585  ;;  %1136 = vst [vmem:[%s2341_s4 + $0x30] sm:$0xff] %v1204_v7  ;;  %v890_v9 = vadd.f32 %v2033_v26, %v814_v35  ;;  %v891_v43 = vadd.f32 %v2035_v25, %v815_v18  ;;  %v740_v0 = vmul.f32 %v1249_v51, %v1790_v20  ;;  %v741_v63 = vmul.f32 %v1249_v51, %v1793_v46 }
 0x152   :  { %v1205_v38 = vpack.c.bf16 %v889_v16, %v888_v23  ;;  %v670_v30 = vadd.f32 1e-05, %v638_v27  ;;  %v671_v60 = vadd.f32 1e-05, %v639_v6  ;;  %v640_v2 = vmul.f32 0.00390625, %v574_v21 }
 0x153   :  { %v1206_v47 = vpack.c.bf16 %v891_v43, %v890_v9  ;;  %v816_v41 = vmul.f32 %v2029_v40, %v740_v0  ;;  %v817_v45 = vmul.f32 %v2031_v62, %v741_v63  ;;  %v641_v58 = vmul.f32 0.00390625, %v577_v61 }
 0x154   :  { %v1251_v8 = vpop.eup %1250  ;;  %1137 = vst [vmem:[%s2341_s4 + $0x38] sm:$0xff] %v1205_v38  ;;  %1254 = vrsqrt.f32 %v670_v30  ;;  %v672_v13 = vadd.f32 1e-05, %v640_v2  ;;  %v642_v20 = vmul.f32 0.00390625, %v580_v52  ;;  %v643_v28 = vmul.f32 0.00390625, %v583_v24  ;;  %v589_v46 = vpop.xlane.xlu1 %588 }
 0x155   :  { %v592_v15 = vpop.xlane.xlu0 %591  ;;  %1138 = vst [vmem:[%s2341_s4 + $0x40] sm:$0xff] %v1206_v47  ;;  %v892_v21 = vadd.f32 %v2033_v26, %v816_v41  ;;  %v893_v12 = vadd.f32 %v2035_v25, %v817_v45  ;;  %v742_v61 = vmul.f32 %v1251_v8, %v1804_v32  ;;  %v743_v11 = vmul.f32 %v1251_v8, %v1807_v33 }
 0x156   :  { %1256 = vrsqrt.f32 %v671_v60  ;;  %v673_v50 = vadd.f32 1e-05, %v641_v58  ;;  %v674_v42 = vadd.f32 1e-05, %v642_v20  ;;  %v675_v59 = vadd.f32 1e-05, %v643_v28 }
 0x157   :  { %v1207_v52 = vpack.c.bf16 %v893_v12, %v892_v21  ;;  %v818_v3 = vmul.f32 %v2029_v40, %v742_v61  ;;  %v819_v7 = vmul.f32 %v2031_v62, %v743_v11  ;;  %1258 = vrsqrt.f32 %v672_v13 }
 0x158   :  { %1260 = vrsqrt.f32 %v673_v50  ;;  %v644_v35 = vmul.f32 0.00390625, %v586_v48  ;;  %v645_v18 = vmul.f32 0.00390625, %v589_v46  ;;  %v646_v27 = vmul.f32 0.00390625, %v592_v15  ;;  %v595_v51 = vpop.xlane.xlu1 %594 }
 0x159   :  { %v598_v23 = vpop.xlane.xlu0 %597  ;;  %1139 = vst [vmem:[%s2341_s4 + $0x48] sm:$0xff] %v1207_v52  ;;  %v894_v32 = vadd.f32 %v2033_v26, %v818_v3  ;;  %v895_v33 = vadd.f32 %v2035_v25, %v819_v7  ;;  %1262 = vrsqrt.f32 %v674_v42  ;;  %v647_v16 = vmul.f32 0.00390625, %v595_v51 }
 0x15a   :  { %v1253_v6 = vpop.eup %1252  ;;  %1264 = vrsqrt.f32 %v675_v59  ;;  %v676_v24 = vadd.f32 1e-05, %v644_v35  ;;  %v677_v9 = vadd.f32 1e-05, %v645_v18  ;;  %v678_v43 = vadd.f32 1e-05, %v646_v27 }
 0x15b   :  { %v1208_v48 = vpack.c.bf16 %v895_v33, %v894_v32  ;;  %v744_v0 = vmul.f32 %v1253_v6, %v1810_v36  ;;  %v745_v63 = vmul.f32 %v1253_v6, %v1813_v4  ;;  %v679_v38 = vadd.f32 1e-05, %v647_v16 }
 0x15c   :  { %1266 = vrsqrt.f32 %v676_v24  ;;  %v648_v30 = vmul.f32 0.00390625, %v598_v23  ;;  %v601_v60 = vpop.xlane.xlu1 %600 }
 0x15d   :  { %v604_v2 = vpop.xlane.xlu0 %603  ;;  %1140 = vst [vmem:[%s2341_s4 + $0x50] sm:$0xff] %v1208_v48  ;;  %v820_v47 = vmul.f32 %v2029_v40, %v744_v0  ;;  %v821_v41 = vmul.f32 %v2031_v62, %v745_v63  ;;  %1268 = vrsqrt.f32 %v677_v9  ;;  %v649_v45 = vmul.f32 0.00390625, %v601_v60  ;;  %v2441_v63 = vld [vmem:[#allocation21_spill] sm:$0xff] }
 0x15e   :  { %v1255_v58 = vpop.eup %1254  ;;  %1270 = vrsqrt.f32 %v678_v43  ;;  %v680_v36 = vadd.f32 1e-05, %v648_v30  ;;  %v650_v8 = vmul.f32 0.00390625, %v604_v2  ;;  %v2442_v30 = vld [vmem:[#allocation22_spill] sm:$0xff] }
 0x15f   :  { %v896_v4 = vadd.f32 %v2033_v26, %v820_v47  ;;  %v897_v13 = vadd.f32 %v2035_v25, %v821_v41  ;;  %v746_v20 = vmul.f32 %v1255_v58, %v1824_v53  ;;  %v747_v28 = vmul.f32 %v1255_v58, %v1827_v1 }
 0x160   :  { %v1257_v46 = vpop.eup %1256  ;;  %1272 = vrsqrt.f32 %v679_v38  ;;  %v2144_v15 = vadd.f32 1e-05, %v649_v45  ;;  %v2146_v21 = vadd.f32 1e-05, %v650_v8  ;;  %v2161_v27 = vpop.xlane.xlu1 %606 }
 0x161   :  { %v1259_v12 = vpop.eup %1258  ;;  %v1209_v61 = vpack.c.bf16 %v897_v13, %v896_v4  ;;  %v822_v11 = vmul.f32 %v2029_v40, %v746_v20  ;;  %v823_v50 = vmul.f32 %v2031_v62, %v747_v28  ;;  %v748_v42 = vmul.f32 %v1257_v46, %v1830_v57  ;;  %v2181_v2 = vpop.xlane.xlu0 %609  ;;  %v2444_v28 = vld [vmem:[#allocation3_spill] sm:$0xff] }
 0x162   :  { %v1261_v59 = vpop.eup %1260  ;;  %v749_v52 = vmul.f32 %v1257_v46, %v1833_v22  ;;  %v750_v53 = vmul.f32 %v1259_v12, %v1844_v5  ;;  %v751_v1 = vmul.f32 %v1259_v12, %v1847_v10  ;;  %1274 = vrsqrt.f32 %v680_v36  ;;  %v2443_v36 = vld [vmem:[#allocation2_spill] sm:$0xff] }
 0x163   :  { %v1263_v3 = vpop.eup %1262  ;;  %1141 = vst [vmem:[%s2341_s4 + $0x58] sm:$0xff] %v1209_v61  ;;  %v898_v7 = vadd.f32 %v2033_v26, %v822_v11  ;;  %v899_v35 = vadd.f32 %v2035_v25, %v823_v50  ;;  %v824_v18 = vmul.f32 %v2029_v40, %v748_v42  ;;  %v752_v57 = vmul.f32 %v1261_v59, %v1850_v14  ;;  %v2445_v42 = vld [vmem:[#allocation4_spill] sm:$0xff] }
 0x164   :  { %v1265_v22 = vpop.eup %1264  ;;  %v825_v5 = vmul.f32 %v2031_v62, %v749_v52  ;;  %v826_v10 = vmul.f32 %v2029_v40, %v750_v53  ;;  %v827_v51 = vmul.f32 %v2031_v62, %v751_v1  ;;  %v753_v23 = vmul.f32 %v1261_v59, %v1853_v49  ;;  %v613_v12 = vpop.xlane.xlu1 %612  ;;  %v2446_v52 = vld [vmem:[#allocation5_spill] sm:$0xff] }
 0x165   :  { %v1210_v32 = vpack.c.bf16 %v899_v35, %v898_v7  ;;  %v900_v33 = vadd.f32 %v2033_v26, %v824_v18  ;;  %v828_v16 = vmul.f32 %v2029_v40, %v752_v57  ;;  %v754_v6 = vmul.f32 %v1263_v3, %v1864_v29  ;;  %v2447_v35 = vld [vmem:[#allocation6_spill] sm:$0xff] }
 0x166   :  { %v1267_v24 = vpop.eup %1266  ;;  %v901_v14 = vadd.f32 %v2035_v25, %v825_v5  ;;  %v902_v9 = vadd.f32 %v2033_v26, %v826_v10  ;;  %v903_v43 = vadd.f32 %v2035_v25, %v827_v51  ;;  %v829_v48 = vmul.f32 %v2031_v62, %v753_v23  ;;  %v2448_v51 = vld [vmem:[#allocation7_spill] sm:$0xff] }
 0x167   :  { %v1269_v0 = vpop.eup %1268  ;;  %1142 = vst [vmem:[%s2341_s4 + $0x60] sm:$0xff] %v1210_v32  ;;  %v904_v49 = vadd.f32 %v2033_v26, %v828_v16  ;;  %v755_v38 = vmul.f32 %v1263_v3, %v2441_v63  ;;  %v830_v29 = vmul.f32 %v2029_v40, %v754_v6  ;;  %v756_v60 = vmul.f32 %v1265_v22, %v2442_v30  ;;  %v2449_v6 = vld [vmem:[#allocation8_spill] sm:$0xff] }
 0x168   :  { %v1271_v47 = vpop.eup %1270  ;;  %v1211_v41 = vpack.c.bf16 %v901_v14, %v900_v33  ;;  %v1212_v45 = vpack.c.bf16 %v903_v43, %v902_v9  ;;  %v905_v58 = vadd.f32 %v2035_v25, %v829_v48  ;;  %v757_v8 = vmul.f32 %v1265_v22, %v2443_v36  ;;  %v616_v14 = vpop.xlane.xlu0 %615  ;;  %v2452_v36 = vld [vmem:[#allocation11_spill] sm:$0xff] }
 0x169   :  { %v831_v4 = vmul.f32 %v2031_v62, %v755_v38  ;;  %v906_v13 = vadd.f32 %v2033_v26, %v830_v29  ;;  %v832_v20 = vmul.f32 %v2029_v40, %v756_v60  ;;  %v758_v46 = vmul.f32 %v1267_v24, %v2444_v28  ;;  %v2450_v38 = vld [vmem:[#allocation9_spill] sm:$0xff]  ;;  %v619_v60 = vpop.xlane.xlu1 %618 }
 0x16a   :  { %v1273_v61 = vpop.eup %1272  ;;  %1143 = vst [vmem:[%s2341_s4 + $0x68] sm:$0xff] %v1211_v41  ;;  %1144 = vst [vmem:[%s2341_s4 + $0x70] sm:$0xff] %v1212_v45  ;;  %v1213_v11 = vpack.c.bf16 %v905_v58, %v904_v49  ;;  %v833_v50 = vmul.f32 %v2031_v62, %v757_v8  ;;  %v759_v59 = vmul.f32 %v1267_v24, %v2445_v42  ;;  %v2451_v45 = vld [vmem:[#allocation10_spill] sm:$0xff]  ;;  %1276 = vrsqrt.f32 %v2144_v15 }
 0x16b   :  { %v760_v53 = vmul.f32 %v1269_v0, %v2446_v52  ;;  %v907_v1 = vadd.f32 %v2035_v25, %v831_v4  ;;  %v908_v3 = vadd.f32 %v2033_v26, %v832_v20  ;;  %v834_v7 = vmul.f32 %v2029_v40, %v758_v46 }
 0x16c   :  { %v761_v18 = vmul.f32 %v1269_v0, %v2447_v35  ;;  %v1275_v57 = vpop.eup %1274  ;;  %1145 = vst [vmem:[%s2341_s4 + $0x78] sm:$0xff] %v1213_v11  ;;  %v909_v22 = vadd.f32 %v2035_v25, %v833_v50  ;;  %v835_v5 = vmul.f32 %v2031_v62, %v759_v59  ;;  %v762_v23 = vmul.f32 %v1271_v47, %v2448_v51  ;;  %v622_v59 = vpop.xlane.xlu0 %621 }
 0x16d   :  { %v836_v10 = vmul.f32 %v2029_v40, %v760_v53  ;;  %v1214_v32 = vpack.c.bf16 %v907_v1, %v906_v13  ;;  %v910_v33 = vadd.f32 %v2033_v26, %v834_v7  ;;  %v763_v24 = vmul.f32 %v1271_v47, %v2449_v6 }
 0x16e   :  { %v837_v16 = vmul.f32 %v2031_v62, %v761_v18  ;;  %v1215_v9 = vpack.c.bf16 %v909_v22, %v908_v3  ;;  %v911_v43 = vadd.f32 %v2035_v25, %v835_v5  ;;  %v838_v0 = vmul.f32 %v2029_v40, %v762_v23  ;;  %v625_v18 = vpop.xlane.xlu1 %624 }
 0x16f   :  { %v912_v48 = vadd.f32 %v2033_v26, %v836_v10  ;;  %1146 = vst [vmem:[%s2341_s4 + $0x80] sm:$0xff] %v1214_v32  ;;  %v839_v63 = vmul.f32 %v2031_v62, %v763_v24  ;;  %v764_v29 = vmul.f32 %v1273_v61, %v2450_v38  ;;  %v765_v30 = vmul.f32 %v1273_v61, %v1913_v39 }
 0x170   :  { %v913_v49 = vadd.f32 %v2035_v25, %v837_v16  ;;  %1147 = vst [vmem:[%s2341_s4 + $0x88] sm:$0xff] %v1215_v9  ;;  %v1216_v47 = vpack.c.bf16 %v911_v43, %v910_v33  ;;  %v914_v41 = vadd.f32 %v2033_v26, %v838_v0  ;;  %v766_v58 = vmul.f32 %v1275_v57, %v2451_v45  ;;  %v2453_v16 = vld [vmem:[#allocation12_spill] sm:$0xff]  ;;  %v2455_v43 = vld [vmem:[#allocation14_spill] sm:$0xff] }
 0x171   :  { %v767_v8 = vmul.f32 %v1275_v57, %v2452_v36  ;;  %v915_v13 = vadd.f32 %v2035_v25, %v839_v63  ;;  %v840_v20 = vmul.f32 %v2029_v40, %v764_v29  ;;  %v841_v28 = vmul.f32 %v2031_v62, %v765_v30 }
 0x172   :  { %v1217_v4 = vpack.c.bf16 %v913_v49, %v912_v48  ;;  %1148 = vst [vmem:[%s2341_s4 + $0x90] sm:$0xff] %v1216_v47  ;;  %v842_v39 = vmul.f32 %v2029_v40, %v766_v58  ;;  %v651_v61 = vmul.f32 0.00390625, %v2161_v27  ;;  %1278 = vrsqrt.f32 %v2146_v21  ;;  %v2456_v47 = vld [vmem:[#allocation15_spill] sm:$0xff] }
 0x173   :  { %v843_v46 = vmul.f32 %v2031_v62, %v767_v8  ;;  %v1218_v11 = vpack.c.bf16 %v915_v13, %v914_v41  ;;  %v916_v50 = vadd.f32 %v2033_v26, %v840_v20  ;;  %v917_v42 = vadd.f32 %v2035_v25, %v841_v28 }
 0x174   :  { %1149 = vst [vmem:[%s2341_s4 + $0x98] sm:$0xff] %v1217_v4  ;;  %v918_v52 = vadd.f32 %v2033_v26, %v842_v39  ;;  %v683_v1 = vadd.f32 1e-05, %v651_v61  ;;  %v652_v15 = vmul.f32 0.00390625, %v2181_v2  ;;  %v653_v3 = vmul.f32 0.00390625, %v613_v12  ;;  %v1277_v32 = vpop.eup %1276 }
 0x175   :  { %v919_v53 = vadd.f32 %v2035_v25, %v843_v46  ;;  %1150 = vst [vmem:[%s2341_s4 + $0xa0] sm:$0xff] %v1218_v11  ;;  %v1219_v27 = vpack.c.bf16 %v917_v42, %v916_v50  ;;  %v654_v7 = vmul.f32 0.00390625, %v616_v14  ;;  %v655_v35 = vmul.f32 0.00390625, %v619_v60  ;;  %v2454_v14 = vld [vmem:[#allocation13_spill] sm:$0xff] }
 0x176   :  { %1280 = vrsqrt.f32 %v683_v1  ;;  %v684_v21 = vadd.f32 1e-05, %v652_v15  ;;  %v656_v22 = vmul.f32 0.00390625, %v622_v59  ;;  %v685_v5 = vadd.f32 1e-05, %v653_v3 }
 0x177   :  { %v1220_v57 = vpack.c.bf16 %v919_v53, %v918_v52  ;;  %1151 = vst [vmem:[%s2341_s4 + $0xa8] sm:$0xff] %v1219_v27  ;;  %v686_v10 = vadd.f32 1e-05, %v654_v7  ;;  %v687_v2 = vadd.f32 1e-05, %v655_v35  ;;  %v657_v51 = vmul.f32 0.00390625, %v625_v18 }
 0x178   :  { %1282 = vrsqrt.f32 %v684_v21  ;;  %v688_v12 = vadd.f32 1e-05, %v656_v22  ;;  %v768_v6 = vmul.f32 %v1277_v32, %v2453_v16  ;;  %v769_v24 = vmul.f32 %v1277_v32, %v1933_v44  ;;  %v2457_v22 = vld [vmem:[#allocation16_spill] sm:$0xff]  ;;  %v2459_v32 = vld [vmem:[#allocation18_spill] sm:$0xff] }
 0x179   :  { %1152 = vst [vmem:[%s2341_s4 + $0xb0] sm:$0xff] %v1220_v57  ;;  %1284 = vrsqrt.f32 %v685_v5  ;;  %v689_v23 = vadd.f32 1e-05, %v657_v51 }
 0x17a   :  { %1286 = vrsqrt.f32 %v686_v10  ;;  %v844_v0 = vmul.f32 %v2029_v40, %v768_v6  ;;  %v845_v49 = vmul.f32 %v2031_v62, %v769_v24 }
 0x17b   :  { %1288 = vrsqrt.f32 %v687_v2 }
 0x17c   :  { %1290 = vrsqrt.f32 %v688_v12  ;;  %v1279_v33 = vpop.eup %1278  ;;  %v920_v30 = vadd.f32 %v2033_v26, %v844_v0  ;;  %v921_v60 = vadd.f32 %v2035_v25, %v845_v49  ;;  %v2461_v0 = vld [vmem:[#allocation20_spill] sm:$0xff] }
 0x17d   :  { %v770_v9 = vmul.f32 %v1279_v33, %v2454_v14  ;;  %v771_v48 = vmul.f32 %v1279_v33, %v2455_v43  ;;  %1292 = vrsqrt.f32 %v689_v23  ;;  %v2460_v14 = vld [vmem:[#allocation19_spill] sm:$0xff] }
 0x17e   :  { %v1221_v4 = vpack.c.bf16 %v921_v60, %v920_v30 }
 0x17f   :  { %v846_v38 = vmul.f32 %v2029_v40, %v770_v9  ;;  %v847_v29 = vmul.f32 %v2031_v62, %v771_v48 }
 0x180   :  { %v1281_v63 = vpop.eup %1280  ;;  %1153 = vst [vmem:[%s2341_s4 + $0xb8] sm:$0xff] %v1221_v4 }
 0x181   :  { %v772_v44 = vmul.f32 %v1281_v63, %v2456_v47  ;;  %v773_v41 = vmul.f32 %v1281_v63, %v1953_v55  ;;  %v922_v58 = vadd.f32 %v2033_v26, %v846_v38  ;;  %v923_v36 = vadd.f32 %v2035_v25, %v847_v29 }
 0x182   :  { %v1283_v45 = vpop.eup %1282 }
 0x183   :  { %v1285_v8 = vpop.eup %1284  ;;  %v848_v13 = vmul.f32 %v2029_v40, %v772_v44  ;;  %v849_v20 = vmul.f32 %v2031_v62, %v773_v41  ;;  %v774_v28 = vmul.f32 %v1283_v45, %v1964_v37  ;;  %v1222_v46 = vpack.c.bf16 %v923_v36, %v922_v58 }
 0x184   :  { %v1287_v39 = vpop.eup %1286  ;;  %v775_v61 = vmul.f32 %v1283_v45, %v1967_v54  ;;  %v776_v11 = vmul.f32 %v1285_v8, %v1970_v19  ;;  %v777_v55 = vmul.f32 %v1285_v8, %v1973_v34 }
 0x185   :  { %v1289_v50 = vpop.eup %1288  ;;  %v924_v42 = vadd.f32 %v2033_v26, %v848_v13  ;;  %v925_v59 = vadd.f32 %v2035_v25, %v849_v20  ;;  %v850_v52 = vmul.f32 %v2029_v40, %v774_v28  ;;  %v778_v37 = vmul.f32 %v1287_v39, %v1984_v56  ;;  %1154 = vst [vmem:[%s2341_s4 + $0xc0] sm:$0xff] %v1222_v46 }
 0x186   :  { %v1291_v53 = vpop.eup %1290  ;;  %v851_v54 = vmul.f32 %v2031_v62, %v775_v61  ;;  %v852_v19 = vmul.f32 %v2029_v40, %v776_v11  ;;  %v853_v34 = vmul.f32 %v2031_v62, %v777_v55  ;;  %v779_v1 = vmul.f32 %v1287_v39, %v1987_v17 }
 0x187   :  { %v1223_v15 = vpack.c.bf16 %v925_v59, %v924_v42  ;;  %v926_v27 = vadd.f32 %v2033_v26, %v850_v52  ;;  %v854_v3 = vmul.f32 %v2029_v40, %v778_v37  ;;  %v780_v56 = vmul.f32 %v1289_v50, %v1990_v31  ;;  %v1293_v7 = vpop.eup %1292  ;;  %v2458_v31 = vld [vmem:[#allocation17_spill] sm:$0xff] }
 0x188   :  { %v927_v35 = vadd.f32 %v2035_v25, %v851_v54  ;;  %v928_v18 = vadd.f32 %v2033_v26, %v852_v19  ;;  %v929_v57 = vadd.f32 %v2035_v25, %v853_v34  ;;  %v855_v21 = vmul.f32 %v2031_v62, %v779_v1 }
 0x189   :  { %1155 = vst [vmem:[%s2341_s4 + $0xc8] sm:$0xff] %v1223_v15  ;;  %v930_v17 = vadd.f32 %v2033_v26, %v854_v3  ;;  %v781_v5 = vmul.f32 %v1289_v50, %v2457_v22  ;;  %v856_v10 = vmul.f32 %v2029_v40, %v780_v56  ;;  %v782_v2 = vmul.f32 %v1291_v53, %v2458_v31 }
 0x18a   :  { %v1224_v12 = vpack.c.bf16 %v927_v35, %v926_v27  ;;  %v1225_v51 = vpack.c.bf16 %v929_v57, %v928_v18  ;;  %v931_v23 = vadd.f32 %v2035_v25, %v855_v21  ;;  %v783_v33 = vmul.f32 %v1291_v53, %v2459_v32 }
 0x18b   :  { %v857_v16 = vmul.f32 %v2031_v62, %v781_v5  ;;  %v932_v6 = vadd.f32 %v2033_v26, %v856_v10  ;;  %v858_v24 = vmul.f32 %v2029_v40, %v782_v2  ;;  %v784_v9 = vmul.f32 %v1293_v7, %v2460_v14 }
 0x18c   :  { %1156 = vst [vmem:[%s2341_s4 + $0xd0] sm:$0xff] %v1224_v12  ;;  %1157 = vst [vmem:[%s2341_s4 + $0xd8] sm:$0xff] %v1225_v51  ;;  %v1226_v43 = vpack.c.bf16 %v931_v23, %v930_v17  ;;  %v859_v48 = vmul.f32 %v2031_v62, %v783_v33  ;;  %v785_v49 = vmul.f32 %v1293_v7, %v2461_v0 }
 0x18d   :  { %v933_v63 = vadd.f32 %v2035_v25, %v857_v16  ;;  %v934_v38 = vadd.f32 %v2033_v26, %v858_v24  ;;  %v860_v29 = vmul.f32 %v2029_v40, %v784_v9 }
 0x18e   :  { %1158 = vst [vmem:[%s2341_s4 + $0xe0] sm:$0xff] %v1226_v43  ;;  %v935_v30 = vadd.f32 %v2035_v25, %v859_v48  ;;  %v861_v60 = vmul.f32 %v2031_v62, %v785_v49 }
 0x18f   :  { %v1227_v47 = vpack.c.bf16 %v933_v63, %v932_v6  ;;  %v936_v44 = vadd.f32 %v2033_v26, %v860_v29 }
 0x190   :  { %v1228_v41 = vpack.c.bf16 %v935_v30, %v934_v38  ;;  %v937_v45 = vadd.f32 %v2035_v25, %v861_v60 }
 0x191   :  { %1159 = vst [vmem:[%s2341_s4 + $0xe8] sm:$0xff] %v1227_v47 }
 0x192   :  { %1160 = vst [vmem:[%s2341_s4 + $0xf0] sm:$0xff] %v1228_v41  ;;  %v1229_v40 = vpack.c.bf16 %v937_v45, %v936_v44 }
 0x194   :  { %1161 = vst [vmem:[%s2341_s4 + $0xf8] sm:$0xff] %v1229_v40 }

// kernel: pretrained_encoder_with_head.15
= control target key start
LH: loop header
LB: loop body
LE: loop exit
PB: predicated region body
PF: predicated region fallthrough
CT: control target
= control target key end

     0   :  { %s3212_s12 = smov 0   ;;  %s3214_s13 = smov 0   ;;  %s3868_s0 = inlined_call_operand.vmem [shape: bf16[256,256], index: 0, kind: input, shape index: {}]   ;;  %s3869_s1 = inlined_call_operand.vmem [shape: bf16[256,768], index: 1, kind: input, shape index: {}]   ;;  %s3870_s2 = inlined_call_operand.vmem [shape: f32[1,768], index: 2, kind: input, shape index: {}]   ;;  %s3871_s3 = inlined_call_operand.vmem [shape: bf16[256,768], index: 3, kind: output, shape index: {}]  }
   0x1   :  { %s3216_s14 = smov 0   ;;  %s3218_s15 = smov 0  }
   0x2   :  { %s3220_s16 = smov 0  }
   0x3 LB: > { %s28_s17 = sadd.s32 1, %s3186_s15  ;;  %s2538_s18 = sadd.s32 4294967295, %s3190_s16   ;;  %s3190_s16 = sphi %s3220_s16, %s13_s16   ;;  %s3186_s15 = sphi %s3218_s15, %s3876_s15   ;;  %s3182_s14 = sphi %s3216_s14, %s3875_s14   ;;  %s3178_s13 = sphi %s3214_s13, %s3874_s13   ;;  %s3174_s12 = sphi %s3212_s12, %s3873_s12  }
   0x4   : > { %p30_p0 = scmp.ge.s32.totalorder %s28_s17, 2  ;;  %p76_p1 = scmp.ne.s32.totalorder %s3178_s13, %s3174_s12 }
   0x5   : > { %p77_p2 = scmp.eq.s32.totalorder %s3190_s16, 0  ;;  %p134_p4 = scmp.eq.s32.totalorder %s2538_s18, 1 }
   0x6   : > { %s3878_s17 = smov (%p30_p0, %s28_s17), 0  ;;  %s69_s20 = sadd.s32 1, %s3178_s13 }
   0x7   : > { %p78_p3 = por %p77_p2, %p76_p1  ;;  %s65_s19 = ssub.s32 %s3186_s15, %s3878_s17 }
   0x8   : > { %p67_p5 = scmp.eq.s32.totalorder %s65_s19, 0  ;;  %p3247_p6 = por %p134_p4, %p76_p1 }
   0x9   : > { %p2542_p7 = scmp.ge.s32.totalorder %s3190_s16, 2 }
   0xa   : > { %s3252_s22 = scalar_select %p67_p5, %s3178_s13, %s69_s20  }
   0xb   : > { %171 = sbr.rel (%p2542_p7) target bundleno = 60 (0x3c), region = 20 }
  0x12   : > { %174 = sbr.rel (!%p78_p3) target bundleno = 60 (0x3c), region = 24  ;;  %s176_s23 = sand.u32 (%p78_p3), 1, %s3178_s13  }
  0x13   : > { %s2820_s24 = smul.u32 (%p78_p3), 12, %s3186_s15 }
  0x14   : > { %s2998_s25 = smul.u32 (%p78_p3), 384, %s176_s23 }
  0x15   : > { %s3260_s28 = scalar_lea.vmem (%p78_p3), %s3869_s1, %s2820_s24 }
  0x16   : > { %v199_v0 = vld [vmem:[%s3260_s28] sm:$0xff] (%p78_p3)  ;;  %v201_v1 = vld [vmem:[%s3260_s28 + $0x18] sm:$0xff] (%p78_p3)  ;;  %v203_v2 = vld [vmem:[%s3260_s28 + $0x30] sm:$0xff] (%p78_p3)  ;;  %s3265_s29 = scalar_lea.vmem (%p78_p3), [#allocation3], %s2998_s25 }
  0x17   : > { %200 = vst [vmem:[%s3265_s29] sm:$0xff] (%p78_p3), %v199_v0  ;;  %202 = vst [vmem:[%s3265_s29 + $0xc] sm:$0xff] (%p78_p3), %v201_v1  ;;  %v205_v3 = vld [vmem:[%s3260_s28 + $0x48] sm:$0xff] (%p78_p3)  ;;  %v207_v4 = vld [vmem:[%s3260_s28 + $0x60] sm:$0xff] (%p78_p3) }
  0x18   : > { %204 = vst [vmem:[%s3265_s29 + $0x18] sm:$0xff] (%p78_p3), %v203_v2  ;;  %v209_v5 = vld [vmem:[%s3260_s28 + $0x78] sm:$0xff] (%p78_p3)  ;;  %206 = vst [vmem:[%s3265_s29 + $0x24] sm:$0xff] (%p78_p3), %v205_v3  ;;  %v211_v6 = vld [vmem:[%s3260_s28 + $0x90] sm:$0xff] (%p78_p3) }
  0x19   : > { %208 = vst [vmem:[%s3265_s29 + $0x30] sm:$0xff] %v207_v4  ;;  %210 = vst [vmem:[%s3265_s29 + $0x3c] sm:$0xff] %v209_v5  ;;  %v213_v7 = vld [vmem:[%s3260_s28 + $0xa8] sm:$0xff]  ;;  %v215_v8 = vld [vmem:[%s3260_s28 + $0xc0] sm:$0xff] }
  0x1a   : > { %212 = vst [vmem:[%s3265_s29 + $0x48] sm:$0xff] %v211_v6  ;;  %214 = vst [vmem:[%s3265_s29 + $0x54] sm:$0xff] %v213_v7  ;;  %v217_v9 = vld [vmem:[%s3260_s28 + $0xd8] sm:$0xff]  ;;  %v219_v10 = vld [vmem:[%s3260_s28 + $0xf0] sm:$0xff] }
  0x1b   : > { %216 = vst [vmem:[%s3265_s29 + $0x60] sm:$0xff] %v215_v8  ;;  %v221_v11 = vld [vmem:[%s3260_s28 + $0x108] sm:$0xff]  ;;  %218 = vst [vmem:[%s3265_s29 + $0x6c] sm:$0xff] %v217_v9  ;;  %v223_v12 = vld [vmem:[%s3260_s28 + $0x120] sm:$0xff] }
  0x1c   : > { %220 = vst [vmem:[%s3265_s29 + $0x78] sm:$0xff] %v219_v10  ;;  %222 = vst [vmem:[%s3265_s29 + $0x84] sm:$0xff] %v221_v11  ;;  %v225_v13 = vld [vmem:[%s3260_s28 + $0x138] sm:$0xff]  ;;  %v227_v14 = vld [vmem:[%s3260_s28 + $0x150] sm:$0xff] }
  0x1d   : > { %224 = vst [vmem:[%s3265_s29 + $0x90] sm:$0xff] %v223_v12  ;;  %226 = vst [vmem:[%s3265_s29 + $0x9c] sm:$0xff] %v225_v13  ;;  %v229_v15 = vld [vmem:[%s3260_s28 + $0x168] sm:$0xff]  ;;  %v231_v16 = vld [vmem:[%s3260_s28 + $0x180] sm:$0xff] }
  0x1e   : > { %228 = vst [vmem:[%s3265_s29 + $0xa8] sm:$0xff] %v227_v14  ;;  %v233_v17 = vld [vmem:[%s3260_s28 + $0x198] sm:$0xff]  ;;  %230 = vst [vmem:[%s3265_s29 + $0xb4] sm:$0xff] %v229_v15  ;;  %v235_v18 = vld [vmem:[%s3260_s28 + $0x1b0] sm:$0xff] }
  0x1f   : > { %232 = vst [vmem:[%s3265_s29 + $0xc0] sm:$0xff] %v231_v16  ;;  %234 = vst [vmem:[%s3265_s29 + $0xcc] sm:$0xff] %v233_v17  ;;  %v237_v19 = vld [vmem:[%s3260_s28 + $0x1c8] sm:$0xff]  ;;  %v239_v20 = vld [vmem:[%s3260_s28 + $0x1e0] sm:$0xff] }
  0x20   : > { %236 = vst [vmem:[%s3265_s29 + $0xd8] sm:$0xff] %v235_v18  ;;  %238 = vst [vmem:[%s3265_s29 + $0xe4] sm:$0xff] %v237_v19  ;;  %v241_v21 = vld [vmem:[%s3260_s28 + $0x1f8] sm:$0xff]  ;;  %v243_v22 = vld [vmem:[%s3260_s28 + $0x210] sm:$0xff] }
  0x21   : > { %240 = vst [vmem:[%s3265_s29 + $0xf0] sm:$0xff] %v239_v20  ;;  %v245_v23 = vld [vmem:[%s3260_s28 + $0x228] sm:$0xff]  ;;  %242 = vst [vmem:[%s3265_s29 + $0xfc] sm:$0xff] %v241_v21  ;;  %v247_v24 = vld [vmem:[%s3260_s28 + $0x240] sm:$0xff] }
  0x22   : > { %244 = vst [vmem:[%s3265_s29 + $0x108] sm:$0xff] %v243_v22  ;;  %246 = vst [vmem:[%s3265_s29 + $0x114] sm:$0xff] %v245_v23  ;;  %v249_v25 = vld [vmem:[%s3260_s28 + $0x258] sm:$0xff]  ;;  %v251_v26 = vld [vmem:[%s3260_s28 + $0x270] sm:$0xff] }
  0x23   : > { %248 = vst [vmem:[%s3265_s29 + $0x120] sm:$0xff] %v247_v24  ;;  %250 = vst [vmem:[%s3265_s29 + $0x12c] sm:$0xff] %v249_v25  ;;  %v253_v27 = vld [vmem:[%s3260_s28 + $0x288] sm:$0xff]  ;;  %v255_v28 = vld [vmem:[%s3260_s28 + $0x2a0] sm:$0xff] }
  0x24   : > { %252 = vst [vmem:[%s3265_s29 + $0x138] sm:$0xff] %v251_v26  ;;  %v257_v29 = vld [vmem:[%s3260_s28 + $0x2b8] sm:$0xff]  ;;  %254 = vst [vmem:[%s3265_s29 + $0x144] sm:$0xff] %v253_v27  ;;  %v259_v30 = vld [vmem:[%s3260_s28 + $0x2d0] sm:$0xff] }
  0x25   : > { %256 = vst [vmem:[%s3265_s29 + $0x150] sm:$0xff] %v255_v28  ;;  %258 = vst [vmem:[%s3265_s29 + $0x15c] sm:$0xff] %v257_v29  ;;  %v261_v31 = vld [vmem:[%s3260_s28 + $0x2e8] sm:$0xff]  ;;  %v2546_v33 = vld [vmem:[%s3260_s28 + $0x20] sm:$0xf] }
  0x26   : > { %v2544_v32 = vld [vmem:[%s3260_s28 + $0x8] sm:$0xf]  ;;  %260 = vst [vmem:[%s3265_s29 + $0x168] sm:$0xff] %v259_v30  ;;  %262 = vst [vmem:[%s3265_s29 + $0x174] sm:$0xff] %v261_v31  ;;  %v2548_v34 = vld [vmem:[%s3260_s28 + $0x38] sm:$0xf] }
  0x27   : > { %2545 = vst [vmem:[%s3265_s29 + $0x8] sm:$0xf] %v2544_v32  ;;  %v2550_v35 = vld [vmem:[%s3260_s28 + $0x50] sm:$0xf]  ;;  %2547 = vst [vmem:[%s3265_s29 + $0x14] sm:$0xf] %v2546_v33 }
  0x28   : > { %2549 = vst [vmem:[%s3265_s29 + $0x20] sm:$0xf] %v2548_v34  ;;  %2551 = vst [vmem:[%s3265_s29 + $0x2c] sm:$0xf] %v2550_v35  ;;  %v2552_v36 = vld [vmem:[%s3260_s28 + $0x68] sm:$0xf] }
  0x29   : > { %v2554_v37 = vld [vmem:[%s3260_s28 + $0x80] sm:$0xf]  ;;  %v2556_v38 = vld [vmem:[%s3260_s28 + $0x98] sm:$0xf]  ;;  %2553 = vst [vmem:[%s3265_s29 + $0x38] sm:$0xf] %v2552_v36 }
  0x2a   : > { %2555 = vst [vmem:[%s3265_s29 + $0x44] sm:$0xf] %v2554_v37  ;;  %2557 = vst [vmem:[%s3265_s29 + $0x50] sm:$0xf] %v2556_v38  ;;  %v2558_v39 = vld [vmem:[%s3260_s28 + $0xb0] sm:$0xf] }
  0x2b   : > { %v2560_v40 = vld [vmem:[%s3260_s28 + $0xc8] sm:$0xf]  ;;  %v2562_v41 = vld [vmem:[%s3260_s28 + $0xe0] sm:$0xf]  ;;  %2559 = vst [vmem:[%s3265_s29 + $0x5c] sm:$0xf] %v2558_v39 }
  0x2c   : > { %2561 = vst [vmem:[%s3265_s29 + $0x68] sm:$0xf] %v2560_v40  ;;  %2563 = vst [vmem:[%s3265_s29 + $0x74] sm:$0xf] %v2562_v41  ;;  %v2564_v42 = vld [vmem:[%s3260_s28 + $0xf8] sm:$0xf] }
  0x2d   : > { %v2566_v43 = vld [vmem:[%s3260_s28 + $0x110] sm:$0xf]  ;;  %v2568_v44 = vld [vmem:[%s3260_s28 + $0x128] sm:$0xf]  ;;  %2565 = vst [vmem:[%s3265_s29 + $0x80] sm:$0xf] %v2564_v42 }
  0x2e   : > { %2567 = vst [vmem:[%s3265_s29 + $0x8c] sm:$0xf] %v2566_v43  ;;  %2569 = vst [vmem:[%s3265_s29 + $0x98] sm:$0xf] %v2568_v44  ;;  %v2570_v45 = vld [vmem:[%s3260_s28 + $0x140] sm:$0xf] }
  0x2f   : > { %v2572_v46 = vld [vmem:[%s3260_s28 + $0x158] sm:$0xf]  ;;  %v2574_v47 = vld [vmem:[%s3260_s28 + $0x170] sm:$0xf]  ;;  %2571 = vst [vmem:[%s3265_s29 + $0xa4] sm:$0xf] %v2570_v45 }
  0x30   : > { %2573 = vst [vmem:[%s3265_s29 + $0xb0] sm:$0xf] %v2572_v46  ;;  %2575 = vst [vmem:[%s3265_s29 + $0xbc] sm:$0xf] %v2574_v47  ;;  %v2576_v48 = vld [vmem:[%s3260_s28 + $0x188] sm:$0xf] }
  0x31   : > { %v2578_v49 = vld [vmem:[%s3260_s28 + $0x1a0] sm:$0xf]  ;;  %v2580_v50 = vld [vmem:[%s3260_s28 + $0x1b8] sm:$0xf]  ;;  %2577 = vst [vmem:[%s3265_s29 + $0xc8] sm:$0xf] %v2576_v48 }
  0x32   : > { %2579 = vst [vmem:[%s3265_s29 + $0xd4] sm:$0xf] %v2578_v49  ;;  %2581 = vst [vmem:[%s3265_s29 + $0xe0] sm:$0xf] %v2580_v50  ;;  %v2582_v51 = vld [vmem:[%s3260_s28 + $0x1d0] sm:$0xf] }
  0x33   : > { %v2584_v52 = vld [vmem:[%s3260_s28 + $0x1e8] sm:$0xf]  ;;  %v2586_v53 = vld [vmem:[%s3260_s28 + $0x200] sm:$0xf]  ;;  %2583 = vst [vmem:[%s3265_s29 + $0xec] sm:$0xf] %v2582_v51 }
  0x34   : > { %2585 = vst [vmem:[%s3265_s29 + $0xf8] sm:$0xf] %v2584_v52  ;;  %2587 = vst [vmem:[%s3265_s29 + $0x104] sm:$0xf] %v2586_v53  ;;  %v2588_v54 = vld [vmem:[%s3260_s28 + $0x218] sm:$0xf] }
  0x35   : > { %v2590_v55 = vld [vmem:[%s3260_s28 + $0x230] sm:$0xf]  ;;  %v2592_v56 = vld [vmem:[%s3260_s28 + $0x248] sm:$0xf]  ;;  %2589 = vst [vmem:[%s3265_s29 + $0x110] sm:$0xf] %v2588_v54 }
  0x36   : > { %2591 = vst [vmem:[%s3265_s29 + $0x11c] sm:$0xf] %v2590_v55  ;;  %2593 = vst [vmem:[%s3265_s29 + $0x128] sm:$0xf] %v2592_v56  ;;  %v2594_v57 = vld [vmem:[%s3260_s28 + $0x260] sm:$0xf] }
  0x37   : > { %v2596_v58 = vld [vmem:[%s3260_s28 + $0x278] sm:$0xf]  ;;  %v2598_v59 = vld [vmem:[%s3260_s28 + $0x290] sm:$0xf]  ;;  %2595 = vst [vmem:[%s3265_s29 + $0x134] sm:$0xf] %v2594_v57 }
  0x38   : > { %2597 = vst [vmem:[%s3265_s29 + $0x140] sm:$0xf] %v2596_v58  ;;  %2599 = vst [vmem:[%s3265_s29 + $0x14c] sm:$0xf] %v2598_v59  ;;  %v2600_v60 = vld [vmem:[%s3260_s28 + $0x2a8] sm:$0xf] }
  0x39   : > { %v2602_v61 = vld [vmem:[%s3260_s28 + $0x2c0] sm:$0xf]  ;;  %v2604_v62 = vld [vmem:[%s3260_s28 + $0x2d8] sm:$0xf]  ;;  %2601 = vst [vmem:[%s3265_s29 + $0x158] sm:$0xf] %v2600_v60 }
  0x3a   : > { %2603 = vst [vmem:[%s3265_s29 + $0x164] sm:$0xf] %v2602_v61  ;;  %2605 = vst [vmem:[%s3265_s29 + $0x170] sm:$0xf] %v2604_v62  ;;  %v2606_v63 = vld [vmem:[%s3260_s28 + $0x2f0] sm:$0xf] }
  0x3b   : > { %2607 = vst [vmem:[%s3265_s29 + $0x17c] sm:$0xf] %v2606_v63 }
  0x3c PF: > { %p2608_p8 = scmp.ge.s32.totalorder %s3190_s16, 1  ;;  %p346_p9 = scmp.lt.s32.totalorder %s3190_s16, 3 }
  0x3e   : > { %p347_p10 = pnand %p2608_p8, %p346_p9 }
  0x3f   : > { %s353_s30 = sand.u32 (!%p347_p10), 1, %s3174_s12   ;;  %v3103_v0 = vld [vmem:[%s3868_s0 + $0x4] ss:$8 sps:$4 sm:$0xff] (!%p347_p10)   ;;  %v3101_v40 = vld [vmem:[%s3868_s0] ss:$8 sps:$4 sm:$0xff] (!%p347_p10)   ;;  %s403_s18 = smul.u32 (!%p347_p10), 3, %s3182_s14 }
  0x40   : > { %350 = sbr.rel (%p347_p10) target bundleno = 481 (0x1e1), region = 54  ;;  %1344 = vmatprep.mubr.bf16.mxu1 (!%p347_p10), %v3103_v0  ;;  %1151 = vmatprep.mubr.bf16.mxu0 (!%p347_p10), %v3103_v0  ;;  %v3107_v41 = vld [vmem:[%s3868_s0 + $0x14] ss:$8 sps:$4 sm:$0xff] (!%p347_p10)   ;;  %v3109_v46 = vld [vmem:[%s3868_s0 + $0x10] ss:$8 sps:$4 sm:$0xff] (!%p347_p10)  }
  0x41   : > { %s3395_s4 = smul.u32 (!%p347_p10), 384, %s353_s30  ;;  %v3110_v47 = vld [vmem:[%s3868_s0 + $0x24] ss:$8 sps:$4 sm:$0xff] (!%p347_p10)   ;;  %v3112_v52 = vld [vmem:[%s3868_s0 + $0x20] ss:$8 sps:$4 sm:$0xff] (!%p347_p10)   ;;  %p404_p11 = scmp.lt.s32.totalorder (!%p347_p10), %s403_s18, 5 }
  0x42   : > { %v3113_v53 = vld [vmem:[%s3868_s0 + $0x34] ss:$8 sps:$4 sm:$0xff] (!%p347_p10)   ;;  %v3115_v55 = vld [vmem:[%s3868_s0 + $0x30] ss:$8 sps:$4 sm:$0xff] (!%p347_p10)   ;;  %v3116_v56 = vld [vmem:[%s3868_s0 + $0x44] ss:$8 sps:$4 sm:$0xff] (!%p347_p10)  }
  0x43   : > { %s3401_s7 = scalar_lea.vmem (!%p347_p10), [#allocation3], %s3395_s4  ;;  %v3118_v57 = vld [vmem:[%s3868_s0 + $0x40] ss:$8 sps:$4 sm:$0xff] (!%p347_p10)   ;;  %v3119_v58 = vld [vmem:[%s3868_s0 + $0x54] ss:$8 sps:$4 sm:$0xff] (!%p347_p10)   ;;  %s3553_s24 = scalar_lea.vmem (!%p347_p10), [#allocation4], %s3395_s4 }
  0x44   : > { %v3040_v1 = vld [vmem:[%s3401_s7 + $0x4] ss:$12 sps:$4 sm:$0xff] (!%p347_p10)   ;;  %v3042_v2 = vld [vmem:[%s3401_s7] ss:$12 sps:$4 sm:$0xff] (!%p347_p10)   ;;  %v3043_v3 = vld [vmem:[%s3401_s7 + $0x1c] ss:$12 sps:$4 sm:$0xff] (!%p347_p10)  }
  0x45   : > { %1119 = vmatprep.subr.bf16.mxu0 (!%p347_p10), %v3040_v1  ;;  %v3045_v4 = vld [vmem:[%s3401_s7 + $0x18] ss:$12 sps:$4 sm:$0xff] (!%p347_p10)   ;;  %v3046_v5 = vld [vmem:[%s3401_s7 + $0x34] ss:$12 sps:$4 sm:$0xff] (!%p347_p10)   ;;  %v3048_v6 = vld [vmem:[%s3401_s7 + $0x30] ss:$12 sps:$4 sm:$0xff] (!%p347_p10)  }
  0x46   : > { %1120 = vmatpush1.bf16.msra.mxu0 (!%p347_p10), %v3042_v2  ;;  %v3049_v7 = vld [vmem:[%s3401_s7 + $0x4c] ss:$12 sps:$4 sm:$0xff] (!%p347_p10)   ;;  %v3061_v8 = vld [vmem:[%s3401_s7 + $0xc8] ss:$12 sps:$4 sm:$0xff] (!%p347_p10)   ;;  %v3052_v10 = vld [vmem:[%s3401_s7 + $0x64] ss:$12 sps:$4 sm:$0xff] (!%p347_p10)  }
  0x47   : > { %1121 = vmatprep.subr.bf16.mxu0 %v3043_v3  ;;  %v3051_v9 = vld [vmem:[%s3401_s7 + $0x48] ss:$12 sps:$4 sm:$0xff]   ;;  %2886 = vmatprep.subr.bf16.mxu1 %v3061_v8  ;;  %v3066_v12 = vld [vmem:[%s3401_s7 + $0xe0] ss:$12 sps:$4 sm:$0xff]   ;;  %v3071_v16 = vld [vmem:[%s3401_s7 + $0xf8] ss:$12 sps:$4 sm:$0xff]  }
  0x48   : > { %v3064_v11 = vld [vmem:[%s3401_s7 + $0x8] ss:$12 sps:$4 sm:$0xff]   ;;  %v3054_v13 = vld [vmem:[%s3401_s7 + $0x60] ss:$12 sps:$4 sm:$0xff]   ;;  %v3057_v17 = vld [vmem:[%s3401_s7 + $0x78] ss:$12 sps:$4 sm:$0xff]  }
  0x49   : > { %2887 = vmatpush3.bf16.msra.mxu1 %v3064_v11  ;;  %v3055_v14 = vld [vmem:[%s3401_s7 + $0x7c] ss:$12 sps:$4 sm:$0xff]   ;;  %v3069_v15 = vld [vmem:[%s3401_s7 + $0x20] ss:$12 sps:$4 sm:$0xff]   ;;  %v3074_v18 = vld [vmem:[%s3401_s7 + $0x38] ss:$12 sps:$4 sm:$0xff]  }
  0x4a   : > { %1122 = vmatpush1.bf16.msra.mxu0 %v3045_v4  ;;  %2888 = vmatprep.subr.bf16.mxu1 %v3066_v12  ;;  %v3058_v19 = vld [vmem:[%s3401_s7 + $0x94] ss:$12 sps:$4 sm:$0xff]   ;;  %v3076_v20 = vld [vmem:[%s3401_s7 + $0x110] ss:$12 sps:$4 sm:$0xff]   ;;  %v3062_v24 = vld [vmem:[%s3401_s7 + $0xac] ss:$12 sps:$4 sm:$0xff]  }
  0x4b   : > { %1123 = vmatprep.subr.bf16.mxu0 %v3046_v5  ;;  %v3060_v21 = vld [vmem:[%s3401_s7 + $0x90] ss:$12 sps:$4 sm:$0xff]   ;;  %v3081_v23 = vld [vmem:[%s3401_s7 + $0x128] ss:$12 sps:$4 sm:$0xff]   ;;  %v3086_v27 = vld [vmem:[%s3401_s7 + $0x140] ss:$12 sps:$4 sm:$0xff]  }
  0x4c   : > { %v3079_v22 = vld [vmem:[%s3401_s7 + $0x50] ss:$12 sps:$4 sm:$0xff]   ;;  %v3065_v25 = vld [vmem:[%s3401_s7 + $0xa8] ss:$12 sps:$4 sm:$0xff]   ;;  %v3070_v29 = vld [vmem:[%s3401_s7 + $0xc0] ss:$12 sps:$4 sm:$0xff]  }
  0x4d   : > { %2889 = vmatpush3.bf16.msra.mxu1 %v3069_v15  ;;  %v3084_v26 = vld [vmem:[%s3401_s7 + $0x68] ss:$12 sps:$4 sm:$0xff]   ;;  %v3067_v28 = vld [vmem:[%s3401_s7 + $0xc4] ss:$12 sps:$4 sm:$0xff]   ;;  %v3089_v30 = vld [vmem:[%s3401_s7 + $0x80] ss:$12 sps:$4 sm:$0xff]  }
  0x4e   : > { %1124 = vmatpush1.bf16.msra.mxu0 %v3048_v6  ;;  %2890 = vmatprep.subr.bf16.mxu1 %v3071_v16  ;;  %v3091_v31 = vld [vmem:[%s3401_s7 + $0x158] ss:$12 sps:$4 sm:$0xff]   ;;  %v3072_v32 = vld [vmem:[%s3401_s7 + $0xdc] ss:$12 sps:$4 sm:$0xff]   ;;  %v3077_v36 = vld [vmem:[%s3401_s7 + $0xf4] ss:$12 sps:$4 sm:$0xff]   ;;  %v1766_v16 = vlaneseq }
  0x4f   : > { %1125 = vmatprep.subr.bf16.mxu0 %v3049_v7  ;;  %v3094_v33 = vld [vmem:[%s3401_s7 + $0x98] ss:$12 sps:$4 sm:$0xff]   ;;  %v3096_v35 = vld [vmem:[%s3401_s7 + $0x170] ss:$12 sps:$4 sm:$0xff]   ;;  %v3085_v42 = vld [vmem:[%s3401_s7 + $0x108] ss:$12 sps:$4 sm:$0xff]  }
  0x50   : > { %v3075_v34 = vld [vmem:[%s3401_s7 + $0xd8] ss:$12 sps:$4 sm:$0xff]   ;;  %v3099_v37 = vld [vmem:[%s3401_s7 + $0xb0] ss:$12 sps:$4 sm:$0xff]   ;;  %v3090_v44 = vld [vmem:[%s3401_s7 + $0x120] ss:$12 sps:$4 sm:$0xff]  }
  0x51   : > { %2891 = vmatpush3.bf16.msra.mxu1 %v3074_v18  ;;  %v3080_v38 = vld [vmem:[%s3401_s7 + $0xf0] ss:$12 sps:$4 sm:$0xff]   ;;  %v3082_v39 = vld [vmem:[%s3401_s7 + $0x10c] ss:$12 sps:$4 sm:$0xff]   ;;  %v3097_v49 = vld [vmem:[%s3401_s7 + $0x154] ss:$12 sps:$4 sm:$0xff]  }
  0x52   : > { %1126 = vmatpush1.bf16.msra.mxu0 %v3051_v9  ;;  %2892 = vmatprep.subr.bf16.mxu1 %v3076_v20  ;;  %v3087_v43 = vld [vmem:[%s3401_s7 + $0x124] ss:$12 sps:$4 sm:$0xff]   ;;  %v3092_v45 = vld [vmem:[%s3401_s7 + $0x13c] ss:$12 sps:$4 sm:$0xff]   ;;  %v3104_v51 = vld [vmem:[%s3401_s7 + $0x16c] ss:$12 sps:$4 sm:$0xff]  }
  0x53   : > { %1127 = vmatprep.subr.bf16.mxu0 %v3052_v10  ;;  %v3095_v48 = vld [vmem:[%s3401_s7 + $0x138] ss:$12 sps:$4 sm:$0xff]   ;;  %v3100_v50 = vld [vmem:[%s3401_s7 + $0x150] ss:$12 sps:$4 sm:$0xff]   ;;  %v3106_v54 = vld [vmem:[%s3401_s7 + $0x168] ss:$12 sps:$4 sm:$0xff]  }
  0x54   : > { %v3121_v59 = vld [vmem:[%s3868_s0 + $0x50] ss:$8 sps:$4 sm:$0xff]   ;;  %v3122_v60 = vld [vmem:[%s3868_s0 + $0x64] ss:$8 sps:$4 sm:$0xff]   ;;  %v3124_v61 = vld [vmem:[%s3868_s0 + $0x60] ss:$8 sps:$4 sm:$0xff]  }
  0x55   : > { %2893 = vmatpush3.bf16.msra.mxu1 %v3079_v22  ;;  %v3125_v62 = vld [vmem:[%s3868_s0 + $0x74] ss:$8 sps:$4 sm:$0xff]   ;;  %v3127_v63 = vld [vmem:[%s3868_s0 + $0x70] ss:$8 sps:$4 sm:$0xff]   ;;  %v3128_v0 = vld [vmem:[%s3868_s0 + $0x84] ss:$8 sps:$4 sm:$0xff]  }
  0x56   : > { %1128 = vmatpush1.bf16.msra.mxu0 %v3054_v13  ;;  %2894 = vmatprep.subr.bf16.mxu1 %v3081_v23  ;;  %v3130_v1 = vld [vmem:[%s3868_s0 + $0x80] ss:$8 sps:$4 sm:$0xff]   ;;  %v3131_v2 = vld [vmem:[%s3868_s0 + $0x94] ss:$8 sps:$4 sm:$0xff]   ;;  %v3133_v3 = vld [vmem:[%s3868_s0 + $0x90] ss:$8 sps:$4 sm:$0xff]  }
  0x57   : > { %1129 = vmatprep.subr.bf16.mxu0 %v3055_v14  ;;  %v3134_v4 = vld [vmem:[%s3868_s0 + $0xa4] ss:$8 sps:$4 sm:$0xff]   ;;  %v3136_v5 = vld [vmem:[%s3868_s0 + $0xa0] ss:$8 sps:$4 sm:$0xff]   ;;  %v3137_v6 = vld [vmem:[%s3868_s0 + $0xb4] ss:$8 sps:$4 sm:$0xff]  }
  0x58   : > { %v3139_v7 = vld [vmem:[%s3868_s0 + $0xb0] ss:$8 sps:$4 sm:$0xff]   ;;  %v3140_v8 = vld [vmem:[%s3868_s0 + $0xc4] ss:$8 sps:$4 sm:$0xff]   ;;  %v3142_v9 = vld [vmem:[%s3868_s0 + $0xc0] ss:$8 sps:$4 sm:$0xff]  }
  0x59   : > { %2895 = vmatpush3.bf16.msra.mxu1 %v3084_v26  ;;  %v3143_v10 = vld [vmem:[%s3868_s0 + $0xd4] ss:$8 sps:$4 sm:$0xff]   ;;  %v3145_v11 = vld [vmem:[%s3868_s0 + $0xd0] ss:$8 sps:$4 sm:$0xff]   ;;  %v3146_v12 = vld [vmem:[%s3868_s0 + $0xe4] ss:$8 sps:$4 sm:$0xff]  }
  0x5a   : > { %1130 = vmatpush1.bf16.msra.mxu0 %v3057_v17  ;;  %2896 = vmatprep.subr.bf16.mxu1 %v3086_v27  ;;  %v3148_v13 = vld [vmem:[%s3868_s0 + $0xe0] ss:$8 sps:$4 sm:$0xff]   ;;  %v3149_v14 = vld [vmem:[%s3868_s0 + $0xf4] ss:$8 sps:$4 sm:$0xff]   ;;  %v3151_v15 = vld [vmem:[%s3868_s0 + $0xf0] ss:$8 sps:$4 sm:$0xff]  }
  0x5b   : > { %1131 = vmatprep.subr.bf16.mxu0 %v3058_v19  ;;  %s3880_s18 = smov (!%p404_p11, %s403_s18), 5  ;;  %v1767_v17 = vshrl.u32 %v1766_v16, 7  ;;  %s2885_s4 = smul.u32 (%p3247_p6), 12, %s3182_s14 }
  0x5c   : > { %s406_s23 = scalar_lea.vmem %s3870_s2, %s3880_s18 }
  0x5d   : > { %2897 = vmatpush3.bf16.msra.mxu1 %v3089_v30  ;;  %v1776_v18 = vsub.s32 2, %v1767_v17  ;;  %v1764_v19 = vld [vmem:[%s406_s23] sm:$0x7]  ;;  %s3729_s26 = scalar_lea.vmem (%p3247_p6), %s3871_s3, %s2885_s4 }
  0x5e   : > { %1132 = vmatpush1.bf16.msra.mxu0 %v3060_v21  ;;  %2898 = vmatprep.subr.bf16.mxu1 %v3091_v31 }
  0x5f   : > { %1133 = vmatprep.subr.bf16.mxu0 %v3062_v24  ;;  %v3548_v21 = vrot.slane %v1764_v19, %v1776_v18 }
  0x61   : > { %2899 = vmatpush3.bf16.msra.mxu1 %v3094_v33 }
  0x62   : > { %1134 = vmatpush1.bf16.msra.mxu0 %v3065_v25  ;;  %2900 = vmatprep.subr.bf16.mxu1 %v3096_v35 }
  0x63   : > { %1135 = vmatprep.subr.bf16.mxu0 %v3067_v28 }
  0x65   : > { %2901 = vmatpush3.bf16.msra.mxu1 %v3099_v37 }
  0x66   : > { %1136 = vmatpush1.bf16.msra.mxu0 %v3070_v29 }
  0x67   : > { %1137 = vmatprep.subr.bf16.mxu0 %v3072_v32 }
  0x68   : > { %1345 = vmatmul.mubr.bf16.vlgmr.msra.gmra.mrb[0].mxu1 %v3101_v40 }
  0x69   : > { %1352 = vmatprep.mubr.bf16.mxu1 %v3107_v41 }
  0x6a   : > { %1138 = vmatpush1.bf16.msra.mxu0 %v3075_v34 }
  0x6b   : > { %1139 = vmatprep.subr.bf16.mxu0 %v3077_v36 }
  0x6e   : > { %1140 = vmatpush1.bf16.msra.mxu0 %v3080_v38  ;;  %v1768_v38 = vsub.s32 0, %v1767_v17 }
  0x6f   : > { %1141 = vmatprep.subr.bf16.mxu0 %v3082_v39 }
  0x70   : > { %1353 = vmatmul.mubr.bf16.gmra.mrb[4].mxu1 %v3109_v46 }
  0x71   : > { %1360 = vmatprep.mubr.bf16.mxu1 %v3110_v47 }
  0x72   : > { %1142 = vmatpush1.bf16.msra.mxu0 %v3085_v42 }
  0x73   : > { %1143 = vmatprep.subr.bf16.mxu0 %v3087_v43 }
  0x76   : > { %1144 = vmatpush1.bf16.msra.mxu0 %v3090_v44 }
  0x77   : > { %1145 = vmatprep.subr.bf16.mxu0 %v3092_v45  ;;  %v3560_v45 = vrot.slane %v1764_v19, %v1768_v38 }
  0x78   : > { %1361 = vmatmul.mubr.bf16.gmra.mrb[8].mxu1 %v3112_v52 }
  0x79   : > { %1368 = vmatprep.mubr.bf16.mxu1 %v3113_v53 }
  0x7a   : > { %1146 = vmatpush1.bf16.msra.mxu0 %v3095_v48 }
  0x7b   : > { %1147 = vmatprep.subr.bf16.mxu0 %v3097_v49 }
  0x7e   : > { %1148 = vmatpush1.bf16.msra.mxu0 %v3100_v50 }
  0x7f   : > { %1149 = vmatprep.subr.bf16.mxu0 %v3104_v51 }
  0x80   : > { %1369 = vmatmul.mubr.bf16.gmra.mrb[12].mxu1 %v3115_v55 }
  0x81   : > { %1376 = vmatprep.mubr.bf16.mxu1 %v3116_v56 }
  0x82   : > { %1150 = vmatpush1.bf16.msra.mxu0 %v3106_v54 }
  0x85   : > { %1152 = vmatmul.mubr.bf16.vlgmr.msra.gmra.mrb[0].mxu0 %v3101_v40 }
  0x86   : > { %1161 = vmatprep.mubr.bf16.mxu0 %v3107_v41  ;;  %v1772_v41 = vsub.s32 1, %v1767_v17 }
  0x88   : > { %1377 = vmatmul.mubr.bf16.gmra.mrb[16].mxu1 %v3118_v57  ;;  %v3563_v48 = vrot.slane %v1764_v19, %v1772_v41 }
  0x89   : > { %1384 = vmatprep.mubr.bf16.mxu1 %v3119_v58 }
  0x8d   : > { %1162 = vmatmul.mubr.bf16.gmra.mrb[4].mxu0 %v3109_v46 }
  0x8e   : > { %1171 = vmatprep.mubr.bf16.mxu0 %v3110_v47 }
  0x90   : > { %1385 = vmatmul.mubr.bf16.gmra.mrb[20].mxu1 %v3121_v59 }
  0x91   : > { %1392 = vmatprep.mubr.bf16.mxu1 %v3122_v60 }
  0x95   : > { %1172 = vmatmul.mubr.bf16.gmra.mrb[8].mxu0 %v3112_v52 }
  0x96   : > { %1181 = vmatprep.mubr.bf16.mxu0 %v3113_v53 }
  0x98   : > { %1393 = vmatmul.mubr.bf16.gmra.mrb[24].mxu1 %v3124_v61 }
  0x99   : > { %1400 = vmatprep.mubr.bf16.mxu1 %v3125_v62 }
  0x9d   : > { %1182 = vmatmul.mubr.bf16.gmra.mrb[12].mxu0 %v3115_v55 }
  0x9e   : > { %1191 = vmatprep.mubr.bf16.mxu0 %v3116_v56 }
  0xa0   : > { %1401 = vmatmul.mubr.bf16.gmra.mrb[28].mxu1 %v3127_v63 }
  0xa1   : > { %1408 = vmatprep.mubr.bf16.mxu1 %v3128_v0 }
  0xa5   : > { %1192 = vmatmul.mubr.bf16.gmra.mrb[16].mxu0 %v3118_v57 }
  0xa6   : > { %1201 = vmatprep.mubr.bf16.mxu0 %v3119_v58 }
  0xa8   : > { %1409 = vmatmul.mubr.bf16.gmra.mrb[32].mxu1 %v3130_v1 }
  0xa9   : > { %1416 = vmatprep.mubr.bf16.mxu1 %v3131_v2 }
  0xad   : > { %1202 = vmatmul.mubr.bf16.gmra.mrb[20].mxu0 %v3121_v59 }
  0xae   : > { %1211 = vmatprep.mubr.bf16.mxu0 %v3122_v60 }
  0xb0   : > { %1417 = vmatmul.mubr.bf16.gmra.mrb[36].mxu1 %v3133_v3 }
  0xb1   : > { %1424 = vmatprep.mubr.bf16.mxu1 %v3134_v4 }
  0xb5   : > { %1212 = vmatmul.mubr.bf16.gmra.mrb[24].mxu0 %v3124_v61 }
  0xb6   : > { %1221 = vmatprep.mubr.bf16.mxu0 %v3125_v62 }
  0xb8   : > { %1425 = vmatmul.mubr.bf16.gmra.mrb[40].mxu1 %v3136_v5 }
  0xb9   : > { %1432 = vmatprep.mubr.bf16.mxu1 %v3137_v6 }
  0xbd   : > { %1222 = vmatmul.mubr.bf16.gmra.mrb[28].mxu0 %v3127_v63 }
  0xbe   : > { %1231 = vmatprep.mubr.bf16.mxu0 %v3128_v0 }
  0xc0   : > { %1433 = vmatmul.mubr.bf16.gmra.mrb[44].mxu1 %v3139_v7 }
  0xc1   : > { %1440 = vmatprep.mubr.bf16.mxu1 %v3140_v8 }
  0xc5   : > { %1232 = vmatmul.mubr.bf16.gmra.mrb[32].mxu0 %v3130_v1 }
  0xc6   : > { %1241 = vmatprep.mubr.bf16.mxu0 %v3131_v2 }
  0xc8   : > { %1441 = vmatmul.mubr.bf16.gmra.mrb[48].mxu1 %v3142_v9 }
  0xc9   : > { %1448 = vmatprep.mubr.bf16.mxu1 %v3143_v10 }
  0xcd   : > { %1242 = vmatmul.mubr.bf16.gmra.mrb[36].mxu0 %v3133_v3 }
  0xce   : > { %1251 = vmatprep.mubr.bf16.mxu0 %v3134_v4 }
  0xd0   : > { %1449 = vmatmul.mubr.bf16.gmra.mrb[52].mxu1 %v3145_v11 }
  0xd1   : > { %1456 = vmatprep.mubr.bf16.mxu1 %v3146_v12 }
  0xd5   : > { %1252 = vmatmul.mubr.bf16.gmra.mrb[40].mxu0 %v3136_v5 }
  0xd6   : > { %1261 = vmatprep.mubr.bf16.mxu0 %v3137_v6 }
  0xd8   : > { %1457 = vmatmul.mubr.bf16.gmra.mrb[56].mxu1 %v3148_v13 }
  0xd9   : > { %1464 = vmatprep.mubr.bf16.mxu1 %v3149_v14 }
  0xdd   : > { %1262 = vmatmul.mubr.bf16.gmra.mrb[44].mxu0 %v3139_v7 }
  0xde   : > { %1271 = vmatprep.mubr.bf16.mxu0 %v3140_v8 }
  0xe0   : > { %1465 = vmatmul.mubr.bf16.gmra.mrb[60].mxu1 %v3151_v15 }
  0xe5   : > { %1272 = vmatmul.mubr.bf16.gmra.mrb[48].mxu0 %v3142_v9 }
  0xe6   : > { %1281 = vmatprep.mubr.bf16.mxu0 %v3143_v10 }
  0xed   : > { %1282 = vmatmul.mubr.bf16.gmra.mrb[52].mxu0 %v3145_v11 }
  0xee   : > { %1291 = vmatprep.mubr.bf16.mxu0 %v3146_v12 }
  0xf5   : > { %1292 = vmatmul.mubr.bf16.gmra.mrb[56].mxu0 %v3148_v13 }
  0xf6   : > { %1301 = vmatprep.mubr.bf16.mxu0 %v3149_v14 }
  0xfd   : > { %1302 = vmatmul.mubr.bf16.gmra.mrb[60].mxu0 %v3151_v15 }
 0x13b   : > { %v2902_v20 = vpop.f32.mrb[0].mxu1 }
 0x13c   : > { %v2903_v22 = vpop.f32.mrb[1].mxu1 }
 0x13d   : > { %v2904_v23 = vadd.f32 %v2903_v22, %v2902_v20  ;;  %v2905_v24 = vpop.f32.mrb[2].mxu1 }
 0x13e   : > { %v2906_v25 = vpop.f32.mrb[3].mxu1 }
 0x13f   : > { %v1783_v26 = vadd.f32 %v2904_v23, %v3548_v21  ;;  %v2907_v27 = vadd.f32 %v2906_v25, %v2905_v24 }
 0x141   : > { %v2822_v28 = vpack.c.bf16 %v1783_v26, %v1783_v26  ;;  %v1786_v29 = vadd.f32 %v2907_v27, %v3548_v21 }
 0x143   : > { %2198 = vst [vmem:[%s3553_s24 + $0x8] sm:$0xf] %v2822_v28  ;;  %v2824_v30 = vpack.c.bf16 %v1786_v29, %v1786_v29  ;;  %v2908_v31 = vpop.f32.mrb[4].mxu1 }
 0x144   : > { %v2909_v32 = vpop.f32.mrb[5].mxu1 }
 0x145   : > { %2200 = vst [vmem:[%s3553_s24 + $0x14] sm:$0xf] %v2824_v30  ;;  %v2910_v33 = vadd.f32 %v2909_v32, %v2908_v31  ;;  %v2911_v34 = vpop.f32.mrb[6].mxu1 }
 0x146   : > { %v2912_v35 = vpop.f32.mrb[7].mxu1 }
 0x147   : > { %v1789_v36 = vadd.f32 %v2910_v33, %v3548_v21  ;;  %v2913_v37 = vadd.f32 %v2912_v35, %v2911_v34 }
 0x149   : > { %v2826_v39 = vpack.c.bf16 %v1789_v36, %v1789_v36  ;;  %v1792_v40 = vadd.f32 %v2913_v37, %v3548_v21 }
 0x14b   : > { %2202 = vst [vmem:[%s3553_s24 + $0x20] sm:$0xf] %v2826_v39  ;;  %v2828_v42 = vpack.c.bf16 %v1792_v40, %v1792_v40  ;;  %v2914_v43 = vpop.f32.mrb[8].mxu1 }
 0x14c   : > { %v2915_v44 = vpop.f32.mrb[9].mxu1 }
 0x14d   : > { %2204 = vst [vmem:[%s3553_s24 + $0x2c] sm:$0xf] %v2828_v42  ;;  %v2916_v46 = vadd.f32 %v2915_v44, %v2914_v43  ;;  %v2917_v47 = vpop.f32.mrb[10].mxu1 }
 0x14e   : > { %v2918_v49 = vpop.f32.mrb[11].mxu1 }
 0x14f   : > { %v1795_v50 = vadd.f32 %v2916_v46, %v3548_v21  ;;  %v2919_v51 = vadd.f32 %v2918_v49, %v2917_v47 }
 0x151   : > { %v2830_v55 = vpack.c.bf16 %v1795_v50, %v1795_v50  ;;  %v1798_v56 = vadd.f32 %v2919_v51, %v3548_v21 }
 0x153   : > { %2206 = vst [vmem:[%s3553_s24 + $0x38] sm:$0xf] %v2830_v55  ;;  %v2832_v61 = vpack.c.bf16 %v1798_v56, %v1798_v56  ;;  %v2920_v62 = vpop.f32.mrb[12].mxu1 }
 0x154   : > { %v2921_v1 = vpop.f32.mrb[13].mxu1 }
 0x155   : > { %2208 = vst [vmem:[%s3553_s24 + $0x44] sm:$0xf] %v2832_v61  ;;  %v2922_v2 = vadd.f32 %v2921_v1, %v2920_v62  ;;  %v2923_v3 = vpop.f32.mrb[14].mxu1 }
 0x156   : > { %v2924_v5 = vpop.f32.mrb[15].mxu1 }
 0x157   : > { %v1801_v6 = vadd.f32 %v2922_v2, %v3548_v21  ;;  %v2925_v7 = vadd.f32 %v2924_v5, %v2923_v3 }
 0x158   : > { %v1153_v52 = vpop.f32.mrb[0].mxu0 }
 0x159   : > { %v1781_v53 = vadd.f32 %v3560_v45, %v1153_v52  ;;  %v1155_v54 = vpop.f32.mrb[1].mxu0  ;;  %v2834_v11 = vpack.c.bf16 %v1801_v6, %v1801_v6  ;;  %v1804_v12 = vadd.f32 %v2925_v7, %v3548_v21 }
 0x15a   : > { %v1782_v57 = vadd.f32 %v3563_v48, %v1155_v54  ;;  %v1157_v58 = vpop.f32.mrb[2].mxu0 }
 0x15b   : > { %v1784_v59 = vadd.f32 %v3560_v45, %v1157_v58  ;;  %v1159_v60 = vpop.f32.mrb[3].mxu0  ;;  %2210 = vst [vmem:[%s3553_s24 + $0x50] sm:$0xf] %v2834_v11  ;;  %v2836_v17 = vpack.c.bf16 %v1804_v12, %v1804_v12  ;;  %v2926_v18 = vpop.f32.mrb[16].mxu1 }
 0x15c   : > { %v2821_v63 = vpack.c.bf16 %v1782_v57, %v1781_v53  ;;  %v1785_v0 = vadd.f32 %v3563_v48, %v1159_v60  ;;  %v2927_v22 = vpop.f32.mrb[17].mxu1 }
 0x15d   : > { %2212 = vst [vmem:[%s3553_s24 + $0x5c] sm:$0xf] %v2836_v17  ;;  %v2928_v23 = vadd.f32 %v2927_v22, %v2926_v18  ;;  %v2929_v24 = vpop.f32.mrb[18].mxu1 }
 0x15e   : > { %2197 = vst [vmem:[%s3553_s24] sm:$0xff] %v2821_v63  ;;  %v2823_v4 = vpack.c.bf16 %v1785_v0, %v1784_v59  ;;  %v2930_v26 = vpop.f32.mrb[19].mxu1 }
 0x15f   : > { %v1807_v27 = vadd.f32 %v2928_v23, %v3548_v21  ;;  %v2931_v28 = vadd.f32 %v2930_v26, %v2929_v24 }
 0x160   : > { %2199 = vst [vmem:[%s3553_s24 + $0xc] sm:$0xff] %v2823_v4  ;;  %v1163_v8 = vpop.f32.mrb[4].mxu0 }
 0x161   : > { %v1787_v9 = vadd.f32 %v3560_v45, %v1163_v8  ;;  %v1165_v10 = vpop.f32.mrb[5].mxu0  ;;  %v2838_v32 = vpack.c.bf16 %v1807_v27, %v1807_v27  ;;  %v1810_v33 = vadd.f32 %v2931_v28, %v3548_v21 }
 0x162   : > { %v1788_v13 = vadd.f32 %v3563_v48, %v1165_v10  ;;  %v1167_v14 = vpop.f32.mrb[6].mxu0 }
 0x163   : > { %v1790_v15 = vadd.f32 %v3560_v45, %v1167_v14  ;;  %v1169_v16 = vpop.f32.mrb[7].mxu0  ;;  %2214 = vst [vmem:[%s3553_s24 + $0x68] sm:$0xf] %v2838_v32  ;;  %v2840_v38 = vpack.c.bf16 %v1810_v33, %v1810_v33  ;;  %v2932_v39 = vpop.f32.mrb[20].mxu1 }
 0x164   : > { %v2825_v19 = vpack.c.bf16 %v1788_v13, %v1787_v9  ;;  %v1791_v20 = vadd.f32 %v3563_v48, %v1169_v16  ;;  %v2933_v42 = vpop.f32.mrb[21].mxu1 }
 0x165   : > { %2216 = vst [vmem:[%s3553_s24 + $0x74] sm:$0xf] %v2840_v38  ;;  %v2934_v43 = vadd.f32 %v2933_v42, %v2932_v39  ;;  %v2935_v44 = vpop.f32.mrb[22].mxu1 }
 0x166   : > { %2201 = vst [vmem:[%s3553_s24 + $0x18] sm:$0xff] %v2825_v19  ;;  %v2827_v25 = vpack.c.bf16 %v1791_v20, %v1790_v15  ;;  %v2936_v47 = vpop.f32.mrb[23].mxu1 }
 0x167   : > { %v1813_v49 = vadd.f32 %v2934_v43, %v3548_v21  ;;  %v2937_v50 = vadd.f32 %v2936_v47, %v2935_v44 }
 0x168   : > { %2203 = vst [vmem:[%s3553_s24 + $0x24] sm:$0xff] %v2827_v25  ;;  %v1173_v29 = vpop.f32.mrb[8].mxu0 }
 0x169   : > { %v1793_v30 = vadd.f32 %v3560_v45, %v1173_v29  ;;  %v1175_v31 = vpop.f32.mrb[9].mxu0  ;;  %v2842_v54 = vpack.c.bf16 %v1813_v49, %v1813_v49  ;;  %v1816_v55 = vadd.f32 %v2937_v50, %v3548_v21 }
 0x16a   : > { %v1794_v34 = vadd.f32 %v3563_v48, %v1175_v31  ;;  %v1177_v35 = vpop.f32.mrb[10].mxu0 }
 0x16b   : > { %v1796_v36 = vadd.f32 %v3560_v45, %v1177_v35  ;;  %v1179_v37 = vpop.f32.mrb[11].mxu0  ;;  %2218 = vst [vmem:[%s3553_s24 + $0x80] sm:$0xf] %v2842_v54  ;;  %v2844_v60 = vpack.c.bf16 %v1816_v55, %v1816_v55  ;;  %v2938_v61 = vpop.f32.mrb[24].mxu1 }
 0x16c   : > { %v2829_v40 = vpack.c.bf16 %v1794_v34, %v1793_v30  ;;  %v1797_v41 = vadd.f32 %v3563_v48, %v1179_v37  ;;  %v2939_v0 = vpop.f32.mrb[25].mxu1 }
 0x16d   : > { %2220 = vst [vmem:[%s3553_s24 + $0x8c] sm:$0xf] %v2844_v60  ;;  %v2940_v1 = vadd.f32 %v2939_v0, %v2938_v61  ;;  %v2941_v2 = vpop.f32.mrb[26].mxu1 }
 0x16e   : > { %2205 = vst [vmem:[%s3553_s24 + $0x30] sm:$0xff] %v2829_v40  ;;  %v2831_v46 = vpack.c.bf16 %v1797_v41, %v1796_v36  ;;  %v2942_v4 = vpop.f32.mrb[27].mxu1 }
 0x16f   : > { %v1819_v5 = vadd.f32 %v2940_v1, %v3548_v21  ;;  %v2943_v6 = vadd.f32 %v2942_v4, %v2941_v2 }
 0x170   : > { %2207 = vst [vmem:[%s3553_s24 + $0x3c] sm:$0xff] %v2831_v46  ;;  %v1183_v51 = vpop.f32.mrb[12].mxu0 }
 0x171   : > { %v1799_v52 = vadd.f32 %v3560_v45, %v1183_v51  ;;  %v1185_v53 = vpop.f32.mrb[13].mxu0  ;;  %v2846_v10 = vpack.c.bf16 %v1819_v5, %v1819_v5  ;;  %v1822_v11 = vadd.f32 %v2943_v6, %v3548_v21 }
 0x172   : > { %v1800_v56 = vadd.f32 %v3563_v48, %v1185_v53  ;;  %v1187_v57 = vpop.f32.mrb[14].mxu0 }
 0x173   : > { %v1802_v58 = vadd.f32 %v3560_v45, %v1187_v57  ;;  %v1189_v59 = vpop.f32.mrb[15].mxu0  ;;  %2222 = vst [vmem:[%s3553_s24 + $0x98] sm:$0xf] %v2846_v10  ;;  %v2848_v16 = vpack.c.bf16 %v1822_v11, %v1822_v11  ;;  %v2944_v17 = vpop.f32.mrb[28].mxu1 }
 0x174   : > { %v2833_v62 = vpack.c.bf16 %v1800_v56, %v1799_v52  ;;  %v1803_v63 = vadd.f32 %v3563_v48, %v1189_v59  ;;  %v2945_v20 = vpop.f32.mrb[29].mxu1 }
 0x175   : > { %2224 = vst [vmem:[%s3553_s24 + $0xa4] sm:$0xf] %v2848_v16  ;;  %v2946_v22 = vadd.f32 %v2945_v20, %v2944_v17  ;;  %v2947_v23 = vpop.f32.mrb[30].mxu1 }
 0x176   : > { %2209 = vst [vmem:[%s3553_s24 + $0x48] sm:$0xff] %v2833_v62  ;;  %v2835_v3 = vpack.c.bf16 %v1803_v63, %v1802_v58  ;;  %v2948_v25 = vpop.f32.mrb[31].mxu1 }
 0x177   : > { %v1825_v26 = vadd.f32 %v2946_v22, %v3548_v21  ;;  %v2949_v27 = vadd.f32 %v2948_v25, %v2947_v23 }
 0x178   : > { %2211 = vst [vmem:[%s3553_s24 + $0x54] sm:$0xff] %v2835_v3  ;;  %v1193_v7 = vpop.f32.mrb[16].mxu0 }
 0x179   : > { %v1805_v8 = vadd.f32 %v3560_v45, %v1193_v7  ;;  %v1195_v9 = vpop.f32.mrb[17].mxu0  ;;  %v2850_v31 = vpack.c.bf16 %v1825_v26, %v1825_v26  ;;  %v1828_v32 = vadd.f32 %v2949_v27, %v3548_v21 }
 0x17a   : > { %v1806_v12 = vadd.f32 %v3563_v48, %v1195_v9  ;;  %v1197_v13 = vpop.f32.mrb[18].mxu0 }
 0x17b   : > { %v1808_v14 = vadd.f32 %v3560_v45, %v1197_v13  ;;  %v1199_v15 = vpop.f32.mrb[19].mxu0  ;;  %2226 = vst [vmem:[%s3553_s24 + $0xb0] sm:$0xf] %v2850_v31  ;;  %v2852_v37 = vpack.c.bf16 %v1828_v32, %v1828_v32  ;;  %v2950_v38 = vpop.f32.mrb[32].mxu1 }
 0x17c   : > { %v2837_v18 = vpack.c.bf16 %v1806_v12, %v1805_v8  ;;  %v1809_v19 = vadd.f32 %v3563_v48, %v1199_v15  ;;  %v2951_v41 = vpop.f32.mrb[33].mxu1 }
 0x17d   : > { %2228 = vst [vmem:[%s3553_s24 + $0xbc] sm:$0xf] %v2852_v37  ;;  %v2952_v42 = vadd.f32 %v2951_v41, %v2950_v38  ;;  %v2953_v43 = vpop.f32.mrb[34].mxu1 }
 0x17e   : > { %2213 = vst [vmem:[%s3553_s24 + $0x60] sm:$0xff] %v2837_v18  ;;  %v2839_v24 = vpack.c.bf16 %v1809_v19, %v1808_v14  ;;  %v2954_v46 = vpop.f32.mrb[35].mxu1 }
 0x17f   : > { %v1831_v47 = vadd.f32 %v2952_v42, %v3548_v21  ;;  %v2955_v49 = vadd.f32 %v2954_v46, %v2953_v43 }
 0x180   : > { %2215 = vst [vmem:[%s3553_s24 + $0x6c] sm:$0xff] %v2839_v24  ;;  %v1203_v28 = vpop.f32.mrb[20].mxu0 }
 0x181   : > { %v1811_v29 = vadd.f32 %v3560_v45, %v1203_v28  ;;  %v1205_v30 = vpop.f32.mrb[21].mxu0  ;;  %v2854_v53 = vpack.c.bf16 %v1831_v47, %v1831_v47  ;;  %v1834_v54 = vadd.f32 %v2955_v49, %v3548_v21 }
 0x182   : > { %v1812_v33 = vadd.f32 %v3563_v48, %v1205_v30  ;;  %v1207_v34 = vpop.f32.mrb[22].mxu0 }
 0x183   : > { %v1814_v35 = vadd.f32 %v3560_v45, %v1207_v34  ;;  %v1209_v36 = vpop.f32.mrb[23].mxu0  ;;  %2230 = vst [vmem:[%s3553_s24 + $0xc8] sm:$0xf] %v2854_v53  ;;  %v2856_v59 = vpack.c.bf16 %v1834_v54, %v1834_v54  ;;  %v2956_v60 = vpop.f32.mrb[36].mxu1 }
 0x184   : > { %v2841_v39 = vpack.c.bf16 %v1812_v33, %v1811_v29  ;;  %v1815_v40 = vadd.f32 %v3563_v48, %v1209_v36  ;;  %v2957_v63 = vpop.f32.mrb[37].mxu1 }
 0x185   : > { %2232 = vst [vmem:[%s3553_s24 + $0xd4] sm:$0xf] %v2856_v59  ;;  %v2958_v0 = vadd.f32 %v2957_v63, %v2956_v60  ;;  %v2959_v1 = vpop.f32.mrb[38].mxu1 }
 0x186   : > { %2217 = vst [vmem:[%s3553_s24 + $0x78] sm:$0xff] %v2841_v39  ;;  %v2843_v44 = vpack.c.bf16 %v1815_v40, %v1814_v35  ;;  %v2960_v3 = vpop.f32.mrb[39].mxu1 }
 0x187   : > { %v1837_v4 = vadd.f32 %v2958_v0, %v3548_v21  ;;  %v2961_v5 = vadd.f32 %v2960_v3, %v2959_v1 }
 0x188   : > { %2219 = vst [vmem:[%s3553_s24 + $0x84] sm:$0xff] %v2843_v44  ;;  %v1213_v50 = vpop.f32.mrb[24].mxu0 }
 0x189   : > { %v1817_v51 = vadd.f32 %v3560_v45, %v1213_v50  ;;  %v1215_v52 = vpop.f32.mrb[25].mxu0  ;;  %v2858_v9 = vpack.c.bf16 %v1837_v4, %v1837_v4  ;;  %v1840_v10 = vadd.f32 %v2961_v5, %v3548_v21 }
 0x18a   : > { %v1818_v55 = vadd.f32 %v3563_v48, %v1215_v52  ;;  %v1217_v56 = vpop.f32.mrb[26].mxu0 }
 0x18b   : > { %v1820_v57 = vadd.f32 %v3560_v45, %v1217_v56  ;;  %v1219_v58 = vpop.f32.mrb[27].mxu0  ;;  %2234 = vst [vmem:[%s3553_s24 + $0xe0] sm:$0xf] %v2858_v9  ;;  %v2860_v15 = vpack.c.bf16 %v1840_v10, %v1840_v10  ;;  %v2962_v16 = vpop.f32.mrb[40].mxu1 }
 0x18c   : > { %v2845_v61 = vpack.c.bf16 %v1818_v55, %v1817_v51  ;;  %v1821_v62 = vadd.f32 %v3563_v48, %v1219_v58  ;;  %v2963_v19 = vpop.f32.mrb[41].mxu1 }
 0x18d   : > { %2236 = vst [vmem:[%s3553_s24 + $0xec] sm:$0xf] %v2860_v15  ;;  %v2964_v20 = vadd.f32 %v2963_v19, %v2962_v16  ;;  %v2965_v22 = vpop.f32.mrb[42].mxu1 }
 0x18e   : > { %2221 = vst [vmem:[%s3553_s24 + $0x90] sm:$0xff] %v2845_v61  ;;  %v2847_v2 = vpack.c.bf16 %v1821_v62, %v1820_v57  ;;  %v2966_v24 = vpop.f32.mrb[43].mxu1 }
 0x18f   : > { %v1843_v25 = vadd.f32 %v2964_v20, %v3548_v21  ;;  %v2967_v26 = vadd.f32 %v2966_v24, %v2965_v22 }
 0x190   : > { %2223 = vst [vmem:[%s3553_s24 + $0x9c] sm:$0xff] %v2847_v2  ;;  %v1223_v6 = vpop.f32.mrb[28].mxu0 }
 0x191   : > { %v1823_v7 = vadd.f32 %v3560_v45, %v1223_v6  ;;  %v1225_v8 = vpop.f32.mrb[29].mxu0  ;;  %v2862_v30 = vpack.c.bf16 %v1843_v25, %v1843_v25  ;;  %v1846_v31 = vadd.f32 %v2967_v26, %v3548_v21 }
 0x192   : > { %v1824_v11 = vadd.f32 %v3563_v48, %v1225_v8  ;;  %v1227_v12 = vpop.f32.mrb[30].mxu0 }
 0x193   : > { %v1826_v13 = vadd.f32 %v3560_v45, %v1227_v12  ;;  %v1229_v14 = vpop.f32.mrb[31].mxu0  ;;  %2238 = vst [vmem:[%s3553_s24 + $0xf8] sm:$0xf] %v2862_v30  ;;  %v2864_v36 = vpack.c.bf16 %v1846_v31, %v1846_v31  ;;  %v2968_v37 = vpop.f32.mrb[44].mxu1 }
 0x194   : > { %v2849_v17 = vpack.c.bf16 %v1824_v11, %v1823_v7  ;;  %v1827_v18 = vadd.f32 %v3563_v48, %v1229_v14  ;;  %v2969_v40 = vpop.f32.mrb[45].mxu1 }
 0x195   : > { %2240 = vst [vmem:[%s3553_s24 + $0x104] sm:$0xf] %v2864_v36  ;;  %v2970_v41 = vadd.f32 %v2969_v40, %v2968_v37  ;;  %v2971_v42 = vpop.f32.mrb[46].mxu1 }
 0x196   : > { %2225 = vst [vmem:[%s3553_s24 + $0xa8] sm:$0xff] %v2849_v17  ;;  %v2851_v23 = vpack.c.bf16 %v1827_v18, %v1826_v13  ;;  %v2972_v44 = vpop.f32.mrb[47].mxu1 }
 0x197   : > { %v1849_v46 = vadd.f32 %v2970_v41, %v3548_v21  ;;  %v2973_v47 = vadd.f32 %v2972_v44, %v2971_v42 }
 0x198   : > { %2227 = vst [vmem:[%s3553_s24 + $0xb4] sm:$0xff] %v2851_v23  ;;  %v1233_v27 = vpop.f32.mrb[32].mxu0 }
 0x199   : > { %v1829_v28 = vadd.f32 %v3560_v45, %v1233_v27  ;;  %v1235_v29 = vpop.f32.mrb[33].mxu0  ;;  %v2866_v52 = vpack.c.bf16 %v1849_v46, %v1849_v46  ;;  %v1852_v53 = vadd.f32 %v2973_v47, %v3548_v21 }
 0x19a   : > { %v1830_v32 = vadd.f32 %v3563_v48, %v1235_v29  ;;  %v1237_v33 = vpop.f32.mrb[34].mxu0 }
 0x19b   : > { %v1832_v34 = vadd.f32 %v3560_v45, %v1237_v33  ;;  %v1239_v35 = vpop.f32.mrb[35].mxu0  ;;  %2242 = vst [vmem:[%s3553_s24 + $0x110] sm:$0xf] %v2866_v52  ;;  %v2868_v58 = vpack.c.bf16 %v1852_v53, %v1852_v53  ;;  %v2974_v59 = vpop.f32.mrb[48].mxu1 }
 0x19c   : > { %v2853_v38 = vpack.c.bf16 %v1830_v32, %v1829_v28  ;;  %v1833_v39 = vadd.f32 %v3563_v48, %v1239_v35  ;;  %v2975_v62 = vpop.f32.mrb[49].mxu1 }
 0x19d   : > { %2244 = vst [vmem:[%s3553_s24 + $0x11c] sm:$0xf] %v2868_v58  ;;  %v2976_v63 = vadd.f32 %v2975_v62, %v2974_v59  ;;  %v2977_v0 = vpop.f32.mrb[50].mxu1 }
 0x19e   : > { %2229 = vst [vmem:[%s3553_s24 + $0xc0] sm:$0xff] %v2853_v38  ;;  %v2855_v43 = vpack.c.bf16 %v1833_v39, %v1832_v34  ;;  %v2978_v2 = vpop.f32.mrb[51].mxu1 }
 0x19f   : > { %v1855_v3 = vadd.f32 %v2976_v63, %v3548_v21  ;;  %v2979_v4 = vadd.f32 %v2978_v2, %v2977_v0 }
 0x1a0   : > { %2231 = vst [vmem:[%s3553_s24 + $0xcc] sm:$0xff] %v2855_v43  ;;  %v1243_v49 = vpop.f32.mrb[36].mxu0 }
 0x1a1   : > { %v1835_v50 = vadd.f32 %v3560_v45, %v1243_v49  ;;  %v1245_v51 = vpop.f32.mrb[37].mxu0  ;;  %v2870_v8 = vpack.c.bf16 %v1855_v3, %v1855_v3  ;;  %v1858_v9 = vadd.f32 %v2979_v4, %v3548_v21 }
 0x1a2   : > { %v1836_v54 = vadd.f32 %v3563_v48, %v1245_v51  ;;  %v1247_v55 = vpop.f32.mrb[38].mxu0 }
 0x1a3   : > { %v1838_v56 = vadd.f32 %v3560_v45, %v1247_v55  ;;  %v1249_v57 = vpop.f32.mrb[39].mxu0  ;;  %2246 = vst [vmem:[%s3553_s24 + $0x128] sm:$0xf] %v2870_v8  ;;  %v2872_v14 = vpack.c.bf16 %v1858_v9, %v1858_v9  ;;  %v2980_v15 = vpop.f32.mrb[52].mxu1 }
 0x1a4   : > { %v2857_v60 = vpack.c.bf16 %v1836_v54, %v1835_v50  ;;  %v1839_v61 = vadd.f32 %v3563_v48, %v1249_v57  ;;  %v2981_v18 = vpop.f32.mrb[53].mxu1 }
 0x1a5   : > { %2248 = vst [vmem:[%s3553_s24 + $0x134] sm:$0xf] %v2872_v14  ;;  %v2982_v19 = vadd.f32 %v2981_v18, %v2980_v15  ;;  %v2983_v20 = vpop.f32.mrb[54].mxu1 }
 0x1a6   : > { %2233 = vst [vmem:[%s3553_s24 + $0xd8] sm:$0xff] %v2857_v60  ;;  %v2859_v1 = vpack.c.bf16 %v1839_v61, %v1838_v56  ;;  %v2984_v23 = vpop.f32.mrb[55].mxu1 }
 0x1a7   : > { %v1861_v24 = vadd.f32 %v2982_v19, %v3548_v21  ;;  %v2985_v25 = vadd.f32 %v2984_v23, %v2983_v20 }
 0x1a8   : > { %2235 = vst [vmem:[%s3553_s24 + $0xe4] sm:$0xff] %v2859_v1  ;;  %v1253_v5 = vpop.f32.mrb[40].mxu0 }
 0x1a9   : > { %v1841_v6 = vadd.f32 %v3560_v45, %v1253_v5  ;;  %v1255_v7 = vpop.f32.mrb[41].mxu0  ;;  %v2874_v29 = vpack.c.bf16 %v1861_v24, %v1861_v24  ;;  %v1864_v30 = vadd.f32 %v2985_v25, %v3548_v21 }
 0x1aa   : > { %v1842_v10 = vadd.f32 %v3563_v48, %v1255_v7  ;;  %v1257_v11 = vpop.f32.mrb[42].mxu0 }
 0x1ab   : > { %v1844_v12 = vadd.f32 %v3560_v45, %v1257_v11  ;;  %v1259_v13 = vpop.f32.mrb[43].mxu0  ;;  %2250 = vst [vmem:[%s3553_s24 + $0x140] sm:$0xf] %v2874_v29  ;;  %v2876_v35 = vpack.c.bf16 %v1864_v30, %v1864_v30  ;;  %v2986_v36 = vpop.f32.mrb[56].mxu1 }
 0x1ac   : > { %v2861_v16 = vpack.c.bf16 %v1842_v10, %v1841_v6  ;;  %v1845_v17 = vadd.f32 %v3563_v48, %v1259_v13  ;;  %v2987_v39 = vpop.f32.mrb[57].mxu1 }
 0x1ad   : > { %2252 = vst [vmem:[%s3553_s24 + $0x14c] sm:$0xf] %v2876_v35  ;;  %v2988_v40 = vadd.f32 %v2987_v39, %v2986_v36  ;;  %v2989_v41 = vpop.f32.mrb[58].mxu1  ;;  %v2296_v39 = vld [vmem:[%s3553_s24 + $0x30] sm:$0xff] (%p3247_p6) }
 0x1ae   : > { %2237 = vst [vmem:[%s3553_s24 + $0xf0] sm:$0xff] %v2861_v16  ;;  %v2863_v22 = vpack.c.bf16 %v1845_v17, %v1844_v12  ;;  %v2990_v43 = vpop.f32.mrb[59].mxu1  ;;  %2297 = vst [vmem:[%s3729_s26 + $0x60] sm:$0xff] (%p3247_p6), %v2296_v39 }
 0x1af   : > { %v1867_v44 = vadd.f32 %v2988_v40, %v3548_v21  ;;  %v2991_v46 = vadd.f32 %v2990_v43, %v2989_v41  ;;  %v2298_v40 = vld [vmem:[%s3553_s24 + $0x3c] sm:$0xff] (%p3247_p6)  ;;  %v2300_v41 = vld [vmem:[%s3553_s24 + $0x48] sm:$0xff] (%p3247_p6) }
 0x1b0   : > { %2239 = vst [vmem:[%s3553_s24 + $0xfc] sm:$0xff] %v2863_v22  ;;  %v1263_v26 = vpop.f32.mrb[44].mxu0  ;;  %v2304_v43 = vld [vmem:[%s3553_s24 + $0x60] sm:$0xff] (%p3247_p6)  ;;  %2299 = vst [vmem:[%s3729_s26 + $0x78] sm:$0xff] (%p3247_p6), %v2298_v40 }
 0x1b1   : > { %v1847_v27 = vadd.f32 %v3560_v45, %v1263_v26  ;;  %v1265_v28 = vpop.f32.mrb[45].mxu0  ;;  %v2878_v51 = vpack.c.bf16 %v1867_v44, %v1867_v44  ;;  %v1870_v52 = vadd.f32 %v2991_v46, %v3548_v21  ;;  %2301 = vst [vmem:[%s3729_s26 + $0x90] sm:$0xff] (%p3247_p6), %v2300_v41  ;;  %2305 = vst [vmem:[%s3729_s26 + $0xc0] sm:$0xff] (%p3247_p6), %v2304_v43  ;;  %v2306_v44 = vld [vmem:[%s3553_s24 + $0x6c] sm:$0xff] (%p3247_p6)  ;;  %v2308_v46 = vld [vmem:[%s3553_s24 + $0x78] sm:$0xff] (%p3247_p6) }
 0x1b2   : > { %v1848_v31 = vadd.f32 %v3563_v48, %v1265_v28  ;;  %v1267_v32 = vpop.f32.mrb[46].mxu0  ;;  %2307 = vst [vmem:[%s3729_s26 + $0xd8] sm:$0xff] (%p3247_p6), %v2306_v44  ;;  %2309 = vst [vmem:[%s3729_s26 + $0xf0] sm:$0xff] (%p3247_p6), %v2308_v46 }
 0x1b3   : > { %v1850_v33 = vadd.f32 %v3560_v45, %v1267_v32  ;;  %v1269_v34 = vpop.f32.mrb[47].mxu0  ;;  %2254 = vst [vmem:[%s3553_s24 + $0x158] sm:$0xf] %v2878_v51  ;;  %v2880_v57 = vpack.c.bf16 %v1870_v52, %v1870_v52  ;;  %v2992_v58 = vpop.f32.mrb[60].mxu1  ;;  %v2316_v51 = vld [vmem:[%s3553_s24 + $0xa8] sm:$0xff] (%p3247_p6)  ;;  %v2318_v52 = vld [vmem:[%s3553_s24 + $0xb4] sm:$0xff] (%p3247_p6) }
 0x1b4   : > { %v2865_v37 = vpack.c.bf16 %v1848_v31, %v1847_v27  ;;  %v1851_v38 = vadd.f32 %v3563_v48, %v1269_v34  ;;  %v2993_v61 = vpop.f32.mrb[61].mxu1  ;;  %2317 = vst [vmem:[%s3729_s26 + $0x150] sm:$0xff] (%p3247_p6), %v2316_v51  ;;  %2319 = vst [vmem:[%s3729_s26 + $0x168] sm:$0xff] (%p3247_p6), %v2318_v52 }
 0x1b5   : > { %2256 = vst [vmem:[%s3553_s24 + $0x164] sm:$0xf] %v2880_v57  ;;  %v2994_v62 = vadd.f32 %v2993_v61, %v2992_v58  ;;  %v2995_v63 = vpop.f32.mrb[62].mxu1  ;;  %v2328_v57 = vld [vmem:[%s3553_s24 + $0xf0] sm:$0xff] (%p3247_p6) }
 0x1b6   : > { %2241 = vst [vmem:[%s3553_s24 + $0x108] sm:$0xff] %v2865_v37  ;;  %v2867_v42 = vpack.c.bf16 %v1851_v38, %v1850_v33  ;;  %v2996_v1 = vpop.f32.mrb[63].mxu1  ;;  %v2290_v37 = vld [vmem:[%s3553_s24 + $0xc] sm:$0xff] (%p3247_p6)  ;;  %v2294_v38 = vld [vmem:[%s3553_s24 + $0x24] sm:$0xff] (%p3247_p6)  ;;  %2329 = vst [vmem:[%s3729_s26 + $0x1e0] sm:$0xff] (%p3247_p6), %v2328_v57 }
 0x1b7   : > { %v1873_v2 = vadd.f32 %v2994_v62, %v3548_v21  ;;  %v2997_v3 = vadd.f32 %v2996_v1, %v2995_v63  ;;  %2291 = vst [vmem:[%s3729_s26 + $0x18] sm:$0xff] (%p3247_p6), %v2290_v37  ;;  %2295 = vst [vmem:[%s3729_s26 + $0x48] sm:$0xff] (%p3247_p6), %v2294_v38  ;;  %v2330_v58 = vld [vmem:[%s3553_s24 + $0xfc] sm:$0xff] (%p3247_p6) }
 0x1b8   : > { %2243 = vst [vmem:[%s3553_s24 + $0x114] sm:$0xff] %v2867_v42  ;;  %v1273_v47 = vpop.f32.mrb[48].mxu0  ;;  %v2302_v42 = vld [vmem:[%s3553_s24 + $0x54] sm:$0xff] (%p3247_p6)  ;;  %2331 = vst [vmem:[%s3729_s26 + $0x1f8] sm:$0xff] (%p3247_p6), %v2330_v58 }
 0x1b9   : > { %v1853_v49 = vadd.f32 %v3560_v45, %v1273_v47  ;;  %v1275_v50 = vpop.f32.mrb[49].mxu0  ;;  %v2882_v7 = vpack.c.bf16 %v1873_v2, %v1873_v2  ;;  %v1876_v8 = vadd.f32 %v2997_v3, %v3548_v21  ;;  %2303 = vst [vmem:[%s3729_s26 + $0xa8] sm:$0xff] (%p3247_p6), %v2302_v42  ;;  %v2310_v47 = vld [vmem:[%s3553_s24 + $0x84] sm:$0xff] (%p3247_p6) }
 0x1ba   : > { %v1854_v53 = vadd.f32 %v3563_v48, %v1275_v50  ;;  %v1277_v54 = vpop.f32.mrb[50].mxu0  ;;  %2311 = vst [vmem:[%s3729_s26 + $0x108] sm:$0xff] (%p3247_p6), %v2310_v47  ;;  %v2314_v50 = vld [vmem:[%s3553_s24 + $0x9c] sm:$0xff] (%p3247_p6) }
 0x1bb   : > { %v1856_v55 = vadd.f32 %v3560_v45, %v1277_v54  ;;  %v1279_v56 = vpop.f32.mrb[51].mxu0  ;;  %2258 = vst [vmem:[%s3553_s24 + $0x170] sm:$0xf] %v2882_v7  ;;  %v2884_v13 = vpack.c.bf16 %v1876_v8, %v1876_v8  ;;  %2315 = vst [vmem:[%s3729_s26 + $0x138] sm:$0xff] (%p3247_p6), %v2314_v50  ;;  %v2322_v54 = vld [vmem:[%s3553_s24 + $0xcc] sm:$0xff] (%p3247_p6) }
 0x1bc   : > { %v2869_v59 = vpack.c.bf16 %v1854_v53, %v1853_v49  ;;  %v1857_v60 = vadd.f32 %v3563_v48, %v1279_v56  ;;  %v2312_v49 = vld [vmem:[%s3553_s24 + $0x90] sm:$0xff] (%p3247_p6)  ;;  %v2320_v53 = vld [vmem:[%s3553_s24 + $0xc0] sm:$0xff] (%p3247_p6)  ;;  %2323 = vst [vmem:[%s3729_s26 + $0x198] sm:$0xff] (%p3247_p6), %v2322_v54  ;;  %v2760_v8 = vld [vmem:[%s3553_s24 + $0x2c] sm:$0xf] (%p3247_p6) }
 0x1bd   : > { %2260 = vst [vmem:[%s3553_s24 + $0x17c] sm:$0xf] %v2884_v13  ;;  %2313 = vst [vmem:[%s3729_s26 + $0x120] sm:$0xff] (%p3247_p6), %v2312_v49  ;;  %v2326_v56 = vld [vmem:[%s3553_s24 + $0xe4] sm:$0xff] (%p3247_p6)  ;;  %v2758_v7 = vld [vmem:[%s3553_s24 + $0x20] sm:$0xf] (%p3247_p6) }
 0x1be   : > { %2245 = vst [vmem:[%s3553_s24 + $0x120] sm:$0xff] %v2869_v59  ;;  %v2871_v0 = vpack.c.bf16 %v1857_v60, %v1856_v55  ;;  %2321 = vst [vmem:[%s3729_s26 + $0x180] sm:$0xff] (%p3247_p6), %v2320_v53  ;;  %v2324_v55 = vld [vmem:[%s3553_s24 + $0xd8] sm:$0xff] (%p3247_p6)  ;;  %v2332_v59 = vld [vmem:[%s3553_s24 + $0x108] sm:$0xff] (%p3247_p6) }
 0x1bf   : > { %2325 = vst [vmem:[%s3729_s26 + $0x1b0] sm:$0xff] (%p3247_p6), %v2324_v55  ;;  %2327 = vst [vmem:[%s3729_s26 + $0x1c8] sm:$0xff] (%p3247_p6), %v2326_v56  ;;  %v2334_v60 = vld [vmem:[%s3553_s24 + $0x114] sm:$0xff] (%p3247_p6)  ;;  %v2770_v13 = vld [vmem:[%s3553_s24 + $0x68] sm:$0xf] (%p3247_p6) }
 0x1c0   : > { %2247 = vst [vmem:[%s3553_s24 + $0x12c] sm:$0xff] %v2871_v0  ;;  %v1283_v4 = vpop.f32.mrb[52].mxu0  ;;  %2333 = vst [vmem:[%s3729_s26 + $0x210] sm:$0xff] (%p3247_p6), %v2332_v59 }
 0x1c1   : > { %v1859_v5 = vadd.f32 %v3560_v45, %v1283_v4  ;;  %v1285_v6 = vpop.f32.mrb[53].mxu0  ;;  %2335 = vst [vmem:[%s3729_s26 + $0x228] sm:$0xff] (%p3247_p6), %v2334_v60  ;;  %2759 = vst [vmem:[%s3729_s26 + $0x38] sm:$0xf] (%p3247_p6), %v2758_v7 }
 0x1c2   : > { %v1860_v9 = vadd.f32 %v3563_v48, %v1285_v6  ;;  %v1287_v10 = vpop.f32.mrb[54].mxu0  ;;  %v2756_v6 = vld [vmem:[%s3553_s24 + $0x14] sm:$0xf] (%p3247_p6)  ;;  %2761 = vst [vmem:[%s3729_s26 + $0x50] sm:$0xf] (%p3247_p6), %v2760_v8 }
 0x1c3   : > { %v1862_v11 = vadd.f32 %v3560_v45, %v1287_v10  ;;  %v1289_v12 = vpop.f32.mrb[55].mxu0  ;;  %2757 = vst [vmem:[%s3729_s26 + $0x20] sm:$0xf] (%p3247_p6), %v2756_v6  ;;  %v2764_v10 = vld [vmem:[%s3553_s24 + $0x44] sm:$0xf] (%p3247_p6) }
 0x1c4   : > { %v2873_v14 = vpack.c.bf16 %v1860_v9, %v1859_v5  ;;  %v1863_v15 = vadd.f32 %v3563_v48, %v1289_v12  ;;  %v2754_v5 = vld [vmem:[%s3553_s24 + $0x8] sm:$0xf] (%p3247_p6)  ;;  %v2762_v9 = vld [vmem:[%s3553_s24 + $0x38] sm:$0xf] (%p3247_p6)  ;;  %2765 = vst [vmem:[%s3729_s26 + $0x80] sm:$0xf] (%p3247_p6), %v2764_v10 }
 0x1c5   : > { %v2336_v61 = vld [vmem:[%s3553_s24 + $0x120] sm:$0xff] (%p3247_p6)  ;;  %2755 = vst [vmem:[%s3729_s26 + $0x8] sm:$0xf] (%p3247_p6), %v2754_v5  ;;  %2763 = vst [vmem:[%s3729_s26 + $0x68] sm:$0xf] (%p3247_p6), %v2762_v9 }
 0x1c6   : > { %2249 = vst [vmem:[%s3553_s24 + $0x138] sm:$0xff] %v2873_v14  ;;  %v2875_v16 = vpack.c.bf16 %v1863_v15, %v1862_v11  ;;  %2337 = vst [vmem:[%s3729_s26 + $0x240] sm:$0xff] (%p3247_p6), %v2336_v61  ;;  %v2766_v11 = vld [vmem:[%s3553_s24 + $0x50] sm:$0xf] (%p3247_p6)  ;;  %v2768_v12 = vld [vmem:[%s3553_s24 + $0x5c] sm:$0xf] (%p3247_p6) }
 0x1c7   : > { %v2338_v62 = vld [vmem:[%s3553_s24 + $0x12c] sm:$0xff] (%p3247_p6)  ;;  %2767 = vst [vmem:[%s3729_s26 + $0x98] sm:$0xf] (%p3247_p6), %v2766_v11  ;;  %v2772_v14 = vld [vmem:[%s3553_s24 + $0x74] sm:$0xf] (%p3247_p6) }
 0x1c8   : > { %2251 = vst [vmem:[%s3553_s24 + $0x144] sm:$0xff] %v2875_v16  ;;  %v1293_v17 = vpop.f32.mrb[56].mxu0  ;;  %2339 = vst [vmem:[%s3729_s26 + $0x258] sm:$0xff] (%p3247_p6), %v2338_v62  ;;  %v2774_v15 = vld [vmem:[%s3553_s24 + $0x80] sm:$0xf] (%p3247_p6) }
 0x1c9   : > { %v1865_v21 = vadd.f32 %v3560_v45, %v1293_v17  ;;  %v1295_v18 = vpop.f32.mrb[57].mxu0  ;;  %2769 = vst [vmem:[%s3729_s26 + $0xb0] sm:$0xf] (%p3247_p6), %v2768_v12  ;;  %2771 = vst [vmem:[%s3729_s26 + $0xc8] sm:$0xf] (%p3247_p6), %v2770_v13 }
 0x1ca   : > { %v1866_v19 = vadd.f32 %v3563_v48, %v1295_v18  ;;  %v1297_v20 = vpop.f32.mrb[58].mxu0  ;;  %2773 = vst [vmem:[%s3729_s26 + $0xe0] sm:$0xf] (%p3247_p6), %v2772_v14  ;;  %v2776_v16 = vld [vmem:[%s3553_s24 + $0x8c] sm:$0xf] (%p3247_p6) }
 0x1cb   : > { %v1868_v22 = vadd.f32 %v3560_v45, %v1297_v20  ;;  %v1299_v23 = vpop.f32.mrb[59].mxu0  ;;  %v2778_v17 = vld [vmem:[%s3553_s24 + $0x98] sm:$0xf] (%p3247_p6)  ;;  %2775 = vst [vmem:[%s3729_s26 + $0xf8] sm:$0xf] (%p3247_p6), %v2774_v15 }
 0x1cc   : > { %v2877_v24 = vpack.c.bf16 %v1866_v19, %v1865_v21  ;;  %v1869_v25 = vadd.f32 %v3563_v48, %v1299_v23  ;;  %2777 = vst [vmem:[%s3729_s26 + $0x110] sm:$0xf] (%p3247_p6), %v2776_v16  ;;  %2779 = vst [vmem:[%s3729_s26 + $0x128] sm:$0xf] (%p3247_p6), %v2778_v17  ;;  %v2780_v21 = vld [vmem:[%s3553_s24 + $0xa4] sm:$0xf] (%p3247_p6) }
 0x1cd   : > { %v2340_v63 = vld [vmem:[%s3553_s24 + $0x138] sm:$0xff] (%p3247_p6)  ;;  %v2782_v18 = vld [vmem:[%s3553_s24 + $0xb0] sm:$0xf] (%p3247_p6)  ;;  %2781 = vst [vmem:[%s3729_s26 + $0x140] sm:$0xf] (%p3247_p6), %v2780_v21 }
 0x1ce   : > { %2253 = vst [vmem:[%s3553_s24 + $0x150] sm:$0xff] %v2877_v24  ;;  %v2879_v26 = vpack.c.bf16 %v1869_v25, %v1868_v22  ;;  %2341 = vst [vmem:[%s3729_s26 + $0x270] sm:$0xff] (%p3247_p6), %v2340_v63  ;;  %v2784_v19 = vld [vmem:[%s3553_s24 + $0xbc] sm:$0xf] (%p3247_p6)  ;;  %v2786_v20 = vld [vmem:[%s3553_s24 + $0xc8] sm:$0xf] (%p3247_p6) }
 0x1cf   : > { %v2342_v0 = vld [vmem:[%s3553_s24 + $0x144] sm:$0xff] (%p3247_p6)  ;;  %2783 = vst [vmem:[%s3729_s26 + $0x158] sm:$0xf] (%p3247_p6), %v2782_v18  ;;  %2785 = vst [vmem:[%s3729_s26 + $0x170] sm:$0xf] (%p3247_p6), %v2784_v19 }
 0x1d0   : > { %2255 = vst [vmem:[%s3553_s24 + $0x15c] sm:$0xff] %v2879_v26  ;;  %v1303_v27 = vpop.f32.mrb[60].mxu0  ;;  %2343 = vst [vmem:[%s3729_s26 + $0x288] sm:$0xff] (%p3247_p6), %v2342_v0  ;;  %v2788_v22 = vld [vmem:[%s3553_s24 + $0xd4] sm:$0xf] (%p3247_p6) }
 0x1d1   : > { %v1871_v28 = vadd.f32 %v3560_v45, %v1303_v27  ;;  %v1305_v29 = vpop.f32.mrb[61].mxu0  ;;  %v2790_v23 = vld [vmem:[%s3553_s24 + $0xe0] sm:$0xf] (%p3247_p6)  ;;  %2787 = vst [vmem:[%s3729_s26 + $0x188] sm:$0xf] (%p3247_p6), %v2786_v20 }
 0x1d2   : > { %v1872_v30 = vadd.f32 %v3563_v48, %v1305_v29  ;;  %v1307_v31 = vpop.f32.mrb[62].mxu0  ;;  %2267 = sbr.rel (!%p3247_p6) target bundleno = 481 (0x1e1), region = 70  ;;  %2789 = vst [vmem:[%s3729_s26 + $0x1a0] sm:$0xf] (%p3247_p6), %v2788_v22  ;;  %2791 = vst [vmem:[%s3729_s26 + $0x1b8] sm:$0xf] (%p3247_p6), %v2790_v23 }
 0x1d3   : > { %v1874_v32 = vadd.f32 %v3560_v45, %v1307_v31  ;;  %v1309_v33 = vpop.f32.mrb[63].mxu0  ;;  %v2288_v45 = vld [vmem:[%s3553_s24] sm:$0xff] (%p3247_p6)  ;;  %v2792_v24 = vld [vmem:[%s3553_s24 + $0xec] sm:$0xf] (%p3247_p6)  ;;  %v2794_v25 = vld [vmem:[%s3553_s24 + $0xf8] sm:$0xf] (%p3247_p6) }
 0x1d4   : > { %v2881_v34 = vpack.c.bf16 %v1872_v30, %v1871_v28  ;;  %v1875_v35 = vadd.f32 %v3563_v48, %v1309_v33  ;;  %v2292_v48 = vld [vmem:[%s3553_s24 + $0x18] sm:$0xff] (%p3247_p6)  ;;  %2289 = vst [vmem:[%s3729_s26] sm:$0xff] (%p3247_p6), %v2288_v45  ;;  %v2796_v26 = vld [vmem:[%s3553_s24 + $0x104] sm:$0xf] (%p3247_p6)  ;;  %2793 = vst [vmem:[%s3729_s26 + $0x1d0] sm:$0xf] (%p3247_p6), %v2792_v24 }
 0x1d5   : > { %2293 = vst [vmem:[%s3729_s26 + $0x30] sm:$0xff] (%p3247_p6), %v2292_v48  ;;  %v2344_v1 = vld [vmem:[%s3553_s24 + $0x150] sm:$0xff] (%p3247_p6)  ;;  %2795 = vst [vmem:[%s3729_s26 + $0x1e8] sm:$0xf] (%p3247_p6), %v2794_v25  ;;  %v2800_v28 = vld [vmem:[%s3553_s24 + $0x11c] sm:$0xf] (%p3247_p6) }
 0x1d6   : > { %2257 = vst [vmem:[%s3553_s24 + $0x168] sm:$0xff] %v2881_v34  ;;  %v2883_v36 = vpack.c.bf16 %v1875_v35, %v1874_v32  ;;  %2345 = vst [vmem:[%s3729_s26 + $0x2a0] sm:$0xff] (%p3247_p6), %v2344_v1  ;;  %v2798_v27 = vld [vmem:[%s3553_s24 + $0x110] sm:$0xf] (%p3247_p6)  ;;  %v2802_v29 = vld [vmem:[%s3553_s24 + $0x128] sm:$0xf] (%p3247_p6) }
 0x1d7   : > { %v2346_v2 = vld [vmem:[%s3553_s24 + $0x15c] sm:$0xff] (%p3247_p6)  ;;  %2797 = vst [vmem:[%s3729_s26 + $0x200] sm:$0xf] (%p3247_p6), %v2796_v26  ;;  %2799 = vst [vmem:[%s3729_s26 + $0x218] sm:$0xf] (%p3247_p6), %v2798_v27 }
 0x1d8   : > { %2259 = vst [vmem:[%s3553_s24 + $0x174] sm:$0xff] %v2883_v36  ;;  %2347 = vst [vmem:[%s3729_s26 + $0x2b8] sm:$0xff] (%p3247_p6), %v2346_v2  ;;  %v2804_v30 = vld [vmem:[%s3553_s24 + $0x134] sm:$0xf] (%p3247_p6)  ;;  %v2806_v31 = vld [vmem:[%s3553_s24 + $0x140] sm:$0xf] (%p3247_p6) }
 0x1d9   : > { %2801 = vst [vmem:[%s3729_s26 + $0x230] sm:$0xf] %v2800_v28  ;;  %2803 = vst [vmem:[%s3729_s26 + $0x248] sm:$0xf] %v2802_v29  ;;  %v2808_v32 = vld [vmem:[%s3553_s24 + $0x14c] sm:$0xf] }
 0x1da   : > { %2805 = vst [vmem:[%s3729_s26 + $0x260] sm:$0xf] %v2804_v30  ;;  %2807 = vst [vmem:[%s3729_s26 + $0x278] sm:$0xf] %v2806_v31  ;;  %v2810_v33 = vld [vmem:[%s3553_s24 + $0x158] sm:$0xf] }
 0x1db   : > { %2809 = vst [vmem:[%s3729_s26 + $0x290] sm:$0xf] %v2808_v32  ;;  %v2812_v34 = vld [vmem:[%s3553_s24 + $0x164] sm:$0xf]  ;;  %v2814_v35 = vld [vmem:[%s3553_s24 + $0x170] sm:$0xf] }
 0x1dc   : > { %2811 = vst [vmem:[%s3729_s26 + $0x2a8] sm:$0xf] %v2810_v33  ;;  %2813 = vst [vmem:[%s3729_s26 + $0x2c0] sm:$0xf] %v2812_v34  ;;  %v2816_v36 = vld [vmem:[%s3553_s24 + $0x17c] sm:$0xf] }
 0x1dd   : > { %v2348_v3 = vld [vmem:[%s3553_s24 + $0x168] sm:$0xff]  ;;  %2815 = vst [vmem:[%s3729_s26 + $0x2d8] sm:$0xf] %v2814_v35  ;;  %2817 = vst [vmem:[%s3729_s26 + $0x2f0] sm:$0xf] %v2816_v36 }
 0x1de   : > { %2349 = vst [vmem:[%s3729_s26 + $0x2d0] sm:$0xff] %v2348_v3 }
 0x1df   : > { %v2350_v4 = vld [vmem:[%s3553_s24 + $0x174] sm:$0xff] }
 0x1e0   : > { %2351 = vst [vmem:[%s3729_s26 + $0x2e8] sm:$0xff] %v2350_v4 }
 0x1e1 PF: > { %s13_s16 = sadd.s32 1, %s3190_s16   ;;  %s3873_s12 = smov %s3178_s13 }
 0x1e2   : > { %p10_p12 = scmp.ge.s32.totalorder %s13_s16, 4   ;;  %s3874_s13 = smov %s3252_s22 }
 0x1e3   : > { %s3875_s14 = smov %s3186_s15  ;;  %s3876_s15 = smov %s3878_s17 }
 0x1e4   :  { %12 = sbr.rel (!%p10_p12) target bundleno = 3 (0x3), region = 145 }

// kernel: pretrained_encoder_with_head.29
= control target key start
LH: loop header
LB: loop body
LE: loop exit
PB: predicated region body
PF: predicated region fallthrough
CT: control target
= control target key end

     0   :  { %s1276_s1 = inlined_call_operand.vmem [shape: bf16[256,128], index: 1, kind: input, shape index: {}]   ;;  %s1277_s0 = inlined_call_operand.vmem [shape: bf16[256,256], index: 0, kind: input, shape index: {}]   ;;  %s1278_s2 = inlined_call_operand.vmem [shape: f32[1,128], index: 2, kind: input, shape index: {}]   ;;  %s1279_s3 = inlined_call_operand.vmem [shape: f32[256,128], index: 3, kind: output, shape index: {}]  }
   0x1   :  { %v915_v0 = vld [vmem:[%s1276_s1 + $0x40] sm:$0xff]   ;;  %v917_v2 = vld [vmem:[%s1276_s1 + $0x48] sm:$0xff]   ;;  %v919_v4 = vld [vmem:[%s1276_s1 + $0x50] sm:$0xff]  }
   0x2   :  { %v916_v1 = vld [vmem:[%s1276_s1] sm:$0xff]   ;;  %787 = vmatprep.subr.bf16.mxu0 %v915_v0  ;;  %899 = vmatprep.subr.bf16.mxu1 %v915_v0  ;;  %v918_v3 = vld [vmem:[%s1276_s1 + $0x8] sm:$0xff]   ;;  %v920_v5 = vld [vmem:[%s1276_s1 + $0x10] sm:$0xff]  }
   0x3   :  { %788 = vmatpush3.bf16.msra.mxu0 %v916_v1  ;;  %907 = vmatpush3.bf16.msra.mxu1 %v916_v1  ;;  %v921_v6 = vld [vmem:[%s1276_s1 + $0x58] sm:$0xff]   ;;  %v923_v8 = vld [vmem:[%s1276_s1 + $0x60] sm:$0xff]   ;;  %v925_v10 = vld [vmem:[%s1276_s1 + $0x68] sm:$0xff]  }
   0x4   :  { %789 = vmatprep.subr.bf16.mxu0 %v917_v2  ;;  %900 = vmatprep.subr.bf16.mxu1 %v917_v2  ;;  %v922_v7 = vld [vmem:[%s1276_s1 + $0x18] sm:$0xff]   ;;  %v924_v9 = vld [vmem:[%s1276_s1 + $0x20] sm:$0xff]   ;;  %v926_v13 = vld [vmem:[%s1276_s1 + $0x28] sm:$0xff]  }
   0x5   :  { %v933_v11 = vld [vmem:[%s1277_s0 + $0x4] ss:$8 sps:$4 sm:$0xff]   ;;  %v927_v14 = vld [vmem:[%s1276_s1 + $0x70] sm:$0xff]   ;;  %v929_v16 = vld [vmem:[%s1276_s1 + $0x78] sm:$0xff]  }
   0x6   :  { %v936_v12 = vld [vmem:[%s1277_s0 + $0x84] ss:$8 sps:$4 sm:$0xff]   ;;  %435 = vmatprep.mubr.bf16.mxu0 %v933_v11  ;;  %v928_v15 = vld [vmem:[%s1276_s1 + $0x30] sm:$0xff]   ;;  %v930_v17 = vld [vmem:[%s1276_s1 + $0x38] sm:$0xff]  }
   0x7   :  { %790 = vmatpush3.bf16.msra.mxu0 %v918_v3  ;;  %908 = vmatpush3.bf16.msra.mxu1 %v918_v3  ;;  %v931_v18 = vld [vmem:[%s1277_s0] ss:$8 sps:$4 sm:$0xff]   ;;  %v937_v20 = vld [vmem:[%s1277_s0 + $0x14] ss:$8 sps:$4 sm:$0xff]   ;;  %v941_v22 = vld [vmem:[%s1277_s0 + $0x10] ss:$8 sps:$4 sm:$0xff]  }
   0x8   :  { %791 = vmatprep.subr.bf16.mxu0 %v919_v4  ;;  %901 = vmatprep.subr.bf16.mxu1 %v919_v4  ;;  %v934_v19 = vld [vmem:[%s1277_s0 + $0x80] ss:$8 sps:$4 sm:$0xff]   ;;  %v939_v21 = vld [vmem:[%s1277_s0 + $0x94] ss:$8 sps:$4 sm:$0xff]   ;;  %v942_v23 = vld [vmem:[%s1277_s0 + $0x90] ss:$8 sps:$4 sm:$0xff]  }
   0x9   :  { %499 = vmatprep.mubr.bf16.mxu1 %v936_v12  ;;  %v943_v24 = vld [vmem:[%s1277_s0 + $0x24] ss:$8 sps:$4 sm:$0xff]   ;;  %v947_v26 = vld [vmem:[%s1277_s0 + $0x20] ss:$8 sps:$4 sm:$0xff]   ;;  %v949_v28 = vld [vmem:[%s1277_s0 + $0x34] ss:$8 sps:$4 sm:$0xff]  }
   0xa   :  { %v945_v25 = vld [vmem:[%s1277_s0 + $0xa4] ss:$8 sps:$4 sm:$0xff]   ;;  %v948_v27 = vld [vmem:[%s1277_s0 + $0xa0] ss:$8 sps:$4 sm:$0xff]   ;;  %v951_v29 = vld [vmem:[%s1277_s0 + $0xb4] ss:$8 sps:$4 sm:$0xff]  }
   0xb   :  { %792 = vmatpush3.bf16.msra.mxu0 %v920_v5  ;;  %909 = vmatpush3.bf16.msra.mxu1 %v920_v5  ;;  %v953_v30 = vld [vmem:[%s1277_s0 + $0x30] ss:$8 sps:$4 sm:$0xff]   ;;  %v955_v32 = vld [vmem:[%s1277_s0 + $0x44] ss:$8 sps:$4 sm:$0xff]   ;;  %v959_v34 = vld [vmem:[%s1277_s0 + $0x40] ss:$8 sps:$4 sm:$0xff]  }
   0xc   :  { %793 = vmatprep.subr.bf16.mxu0 %v921_v6  ;;  %902 = vmatprep.subr.bf16.mxu1 %v921_v6  ;;  %v954_v31 = vld [vmem:[%s1277_s0 + $0xb0] ss:$8 sps:$4 sm:$0xff]   ;;  %v957_v33 = vld [vmem:[%s1277_s0 + $0xc4] ss:$8 sps:$4 sm:$0xff]   ;;  %v960_v35 = vld [vmem:[%s1277_s0 + $0xc0] ss:$8 sps:$4 sm:$0xff]  }
   0xd   :  { %v961_v36 = vld [vmem:[%s1277_s0 + $0x54] ss:$8 sps:$4 sm:$0xff]   ;;  %v965_v38 = vld [vmem:[%s1277_s0 + $0x50] ss:$8 sps:$4 sm:$0xff]   ;;  %v967_v40 = vld [vmem:[%s1277_s0 + $0x64] ss:$8 sps:$4 sm:$0xff]  }
   0xe   :  { %v963_v37 = vld [vmem:[%s1277_s0 + $0xd4] ss:$8 sps:$4 sm:$0xff]   ;;  %v966_v39 = vld [vmem:[%s1277_s0 + $0xd0] ss:$8 sps:$4 sm:$0xff]   ;;  %v969_v41 = vld [vmem:[%s1277_s0 + $0xe4] ss:$8 sps:$4 sm:$0xff]  }
   0xf   :  { %794 = vmatpush3.bf16.msra.mxu0 %v922_v7  ;;  %910 = vmatpush3.bf16.msra.mxu1 %v922_v7  ;;  %v971_v42 = vld [vmem:[%s1277_s0 + $0x60] ss:$8 sps:$4 sm:$0xff]   ;;  %v973_v44 = vld [vmem:[%s1277_s0 + $0x74] ss:$8 sps:$4 sm:$0xff]   ;;  %v977_v46 = vld [vmem:[%s1277_s0 + $0x70] ss:$8 sps:$4 sm:$0xff]  }
  0x10   :  { %795 = vmatprep.subr.bf16.mxu0 %v923_v8  ;;  %903 = vmatprep.subr.bf16.mxu1 %v923_v8  ;;  %v972_v43 = vld [vmem:[%s1277_s0 + $0xe0] ss:$8 sps:$4 sm:$0xff]   ;;  %v975_v45 = vld [vmem:[%s1277_s0 + $0xf4] ss:$8 sps:$4 sm:$0xff]   ;;  %v978_v47 = vld [vmem:[%s1277_s0 + $0xf0] ss:$8 sps:$4 sm:$0xff]  }
  0x11   :  { %v1146_v51 = vld [vmem:[%s1278_s2] ss:$0 sm:$0xff] }
  0x13   :  { %796 = vmatpush3.bf16.msra.mxu0 %v924_v9  ;;  %911 = vmatpush3.bf16.msra.mxu1 %v924_v9 }
  0x14   :  { %797 = vmatprep.subr.bf16.mxu0 %v925_v10  ;;  %904 = vmatprep.subr.bf16.mxu1 %v925_v10 }
  0x17   :  { %798 = vmatpush3.bf16.msra.mxu0 %v926_v13  ;;  %912 = vmatpush3.bf16.msra.mxu1 %v926_v13 }
  0x18   :  { %799 = vmatprep.subr.bf16.mxu0 %v927_v14  ;;  %905 = vmatprep.subr.bf16.mxu1 %v927_v14 }
  0x1b   :  { %800 = vmatpush3.bf16.msra.mxu0 %v928_v15  ;;  %913 = vmatpush3.bf16.msra.mxu1 %v928_v15 }
  0x1c   :  { %801 = vmatprep.subr.bf16.mxu0 %v929_v16  ;;  %906 = vmatprep.subr.bf16.mxu1 %v929_v16 }
  0x1f   :  { %802 = vmatpush3.bf16.msra.mxu0 %v930_v17  ;;  %914 = vmatpush3.bf16.msra.mxu1 %v930_v17 }
  0x22   :  { %436 = vmatmul.mubr.bf16.vlgmr.msra.gmra.mrb[0].mxu0 %v931_v18  ;;  %500 = vmatmul.mubr.bf16.vlgmr.msra.gmra.mrb[0].mxu1 %v934_v19 }
  0x23   :  { %443 = vmatprep.mubr.bf16.mxu0 %v937_v20  ;;  %507 = vmatprep.mubr.bf16.mxu1 %v939_v21 }
  0x2a   :  { %444 = vmatmul.mubr.bf16.gmra.mrb[4].mxu0 %v941_v22  ;;  %508 = vmatmul.mubr.bf16.gmra.mrb[4].mxu1 %v942_v23 }
  0x2b   :  { %451 = vmatprep.mubr.bf16.mxu0 %v943_v24  ;;  %515 = vmatprep.mubr.bf16.mxu1 %v945_v25 }
  0x32   :  { %452 = vmatmul.mubr.bf16.gmra.mrb[8].mxu0 %v947_v26  ;;  %516 = vmatmul.mubr.bf16.gmra.mrb[8].mxu1 %v948_v27 }
  0x33   :  { %459 = vmatprep.mubr.bf16.mxu0 %v949_v28  ;;  %523 = vmatprep.mubr.bf16.mxu1 %v951_v29 }
  0x3a   :  { %460 = vmatmul.mubr.bf16.gmra.mrb[12].mxu0 %v953_v30  ;;  %524 = vmatmul.mubr.bf16.gmra.mrb[12].mxu1 %v954_v31 }
  0x3b   :  { %467 = vmatprep.mubr.bf16.mxu0 %v955_v32  ;;  %531 = vmatprep.mubr.bf16.mxu1 %v957_v33 }
  0x42   :  { %468 = vmatmul.mubr.bf16.gmra.mrb[16].mxu0 %v959_v34  ;;  %532 = vmatmul.mubr.bf16.gmra.mrb[16].mxu1 %v960_v35 }
  0x43   :  { %475 = vmatprep.mubr.bf16.mxu0 %v961_v36  ;;  %539 = vmatprep.mubr.bf16.mxu1 %v963_v37 }
  0x4a   :  { %476 = vmatmul.mubr.bf16.gmra.mrb[20].mxu0 %v965_v38  ;;  %540 = vmatmul.mubr.bf16.gmra.mrb[20].mxu1 %v966_v39 }
  0x4b   :  { %483 = vmatprep.mubr.bf16.mxu0 %v967_v40  ;;  %547 = vmatprep.mubr.bf16.mxu1 %v969_v41 }
  0x52   :  { %484 = vmatmul.mubr.bf16.gmra.mrb[24].mxu0 %v971_v42  ;;  %548 = vmatmul.mubr.bf16.gmra.mrb[24].mxu1 %v972_v43 }
  0x53   :  { %491 = vmatprep.mubr.bf16.mxu0 %v973_v44  ;;  %555 = vmatprep.mubr.bf16.mxu1 %v975_v45 }
  0x5a   :  { %492 = vmatmul.mubr.bf16.gmra.mrb[28].mxu0 %v977_v46  ;;  %556 = vmatmul.mubr.bf16.gmra.mrb[28].mxu1 %v978_v47 }
  0xf5   :  { %v803_v48 = vpop.f32.mrb[0].mxu0  ;;  %v851_v49 = vpop.f32.mrb[0].mxu1 }
  0xf6   :  { %v804_v50 = vpop.f32.mrb[1].mxu0  ;;  %v852_v52 = vpop.f32.mrb[1].mxu1 }
  0xf7   :  { %v805_v53 = vadd.f32 %v804_v50, %v803_v48  ;;  %v853_v54 = vadd.f32 %v852_v52, %v851_v49  ;;  %v806_v55 = vpop.f32.mrb[2].mxu0  ;;  %v854_v56 = vpop.f32.mrb[2].mxu1 }
  0xf8   :  { %v807_v57 = vpop.f32.mrb[3].mxu0  ;;  %v855_v58 = vpop.f32.mrb[3].mxu1 }
  0xf9   :  { %v670_v59 = vadd.f32 %v805_v53, %v1146_v51  ;;  %v686_v60 = vadd.f32 %v853_v54, %v1146_v51  ;;  %v808_v61 = vadd.f32 %v807_v57, %v806_v55  ;;  %v856_v62 = vadd.f32 %v855_v58, %v854_v56 }
  0xfb   :  { %702 = vst [vmem:[%s1279_s3] sm:$0xff] %v670_v59  ;;  %718 = vst [vmem:[%s1279_s3 + $0x80] sm:$0xff] %v686_v60  ;;  %v671_v63 = vadd.f32 %v808_v61, %v1146_v51  ;;  %v687_v0 = vadd.f32 %v856_v62, %v1146_v51 }
  0xfd   :  { %703 = vst [vmem:[%s1279_s3 + $0x8] sm:$0xff] %v671_v63  ;;  %719 = vst [vmem:[%s1279_s3 + $0x88] sm:$0xff] %v687_v0  ;;  %v809_v1 = vpop.f32.mrb[4].mxu0  ;;  %v857_v2 = vpop.f32.mrb[4].mxu1 }
  0xfe   :  { %v810_v3 = vpop.f32.mrb[5].mxu0  ;;  %v858_v4 = vpop.f32.mrb[5].mxu1 }
  0xff   :  { %v811_v5 = vadd.f32 %v810_v3, %v809_v1  ;;  %v859_v6 = vadd.f32 %v858_v4, %v857_v2  ;;  %v812_v7 = vpop.f32.mrb[6].mxu0  ;;  %v860_v8 = vpop.f32.mrb[6].mxu1 }
 0x100   :  { %v813_v9 = vpop.f32.mrb[7].mxu0  ;;  %v861_v10 = vpop.f32.mrb[7].mxu1 }
 0x101   :  { %v672_v11 = vadd.f32 %v811_v5, %v1146_v51  ;;  %v688_v12 = vadd.f32 %v859_v6, %v1146_v51  ;;  %v814_v13 = vadd.f32 %v813_v9, %v812_v7  ;;  %v862_v14 = vadd.f32 %v861_v10, %v860_v8 }
 0x103   :  { %704 = vst [vmem:[%s1279_s3 + $0x10] sm:$0xff] %v672_v11  ;;  %720 = vst [vmem:[%s1279_s3 + $0x90] sm:$0xff] %v688_v12  ;;  %v673_v15 = vadd.f32 %v814_v13, %v1146_v51  ;;  %v689_v16 = vadd.f32 %v862_v14, %v1146_v51 }
 0x105   :  { %705 = vst [vmem:[%s1279_s3 + $0x18] sm:$0xff] %v673_v15  ;;  %721 = vst [vmem:[%s1279_s3 + $0x98] sm:$0xff] %v689_v16  ;;  %v815_v17 = vpop.f32.mrb[8].mxu0  ;;  %v863_v18 = vpop.f32.mrb[8].mxu1 }
 0x106   :  { %v816_v19 = vpop.f32.mrb[9].mxu0  ;;  %v864_v20 = vpop.f32.mrb[9].mxu1 }
 0x107   :  { %v817_v21 = vadd.f32 %v816_v19, %v815_v17  ;;  %v865_v22 = vadd.f32 %v864_v20, %v863_v18  ;;  %v818_v23 = vpop.f32.mrb[10].mxu0  ;;  %v866_v24 = vpop.f32.mrb[10].mxu1 }
 0x108   :  { %v819_v25 = vpop.f32.mrb[11].mxu0  ;;  %v867_v26 = vpop.f32.mrb[11].mxu1 }
 0x109   :  { %v674_v27 = vadd.f32 %v817_v21, %v1146_v51  ;;  %v690_v28 = vadd.f32 %v865_v22, %v1146_v51  ;;  %v820_v29 = vadd.f32 %v819_v25, %v818_v23  ;;  %v868_v30 = vadd.f32 %v867_v26, %v866_v24 }
 0x10b   :  { %706 = vst [vmem:[%s1279_s3 + $0x20] sm:$0xff] %v674_v27  ;;  %722 = vst [vmem:[%s1279_s3 + $0xa0] sm:$0xff] %v690_v28  ;;  %v675_v31 = vadd.f32 %v820_v29, %v1146_v51  ;;  %v691_v32 = vadd.f32 %v868_v30, %v1146_v51 }
 0x10d   :  { %707 = vst [vmem:[%s1279_s3 + $0x28] sm:$0xff] %v675_v31  ;;  %723 = vst [vmem:[%s1279_s3 + $0xa8] sm:$0xff] %v691_v32  ;;  %v821_v33 = vpop.f32.mrb[12].mxu0  ;;  %v869_v34 = vpop.f32.mrb[12].mxu1 }
 0x10e   :  { %v822_v35 = vpop.f32.mrb[13].mxu0  ;;  %v870_v36 = vpop.f32.mrb[13].mxu1 }
 0x10f   :  { %v823_v37 = vadd.f32 %v822_v35, %v821_v33  ;;  %v871_v38 = vadd.f32 %v870_v36, %v869_v34  ;;  %v824_v39 = vpop.f32.mrb[14].mxu0  ;;  %v872_v40 = vpop.f32.mrb[14].mxu1 }
 0x110   :  { %v825_v41 = vpop.f32.mrb[15].mxu0  ;;  %v873_v42 = vpop.f32.mrb[15].mxu1 }
 0x111   :  { %v676_v43 = vadd.f32 %v823_v37, %v1146_v51  ;;  %v692_v44 = vadd.f32 %v871_v38, %v1146_v51  ;;  %v826_v45 = vadd.f32 %v825_v41, %v824_v39  ;;  %v874_v46 = vadd.f32 %v873_v42, %v872_v40 }
 0x113   :  { %708 = vst [vmem:[%s1279_s3 + $0x30] sm:$0xff] %v676_v43  ;;  %724 = vst [vmem:[%s1279_s3 + $0xb0] sm:$0xff] %v692_v44  ;;  %v677_v47 = vadd.f32 %v826_v45, %v1146_v51  ;;  %v693_v48 = vadd.f32 %v874_v46, %v1146_v51 }
 0x115   :  { %709 = vst [vmem:[%s1279_s3 + $0x38] sm:$0xff] %v677_v47  ;;  %725 = vst [vmem:[%s1279_s3 + $0xb8] sm:$0xff] %v693_v48  ;;  %v827_v49 = vpop.f32.mrb[16].mxu0  ;;  %v875_v50 = vpop.f32.mrb[16].mxu1 }
 0x116   :  { %v828_v52 = vpop.f32.mrb[17].mxu0  ;;  %v876_v53 = vpop.f32.mrb[17].mxu1 }
 0x117   :  { %v829_v54 = vadd.f32 %v828_v52, %v827_v49  ;;  %v877_v55 = vadd.f32 %v876_v53, %v875_v50  ;;  %v830_v56 = vpop.f32.mrb[18].mxu0  ;;  %v878_v57 = vpop.f32.mrb[18].mxu1 }
 0x118   :  { %v831_v58 = vpop.f32.mrb[19].mxu0  ;;  %v879_v59 = vpop.f32.mrb[19].mxu1 }
 0x119   :  { %v678_v60 = vadd.f32 %v829_v54, %v1146_v51  ;;  %v694_v61 = vadd.f32 %v877_v55, %v1146_v51  ;;  %v832_v62 = vadd.f32 %v831_v58, %v830_v56  ;;  %v880_v63 = vadd.f32 %v879_v59, %v878_v57 }
 0x11b   :  { %710 = vst [vmem:[%s1279_s3 + $0x40] sm:$0xff] %v678_v60  ;;  %726 = vst [vmem:[%s1279_s3 + $0xc0] sm:$0xff] %v694_v61  ;;  %v679_v0 = vadd.f32 %v832_v62, %v1146_v51  ;;  %v695_v1 = vadd.f32 %v880_v63, %v1146_v51 }
 0x11d   :  { %711 = vst [vmem:[%s1279_s3 + $0x48] sm:$0xff] %v679_v0  ;;  %727 = vst [vmem:[%s1279_s3 + $0xc8] sm:$0xff] %v695_v1  ;;  %v833_v2 = vpop.f32.mrb[20].mxu0  ;;  %v881_v3 = vpop.f32.mrb[20].mxu1 }
 0x11e   :  { %v834_v4 = vpop.f32.mrb[21].mxu0  ;;  %v882_v5 = vpop.f32.mrb[21].mxu1 }
 0x11f   :  { %v835_v6 = vadd.f32 %v834_v4, %v833_v2  ;;  %v883_v7 = vadd.f32 %v882_v5, %v881_v3  ;;  %v836_v8 = vpop.f32.mrb[22].mxu0  ;;  %v884_v9 = vpop.f32.mrb[22].mxu1 }
 0x120   :  { %v837_v10 = vpop.f32.mrb[23].mxu0  ;;  %v885_v11 = vpop.f32.mrb[23].mxu1 }
 0x121   :  { %v680_v12 = vadd.f32 %v835_v6, %v1146_v51  ;;  %v696_v13 = vadd.f32 %v883_v7, %v1146_v51  ;;  %v838_v14 = vadd.f32 %v837_v10, %v836_v8  ;;  %v886_v15 = vadd.f32 %v885_v11, %v884_v9 }
 0x123   :  { %712 = vst [vmem:[%s1279_s3 + $0x50] sm:$0xff] %v680_v12  ;;  %728 = vst [vmem:[%s1279_s3 + $0xd0] sm:$0xff] %v696_v13  ;;  %v681_v16 = vadd.f32 %v838_v14, %v1146_v51  ;;  %v697_v17 = vadd.f32 %v886_v15, %v1146_v51 }
 0x125   :  { %713 = vst [vmem:[%s1279_s3 + $0x58] sm:$0xff] %v681_v16  ;;  %729 = vst [vmem:[%s1279_s3 + $0xd8] sm:$0xff] %v697_v17  ;;  %v839_v18 = vpop.f32.mrb[24].mxu0  ;;  %v887_v19 = vpop.f32.mrb[24].mxu1 }
 0x126   :  { %v840_v20 = vpop.f32.mrb[25].mxu0  ;;  %v888_v21 = vpop.f32.mrb[25].mxu1 }
 0x127   :  { %v841_v22 = vadd.f32 %v840_v20, %v839_v18  ;;  %v889_v23 = vadd.f32 %v888_v21, %v887_v19  ;;  %v842_v24 = vpop.f32.mrb[26].mxu0  ;;  %v890_v25 = vpop.f32.mrb[26].mxu1 }
 0x128   :  { %v843_v26 = vpop.f32.mrb[27].mxu0  ;;  %v891_v27 = vpop.f32.mrb[27].mxu1 }
 0x129   :  { %v682_v28 = vadd.f32 %v841_v22, %v1146_v51  ;;  %v698_v29 = vadd.f32 %v889_v23, %v1146_v51  ;;  %v844_v30 = vadd.f32 %v843_v26, %v842_v24  ;;  %v892_v31 = vadd.f32 %v891_v27, %v890_v25 }
 0x12b   :  { %714 = vst [vmem:[%s1279_s3 + $0x60] sm:$0xff] %v682_v28  ;;  %730 = vst [vmem:[%s1279_s3 + $0xe0] sm:$0xff] %v698_v29  ;;  %v683_v32 = vadd.f32 %v844_v30, %v1146_v51  ;;  %v699_v33 = vadd.f32 %v892_v31, %v1146_v51 }
 0x12d   :  { %715 = vst [vmem:[%s1279_s3 + $0x68] sm:$0xff] %v683_v32  ;;  %731 = vst [vmem:[%s1279_s3 + $0xe8] sm:$0xff] %v699_v33  ;;  %v845_v34 = vpop.f32.mrb[28].mxu0  ;;  %v893_v35 = vpop.f32.mrb[28].mxu1 }
 0x12e   :  { %v846_v36 = vpop.f32.mrb[29].mxu0  ;;  %v894_v37 = vpop.f32.mrb[29].mxu1 }
 0x12f   :  { %v847_v38 = vadd.f32 %v846_v36, %v845_v34  ;;  %v895_v39 = vadd.f32 %v894_v37, %v893_v35  ;;  %v848_v40 = vpop.f32.mrb[30].mxu0  ;;  %v896_v41 = vpop.f32.mrb[30].mxu1 }
 0x130   :  { %v849_v42 = vpop.f32.mrb[31].mxu0  ;;  %v897_v43 = vpop.f32.mrb[31].mxu1 }
 0x131   :  { %v684_v44 = vadd.f32 %v847_v38, %v1146_v51  ;;  %v700_v45 = vadd.f32 %v895_v39, %v1146_v51  ;;  %v850_v46 = vadd.f32 %v849_v42, %v848_v40  ;;  %v898_v47 = vadd.f32 %v897_v43, %v896_v41 }
 0x133   :  { %716 = vst [vmem:[%s1279_s3 + $0x70] sm:$0xff] %v684_v44  ;;  %732 = vst [vmem:[%s1279_s3 + $0xf0] sm:$0xff] %v700_v45  ;;  %v685_v48 = vadd.f32 %v850_v46, %v1146_v51  ;;  %v701_v49 = vadd.f32 %v898_v47, %v1146_v51 }
 0x135   :  { %717 = vst [vmem:[%s1279_s3 + $0x78] sm:$0xff] %v685_v48  ;;  %733 = vst [vmem:[%s1279_s3 + $0xf8] sm:$0xff] %v701_v49 }

// kernel: pretrained_encoder_with_head.20
= control target key start
LH: loop header
LB: loop body
LE: loop exit
PB: predicated region body
PF: predicated region fallthrough
CT: control target
= control target key end

     0   :  { %s2818_s1 = inlined_call_operand.vmem [shape: bf16[512,256], index: 1, kind: input, shape index: {}]   ;;  %s2819_s0 = inlined_call_operand.vmem [shape: bf16[256,512], index: 0, kind: input, shape index: {}]   ;;  %s2820_s2 = inlined_call_operand.vmem [shape: f32[1,256], index: 2, kind: input, shape index: {}]   ;;  %s2821_s3 = inlined_call_operand.vmem [shape: bf16[256,256], index: 3, kind: output, shape index: {}]  }
   0x1   :  { %v2055_v0 = vld [vmem:[%s2818_s1 + $0x4] ss:$8 sps:$4 sm:$0xff]   ;;  %v2059_v2 = vld [vmem:[%s2818_s1] ss:$8 sps:$4 sm:$0xff]   ;;  %v2061_v4 = vld [vmem:[%s2818_s1 + $0x14] ss:$8 sps:$4 sm:$0xff]  }
   0x2   :  { %v2057_v1 = vld [vmem:[%s2818_s1 + $0x104] ss:$8 sps:$4 sm:$0xff]   ;;  %914 = vmatprep.subr.bf16.mxu1 %v2055_v0  ;;  %v2060_v3 = vld [vmem:[%s2818_s1 + $0x100] ss:$8 sps:$4 sm:$0xff]   ;;  %v2063_v5 = vld [vmem:[%s2818_s1 + $0x114] ss:$8 sps:$4 sm:$0xff]  }
   0x3   :  { %1107 = vmatprep.subr.bf16.mxu0 %v2057_v1  ;;  %915 = vmatpush1.bf16.msra.mxu1 %v2059_v2  ;;  %v2065_v6 = vld [vmem:[%s2818_s1 + $0x10] ss:$8 sps:$4 sm:$0xff]   ;;  %v2067_v8 = vld [vmem:[%s2818_s1 + $0x24] ss:$8 sps:$4 sm:$0xff]   ;;  %v2071_v10 = vld [vmem:[%s2818_s1 + $0x20] ss:$8 sps:$4 sm:$0xff]  }
   0x4   :  { %1108 = vmatpush1.bf16.msra.mxu0 %v2060_v3  ;;  %916 = vmatprep.subr.bf16.mxu1 %v2061_v4  ;;  %v2066_v7 = vld [vmem:[%s2818_s1 + $0x110] ss:$8 sps:$4 sm:$0xff]   ;;  %v2069_v9 = vld [vmem:[%s2818_s1 + $0x124] ss:$8 sps:$4 sm:$0xff]   ;;  %v2072_v11 = vld [vmem:[%s2818_s1 + $0x120] ss:$8 sps:$4 sm:$0xff]  }
   0x5   :  { %1109 = vmatprep.subr.bf16.mxu0 %v2063_v5  ;;  %v2073_v12 = vld [vmem:[%s2818_s1 + $0x34] ss:$8 sps:$4 sm:$0xff]   ;;  %v2077_v14 = vld [vmem:[%s2818_s1 + $0x30] ss:$8 sps:$4 sm:$0xff]   ;;  %v2079_v16 = vld [vmem:[%s2818_s1 + $0x44] ss:$8 sps:$4 sm:$0xff]  }
   0x6   :  { %v2075_v13 = vld [vmem:[%s2818_s1 + $0x134] ss:$8 sps:$4 sm:$0xff]   ;;  %v2078_v15 = vld [vmem:[%s2818_s1 + $0x130] ss:$8 sps:$4 sm:$0xff]   ;;  %v2081_v17 = vld [vmem:[%s2818_s1 + $0x144] ss:$8 sps:$4 sm:$0xff]  }
   0x7   :  { %917 = vmatpush1.bf16.msra.mxu1 %v2065_v6  ;;  %v2083_v18 = vld [vmem:[%s2818_s1 + $0x40] ss:$8 sps:$4 sm:$0xff]   ;;  %v2085_v20 = vld [vmem:[%s2818_s1 + $0x54] ss:$8 sps:$4 sm:$0xff]   ;;  %v2089_v22 = vld [vmem:[%s2818_s1 + $0x50] ss:$8 sps:$4 sm:$0xff]  }
   0x8   :  { %1110 = vmatpush1.bf16.msra.mxu0 %v2066_v7  ;;  %918 = vmatprep.subr.bf16.mxu1 %v2067_v8  ;;  %v2084_v19 = vld [vmem:[%s2818_s1 + $0x140] ss:$8 sps:$4 sm:$0xff]   ;;  %v2087_v21 = vld [vmem:[%s2818_s1 + $0x154] ss:$8 sps:$4 sm:$0xff]   ;;  %v2090_v23 = vld [vmem:[%s2818_s1 + $0x150] ss:$8 sps:$4 sm:$0xff]  }
   0x9   :  { %1111 = vmatprep.subr.bf16.mxu0 %v2069_v9  ;;  %v2091_v24 = vld [vmem:[%s2818_s1 + $0x64] ss:$8 sps:$4 sm:$0xff]   ;;  %v2095_v26 = vld [vmem:[%s2818_s1 + $0x60] ss:$8 sps:$4 sm:$0xff]   ;;  %v2097_v28 = vld [vmem:[%s2818_s1 + $0x74] ss:$8 sps:$4 sm:$0xff]  }
   0xa   :  { %v2093_v25 = vld [vmem:[%s2818_s1 + $0x164] ss:$8 sps:$4 sm:$0xff]   ;;  %v2096_v27 = vld [vmem:[%s2818_s1 + $0x160] ss:$8 sps:$4 sm:$0xff]   ;;  %v2099_v29 = vld [vmem:[%s2818_s1 + $0x174] ss:$8 sps:$4 sm:$0xff]  }
   0xb   :  { %919 = vmatpush1.bf16.msra.mxu1 %v2071_v10  ;;  %v2101_v30 = vld [vmem:[%s2818_s1 + $0x70] ss:$8 sps:$4 sm:$0xff]   ;;  %v2103_v32 = vld [vmem:[%s2818_s1 + $0x84] ss:$8 sps:$4 sm:$0xff]   ;;  %v2107_v34 = vld [vmem:[%s2818_s1 + $0x80] ss:$8 sps:$4 sm:$0xff]  }
   0xc   :  { %1112 = vmatpush1.bf16.msra.mxu0 %v2072_v11  ;;  %920 = vmatprep.subr.bf16.mxu1 %v2073_v12  ;;  %v2102_v31 = vld [vmem:[%s2818_s1 + $0x170] ss:$8 sps:$4 sm:$0xff]   ;;  %v2105_v33 = vld [vmem:[%s2818_s1 + $0x184] ss:$8 sps:$4 sm:$0xff]   ;;  %v2108_v35 = vld [vmem:[%s2818_s1 + $0x180] ss:$8 sps:$4 sm:$0xff]  }
   0xd   :  { %1113 = vmatprep.subr.bf16.mxu0 %v2075_v13  ;;  %v2109_v36 = vld [vmem:[%s2818_s1 + $0x94] ss:$8 sps:$4 sm:$0xff]   ;;  %v2113_v38 = vld [vmem:[%s2818_s1 + $0x90] ss:$8 sps:$4 sm:$0xff]   ;;  %v2115_v40 = vld [vmem:[%s2818_s1 + $0xa4] ss:$8 sps:$4 sm:$0xff]  }
   0xe   :  { %v2111_v37 = vld [vmem:[%s2818_s1 + $0x194] ss:$8 sps:$4 sm:$0xff]   ;;  %v2114_v39 = vld [vmem:[%s2818_s1 + $0x190] ss:$8 sps:$4 sm:$0xff]   ;;  %v2117_v41 = vld [vmem:[%s2818_s1 + $0x1a4] ss:$8 sps:$4 sm:$0xff]  }
   0xf   :  { %921 = vmatpush1.bf16.msra.mxu1 %v2077_v14  ;;  %v2119_v42 = vld [vmem:[%s2818_s1 + $0xa0] ss:$8 sps:$4 sm:$0xff]   ;;  %v2121_v44 = vld [vmem:[%s2818_s1 + $0xb4] ss:$8 sps:$4 sm:$0xff]   ;;  %v2125_v46 = vld [vmem:[%s2818_s1 + $0xb0] ss:$8 sps:$4 sm:$0xff]  }
  0x10   :  { %1114 = vmatpush1.bf16.msra.mxu0 %v2078_v15  ;;  %922 = vmatprep.subr.bf16.mxu1 %v2079_v16  ;;  %v2120_v43 = vld [vmem:[%s2818_s1 + $0x1a0] ss:$8 sps:$4 sm:$0xff]   ;;  %v2123_v45 = vld [vmem:[%s2818_s1 + $0x1b4] ss:$8 sps:$4 sm:$0xff]   ;;  %v2126_v47 = vld [vmem:[%s2818_s1 + $0x1b0] ss:$8 sps:$4 sm:$0xff]  }
  0x11   :  { %1115 = vmatprep.subr.bf16.mxu0 %v2081_v17  ;;  %v2127_v48 = vld [vmem:[%s2818_s1 + $0xc4] ss:$8 sps:$4 sm:$0xff]   ;;  %v2131_v52 = vld [vmem:[%s2818_s1 + $0xc0] ss:$8 sps:$4 sm:$0xff]   ;;  %v2133_v54 = vld [vmem:[%s2818_s1 + $0xd4] ss:$8 sps:$4 sm:$0xff]  }
  0x12   :  { %v2153_v49 = vld [vmem:[%s2819_s0 + $0x4] ss:$16 sps:$4 sm:$0xff]   ;;  %v2156_v51 = vld [vmem:[%s2819_s0 + $0xc] ss:$16 sps:$4 sm:$0xff]   ;;  %v2132_v53 = vld [vmem:[%s2818_s1 + $0x1c0] ss:$8 sps:$4 sm:$0xff]  }
  0x13   :  { %923 = vmatpush1.bf16.msra.mxu1 %v2083_v18  ;;  %v2129_v50 = vld [vmem:[%s2818_s1 + $0x1c4] ss:$8 sps:$4 sm:$0xff]   ;;  %946 = vmatprep.mubr.bf16.mxu1 %v2153_v49  ;;  %v2135_v55 = vld [vmem:[%s2818_s1 + $0x1d4] ss:$8 sps:$4 sm:$0xff]   ;;  %v2137_v56 = vld [vmem:[%s2818_s1 + $0xd0] ss:$8 sps:$4 sm:$0xff]  }
  0x14   :  { %1116 = vmatpush1.bf16.msra.mxu0 %v2084_v19  ;;  %924 = vmatprep.subr.bf16.mxu1 %v2085_v20  ;;  %v2138_v57 = vld [vmem:[%s2818_s1 + $0x1d0] ss:$8 sps:$4 sm:$0xff]   ;;  %v2139_v58 = vld [vmem:[%s2818_s1 + $0xe4] ss:$8 sps:$4 sm:$0xff]   ;;  %v2143_v60 = vld [vmem:[%s2818_s1 + $0xe0] ss:$8 sps:$4 sm:$0xff]  }
  0x15   :  { %1117 = vmatprep.subr.bf16.mxu0 %v2087_v21  ;;  %1139 = vmatprep.mubr.bf16.mxu0 %v2156_v51  ;;  %v2141_v59 = vld [vmem:[%s2818_s1 + $0x1e4] ss:$8 sps:$4 sm:$0xff]   ;;  %v2144_v61 = vld [vmem:[%s2818_s1 + $0x1e0] ss:$8 sps:$4 sm:$0xff]   ;;  %v2145_v62 = vld [vmem:[%s2818_s1 + $0xf4] ss:$8 sps:$4 sm:$0xff]  }
  0x16   :  { %v2147_v63 = vld [vmem:[%s2818_s1 + $0x1f4] ss:$8 sps:$4 sm:$0xff]   ;;  %v2149_v0 = vld [vmem:[%s2818_s1 + $0xf0] ss:$8 sps:$4 sm:$0xff]  }
  0x17   :  { %925 = vmatpush1.bf16.msra.mxu1 %v2089_v22  ;;  %v2150_v1 = vld [vmem:[%s2818_s1 + $0x1f0] ss:$8 sps:$4 sm:$0xff]   ;;  %v2157_v4 = vld [vmem:[%s2819_s0 + $0x24] ss:$16 sps:$4 sm:$0xff]   ;;  %v2159_v5 = vld [vmem:[%s2819_s0 + $0x2c] ss:$16 sps:$4 sm:$0xff]  }
  0x18   :  { %1118 = vmatpush1.bf16.msra.mxu0 %v2090_v23  ;;  %926 = vmatprep.subr.bf16.mxu1 %v2091_v24  ;;  %v2151_v2 = vld [vmem:[%s2819_s0] ss:$16 sps:$4 sm:$0xff]   ;;  %v2154_v3 = vld [vmem:[%s2819_s0 + $0x8] ss:$16 sps:$4 sm:$0xff]   ;;  %v2163_v8 = vld [vmem:[%s2819_s0 + $0x44] ss:$16 sps:$4 sm:$0xff]  }
  0x19   :  { %1119 = vmatprep.subr.bf16.mxu0 %v2093_v25  ;;  %v2161_v6 = vld [vmem:[%s2819_s0 + $0x20] ss:$16 sps:$4 sm:$0xff]   ;;  %v2162_v7 = vld [vmem:[%s2819_s0 + $0x28] ss:$16 sps:$4 sm:$0xff]   ;;  %v2165_v9 = vld [vmem:[%s2819_s0 + $0x4c] ss:$16 sps:$4 sm:$0xff]  }
  0x1a   :  { %v2167_v10 = vld [vmem:[%s2819_s0 + $0x40] ss:$16 sps:$4 sm:$0xff]   ;;  %v2168_v11 = vld [vmem:[%s2819_s0 + $0x48] ss:$16 sps:$4 sm:$0xff]   ;;  %v2169_v12 = vld [vmem:[%s2819_s0 + $0x64] ss:$16 sps:$4 sm:$0xff]  }
  0x1b   :  { %927 = vmatpush1.bf16.msra.mxu1 %v2095_v26  ;;  %v2171_v13 = vld [vmem:[%s2819_s0 + $0x6c] ss:$16 sps:$4 sm:$0xff]   ;;  %v2173_v14 = vld [vmem:[%s2819_s0 + $0x60] ss:$16 sps:$4 sm:$0xff]   ;;  %v2174_v15 = vld [vmem:[%s2819_s0 + $0x68] ss:$16 sps:$4 sm:$0xff]  }
  0x1c   :  { %1120 = vmatpush1.bf16.msra.mxu0 %v2096_v27  ;;  %928 = vmatprep.subr.bf16.mxu1 %v2097_v28  ;;  %v2175_v16 = vld [vmem:[%s2819_s0 + $0x84] ss:$16 sps:$4 sm:$0xff]   ;;  %v2177_v17 = vld [vmem:[%s2819_s0 + $0x8c] ss:$16 sps:$4 sm:$0xff]   ;;  %v2179_v18 = vld [vmem:[%s2819_s0 + $0x80] ss:$16 sps:$4 sm:$0xff]  }
  0x1d   :  { %1121 = vmatprep.subr.bf16.mxu0 %v2099_v29  ;;  %v2180_v19 = vld [vmem:[%s2819_s0 + $0x88] ss:$16 sps:$4 sm:$0xff]   ;;  %v2181_v20 = vld [vmem:[%s2819_s0 + $0xa4] ss:$16 sps:$4 sm:$0xff]   ;;  %v2183_v21 = vld [vmem:[%s2819_s0 + $0xac] ss:$16 sps:$4 sm:$0xff]  }
  0x1e   :  { %v2185_v22 = vld [vmem:[%s2819_s0 + $0xa0] ss:$16 sps:$4 sm:$0xff]   ;;  %v2186_v23 = vld [vmem:[%s2819_s0 + $0xa8] ss:$16 sps:$4 sm:$0xff]   ;;  %v2187_v24 = vld [vmem:[%s2819_s0 + $0xc4] ss:$16 sps:$4 sm:$0xff]  }
  0x1f   :  { %929 = vmatpush1.bf16.msra.mxu1 %v2101_v30  ;;  %v2189_v25 = vld [vmem:[%s2819_s0 + $0xcc] ss:$16 sps:$4 sm:$0xff]   ;;  %v2191_v26 = vld [vmem:[%s2819_s0 + $0xc0] ss:$16 sps:$4 sm:$0xff]   ;;  %v2192_v27 = vld [vmem:[%s2819_s0 + $0xc8] ss:$16 sps:$4 sm:$0xff]  }
  0x20   :  { %1122 = vmatpush1.bf16.msra.mxu0 %v2102_v31  ;;  %930 = vmatprep.subr.bf16.mxu1 %v2103_v32  ;;  %v2193_v28 = vld [vmem:[%s2819_s0 + $0xe4] ss:$16 sps:$4 sm:$0xff]   ;;  %v2195_v29 = vld [vmem:[%s2819_s0 + $0xec] ss:$16 sps:$4 sm:$0xff]   ;;  %v2197_v30 = vld [vmem:[%s2819_s0 + $0xe0] ss:$16 sps:$4 sm:$0xff]  }
  0x21   :  { %1123 = vmatprep.subr.bf16.mxu0 %v2105_v33  ;;  %v2198_v31 = vld [vmem:[%s2819_s0 + $0xe8] ss:$16 sps:$4 sm:$0xff]   ;;  %v2199_v32 = vld [vmem:[%s2819_s0 + $0x104] ss:$16 sps:$4 sm:$0xff]   ;;  %v2201_v33 = vld [vmem:[%s2819_s0 + $0x10c] ss:$16 sps:$4 sm:$0xff]  }
  0x22   :  { %v2225_v49 = vld [vmem:[%s2819_s0 + $0x18c] ss:$16 sps:$4 sm:$0xff]   ;;  %v2228_v51 = vld [vmem:[%s2819_s0 + $0x188] ss:$16 sps:$4 sm:$0xff]  }
  0x23   :  { %931 = vmatpush1.bf16.msra.mxu1 %v2107_v34  ;;  %v2203_v34 = vld [vmem:[%s2819_s0 + $0x100] ss:$16 sps:$4 sm:$0xff]  }
  0x24   :  { %1124 = vmatpush1.bf16.msra.mxu0 %v2108_v35  ;;  %932 = vmatprep.subr.bf16.mxu1 %v2109_v36  ;;  %v2204_v35 = vld [vmem:[%s2819_s0 + $0x108] ss:$16 sps:$4 sm:$0xff]   ;;  %v2205_v36 = vld [vmem:[%s2819_s0 + $0x124] ss:$16 sps:$4 sm:$0xff]  }
  0x25   :  { %1125 = vmatprep.subr.bf16.mxu0 %v2111_v37  ;;  %v2207_v37 = vld [vmem:[%s2819_s0 + $0x12c] ss:$16 sps:$4 sm:$0xff]  }
  0x27   :  { %933 = vmatpush1.bf16.msra.mxu1 %v2113_v38  ;;  %v2209_v38 = vld [vmem:[%s2819_s0 + $0x120] ss:$16 sps:$4 sm:$0xff]  }
  0x28   :  { %1126 = vmatpush1.bf16.msra.mxu0 %v2114_v39  ;;  %934 = vmatprep.subr.bf16.mxu1 %v2115_v40  ;;  %v2210_v39 = vld [vmem:[%s2819_s0 + $0x128] ss:$16 sps:$4 sm:$0xff]   ;;  %v2211_v40 = vld [vmem:[%s2819_s0 + $0x144] ss:$16 sps:$4 sm:$0xff]  }
  0x29   :  { %1127 = vmatprep.subr.bf16.mxu0 %v2117_v41  ;;  %v2213_v41 = vld [vmem:[%s2819_s0 + $0x14c] ss:$16 sps:$4 sm:$0xff]  }
  0x2b   :  { %935 = vmatpush1.bf16.msra.mxu1 %v2119_v42  ;;  %v2215_v42 = vld [vmem:[%s2819_s0 + $0x140] ss:$16 sps:$4 sm:$0xff]  }
  0x2c   :  { %1128 = vmatpush1.bf16.msra.mxu0 %v2120_v43  ;;  %936 = vmatprep.subr.bf16.mxu1 %v2121_v44  ;;  %v2216_v43 = vld [vmem:[%s2819_s0 + $0x148] ss:$16 sps:$4 sm:$0xff]   ;;  %v2217_v44 = vld [vmem:[%s2819_s0 + $0x164] ss:$16 sps:$4 sm:$0xff]  }
  0x2d   :  { %1129 = vmatprep.subr.bf16.mxu0 %v2123_v45  ;;  %v2219_v45 = vld [vmem:[%s2819_s0 + $0x16c] ss:$16 sps:$4 sm:$0xff]  }
  0x2f   :  { %937 = vmatpush1.bf16.msra.mxu1 %v2125_v46  ;;  %v2221_v46 = vld [vmem:[%s2819_s0 + $0x160] ss:$16 sps:$4 sm:$0xff]  }
  0x30   :  { %1130 = vmatpush1.bf16.msra.mxu0 %v2126_v47  ;;  %938 = vmatprep.subr.bf16.mxu1 %v2127_v48  ;;  %v2222_v47 = vld [vmem:[%s2819_s0 + $0x168] ss:$16 sps:$4 sm:$0xff]   ;;  %v2223_v48 = vld [vmem:[%s2819_s0 + $0x184] ss:$16 sps:$4 sm:$0xff]  }
  0x31   :  { %1131 = vmatprep.subr.bf16.mxu0 %v2129_v50  ;;  %v2227_v50 = vld [vmem:[%s2819_s0 + $0x180] ss:$16 sps:$4 sm:$0xff]  }
  0x33   :  { %939 = vmatpush1.bf16.msra.mxu1 %v2131_v52  ;;  %v2229_v52 = vld [vmem:[%s2819_s0 + $0x1a4] ss:$16 sps:$4 sm:$0xff]  }
  0x34   :  { %1132 = vmatpush1.bf16.msra.mxu0 %v2132_v53  ;;  %940 = vmatprep.subr.bf16.mxu1 %v2133_v54  ;;  %v2231_v53 = vld [vmem:[%s2819_s0 + $0x1ac] ss:$16 sps:$4 sm:$0xff]   ;;  %v2233_v54 = vld [vmem:[%s2819_s0 + $0x1a0] ss:$16 sps:$4 sm:$0xff]  }
  0x35   :  { %1133 = vmatprep.subr.bf16.mxu0 %v2135_v55  ;;  %v2234_v55 = vld [vmem:[%s2819_s0 + $0x1a8] ss:$16 sps:$4 sm:$0xff]  }
  0x37   :  { %941 = vmatpush1.bf16.msra.mxu1 %v2137_v56  ;;  %v2235_v56 = vld [vmem:[%s2819_s0 + $0x1c4] ss:$16 sps:$4 sm:$0xff]  }
  0x38   :  { %1134 = vmatpush1.bf16.msra.mxu0 %v2138_v57  ;;  %942 = vmatprep.subr.bf16.mxu1 %v2139_v58  ;;  %v2237_v57 = vld [vmem:[%s2819_s0 + $0x1cc] ss:$16 sps:$4 sm:$0xff]   ;;  %v2239_v58 = vld [vmem:[%s2819_s0 + $0x1c0] ss:$16 sps:$4 sm:$0xff]  }
  0x39   :  { %1135 = vmatprep.subr.bf16.mxu0 %v2141_v59  ;;  %v2240_v59 = vld [vmem:[%s2819_s0 + $0x1c8] ss:$16 sps:$4 sm:$0xff]  }
  0x3b   :  { %943 = vmatpush1.bf16.msra.mxu1 %v2143_v60  ;;  %v2241_v60 = vld [vmem:[%s2819_s0 + $0x1e4] ss:$16 sps:$4 sm:$0xff]  }
  0x3c   :  { %1136 = vmatpush1.bf16.msra.mxu0 %v2144_v61  ;;  %944 = vmatprep.subr.bf16.mxu1 %v2145_v62  ;;  %v2243_v61 = vld [vmem:[%s2819_s0 + $0x1ec] ss:$16 sps:$4 sm:$0xff]   ;;  %v2245_v62 = vld [vmem:[%s2819_s0 + $0x1e0] ss:$16 sps:$4 sm:$0xff]  }
  0x3d   :  { %1137 = vmatprep.subr.bf16.mxu0 %v2147_v63  ;;  %v2246_v63 = vld [vmem:[%s2819_s0 + $0x1e8] ss:$16 sps:$4 sm:$0xff]  }
  0x3f   :  { %945 = vmatpush1.bf16.msra.mxu1 %v2149_v0  ;;  %v1497_v0 = vlaneseq }
  0x40   :  { %1138 = vmatpush1.bf16.msra.mxu0 %v2150_v1 }
  0x41   :  { %v1498_v1 = vshrl.u32 %v1497_v0, 7 }
  0x42   :  { %947 = vmatmul.mubr.bf16.vlgmr.msra.gmra.mrb[0].mxu1 %v2151_v2 }
  0x43   :  { %1140 = vmatmul.mubr.bf16.vlgmr.msra.gmra.mrb[0].mxu0 %v2154_v3  ;;  %956 = vmatprep.mubr.bf16.mxu1 %v2157_v4  ;;  %v1499_v2 = vsub.s32 0, %v1498_v1  ;;  %v1495_v3 = vld [vmem:[%s2820_s2] sm:$0x3]  ;;  %v1503_v4 = vsub.s32 1, %v1498_v1 }
  0x44   :  { %1149 = vmatprep.mubr.bf16.mxu0 %v2159_v5 }
  0x45   :  { %v2654_v5 = vrot.slane %v1495_v3, %v1499_v2 }
  0x4a   :  { %957 = vmatmul.mubr.bf16.gmra.mrb[4].mxu1 %v2161_v6 }
  0x4b   :  { %1150 = vmatmul.mubr.bf16.gmra.mrb[4].mxu0 %v2162_v7  ;;  %966 = vmatprep.mubr.bf16.mxu1 %v2163_v8  ;;  %v2656_v8 = vrot.slane %v1495_v3, %v1503_v4 }
  0x4c   :  { %1159 = vmatprep.mubr.bf16.mxu0 %v2165_v9 }
  0x52   :  { %967 = vmatmul.mubr.bf16.gmra.mrb[8].mxu1 %v2167_v10 }
  0x53   :  { %1160 = vmatmul.mubr.bf16.gmra.mrb[8].mxu0 %v2168_v11  ;;  %976 = vmatprep.mubr.bf16.mxu1 %v2169_v12 }
  0x54   :  { %1169 = vmatprep.mubr.bf16.mxu0 %v2171_v13 }
  0x5a   :  { %977 = vmatmul.mubr.bf16.gmra.mrb[12].mxu1 %v2173_v14 }
  0x5b   :  { %1170 = vmatmul.mubr.bf16.gmra.mrb[12].mxu0 %v2174_v15  ;;  %986 = vmatprep.mubr.bf16.mxu1 %v2175_v16 }
  0x5c   :  { %1179 = vmatprep.mubr.bf16.mxu0 %v2177_v17 }
  0x62   :  { %987 = vmatmul.mubr.bf16.gmra.mrb[16].mxu1 %v2179_v18 }
  0x63   :  { %1180 = vmatmul.mubr.bf16.gmra.mrb[16].mxu0 %v2180_v19  ;;  %996 = vmatprep.mubr.bf16.mxu1 %v2181_v20 }
  0x64   :  { %1189 = vmatprep.mubr.bf16.mxu0 %v2183_v21 }
  0x6a   :  { %997 = vmatmul.mubr.bf16.gmra.mrb[20].mxu1 %v2185_v22 }
  0x6b   :  { %1190 = vmatmul.mubr.bf16.gmra.mrb[20].mxu0 %v2186_v23  ;;  %1006 = vmatprep.mubr.bf16.mxu1 %v2187_v24 }
  0x6c   :  { %1199 = vmatprep.mubr.bf16.mxu0 %v2189_v25 }
  0x72   :  { %1007 = vmatmul.mubr.bf16.gmra.mrb[24].mxu1 %v2191_v26 }
  0x73   :  { %1200 = vmatmul.mubr.bf16.gmra.mrb[24].mxu0 %v2192_v27  ;;  %1016 = vmatprep.mubr.bf16.mxu1 %v2193_v28 }
  0x74   :  { %1209 = vmatprep.mubr.bf16.mxu0 %v2195_v29 }
  0x7a   :  { %1017 = vmatmul.mubr.bf16.gmra.mrb[28].mxu1 %v2197_v30 }
  0x7b   :  { %1210 = vmatmul.mubr.bf16.gmra.mrb[28].mxu0 %v2198_v31  ;;  %1026 = vmatprep.mubr.bf16.mxu1 %v2199_v32 }
  0x7c   :  { %1219 = vmatprep.mubr.bf16.mxu0 %v2201_v33 }
  0x82   :  { %1027 = vmatmul.mubr.bf16.gmra.mrb[32].mxu1 %v2203_v34 }
  0x83   :  { %1220 = vmatmul.mubr.bf16.gmra.mrb[32].mxu0 %v2204_v35  ;;  %1036 = vmatprep.mubr.bf16.mxu1 %v2205_v36 }
  0x84   :  { %1229 = vmatprep.mubr.bf16.mxu0 %v2207_v37 }
  0x8a   :  { %1037 = vmatmul.mubr.bf16.gmra.mrb[36].mxu1 %v2209_v38 }
  0x8b   :  { %1230 = vmatmul.mubr.bf16.gmra.mrb[36].mxu0 %v2210_v39  ;;  %1046 = vmatprep.mubr.bf16.mxu1 %v2211_v40 }
  0x8c   :  { %1239 = vmatprep.mubr.bf16.mxu0 %v2213_v41 }
  0x92   :  { %1047 = vmatmul.mubr.bf16.gmra.mrb[40].mxu1 %v2215_v42 }
  0x93   :  { %1240 = vmatmul.mubr.bf16.gmra.mrb[40].mxu0 %v2216_v43  ;;  %1056 = vmatprep.mubr.bf16.mxu1 %v2217_v44 }
  0x94   :  { %1249 = vmatprep.mubr.bf16.mxu0 %v2219_v45 }
  0x9a   :  { %1057 = vmatmul.mubr.bf16.gmra.mrb[44].mxu1 %v2221_v46 }
  0x9b   :  { %1250 = vmatmul.mubr.bf16.gmra.mrb[44].mxu0 %v2222_v47  ;;  %1066 = vmatprep.mubr.bf16.mxu1 %v2223_v48 }
  0x9c   :  { %1259 = vmatprep.mubr.bf16.mxu0 %v2225_v49 }
  0xa2   :  { %1067 = vmatmul.mubr.bf16.gmra.mrb[48].mxu1 %v2227_v50 }
  0xa3   :  { %1260 = vmatmul.mubr.bf16.gmra.mrb[48].mxu0 %v2228_v51  ;;  %1076 = vmatprep.mubr.bf16.mxu1 %v2229_v52 }
  0xa4   :  { %1269 = vmatprep.mubr.bf16.mxu0 %v2231_v53 }
  0xaa   :  { %1077 = vmatmul.mubr.bf16.gmra.mrb[52].mxu1 %v2233_v54 }
  0xab   :  { %1270 = vmatmul.mubr.bf16.gmra.mrb[52].mxu0 %v2234_v55  ;;  %1086 = vmatprep.mubr.bf16.mxu1 %v2235_v56 }
  0xac   :  { %1279 = vmatprep.mubr.bf16.mxu0 %v2237_v57 }
  0xb2   :  { %1087 = vmatmul.mubr.bf16.gmra.mrb[56].mxu1 %v2239_v58 }
  0xb3   :  { %1280 = vmatmul.mubr.bf16.gmra.mrb[56].mxu0 %v2240_v59  ;;  %1096 = vmatprep.mubr.bf16.mxu1 %v2241_v60 }
  0xb4   :  { %1289 = vmatprep.mubr.bf16.mxu0 %v2243_v61 }
  0xba   :  { %1097 = vmatmul.mubr.bf16.gmra.mrb[60].mxu1 %v2245_v62 }
  0xbb   :  { %1290 = vmatmul.mubr.bf16.gmra.mrb[60].mxu0 %v2246_v63 }
 0x115   :  { %v948_v6 = vpop.f32.mrb[0].mxu1 }
 0x116   :  { %v1141_v7 = vpop.f32.mrb[0].mxu0  ;;  %v950_v10 = vpop.f32.mrb[1].mxu1 }
 0x117   :  { %v1142_v9 = vadd.f32 %v1141_v7, %v948_v6  ;;  %v1143_v11 = vpop.f32.mrb[1].mxu0  ;;  %v952_v13 = vpop.f32.mrb[2].mxu1 }
 0x118   :  { %v1144_v12 = vadd.f32 %v1143_v11, %v950_v10  ;;  %v1145_v14 = vpop.f32.mrb[2].mxu0  ;;  %v954_v17 = vpop.f32.mrb[3].mxu1 }
 0x119   :  { %v1507_v15 = vadd.f32 %v2654_v5, %v1142_v9  ;;  %v1146_v16 = vadd.f32 %v1145_v14, %v952_v13  ;;  %v1147_v18 = vpop.f32.mrb[3].mxu0 }
 0x11a   :  { %v1508_v19 = vadd.f32 %v2656_v8, %v1144_v12  ;;  %v1148_v20 = vadd.f32 %v1147_v18, %v954_v17 }
 0x11b   :  { %v1509_v21 = vadd.f32 %v2654_v5, %v1146_v16 }
 0x11c   :  { %v1959_v22 = vpack.c.bf16 %v1508_v19, %v1507_v15  ;;  %v1510_v23 = vadd.f32 %v2656_v8, %v1148_v20 }
 0x11d   :  { %v958_v25 = vpop.f32.mrb[4].mxu1 }
 0x11e   :  { %1763 = vst [vmem:[%s2821_s3] sm:$0xff] %v1959_v22  ;;  %v1960_v24 = vpack.c.bf16 %v1510_v23, %v1509_v21  ;;  %v1151_v26 = vpop.f32.mrb[4].mxu0  ;;  %v960_v28 = vpop.f32.mrb[5].mxu1 }
 0x11f   :  { %v1152_v27 = vadd.f32 %v1151_v26, %v958_v25  ;;  %v1153_v29 = vpop.f32.mrb[5].mxu0  ;;  %v962_v31 = vpop.f32.mrb[6].mxu1 }
 0x120   :  { %1764 = vst [vmem:[%s2821_s3 + $0x8] sm:$0xff] %v1960_v24  ;;  %v1154_v30 = vadd.f32 %v1153_v29, %v960_v28  ;;  %v1155_v32 = vpop.f32.mrb[6].mxu0  ;;  %v964_v35 = vpop.f32.mrb[7].mxu1 }
 0x121   :  { %v1511_v33 = vadd.f32 %v2654_v5, %v1152_v27  ;;  %v1156_v34 = vadd.f32 %v1155_v32, %v962_v31  ;;  %v1157_v36 = vpop.f32.mrb[7].mxu0 }
 0x122   :  { %v1512_v37 = vadd.f32 %v2656_v8, %v1154_v30  ;;  %v1158_v38 = vadd.f32 %v1157_v36, %v964_v35 }
 0x123   :  { %v1513_v39 = vadd.f32 %v2654_v5, %v1156_v34 }
 0x124   :  { %v1961_v40 = vpack.c.bf16 %v1512_v37, %v1511_v33  ;;  %v1514_v41 = vadd.f32 %v2656_v8, %v1158_v38 }
 0x125   :  { %v968_v43 = vpop.f32.mrb[8].mxu1 }
 0x126   :  { %1765 = vst [vmem:[%s2821_s3 + $0x10] sm:$0xff] %v1961_v40  ;;  %v1962_v42 = vpack.c.bf16 %v1514_v41, %v1513_v39  ;;  %v1161_v44 = vpop.f32.mrb[8].mxu0  ;;  %v970_v46 = vpop.f32.mrb[9].mxu1 }
 0x127   :  { %v1162_v45 = vadd.f32 %v1161_v44, %v968_v43  ;;  %v1163_v47 = vpop.f32.mrb[9].mxu0  ;;  %v972_v49 = vpop.f32.mrb[10].mxu1 }
 0x128   :  { %1766 = vst [vmem:[%s2821_s3 + $0x18] sm:$0xff] %v1962_v42  ;;  %v1164_v48 = vadd.f32 %v1163_v47, %v970_v46  ;;  %v1165_v50 = vpop.f32.mrb[10].mxu0  ;;  %v974_v53 = vpop.f32.mrb[11].mxu1 }
 0x129   :  { %v1515_v51 = vadd.f32 %v2654_v5, %v1162_v45  ;;  %v1166_v52 = vadd.f32 %v1165_v50, %v972_v49  ;;  %v1167_v54 = vpop.f32.mrb[11].mxu0 }
 0x12a   :  { %v1516_v55 = vadd.f32 %v2656_v8, %v1164_v48  ;;  %v1168_v56 = vadd.f32 %v1167_v54, %v974_v53 }
 0x12b   :  { %v1517_v57 = vadd.f32 %v2654_v5, %v1166_v52 }
 0x12c   :  { %v1963_v58 = vpack.c.bf16 %v1516_v55, %v1515_v51  ;;  %v1518_v59 = vadd.f32 %v2656_v8, %v1168_v56 }
 0x12d   :  { %v978_v61 = vpop.f32.mrb[12].mxu1 }
 0x12e   :  { %1767 = vst [vmem:[%s2821_s3 + $0x20] sm:$0xff] %v1963_v58  ;;  %v1964_v60 = vpack.c.bf16 %v1518_v59, %v1517_v57  ;;  %v1171_v62 = vpop.f32.mrb[12].mxu0  ;;  %v980_v0 = vpop.f32.mrb[13].mxu1 }
 0x12f   :  { %v1172_v63 = vadd.f32 %v1171_v62, %v978_v61  ;;  %v1173_v1 = vpop.f32.mrb[13].mxu0  ;;  %v982_v3 = vpop.f32.mrb[14].mxu1 }
 0x130   :  { %1768 = vst [vmem:[%s2821_s3 + $0x28] sm:$0xff] %v1964_v60  ;;  %v1174_v2 = vadd.f32 %v1173_v1, %v980_v0  ;;  %v1175_v4 = vpop.f32.mrb[14].mxu0  ;;  %v984_v9 = vpop.f32.mrb[15].mxu1 }
 0x131   :  { %v1519_v6 = vadd.f32 %v2654_v5, %v1172_v63  ;;  %v1176_v7 = vadd.f32 %v1175_v4, %v982_v3  ;;  %v1177_v10 = vpop.f32.mrb[15].mxu0 }
 0x132   :  { %v1520_v11 = vadd.f32 %v2656_v8, %v1174_v2  ;;  %v1178_v12 = vadd.f32 %v1177_v10, %v984_v9 }
 0x133   :  { %v1521_v13 = vadd.f32 %v2654_v5, %v1176_v7 }
 0x134   :  { %v1965_v14 = vpack.c.bf16 %v1520_v11, %v1519_v6  ;;  %v1522_v15 = vadd.f32 %v2656_v8, %v1178_v12 }
 0x135   :  { %v988_v17 = vpop.f32.mrb[16].mxu1 }
 0x136   :  { %1769 = vst [vmem:[%s2821_s3 + $0x30] sm:$0xff] %v1965_v14  ;;  %v1966_v16 = vpack.c.bf16 %v1522_v15, %v1521_v13  ;;  %v1181_v18 = vpop.f32.mrb[16].mxu0  ;;  %v990_v20 = vpop.f32.mrb[17].mxu1 }
 0x137   :  { %v1182_v19 = vadd.f32 %v1181_v18, %v988_v17  ;;  %v1183_v21 = vpop.f32.mrb[17].mxu0  ;;  %v992_v23 = vpop.f32.mrb[18].mxu1 }
 0x138   :  { %1770 = vst [vmem:[%s2821_s3 + $0x38] sm:$0xff] %v1966_v16  ;;  %v1184_v22 = vadd.f32 %v1183_v21, %v990_v20  ;;  %v1185_v24 = vpop.f32.mrb[18].mxu0  ;;  %v994_v27 = vpop.f32.mrb[19].mxu1 }
 0x139   :  { %v1523_v25 = vadd.f32 %v2654_v5, %v1182_v19  ;;  %v1186_v26 = vadd.f32 %v1185_v24, %v992_v23  ;;  %v1187_v28 = vpop.f32.mrb[19].mxu0 }
 0x13a   :  { %v1524_v29 = vadd.f32 %v2656_v8, %v1184_v22  ;;  %v1188_v30 = vadd.f32 %v1187_v28, %v994_v27 }
 0x13b   :  { %v1525_v31 = vadd.f32 %v2654_v5, %v1186_v26 }
 0x13c   :  { %v1967_v32 = vpack.c.bf16 %v1524_v29, %v1523_v25  ;;  %v1526_v33 = vadd.f32 %v2656_v8, %v1188_v30 }
 0x13d   :  { %v998_v35 = vpop.f32.mrb[20].mxu1 }
 0x13e   :  { %1771 = vst [vmem:[%s2821_s3 + $0x40] sm:$0xff] %v1967_v32  ;;  %v1968_v34 = vpack.c.bf16 %v1526_v33, %v1525_v31  ;;  %v1191_v36 = vpop.f32.mrb[20].mxu0  ;;  %v1000_v38 = vpop.f32.mrb[21].mxu1 }
 0x13f   :  { %v1192_v37 = vadd.f32 %v1191_v36, %v998_v35  ;;  %v1193_v39 = vpop.f32.mrb[21].mxu0  ;;  %v1002_v41 = vpop.f32.mrb[22].mxu1 }
 0x140   :  { %1772 = vst [vmem:[%s2821_s3 + $0x48] sm:$0xff] %v1968_v34  ;;  %v1194_v40 = vadd.f32 %v1193_v39, %v1000_v38  ;;  %v1195_v42 = vpop.f32.mrb[22].mxu0  ;;  %v1004_v45 = vpop.f32.mrb[23].mxu1 }
 0x141   :  { %v1527_v43 = vadd.f32 %v2654_v5, %v1192_v37  ;;  %v1196_v44 = vadd.f32 %v1195_v42, %v1002_v41  ;;  %v1197_v46 = vpop.f32.mrb[23].mxu0 }
 0x142   :  { %v1528_v47 = vadd.f32 %v2656_v8, %v1194_v40  ;;  %v1198_v48 = vadd.f32 %v1197_v46, %v1004_v45 }
 0x143   :  { %v1529_v49 = vadd.f32 %v2654_v5, %v1196_v44 }
 0x144   :  { %v1969_v50 = vpack.c.bf16 %v1528_v47, %v1527_v43  ;;  %v1530_v51 = vadd.f32 %v2656_v8, %v1198_v48 }
 0x145   :  { %v1008_v53 = vpop.f32.mrb[24].mxu1 }
 0x146   :  { %1773 = vst [vmem:[%s2821_s3 + $0x50] sm:$0xff] %v1969_v50  ;;  %v1970_v52 = vpack.c.bf16 %v1530_v51, %v1529_v49  ;;  %v1201_v54 = vpop.f32.mrb[24].mxu0  ;;  %v1010_v56 = vpop.f32.mrb[25].mxu1 }
 0x147   :  { %v1202_v55 = vadd.f32 %v1201_v54, %v1008_v53  ;;  %v1203_v57 = vpop.f32.mrb[25].mxu0  ;;  %v1012_v59 = vpop.f32.mrb[26].mxu1 }
 0x148   :  { %1774 = vst [vmem:[%s2821_s3 + $0x58] sm:$0xff] %v1970_v52  ;;  %v1204_v58 = vadd.f32 %v1203_v57, %v1010_v56  ;;  %v1205_v60 = vpop.f32.mrb[26].mxu0  ;;  %v1014_v63 = vpop.f32.mrb[27].mxu1 }
 0x149   :  { %v1531_v61 = vadd.f32 %v2654_v5, %v1202_v55  ;;  %v1206_v62 = vadd.f32 %v1205_v60, %v1012_v59  ;;  %v1207_v0 = vpop.f32.mrb[27].mxu0 }
 0x14a   :  { %v1532_v1 = vadd.f32 %v2656_v8, %v1204_v58  ;;  %v1208_v2 = vadd.f32 %v1207_v0, %v1014_v63 }
 0x14b   :  { %v1533_v3 = vadd.f32 %v2654_v5, %v1206_v62 }
 0x14c   :  { %v1971_v4 = vpack.c.bf16 %v1532_v1, %v1531_v61  ;;  %v1534_v6 = vadd.f32 %v2656_v8, %v1208_v2 }
 0x14d   :  { %v1018_v9 = vpop.f32.mrb[28].mxu1 }
 0x14e   :  { %1775 = vst [vmem:[%s2821_s3 + $0x60] sm:$0xff] %v1971_v4  ;;  %v1972_v7 = vpack.c.bf16 %v1534_v6, %v1533_v3  ;;  %v1211_v10 = vpop.f32.mrb[28].mxu0  ;;  %v1020_v12 = vpop.f32.mrb[29].mxu1 }
 0x14f   :  { %v1212_v11 = vadd.f32 %v1211_v10, %v1018_v9  ;;  %v1213_v13 = vpop.f32.mrb[29].mxu0  ;;  %v1022_v15 = vpop.f32.mrb[30].mxu1 }
 0x150   :  { %1776 = vst [vmem:[%s2821_s3 + $0x68] sm:$0xff] %v1972_v7  ;;  %v1214_v14 = vadd.f32 %v1213_v13, %v1020_v12  ;;  %v1215_v16 = vpop.f32.mrb[30].mxu0  ;;  %v1024_v19 = vpop.f32.mrb[31].mxu1 }
 0x151   :  { %v1535_v17 = vadd.f32 %v2654_v5, %v1212_v11  ;;  %v1216_v18 = vadd.f32 %v1215_v16, %v1022_v15  ;;  %v1217_v20 = vpop.f32.mrb[31].mxu0 }
 0x152   :  { %v1536_v21 = vadd.f32 %v2656_v8, %v1214_v14  ;;  %v1218_v22 = vadd.f32 %v1217_v20, %v1024_v19 }
 0x153   :  { %v1537_v23 = vadd.f32 %v2654_v5, %v1216_v18 }
 0x154   :  { %v1973_v24 = vpack.c.bf16 %v1536_v21, %v1535_v17  ;;  %v1538_v25 = vadd.f32 %v2656_v8, %v1218_v22 }
 0x155   :  { %v1028_v27 = vpop.f32.mrb[32].mxu1 }
 0x156   :  { %1777 = vst [vmem:[%s2821_s3 + $0x70] sm:$0xff] %v1973_v24  ;;  %v1974_v26 = vpack.c.bf16 %v1538_v25, %v1537_v23  ;;  %v1221_v28 = vpop.f32.mrb[32].mxu0  ;;  %v1030_v30 = vpop.f32.mrb[33].mxu1 }
 0x157   :  { %v1222_v29 = vadd.f32 %v1221_v28, %v1028_v27  ;;  %v1223_v31 = vpop.f32.mrb[33].mxu0  ;;  %v1032_v33 = vpop.f32.mrb[34].mxu1 }
 0x158   :  { %1778 = vst [vmem:[%s2821_s3 + $0x78] sm:$0xff] %v1974_v26  ;;  %v1224_v32 = vadd.f32 %v1223_v31, %v1030_v30  ;;  %v1225_v34 = vpop.f32.mrb[34].mxu0  ;;  %v1034_v37 = vpop.f32.mrb[35].mxu1 }
 0x159   :  { %v1539_v35 = vadd.f32 %v2654_v5, %v1222_v29  ;;  %v1226_v36 = vadd.f32 %v1225_v34, %v1032_v33  ;;  %v1227_v38 = vpop.f32.mrb[35].mxu0 }
 0x15a   :  { %v1540_v39 = vadd.f32 %v2656_v8, %v1224_v32  ;;  %v1228_v40 = vadd.f32 %v1227_v38, %v1034_v37 }
 0x15b   :  { %v1541_v41 = vadd.f32 %v2654_v5, %v1226_v36 }
 0x15c   :  { %v1975_v42 = vpack.c.bf16 %v1540_v39, %v1539_v35  ;;  %v1542_v43 = vadd.f32 %v2656_v8, %v1228_v40 }
 0x15d   :  { %v1038_v45 = vpop.f32.mrb[36].mxu1 }
 0x15e   :  { %1779 = vst [vmem:[%s2821_s3 + $0x80] sm:$0xff] %v1975_v42  ;;  %v1976_v44 = vpack.c.bf16 %v1542_v43, %v1541_v41  ;;  %v1231_v46 = vpop.f32.mrb[36].mxu0  ;;  %v1040_v48 = vpop.f32.mrb[37].mxu1 }
 0x15f   :  { %v1232_v47 = vadd.f32 %v1231_v46, %v1038_v45  ;;  %v1233_v49 = vpop.f32.mrb[37].mxu0  ;;  %v1042_v51 = vpop.f32.mrb[38].mxu1 }
 0x160   :  { %1780 = vst [vmem:[%s2821_s3 + $0x88] sm:$0xff] %v1976_v44  ;;  %v1234_v50 = vadd.f32 %v1233_v49, %v1040_v48  ;;  %v1235_v52 = vpop.f32.mrb[38].mxu0  ;;  %v1044_v55 = vpop.f32.mrb[39].mxu1 }
 0x161   :  { %v1543_v53 = vadd.f32 %v2654_v5, %v1232_v47  ;;  %v1236_v54 = vadd.f32 %v1235_v52, %v1042_v51  ;;  %v1237_v56 = vpop.f32.mrb[39].mxu0 }
 0x162   :  { %v1544_v57 = vadd.f32 %v2656_v8, %v1234_v50  ;;  %v1238_v58 = vadd.f32 %v1237_v56, %v1044_v55 }
 0x163   :  { %v1545_v59 = vadd.f32 %v2654_v5, %v1236_v54 }
 0x164   :  { %v1977_v60 = vpack.c.bf16 %v1544_v57, %v1543_v53  ;;  %v1546_v61 = vadd.f32 %v2656_v8, %v1238_v58 }
 0x165   :  { %v1048_v63 = vpop.f32.mrb[40].mxu1 }
 0x166   :  { %1781 = vst [vmem:[%s2821_s3 + $0x90] sm:$0xff] %v1977_v60  ;;  %v1978_v62 = vpack.c.bf16 %v1546_v61, %v1545_v59  ;;  %v1241_v0 = vpop.f32.mrb[40].mxu0  ;;  %v1050_v2 = vpop.f32.mrb[41].mxu1 }
 0x167   :  { %v1242_v1 = vadd.f32 %v1241_v0, %v1048_v63  ;;  %v1243_v3 = vpop.f32.mrb[41].mxu0  ;;  %v1052_v6 = vpop.f32.mrb[42].mxu1 }
 0x168   :  { %1782 = vst [vmem:[%s2821_s3 + $0x98] sm:$0xff] %v1978_v62  ;;  %v1244_v4 = vadd.f32 %v1243_v3, %v1050_v2  ;;  %v1245_v7 = vpop.f32.mrb[42].mxu0  ;;  %v1054_v11 = vpop.f32.mrb[43].mxu1 }
 0x169   :  { %v1547_v9 = vadd.f32 %v2654_v5, %v1242_v1  ;;  %v1246_v10 = vadd.f32 %v1245_v7, %v1052_v6  ;;  %v1247_v12 = vpop.f32.mrb[43].mxu0 }
 0x16a   :  { %v1548_v13 = vadd.f32 %v2656_v8, %v1244_v4  ;;  %v1248_v14 = vadd.f32 %v1247_v12, %v1054_v11 }
 0x16b   :  { %v1549_v15 = vadd.f32 %v2654_v5, %v1246_v10 }
 0x16c   :  { %v1979_v16 = vpack.c.bf16 %v1548_v13, %v1547_v9  ;;  %v1550_v17 = vadd.f32 %v2656_v8, %v1248_v14 }
 0x16d   :  { %v1058_v19 = vpop.f32.mrb[44].mxu1 }
 0x16e   :  { %1783 = vst [vmem:[%s2821_s3 + $0xa0] sm:$0xff] %v1979_v16  ;;  %v1980_v18 = vpack.c.bf16 %v1550_v17, %v1549_v15  ;;  %v1251_v20 = vpop.f32.mrb[44].mxu0  ;;  %v1060_v22 = vpop.f32.mrb[45].mxu1 }
 0x16f   :  { %v1252_v21 = vadd.f32 %v1251_v20, %v1058_v19  ;;  %v1253_v23 = vpop.f32.mrb[45].mxu0  ;;  %v1062_v25 = vpop.f32.mrb[46].mxu1 }
 0x170   :  { %1784 = vst [vmem:[%s2821_s3 + $0xa8] sm:$0xff] %v1980_v18  ;;  %v1254_v24 = vadd.f32 %v1253_v23, %v1060_v22  ;;  %v1255_v26 = vpop.f32.mrb[46].mxu0  ;;  %v1064_v29 = vpop.f32.mrb[47].mxu1 }
 0x171   :  { %v1551_v27 = vadd.f32 %v2654_v5, %v1252_v21  ;;  %v1256_v28 = vadd.f32 %v1255_v26, %v1062_v25  ;;  %v1257_v30 = vpop.f32.mrb[47].mxu0 }
 0x172   :  { %v1552_v31 = vadd.f32 %v2656_v8, %v1254_v24  ;;  %v1258_v32 = vadd.f32 %v1257_v30, %v1064_v29 }
 0x173   :  { %v1553_v33 = vadd.f32 %v2654_v5, %v1256_v28 }
 0x174   :  { %v1981_v34 = vpack.c.bf16 %v1552_v31, %v1551_v27  ;;  %v1554_v35 = vadd.f32 %v2656_v8, %v1258_v32 }
 0x175   :  { %v1068_v37 = vpop.f32.mrb[48].mxu1 }
 0x176   :  { %1785 = vst [vmem:[%s2821_s3 + $0xb0] sm:$0xff] %v1981_v34  ;;  %v1982_v36 = vpack.c.bf16 %v1554_v35, %v1553_v33  ;;  %v1261_v38 = vpop.f32.mrb[48].mxu0  ;;  %v1070_v40 = vpop.f32.mrb[49].mxu1 }
 0x177   :  { %v1262_v39 = vadd.f32 %v1261_v38, %v1068_v37  ;;  %v1263_v41 = vpop.f32.mrb[49].mxu0  ;;  %v1072_v43 = vpop.f32.mrb[50].mxu1 }
 0x178   :  { %1786 = vst [vmem:[%s2821_s3 + $0xb8] sm:$0xff] %v1982_v36  ;;  %v1264_v42 = vadd.f32 %v1263_v41, %v1070_v40  ;;  %v1265_v44 = vpop.f32.mrb[50].mxu0  ;;  %v1074_v47 = vpop.f32.mrb[51].mxu1 }
 0x179   :  { %v1555_v45 = vadd.f32 %v2654_v5, %v1262_v39  ;;  %v1266_v46 = vadd.f32 %v1265_v44, %v1072_v43  ;;  %v1267_v48 = vpop.f32.mrb[51].mxu0 }
 0x17a   :  { %v1556_v49 = vadd.f32 %v2656_v8, %v1264_v42  ;;  %v1268_v50 = vadd.f32 %v1267_v48, %v1074_v47 }
 0x17b   :  { %v1557_v51 = vadd.f32 %v2654_v5, %v1266_v46 }
 0x17c   :  { %v1983_v52 = vpack.c.bf16 %v1556_v49, %v1555_v45  ;;  %v1558_v53 = vadd.f32 %v2656_v8, %v1268_v50 }
 0x17d   :  { %v1078_v55 = vpop.f32.mrb[52].mxu1 }
 0x17e   :  { %1787 = vst [vmem:[%s2821_s3 + $0xc0] sm:$0xff] %v1983_v52  ;;  %v1984_v54 = vpack.c.bf16 %v1558_v53, %v1557_v51  ;;  %v1271_v56 = vpop.f32.mrb[52].mxu0  ;;  %v1080_v58 = vpop.f32.mrb[53].mxu1 }
 0x17f   :  { %v1272_v57 = vadd.f32 %v1271_v56, %v1078_v55  ;;  %v1273_v59 = vpop.f32.mrb[53].mxu0  ;;  %v1082_v61 = vpop.f32.mrb[54].mxu1 }
 0x180   :  { %1788 = vst [vmem:[%s2821_s3 + $0xc8] sm:$0xff] %v1984_v54  ;;  %v1274_v60 = vadd.f32 %v1273_v59, %v1080_v58  ;;  %v1275_v62 = vpop.f32.mrb[54].mxu0  ;;  %v1084_v1 = vpop.f32.mrb[55].mxu1 }
 0x181   :  { %v1559_v63 = vadd.f32 %v2654_v5, %v1272_v57  ;;  %v1276_v0 = vadd.f32 %v1275_v62, %v1082_v61  ;;  %v1277_v2 = vpop.f32.mrb[55].mxu0 }
 0x182   :  { %v1560_v3 = vadd.f32 %v2656_v8, %v1274_v60  ;;  %v1278_v4 = vadd.f32 %v1277_v2, %v1084_v1 }
 0x183   :  { %v1561_v6 = vadd.f32 %v2654_v5, %v1276_v0 }
 0x184   :  { %v1985_v7 = vpack.c.bf16 %v1560_v3, %v1559_v63  ;;  %v1562_v9 = vadd.f32 %v2656_v8, %v1278_v4 }
 0x185   :  { %v1088_v11 = vpop.f32.mrb[56].mxu1 }
 0x186   :  { %1789 = vst [vmem:[%s2821_s3 + $0xd0] sm:$0xff] %v1985_v7  ;;  %v1986_v10 = vpack.c.bf16 %v1562_v9, %v1561_v6  ;;  %v1281_v12 = vpop.f32.mrb[56].mxu0  ;;  %v1090_v14 = vpop.f32.mrb[57].mxu1 }
 0x187   :  { %v1282_v13 = vadd.f32 %v1281_v12, %v1088_v11  ;;  %v1283_v15 = vpop.f32.mrb[57].mxu0  ;;  %v1092_v17 = vpop.f32.mrb[58].mxu1 }
 0x188   :  { %1790 = vst [vmem:[%s2821_s3 + $0xd8] sm:$0xff] %v1986_v10  ;;  %v1284_v16 = vadd.f32 %v1283_v15, %v1090_v14  ;;  %v1285_v18 = vpop.f32.mrb[58].mxu0  ;;  %v1094_v21 = vpop.f32.mrb[59].mxu1 }
 0x189   :  { %v1563_v19 = vadd.f32 %v2654_v5, %v1282_v13  ;;  %v1286_v20 = vadd.f32 %v1285_v18, %v1092_v17  ;;  %v1287_v22 = vpop.f32.mrb[59].mxu0 }
 0x18a   :  { %v1564_v23 = vadd.f32 %v2656_v8, %v1284_v16  ;;  %v1288_v24 = vadd.f32 %v1287_v22, %v1094_v21 }
 0x18b   :  { %v1565_v25 = vadd.f32 %v2654_v5, %v1286_v20 }
 0x18c   :  { %v1987_v26 = vpack.c.bf16 %v1564_v23, %v1563_v19  ;;  %v1566_v27 = vadd.f32 %v2656_v8, %v1288_v24 }
 0x18d   :  { %v1098_v29 = vpop.f32.mrb[60].mxu1 }
 0x18e   :  { %1791 = vst [vmem:[%s2821_s3 + $0xe0] sm:$0xff] %v1987_v26  ;;  %v1988_v28 = vpack.c.bf16 %v1566_v27, %v1565_v25  ;;  %v1291_v30 = vpop.f32.mrb[60].mxu0  ;;  %v1100_v32 = vpop.f32.mrb[61].mxu1 }
 0x18f   :  { %v1292_v31 = vadd.f32 %v1291_v30, %v1098_v29  ;;  %v1293_v33 = vpop.f32.mrb[61].mxu0  ;;  %v1102_v35 = vpop.f32.mrb[62].mxu1 }
 0x190   :  { %1792 = vst [vmem:[%s2821_s3 + $0xe8] sm:$0xff] %v1988_v28  ;;  %v1294_v34 = vadd.f32 %v1293_v33, %v1100_v32  ;;  %v1295_v36 = vpop.f32.mrb[62].mxu0  ;;  %v1104_v39 = vpop.f32.mrb[63].mxu1 }
 0x191   :  { %v1567_v37 = vadd.f32 %v2654_v5, %v1292_v31  ;;  %v1296_v38 = vadd.f32 %v1295_v36, %v1102_v35  ;;  %v1297_v40 = vpop.f32.mrb[63].mxu0 }
 0x192   :  { %v1568_v41 = vadd.f32 %v2656_v8, %v1294_v34  ;;  %v1298_v42 = vadd.f32 %v1297_v40, %v1104_v39 }
 0x193   :  { %v1569_v43 = vadd.f32 %v2654_v5, %v1296_v38 }
 0x194   :  { %v1989_v44 = vpack.c.bf16 %v1568_v41, %v1567_v37  ;;  %v1570_v45 = vadd.f32 %v2656_v8, %v1298_v42 }
 0x196   :  { %1793 = vst [vmem:[%s2821_s3 + $0xf0] sm:$0xff] %v1989_v44  ;;  %v1990_v46 = vpack.c.bf16 %v1570_v45, %v1569_v43 }
 0x198   :  { %1794 = vst [vmem:[%s2821_s3 + $0xf8] sm:$0xff] %v1990_v46 }

// kernel: pretrained_encoder_with_head.19
= control target key start
LH: loop header
LB: loop body
LE: loop exit
PB: predicated region body
PF: predicated region fallthrough
CT: control target
= control target key end

     0   :  { %s5874_s1 = inlined_call_operand.vmem [shape: bf16[256,512], index: 1, kind: input, shape index: {}]   ;;  %s5875_s0 = inlined_call_operand.vmem [shape: bf16[256,256], index: 0, kind: input, shape index: {}]   ;;  %s5876_s2 = inlined_call_operand.vmem [shape: f32[1,512], index: 2, kind: input, shape index: {}]   ;;  %s5877_s3 = inlined_call_operand.vmem [shape: bf16[256,512], index: 3, kind: output, shape index: {}]  }
   0x1   :  { %v3601_v0 = vld [vmem:[%s5874_s1 + $0x4] ss:$16 sps:$4 sm:$0xff]   ;;  %v3603_v1 = vld [vmem:[%s5874_s1 + $0xc] ss:$16 sps:$4 sm:$0xff]   ;;  %v3605_v2 = vld [vmem:[%s5874_s1] ss:$16 sps:$4 sm:$0xff]  }
   0x2   :  { %850 = vmatprep.subr.bf16.mxu0 %v3601_v0  ;;  %v3606_v3 = vld [vmem:[%s5874_s1 + $0x8] ss:$16 sps:$4 sm:$0xff]   ;;  %1043 = vmatprep.subr.bf16.mxu1 %v3603_v1  ;;  %v3607_v4 = vld [vmem:[%s5874_s1 + $0x24] ss:$16 sps:$4 sm:$0xff]   ;;  %v3609_v5 = vld [vmem:[%s5874_s1 + $0x2c] ss:$16 sps:$4 sm:$0xff]  }
   0x3   :  { %851 = vmatpush1.bf16.msra.mxu0 %v3605_v2  ;;  %1044 = vmatpush1.bf16.msra.mxu1 %v3606_v3  ;;  %v3611_v6 = vld [vmem:[%s5874_s1 + $0x20] ss:$16 sps:$4 sm:$0xff]   ;;  %v3612_v7 = vld [vmem:[%s5874_s1 + $0x28] ss:$16 sps:$4 sm:$0xff]   ;;  %v3613_v8 = vld [vmem:[%s5874_s1 + $0x44] ss:$16 sps:$4 sm:$0xff]  }
   0x4   :  { %852 = vmatprep.subr.bf16.mxu0 %v3607_v4  ;;  %1045 = vmatprep.subr.bf16.mxu1 %v3609_v5  ;;  %v3615_v9 = vld [vmem:[%s5874_s1 + $0x4c] ss:$16 sps:$4 sm:$0xff]   ;;  %v3617_v10 = vld [vmem:[%s5874_s1 + $0x40] ss:$16 sps:$4 sm:$0xff]   ;;  %v3618_v11 = vld [vmem:[%s5874_s1 + $0x48] ss:$16 sps:$4 sm:$0xff]  }
   0x5   :  { %v3619_v12 = vld [vmem:[%s5874_s1 + $0x64] ss:$16 sps:$4 sm:$0xff]   ;;  %v3621_v13 = vld [vmem:[%s5874_s1 + $0x6c] ss:$16 sps:$4 sm:$0xff]   ;;  %v3623_v14 = vld [vmem:[%s5874_s1 + $0x60] ss:$16 sps:$4 sm:$0xff]  }
   0x6   :  { %v3624_v15 = vld [vmem:[%s5874_s1 + $0x68] ss:$16 sps:$4 sm:$0xff]   ;;  %v3625_v16 = vld [vmem:[%s5874_s1 + $0x84] ss:$16 sps:$4 sm:$0xff]   ;;  %v3627_v17 = vld [vmem:[%s5874_s1 + $0x8c] ss:$16 sps:$4 sm:$0xff]  }
   0x7   :  { %853 = vmatpush1.bf16.msra.mxu0 %v3611_v6  ;;  %1046 = vmatpush1.bf16.msra.mxu1 %v3612_v7  ;;  %v3629_v18 = vld [vmem:[%s5874_s1 + $0x80] ss:$16 sps:$4 sm:$0xff]   ;;  %v3630_v19 = vld [vmem:[%s5874_s1 + $0x88] ss:$16 sps:$4 sm:$0xff]   ;;  %v3631_v20 = vld [vmem:[%s5874_s1 + $0xa4] ss:$16 sps:$4 sm:$0xff]  }
   0x8   :  { %854 = vmatprep.subr.bf16.mxu0 %v3613_v8  ;;  %1047 = vmatprep.subr.bf16.mxu1 %v3615_v9  ;;  %v3633_v21 = vld [vmem:[%s5874_s1 + $0xac] ss:$16 sps:$4 sm:$0xff]   ;;  %v3635_v22 = vld [vmem:[%s5874_s1 + $0xa0] ss:$16 sps:$4 sm:$0xff]   ;;  %v3636_v23 = vld [vmem:[%s5874_s1 + $0xa8] ss:$16 sps:$4 sm:$0xff]  }
   0x9   :  { %v3637_v24 = vld [vmem:[%s5874_s1 + $0xc4] ss:$16 sps:$4 sm:$0xff]   ;;  %v3639_v25 = vld [vmem:[%s5874_s1 + $0xcc] ss:$16 sps:$4 sm:$0xff]   ;;  %v3641_v26 = vld [vmem:[%s5874_s1 + $0xc0] ss:$16 sps:$4 sm:$0xff]  }
   0xa   :  { %v3642_v27 = vld [vmem:[%s5874_s1 + $0xc8] ss:$16 sps:$4 sm:$0xff]   ;;  %v3643_v28 = vld [vmem:[%s5874_s1 + $0xe4] ss:$16 sps:$4 sm:$0xff]   ;;  %v3645_v29 = vld [vmem:[%s5874_s1 + $0xec] ss:$16 sps:$4 sm:$0xff]  }
   0xb   :  { %855 = vmatpush1.bf16.msra.mxu0 %v3617_v10  ;;  %1048 = vmatpush1.bf16.msra.mxu1 %v3618_v11  ;;  %v3647_v30 = vld [vmem:[%s5874_s1 + $0xe0] ss:$16 sps:$4 sm:$0xff]   ;;  %v3648_v31 = vld [vmem:[%s5874_s1 + $0xe8] ss:$16 sps:$4 sm:$0xff]   ;;  %v3649_v32 = vld [vmem:[%s5874_s1 + $0x104] ss:$16 sps:$4 sm:$0xff]  }
   0xc   :  { %856 = vmatprep.subr.bf16.mxu0 %v3619_v12  ;;  %1049 = vmatprep.subr.bf16.mxu1 %v3621_v13  ;;  %v3651_v33 = vld [vmem:[%s5874_s1 + $0x10c] ss:$16 sps:$4 sm:$0xff]   ;;  %v3653_v34 = vld [vmem:[%s5874_s1 + $0x100] ss:$16 sps:$4 sm:$0xff]   ;;  %v3654_v35 = vld [vmem:[%s5874_s1 + $0x108] ss:$16 sps:$4 sm:$0xff]  }
   0xd   :  { %v3655_v36 = vld [vmem:[%s5874_s1 + $0x124] ss:$16 sps:$4 sm:$0xff]   ;;  %v3657_v37 = vld [vmem:[%s5874_s1 + $0x12c] ss:$16 sps:$4 sm:$0xff]   ;;  %v3659_v38 = vld [vmem:[%s5874_s1 + $0x120] ss:$16 sps:$4 sm:$0xff]  }
   0xe   :  { %v3660_v39 = vld [vmem:[%s5874_s1 + $0x128] ss:$16 sps:$4 sm:$0xff]   ;;  %v3661_v40 = vld [vmem:[%s5874_s1 + $0x144] ss:$16 sps:$4 sm:$0xff]   ;;  %v3663_v41 = vld [vmem:[%s5874_s1 + $0x14c] ss:$16 sps:$4 sm:$0xff]  }
   0xf   :  { %857 = vmatpush1.bf16.msra.mxu0 %v3623_v14  ;;  %1050 = vmatpush1.bf16.msra.mxu1 %v3624_v15  ;;  %v3665_v42 = vld [vmem:[%s5874_s1 + $0x140] ss:$16 sps:$4 sm:$0xff]   ;;  %v3666_v43 = vld [vmem:[%s5874_s1 + $0x148] ss:$16 sps:$4 sm:$0xff]   ;;  %v3667_v44 = vld [vmem:[%s5874_s1 + $0x164] ss:$16 sps:$4 sm:$0xff]  }
  0x10   :  { %858 = vmatprep.subr.bf16.mxu0 %v3625_v16  ;;  %1051 = vmatprep.subr.bf16.mxu1 %v3627_v17  ;;  %v3669_v45 = vld [vmem:[%s5874_s1 + $0x16c] ss:$16 sps:$4 sm:$0xff]   ;;  %v3671_v46 = vld [vmem:[%s5874_s1 + $0x160] ss:$16 sps:$4 sm:$0xff]   ;;  %v3672_v47 = vld [vmem:[%s5874_s1 + $0x168] ss:$16 sps:$4 sm:$0xff]  }
  0x11   :  { %v3699_v48 = vld [vmem:[%s5875_s0 + $0x4] ss:$8 sps:$4 sm:$0xff]   ;;  %v3677_v51 = vld [vmem:[%s5874_s1 + $0x180] ss:$16 sps:$4 sm:$0xff]   ;;  %v3678_v52 = vld [vmem:[%s5874_s1 + $0x188] ss:$16 sps:$4 sm:$0xff]  }
  0x12   :  { %v3673_v49 = vld [vmem:[%s5874_s1 + $0x184] ss:$16 sps:$4 sm:$0xff]   ;;  %v3675_v50 = vld [vmem:[%s5874_s1 + $0x18c] ss:$16 sps:$4 sm:$0xff]   ;;  %882 = vmatprep.mubr.bf16.mxu0 %v3699_v48  ;;  %1075 = vmatprep.mubr.bf16.mxu1 %v3699_v48  ;;  %v3683_v55 = vld [vmem:[%s5874_s1 + $0x1a0] ss:$16 sps:$4 sm:$0xff]  }
  0x13   :  { %859 = vmatpush1.bf16.msra.mxu0 %v3629_v18  ;;  %1052 = vmatpush1.bf16.msra.mxu1 %v3630_v19  ;;  %v3679_v53 = vld [vmem:[%s5874_s1 + $0x1a4] ss:$16 sps:$4 sm:$0xff]   ;;  %v3681_v54 = vld [vmem:[%s5874_s1 + $0x1ac] ss:$16 sps:$4 sm:$0xff]   ;;  %v3684_v56 = vld [vmem:[%s5874_s1 + $0x1a8] ss:$16 sps:$4 sm:$0xff]  }
  0x14   :  { %860 = vmatprep.subr.bf16.mxu0 %v3631_v20  ;;  %1053 = vmatprep.subr.bf16.mxu1 %v3633_v21  ;;  %v3685_v57 = vld [vmem:[%s5874_s1 + $0x1c4] ss:$16 sps:$4 sm:$0xff]   ;;  %v3687_v58 = vld [vmem:[%s5874_s1 + $0x1cc] ss:$16 sps:$4 sm:$0xff]   ;;  %v3689_v59 = vld [vmem:[%s5874_s1 + $0x1c0] ss:$16 sps:$4 sm:$0xff]  }
  0x15   :  { %v3690_v60 = vld [vmem:[%s5874_s1 + $0x1c8] ss:$16 sps:$4 sm:$0xff]   ;;  %v3691_v61 = vld [vmem:[%s5874_s1 + $0x1e4] ss:$16 sps:$4 sm:$0xff]   ;;  %v3693_v62 = vld [vmem:[%s5874_s1 + $0x1ec] ss:$16 sps:$4 sm:$0xff]  }
  0x16   :  { %v3695_v63 = vld [vmem:[%s5874_s1 + $0x1e0] ss:$16 sps:$4 sm:$0xff]   ;;  %v3696_v0 = vld [vmem:[%s5874_s1 + $0x1e8] ss:$16 sps:$4 sm:$0xff]   ;;  %v3700_v2 = vld [vmem:[%s5875_s0 + $0x14] ss:$8 sps:$4 sm:$0xff]  }
  0x17   :  { %861 = vmatpush1.bf16.msra.mxu0 %v3635_v22  ;;  %1054 = vmatpush1.bf16.msra.mxu1 %v3636_v23  ;;  %v3697_v1 = vld [vmem:[%s5875_s0] ss:$8 sps:$4 sm:$0xff]   ;;  %v3702_v3 = vld [vmem:[%s5875_s0 + $0x10] ss:$8 sps:$4 sm:$0xff]   ;;  %v3703_v4 = vld [vmem:[%s5875_s0 + $0x24] ss:$8 sps:$4 sm:$0xff]  }
  0x18   :  { %862 = vmatprep.subr.bf16.mxu0 %v3637_v24  ;;  %1055 = vmatprep.subr.bf16.mxu1 %v3639_v25  ;;  %v3705_v5 = vld [vmem:[%s5875_s0 + $0x20] ss:$8 sps:$4 sm:$0xff]   ;;  %v3706_v6 = vld [vmem:[%s5875_s0 + $0x34] ss:$8 sps:$4 sm:$0xff]   ;;  %v3708_v7 = vld [vmem:[%s5875_s0 + $0x30] ss:$8 sps:$4 sm:$0xff]  }
  0x19   :  { %v3709_v8 = vld [vmem:[%s5875_s0 + $0x44] ss:$8 sps:$4 sm:$0xff]   ;;  %v3711_v9 = vld [vmem:[%s5875_s0 + $0x40] ss:$8 sps:$4 sm:$0xff]   ;;  %v3712_v10 = vld [vmem:[%s5875_s0 + $0x54] ss:$8 sps:$4 sm:$0xff]  }
  0x1a   :  { %v3714_v11 = vld [vmem:[%s5875_s0 + $0x50] ss:$8 sps:$4 sm:$0xff]   ;;  %v3715_v12 = vld [vmem:[%s5875_s0 + $0x64] ss:$8 sps:$4 sm:$0xff]   ;;  %v3717_v13 = vld [vmem:[%s5875_s0 + $0x60] ss:$8 sps:$4 sm:$0xff]  }
  0x1b   :  { %863 = vmatpush1.bf16.msra.mxu0 %v3641_v26  ;;  %1056 = vmatpush1.bf16.msra.mxu1 %v3642_v27  ;;  %v3718_v14 = vld [vmem:[%s5875_s0 + $0x74] ss:$8 sps:$4 sm:$0xff]   ;;  %v3720_v15 = vld [vmem:[%s5875_s0 + $0x70] ss:$8 sps:$4 sm:$0xff]   ;;  %v3721_v16 = vld [vmem:[%s5875_s0 + $0x84] ss:$8 sps:$4 sm:$0xff]  }
  0x1c   :  { %864 = vmatprep.subr.bf16.mxu0 %v3643_v28  ;;  %1057 = vmatprep.subr.bf16.mxu1 %v3645_v29  ;;  %v3723_v17 = vld [vmem:[%s5875_s0 + $0x80] ss:$8 sps:$4 sm:$0xff]   ;;  %v3724_v18 = vld [vmem:[%s5875_s0 + $0x94] ss:$8 sps:$4 sm:$0xff]   ;;  %v3726_v19 = vld [vmem:[%s5875_s0 + $0x90] ss:$8 sps:$4 sm:$0xff]  }
  0x1d   :  { %v3727_v20 = vld [vmem:[%s5875_s0 + $0xa4] ss:$8 sps:$4 sm:$0xff]   ;;  %v3729_v21 = vld [vmem:[%s5875_s0 + $0xa0] ss:$8 sps:$4 sm:$0xff]   ;;  %v3730_v22 = vld [vmem:[%s5875_s0 + $0xb4] ss:$8 sps:$4 sm:$0xff]  }
  0x1e   :  { %v3732_v23 = vld [vmem:[%s5875_s0 + $0xb0] ss:$8 sps:$4 sm:$0xff]   ;;  %v3733_v24 = vld [vmem:[%s5875_s0 + $0xc4] ss:$8 sps:$4 sm:$0xff]   ;;  %v3735_v25 = vld [vmem:[%s5875_s0 + $0xc0] ss:$8 sps:$4 sm:$0xff]  }
  0x1f   :  { %865 = vmatpush1.bf16.msra.mxu0 %v3647_v30  ;;  %1058 = vmatpush1.bf16.msra.mxu1 %v3648_v31  ;;  %v3736_v26 = vld [vmem:[%s5875_s0 + $0xd4] ss:$8 sps:$4 sm:$0xff]   ;;  %v3738_v27 = vld [vmem:[%s5875_s0 + $0xd0] ss:$8 sps:$4 sm:$0xff]   ;;  %v3739_v28 = vld [vmem:[%s5875_s0 + $0xe4] ss:$8 sps:$4 sm:$0xff]  }
  0x20   :  { %866 = vmatprep.subr.bf16.mxu0 %v3649_v32  ;;  %1059 = vmatprep.subr.bf16.mxu1 %v3651_v33  ;;  %v3741_v29 = vld [vmem:[%s5875_s0 + $0xe0] ss:$8 sps:$4 sm:$0xff]   ;;  %v3742_v30 = vld [vmem:[%s5875_s0 + $0xf4] ss:$8 sps:$4 sm:$0xff]   ;;  %v3744_v31 = vld [vmem:[%s5875_s0 + $0xf0] ss:$8 sps:$4 sm:$0xff]   ;;  %v1625_v32 = vlaneseq }
  0x22   :  { %v1626_v33 = vshrl.u32 %v1625_v32, 7 }
  0x23   :  { %867 = vmatpush1.bf16.msra.mxu0 %v3653_v34  ;;  %1060 = vmatpush1.bf16.msra.mxu1 %v3654_v35 }
  0x24   :  { %868 = vmatprep.subr.bf16.mxu0 %v3655_v36  ;;  %1061 = vmatprep.subr.bf16.mxu1 %v3657_v37  ;;  %v1627_v34 = vsub.s32 0, %v1626_v33  ;;  %v1635_v35 = vsub.s32 2, %v1626_v33  ;;  %v1623_v36 = vld [vmem:[%s5876_s2] sm:$0xf]  ;;  %v1631_v37 = vsub.s32 1, %v1626_v33 }
  0x27   :  { %869 = vmatpush1.bf16.msra.mxu0 %v3659_v38  ;;  %1062 = vmatpush1.bf16.msra.mxu1 %v3660_v39  ;;  %v1639_v38 = vsub.s32 3, %v1626_v33  ;;  %v4312_v39 = vrot.slane %v1623_v36, %v1627_v34 }
  0x28   :  { %870 = vmatprep.subr.bf16.mxu0 %v3661_v40  ;;  %1063 = vmatprep.subr.bf16.mxu1 %v3663_v41  ;;  %v4314_v40 = vrot.slane %v1623_v36, %v1635_v35  ;;  %v4316_v41 = vrot.slane %v1623_v36, %v1631_v37 }
  0x2b   :  { %871 = vmatpush1.bf16.msra.mxu0 %v3665_v42  ;;  %1064 = vmatpush1.bf16.msra.mxu1 %v3666_v43  ;;  %v4318_v42 = vrot.slane %v1623_v36, %v1639_v38 }
  0x2c   :  { %872 = vmatprep.subr.bf16.mxu0 %v3667_v44  ;;  %1065 = vmatprep.subr.bf16.mxu1 %v3669_v45 }
  0x2f   :  { %873 = vmatpush1.bf16.msra.mxu0 %v3671_v46  ;;  %1066 = vmatpush1.bf16.msra.mxu1 %v3672_v47 }
  0x30   :  { %874 = vmatprep.subr.bf16.mxu0 %v3673_v49  ;;  %1067 = vmatprep.subr.bf16.mxu1 %v3675_v50 }
  0x33   :  { %875 = vmatpush1.bf16.msra.mxu0 %v3677_v51  ;;  %1068 = vmatpush1.bf16.msra.mxu1 %v3678_v52 }
  0x34   :  { %876 = vmatprep.subr.bf16.mxu0 %v3679_v53  ;;  %1069 = vmatprep.subr.bf16.mxu1 %v3681_v54 }
  0x37   :  { %877 = vmatpush1.bf16.msra.mxu0 %v3683_v55  ;;  %1070 = vmatpush1.bf16.msra.mxu1 %v3684_v56 }
  0x38   :  { %878 = vmatprep.subr.bf16.mxu0 %v3685_v57  ;;  %1071 = vmatprep.subr.bf16.mxu1 %v3687_v58 }
  0x3b   :  { %879 = vmatpush1.bf16.msra.mxu0 %v3689_v59  ;;  %1072 = vmatpush1.bf16.msra.mxu1 %v3690_v60 }
  0x3c   :  { %880 = vmatprep.subr.bf16.mxu0 %v3691_v61  ;;  %1073 = vmatprep.subr.bf16.mxu1 %v3693_v62 }
  0x3f   :  { %881 = vmatpush1.bf16.msra.mxu0 %v3695_v63  ;;  %1074 = vmatpush1.bf16.msra.mxu1 %v3696_v0 }
  0x42   :  { %883 = vmatmul.mubr.bf16.vlgmr.msra.gmra.mrb[0].mxu0 %v3697_v1  ;;  %1076 = vmatmul.mubr.bf16.vlgmr.msra.gmra.mrb[0].mxu1 %v3697_v1 }
  0x43   :  { %892 = vmatprep.mubr.bf16.mxu0 %v3700_v2  ;;  %1085 = vmatprep.mubr.bf16.mxu1 %v3700_v2 }
  0x4a   :  { %893 = vmatmul.mubr.bf16.gmra.mrb[4].mxu0 %v3702_v3  ;;  %1086 = vmatmul.mubr.bf16.gmra.mrb[4].mxu1 %v3702_v3 }
  0x4b   :  { %902 = vmatprep.mubr.bf16.mxu0 %v3703_v4  ;;  %1095 = vmatprep.mubr.bf16.mxu1 %v3703_v4 }
  0x52   :  { %903 = vmatmul.mubr.bf16.gmra.mrb[8].mxu0 %v3705_v5  ;;  %1096 = vmatmul.mubr.bf16.gmra.mrb[8].mxu1 %v3705_v5 }
  0x53   :  { %912 = vmatprep.mubr.bf16.mxu0 %v3706_v6  ;;  %1105 = vmatprep.mubr.bf16.mxu1 %v3706_v6 }
  0x5a   :  { %913 = vmatmul.mubr.bf16.gmra.mrb[12].mxu0 %v3708_v7  ;;  %1106 = vmatmul.mubr.bf16.gmra.mrb[12].mxu1 %v3708_v7 }
  0x5b   :  { %922 = vmatprep.mubr.bf16.mxu0 %v3709_v8  ;;  %1115 = vmatprep.mubr.bf16.mxu1 %v3709_v8 }
  0x62   :  { %923 = vmatmul.mubr.bf16.gmra.mrb[16].mxu0 %v3711_v9  ;;  %1116 = vmatmul.mubr.bf16.gmra.mrb[16].mxu1 %v3711_v9 }
  0x63   :  { %932 = vmatprep.mubr.bf16.mxu0 %v3712_v10  ;;  %1125 = vmatprep.mubr.bf16.mxu1 %v3712_v10 }
  0x6a   :  { %933 = vmatmul.mubr.bf16.gmra.mrb[20].mxu0 %v3714_v11  ;;  %1126 = vmatmul.mubr.bf16.gmra.mrb[20].mxu1 %v3714_v11 }
  0x6b   :  { %942 = vmatprep.mubr.bf16.mxu0 %v3715_v12  ;;  %1135 = vmatprep.mubr.bf16.mxu1 %v3715_v12 }
  0x72   :  { %943 = vmatmul.mubr.bf16.gmra.mrb[24].mxu0 %v3717_v13  ;;  %1136 = vmatmul.mubr.bf16.gmra.mrb[24].mxu1 %v3717_v13 }
  0x73   :  { %952 = vmatprep.mubr.bf16.mxu0 %v3718_v14  ;;  %1145 = vmatprep.mubr.bf16.mxu1 %v3718_v14 }
  0x7a   :  { %953 = vmatmul.mubr.bf16.gmra.mrb[28].mxu0 %v3720_v15  ;;  %1146 = vmatmul.mubr.bf16.gmra.mrb[28].mxu1 %v3720_v15 }
  0x7b   :  { %962 = vmatprep.mubr.bf16.mxu0 %v3721_v16  ;;  %1155 = vmatprep.mubr.bf16.mxu1 %v3721_v16 }
  0x82   :  { %963 = vmatmul.mubr.bf16.gmra.mrb[32].mxu0 %v3723_v17  ;;  %1156 = vmatmul.mubr.bf16.gmra.mrb[32].mxu1 %v3723_v17 }
  0x83   :  { %972 = vmatprep.mubr.bf16.mxu0 %v3724_v18  ;;  %1165 = vmatprep.mubr.bf16.mxu1 %v3724_v18 }
  0x8a   :  { %973 = vmatmul.mubr.bf16.gmra.mrb[36].mxu0 %v3726_v19  ;;  %1166 = vmatmul.mubr.bf16.gmra.mrb[36].mxu1 %v3726_v19 }
  0x8b   :  { %982 = vmatprep.mubr.bf16.mxu0 %v3727_v20  ;;  %1175 = vmatprep.mubr.bf16.mxu1 %v3727_v20 }
  0x92   :  { %983 = vmatmul.mubr.bf16.gmra.mrb[40].mxu0 %v3729_v21  ;;  %1176 = vmatmul.mubr.bf16.gmra.mrb[40].mxu1 %v3729_v21 }
  0x93   :  { %992 = vmatprep.mubr.bf16.mxu0 %v3730_v22  ;;  %1185 = vmatprep.mubr.bf16.mxu1 %v3730_v22 }
  0x9a   :  { %993 = vmatmul.mubr.bf16.gmra.mrb[44].mxu0 %v3732_v23  ;;  %1186 = vmatmul.mubr.bf16.gmra.mrb[44].mxu1 %v3732_v23 }
  0x9b   :  { %1002 = vmatprep.mubr.bf16.mxu0 %v3733_v24  ;;  %1195 = vmatprep.mubr.bf16.mxu1 %v3733_v24 }
  0xa2   :  { %1003 = vmatmul.mubr.bf16.gmra.mrb[48].mxu0 %v3735_v25  ;;  %1196 = vmatmul.mubr.bf16.gmra.mrb[48].mxu1 %v3735_v25 }
  0xa3   :  { %1012 = vmatprep.mubr.bf16.mxu0 %v3736_v26  ;;  %1205 = vmatprep.mubr.bf16.mxu1 %v3736_v26 }
  0xaa   :  { %1013 = vmatmul.mubr.bf16.gmra.mrb[52].mxu0 %v3738_v27  ;;  %1206 = vmatmul.mubr.bf16.gmra.mrb[52].mxu1 %v3738_v27 }
  0xab   :  { %1022 = vmatprep.mubr.bf16.mxu0 %v3739_v28  ;;  %1215 = vmatprep.mubr.bf16.mxu1 %v3739_v28 }
  0xb2   :  { %1023 = vmatmul.mubr.bf16.gmra.mrb[56].mxu0 %v3741_v29  ;;  %1216 = vmatmul.mubr.bf16.gmra.mrb[56].mxu1 %v3741_v29 }
  0xb3   :  { %1032 = vmatprep.mubr.bf16.mxu0 %v3742_v30  ;;  %1225 = vmatprep.mubr.bf16.mxu1 %v3742_v30 }
  0xba   :  { %1033 = vmatmul.mubr.bf16.gmra.mrb[60].mxu0 %v3744_v31  ;;  %1226 = vmatmul.mubr.bf16.gmra.mrb[60].mxu1 %v3744_v31 }
 0x115   :  { %v884_v43 = vpop.f32.mrb[0].mxu0  ;;  %v1077_v44 = vpop.f32.mrb[0].mxu1 }
 0x116   :  { %v1645_v45 = vadd.f32 %v4312_v39, %v884_v43  ;;  %v1647_v46 = vadd.f32 %v4314_v40, %v1077_v44  ;;  %v886_v47 = vpop.f32.mrb[1].mxu0  ;;  %v1079_v48 = vpop.f32.mrb[1].mxu1 }
 0x117   :  { %v4323_v49 = vadd.f32 %v4316_v41, %v886_v47  ;;  %v4326_v50 = vadd.f32 %v4318_v42, %v1079_v48  ;;  %v888_v51 = vpop.f32.mrb[2].mxu0  ;;  %v1081_v52 = vpop.f32.mrb[2].mxu1 }
 0x118   :  { %v1901_v53 = vmul.f32 0.044715, %v1645_v45  ;;  %v1903_v54 = vmul.f32 0.044715, %v1647_v46  ;;  %v4331_v59 = vadd.f32 %v4312_v39, %v888_v51  ;;  %v4334_v60 = vadd.f32 %v4314_v40, %v1081_v52  ;;  %v890_v61 = vpop.f32.mrb[3].mxu0  ;;  %v1083_v62 = vpop.f32.mrb[3].mxu1 }
 0x119   :  { %v1902_v55 = vmul.f32 0.044715, %v4323_v49  ;;  %v1904_v56 = vmul.f32 0.044715, %v4326_v50  ;;  %v4339_v1 = vadd.f32 %v4316_v41, %v890_v61  ;;  %v4347_v13 = vadd.f32 %v4318_v42, %v1083_v62 }
 0x11a   :  { %v2029_v57 = vmul.f32 %v1901_v53, %v1645_v45  ;;  %v2031_v58 = vmul.f32 %v1903_v54, %v1647_v46  ;;  %v1905_v4 = vmul.f32 0.044715, %v4331_v59  ;;  %v1907_v7 = vmul.f32 0.044715, %v4334_v60 }
 0x11b   :  { %v2030_v63 = vmul.f32 %v1902_v55, %v4323_v49  ;;  %v2032_v0 = vmul.f32 %v1904_v56, %v4326_v50  ;;  %v1906_v19 = vmul.f32 0.044715, %v4339_v1  ;;  %v4355_v22 = vmul.f32 0.5, %v1645_v45 }
 0x11c   :  { %v2157_v2 = vmul.f32 %v2029_v57, %v1645_v45  ;;  %v2159_v3 = vmul.f32 %v2031_v58, %v1647_v46  ;;  %v2033_v12 = vmul.f32 %v1905_v4, %v4331_v59  ;;  %v2035_v18 = vmul.f32 %v1907_v7, %v4334_v60 }
 0x11d   :  { %v2158_v5 = vmul.f32 %v2030_v63, %v4323_v49  ;;  %v2160_v6 = vmul.f32 %v2032_v0, %v4326_v50  ;;  %v894_v8 = vpop.f32.mrb[4].mxu0  ;;  %v1087_v9 = vpop.f32.mrb[4].mxu1  ;;  %v2034_v30 = vmul.f32 %v1906_v19, %v4339_v1  ;;  %v1908_v33 = vmul.f32 0.044715, %v4347_v13 }
 0x11e   :  { %v2285_v10 = vadd.f32 %v2157_v2, %v1645_v45  ;;  %v2287_v11 = vadd.f32 %v2159_v3, %v1647_v46  ;;  %v896_v14 = vpop.f32.mrb[5].mxu0  ;;  %v1089_v15 = vpop.f32.mrb[5].mxu1  ;;  %v2161_v25 = vmul.f32 %v2033_v12, %v4331_v59  ;;  %v2163_v29 = vmul.f32 %v2035_v18, %v4334_v60 }
 0x11f   :  { %v2286_v16 = vadd.f32 %v2158_v5, %v4323_v49  ;;  %v2288_v17 = vadd.f32 %v2160_v6, %v4326_v50  ;;  %v898_v20 = vpop.f32.mrb[6].mxu0  ;;  %v4353_v21 = vpop.f32.mrb[6].mxu1  ;;  %v4367_v34 = vadd.f32 %v4312_v39, %v894_v8  ;;  %v2162_v36 = vmul.f32 %v2034_v30, %v4339_v1 }
 0x120   :  { %v2413_v23 = vmul.f32 0.7978846, %v2285_v10  ;;  %v2415_v24 = vmul.f32 0.7978846, %v2287_v11  ;;  %v4358_v26 = vpop.f32.mrb[7].mxu0  ;;  %v4362_v31 = vpop.f32.mrb[7].mxu1  ;;  %v2289_v32 = vadd.f32 %v2161_v25, %v4331_v59  ;;  %v2291_v35 = vadd.f32 %v2163_v29, %v4334_v60 }
 0x121   :  { %v2414_v27 = vmul.f32 0.7978846, %v2286_v16  ;;  %v2416_v28 = vmul.f32 0.7978846, %v2288_v17  ;;  %v4372_v37 = vadd.f32 %v4314_v40, %v1087_v9  ;;  %v4374_v38 = vmul.f32 0.5, %v1647_v46 }
 0x122   :  { %3745 = vtanh.f32 %v2413_v23  ;;  %v2417_v43 = vmul.f32 0.7978846, %v2289_v32  ;;  %v2036_v44 = vmul.f32 %v1908_v33, %v4347_v13  ;;  %v2419_v45 = vmul.f32 0.7978846, %v2291_v35 }
 0x123   :  { %3747 = vtanh.f32 %v2415_v24  ;;  %v2290_v47 = vadd.f32 %v2162_v36, %v4339_v1  ;;  %v1909_v48 = vmul.f32 0.044715, %v4367_v34  ;;  %v4384_v53 = vmul.f32 0.5, %v4323_v49 }
 0x124   :  { %3749 = vtanh.f32 %v2414_v27  ;;  %v2164_v46 = vmul.f32 %v2036_v44, %v4347_v13  ;;  %v1911_v54 = vmul.f32 0.044715, %v4372_v37  ;;  %v4394_v61 = vadd.f32 %v4316_v41, %v896_v14 }
 0x125   :  { %3751 = vtanh.f32 %v2416_v28  ;;  %v4379_v51 = vpop.f32.mrb[8].mxu0  ;;  %v4381_v52 = vpop.f32.mrb[8].mxu1  ;;  %v2418_v57 = vmul.f32 0.7978846, %v2290_v47  ;;  %v2037_v58 = vmul.f32 %v1909_v48, %v4367_v34  ;;  %v4403_v2 = vadd.f32 %v4318_v42, %v1089_v15 }
 0x126   :  { %3753 = vtanh.f32 %v2417_v43  ;;  %v4388_v55 = vpop.f32.mrb[9].mxu0  ;;  %v4390_v56 = vpop.f32.mrb[9].mxu1  ;;  %v2292_v63 = vadd.f32 %v2164_v46, %v4347_v13  ;;  %v2039_v0 = vmul.f32 %v1911_v54, %v4372_v37  ;;  %v4406_v3 = vadd.f32 %v4312_v39, %v898_v20 }
 0x127   :  { %3755 = vtanh.f32 %v2419_v45  ;;  %v4396_v62 = vpop.f32.mrb[10].mxu0  ;;  %v4398_v49 = vpop.f32.mrb[10].mxu1  ;;  %v1776_v6 = vmul.f32 0.5, %v4326_v50  ;;  %v2165_v7 = vmul.f32 %v2037_v58, %v4367_v34  ;;  %v1910_v8 = vmul.f32 0.044715, %v4394_v61 }
 0x128   :  { %v4408_v4 = vpop.f32.mrb[11].mxu0  ;;  %v4410_v5 = vpop.f32.mrb[11].mxu1  ;;  %3757 = vtanh.f32 %v2418_v57  ;;  %v1777_v9 = vmul.f32 0.5, %v4331_v59  ;;  %v2420_v10 = vmul.f32 0.7978846, %v2292_v63  ;;  %v2167_v11 = vmul.f32 %v2039_v0, %v4372_v37 }
 0x129   :  { %v1912_v12 = vmul.f32 0.044715, %v4403_v2  ;;  %v4419_v14 = vmul.f32 0.5, %v4334_v60  ;;  %v2293_v15 = vadd.f32 %v2165_v7, %v4367_v34  ;;  %v2038_v16 = vmul.f32 %v1910_v8, %v4394_v61 }
 0x12a   :  { %v1913_v50 = vmul.f32 0.044715, %v4406_v3  ;;  %v1778_v18 = vmul.f32 0.5, %v4339_v1  ;;  %3759 = vtanh.f32 %v2420_v10  ;;  %v2295_v59 = vadd.f32 %v2167_v11, %v4372_v37 }
 0x12b   :  { %v2040_v19 = vmul.f32 %v1912_v12, %v4403_v2  ;;  %v2421_v24 = vmul.f32 0.7978846, %v2293_v15  ;;  %v2166_v60 = vmul.f32 %v2038_v16, %v4394_v61  ;;  %v4436_v33 = vadd.f32 %v4314_v40, %v4353_v21 }
 0x12c   :  { %v3746_v17 = vpop.eup %3745  ;;  %v2041_v25 = vmul.f32 %v1913_v50, %v4406_v3  ;;  %v2423_v32 = vmul.f32 0.7978846, %v2295_v59  ;;  %v1780_v15 = vmul.f32 0.5, %v4347_v13 }
 0x12d   :  { %v3748_v20 = vpop.eup %3747  ;;  %v2669_v23 = vadd.f32 1.0, %v3746_v17  ;;  %v4429_v27 = vpop.f32.mrb[12].mxu0  ;;  %v2168_v1 = vmul.f32 %v2040_v19, %v4403_v2  ;;  %3761 = vtanh.f32 %v2421_v24  ;;  %v2294_v47 = vadd.f32 %v2166_v60, %v4394_v61 }
 0x12e   :  { %v4431_v28 = vpop.f32.mrb[12].mxu1  ;;  %v3750_v29 = vpop.eup %3749  ;;  %v2671_v30 = vadd.f32 1.0, %v3748_v20  ;;  %3763 = vtanh.f32 %v2423_v32  ;;  %v2169_v11 = vmul.f32 %v2041_v25, %v4406_v3  ;;  %v4469_v60 = vadd.f32 %v4318_v42, %v4362_v31 }
 0x12f   :  { %v4438_v35 = vpop.f32.mrb[13].mxu0  ;;  %v4440_v36 = vpop.f32.mrb[13].mxu1  ;;  %v2797_v44 = vmul.f32 %v2669_v23, %v4355_v22  ;;  %v2670_v45 = vadd.f32 1.0, %v3750_v29  ;;  %v2296_v58 = vadd.f32 %v2168_v1, %v4403_v2  ;;  %v2422_v10 = vmul.f32 0.7978846, %v2294_v47 }
 0x130   :  { %v3752_v43 = vpop.eup %3751  ;;  %v4444_v48 = vpop.f32.mrb[14].mxu0  ;;  %v2799_v57 = vmul.f32 %v2671_v30, %v4374_v38  ;;  %v1915_v38 = vmul.f32 0.044715, %v4436_v33  ;;  %v2297_v19 = vadd.f32 %v2169_v11, %v4406_v3  ;;  %v1781_v32 = vmul.f32 0.5, %v4367_v34 }
 0x131   :  { %v4446_v46 = vpop.f32.mrb[14].mxu1  ;;  %v3754_v54 = vpop.eup %3753  ;;  %v2672_v21 = vadd.f32 1.0, %v3752_v43  ;;  %v2798_v7 = vmul.f32 %v2670_v45, %v4384_v53  ;;  %v2424_v16 = vmul.f32 0.7978846, %v2296_v58  ;;  %3765 = vtanh.f32 %v2422_v10 }
 0x132   :  { %v4450_v63 = vpop.f32.mrb[15].mxu0  ;;  %v4452_v0 = vpop.f32.mrb[15].mxu1  ;;  %v2673_v8 = vadd.f32 1.0, %v3754_v54  ;;  %v2425_v53 = vmul.f32 0.7978846, %v2297_v19  ;;  %v2043_v13 = vmul.f32 %v1915_v38, %v4436_v33  ;;  %v1783_v1 = vmul.f32 0.5, %v4372_v37 }
 0x133   :  { %v3756_v22 = vpop.eup %3755  ;;  %v2800_v12 = vmul.f32 %v2672_v21, %v1776_v6  ;;  %v3537_v17 = vpack.c.bf16 %v2798_v7, %v2797_v44  ;;  %3767 = vtanh.f32 %v2424_v16  ;;  %v4465_v6 = vadd.f32 %v4316_v41, %v4358_v26 }
 0x134   :  { %v3758_v50 = vpop.eup %3757  ;;  %v2675_v59 = vadd.f32 1.0, %v3756_v22  ;;  %v2801_v23 = vmul.f32 %v2673_v8, %v1777_v9  ;;  %v4482_v26 = vadd.f32 %v4312_v39, %v4379_v51  ;;  %v1782_v47 = vmul.f32 0.5, %v4394_v61 }
 0x135   :  { %v3538_v20 = vpack.c.bf16 %v2800_v12, %v2799_v57  ;;  %v2674_v24 = vadd.f32 1.0, %v3758_v50  ;;  %3309 = vst [vmem:[%s5877_s3] sm:$0xff] %v3537_v17  ;;  %v4471_v25 = vpop.f32.mrb[16].mxu0  ;;  %v4473_v9 = vpop.f32.mrb[16].mxu1  ;;  %v2171_v54 = vmul.f32 %v2043_v13, %v4436_v33  ;;  %v1914_v57 = vmul.f32 0.044715, %v4465_v6 }
 0x136   :  { %v3760_v29 = vpop.eup %3759  ;;  %v4484_v31 = vpop.f32.mrb[17].mxu0  ;;  %v2803_v44 = vmul.f32 %v2675_v59, %v4419_v14  ;;  %v1916_v51 = vmul.f32 0.044715, %v4469_v60  ;;  %v4499_v21 = vadd.f32 %v4314_v40, %v4381_v52  ;;  %3769 = vtanh.f32 %v2425_v53 }
 0x137   :  { %3310 = vst [vmem:[%s5877_s3 + $0x8] sm:$0xff] %v3538_v20  ;;  %v2802_v30 = vmul.f32 %v2674_v24, %v1778_v18  ;;  %v4486_v43 = vpop.f32.mrb[17].mxu1  ;;  %v2676_v45 = vadd.f32 1.0, %v3760_v29  ;;  %v4491_v18 = vpop.f32.mrb[18].mxu0  ;;  %v2299_v61 = vadd.f32 %v2171_v54, %v4436_v33  ;;  %v1917_v7 = vmul.f32 0.044715, %v4482_v26 }
 0x138   :  { %v4493_v34 = vpop.f32.mrb[18].mxu1  ;;  %v4501_v58 = vpop.f32.mrb[19].mxu0  ;;  %v2042_v52 = vmul.f32 %v1914_v57, %v4465_v6  ;;  %v2044_v12 = vmul.f32 %v1916_v51, %v4469_v60  ;;  %v1784_v59 = vmul.f32 0.5, %v4403_v2 }
 0x139   :  { %v3539_v37 = vpack.c.bf16 %v2802_v30, %v2801_v23  ;;  %v3762_v14 = vpop.eup %3761  ;;  %v2804_v22 = vmul.f32 %v2676_v45, %v1780_v15  ;;  %v4505_v8 = vpop.f32.mrb[19].mxu1  ;;  %v4514_v15 = vadd.f32 %v4316_v41, %v4388_v55  ;;  %v2427_v50 = vmul.f32 0.7978846, %v2299_v61 }
 0x13a   :  { %v3764_v10 = vpop.eup %3763  ;;  %v2677_v11 = vadd.f32 1.0, %v3762_v14  ;;  %v2045_v17 = vmul.f32 %v1917_v7, %v4482_v26  ;;  %v2170_v19 = vmul.f32 %v2042_v52, %v4465_v6  ;;  %v2172_v20 = vmul.f32 %v2044_v12, %v4469_v60 }
 0x13b   :  { %3311 = vst [vmem:[%s5877_s3 + $0x10] sm:$0xff] %v3539_v37  ;;  %v3540_v16 = vpack.c.bf16 %v2804_v22, %v2803_v44  ;;  %v2679_v38 = vadd.f32 1.0, %v3764_v10  ;;  %v1919_v23 = vmul.f32 0.044715, %v4499_v21  ;;  %v3766_v24 = vpop.eup %3765  ;;  %3771 = vtanh.f32 %v2427_v50 }
 0x13c   :  { %v2805_v55 = vmul.f32 %v2677_v11, %v1781_v32  ;;  %v2173_v13 = vmul.f32 %v2045_v17, %v4482_v26  ;;  %v2678_v44 = vadd.f32 1.0, %v3766_v24  ;;  %v2298_v45 = vadd.f32 %v2170_v19, %v4465_v6 }
 0x13d   :  { %3312 = vst [vmem:[%s5877_s3 + $0x18] sm:$0xff] %v3540_v16  ;;  %v2807_v53 = vmul.f32 %v2679_v38, %v1783_v1  ;;  %v4525_v29 = vpop.f32.mrb[20].mxu0  ;;  %v4527_v30 = vpop.f32.mrb[20].mxu1  ;;  %v2300_v54 = vadd.f32 %v2172_v20, %v4469_v60  ;;  %v2047_v37 = vmul.f32 %v1919_v23, %v4499_v21  ;;  %v1918_v14 = vmul.f32 0.044715, %v4514_v15 }
 0x13e   :  { %v3768_v2 = vpop.eup %3767  ;;  %v4532_v57 = vpop.f32.mrb[21].mxu0  ;;  %v2301_v1 = vadd.f32 %v2173_v13, %v4482_v26  ;;  %v4540_v22 = vadd.f32 %v4318_v42, %v4390_v56  ;;  %v2806_v10 = vmul.f32 %v2678_v44, %v1782_v47  ;;  %v2426_v11 = vmul.f32 0.7978846, %v2298_v45 }
 0x13f   :  { %v4534_v51 = vpop.f32.mrb[21].mxu1  ;;  %v2680_v32 = vadd.f32 1.0, %v3768_v2  ;;  %v4542_v61 = vpop.f32.mrb[22].mxu0  ;;  %v2428_v52 = vmul.f32 0.7978846, %v2300_v54  ;;  %v2175_v12 = vmul.f32 %v2047_v37, %v4499_v21  ;;  %v1785_v17 = vmul.f32 0.5, %v4406_v3 }
 0x140   :  { %v4544_v7 = vpop.f32.mrb[22].mxu1  ;;  %v4547_v16 = vpop.f32.mrb[23].mxu0  ;;  %v2429_v19 = vmul.f32 0.7978846, %v2301_v1  ;;  %v2046_v56 = vmul.f32 %v1918_v14, %v4514_v15  ;;  %v3541_v20 = vpack.c.bf16 %v2806_v10, %v2805_v55  ;;  %v1787_v23 = vmul.f32 0.5, %v4436_v33 }
 0x141   :  { %v4549_v38 = vpop.f32.mrb[23].mxu1  ;;  %v2808_v50 = vmul.f32 %v2680_v32, %v1784_v59  ;;  %3773 = vtanh.f32 %v2426_v11  ;;  %v2303_v47 = vadd.f32 %v2175_v12, %v4499_v21  ;;  %v3770_v24 = vpop.eup %3769  ;;  %v1920_v44 = vmul.f32 0.044715, %v4540_v22 }
 0x142   :  { %3775 = vtanh.f32 %v2428_v52  ;;  %v2174_v2 = vmul.f32 %v2046_v56, %v4514_v15  ;;  %3313 = vst [vmem:[%s5877_s3 + $0x20] sm:$0xff] %v3541_v20  ;;  %v1786_v3 = vmul.f32 0.5, %v4465_v6  ;;  %v4563_v33 = vadd.f32 %v4312_v39, %v4396_v62 }
 0x143   :  { %v3542_v13 = vpack.c.bf16 %v2808_v50, %v2807_v53  ;;  %3777 = vtanh.f32 %v2429_v19  ;;  %v2431_v59 = vmul.f32 0.7978846, %v2303_v47  ;;  %v2048_v53 = vmul.f32 %v1920_v44, %v4540_v22 }
 0x144   :  { %v2302_v55 = vadd.f32 %v2174_v2, %v4514_v15  ;;  %v4572_v45 = vadd.f32 %v4314_v40, %v4398_v49  ;;  %v4576_v6 = vadd.f32 %v4316_v41, %v4408_v4  ;;  %v2681_v37 = vadd.f32 1.0, %v3770_v24 }
 0x145   :  { %3314 = vst [vmem:[%s5877_s3 + $0x28] sm:$0xff] %v3542_v13  ;;  %v4578_v54 = vpop.f32.mrb[24].mxu0  ;;  %v4580_v62 = vpop.f32.mrb[24].mxu1  ;;  %3779 = vtanh.f32 %v2431_v59  ;;  %v1921_v32 = vmul.f32 0.044715, %v4563_v33  ;;  %v4585_v1 = vadd.f32 %v4318_v42, %v4410_v5  ;;  %v1788_v4 = vmul.f32 0.5, %v4469_v60 }
 0x146   :  { %v4587_v14 = vpop.f32.mrb[25].mxu0  ;;  %v4589_v49 = vpop.f32.mrb[25].mxu1  ;;  %v2430_v11 = vmul.f32 0.7978846, %v2302_v55  ;;  %v2176_v52 = vmul.f32 %v2048_v53, %v4540_v22  ;;  %v1923_v12 = vmul.f32 0.044715, %v4572_v45  ;;  %v2809_v59 = vmul.f32 %v2681_v37, %v1785_v17 }
 0x147   :  { %v3772_v10 = vpop.eup %3771  ;;  %v4594_v50 = vpop.f32.mrb[26].mxu0  ;;  %v1789_v56 = vmul.f32 0.5, %v4482_v26  ;;  %v2049_v5 = vmul.f32 %v1921_v32, %v4563_v33  ;;  %v1922_v20 = vmul.f32 0.044715, %v4576_v6  ;;  %v4604_v60 = vmul.f32 0.5, %v4499_v21 }
 0x148   :  { %5878 = vst [vmem:[#allocation3_spill] sm:$0xff] %v4594_v50  ;;  %v2683_v19 = vadd.f32 1.0, %v3772_v10  ;;  %v4599_v47 = vpop.f32.mrb[26].mxu1  ;;  %v4601_v24 = vpop.f32.mrb[27].mxu0  ;;  %3781 = vtanh.f32 %v2430_v11  ;;  %v2304_v13 = vadd.f32 %v2176_v52, %v4540_v22  ;;  %v2051_v2 = vmul.f32 %v1923_v12, %v4572_v45 }
 0x149   :  { %5879 = vst [vmem:[#allocation4_spill] sm:$0xff] %v4599_v47  ;;  %5880 = vst [vmem:[#allocation5_spill] sm:$0xff] %v4601_v24  ;;  %v4608_v44 = vpop.f32.mrb[27].mxu1  ;;  %v2177_v26 = vmul.f32 %v2049_v5, %v4563_v33  ;;  %v2050_v55 = vmul.f32 %v1922_v20, %v4576_v6  ;;  %v1924_v53 = vmul.f32 0.044715, %v4585_v1  ;;  %v4616_v21 = vadd.f32 %v4312_v39, %v4429_v27 }
 0x14a   :  { %5881 = vst [vmem:[#allocation6_spill] sm:$0xff] %v4608_v44  ;;  %v2811_v32 = vmul.f32 %v2683_v19, %v1787_v23  ;;  %v2432_v10 = vmul.f32 0.7978846, %v2304_v13  ;;  %v2179_v24 = vmul.f32 %v2051_v2, %v4572_v45  ;;  %v4623_v37 = vadd.f32 %v4314_v40, %v4431_v28 }
 0x14b   :  { %v3774_v11 = vpop.eup %3773  ;;  %v2305_v52 = vadd.f32 %v2177_v26, %v4563_v33  ;;  %v2178_v12 = vmul.f32 %v2050_v55, %v4576_v6  ;;  %v2052_v17 = vmul.f32 %v1924_v53, %v4585_v1  ;;  %v4628_v27 = vadd.f32 %v4316_v41, %v4438_v35 }
 0x14c   :  { %v3776_v5 = vpop.eup %3775  ;;  %v2682_v23 = vadd.f32 1.0, %v3774_v11  ;;  %3783 = vtanh.f32 %v2432_v10  ;;  %v2307_v19 = vadd.f32 %v2179_v24, %v4572_v45  ;;  %v1925_v35 = vmul.f32 0.044715, %v4616_v21 }
 0x14d   :  { %v4630_v20 = vpop.f32.mrb[28].mxu0  ;;  %v4632_v13 = vpop.f32.mrb[28].mxu1  ;;  %v2684_v26 = vadd.f32 1.0, %v3776_v5  ;;  %v2433_v55 = vmul.f32 0.7978846, %v2305_v52  ;;  %v2306_v53 = vadd.f32 %v2178_v12, %v4576_v6  ;;  %v2180_v28 = vmul.f32 %v2052_v17, %v4585_v1 }
 0x14e   :  { %5882 = vst [vmem:[#allocation7_spill] sm:$0xff] %v4630_v20  ;;  %5883 = vst [vmem:[#allocation8_spill] sm:$0xff] %v4632_v13  ;;  %v3778_v2 = vpop.eup %3777  ;;  %v4636_v44 = vpop.f32.mrb[29].mxu0  ;;  %v2810_v24 = vmul.f32 %v2682_v23, %v1786_v3  ;;  %v2435_v47 = vmul.f32 0.7978846, %v2307_v19  ;;  %v1792_v3 = vmul.f32 0.5, %v4540_v22 }
 0x14f   :  { %5884 = vst [vmem:[#allocation9_spill] sm:$0xff] %v4636_v44  ;;  %v4638_v10 = vpop.f32.mrb[29].mxu1  ;;  %v2685_v11 = vadd.f32 1.0, %v3778_v2  ;;  %v4641_v50 = vpop.f32.mrb[30].mxu0  ;;  %v2812_v13 = vmul.f32 %v2684_v26, %v1788_v4  ;;  %3785 = vtanh.f32 %v2433_v55  ;;  %v2434_v5 = vmul.f32 0.7978846, %v2306_v53 }
 0x150   :  { %5885 = vst [vmem:[#allocation10_spill] sm:$0xff] %v4638_v10  ;;  %v3780_v20 = vpop.eup %3779  ;;  %v2308_v52 = vadd.f32 %v2180_v28, %v4585_v1  ;;  %v4644_v12 = vpop.f32.mrb[30].mxu1  ;;  %v3543_v44 = vpack.c.bf16 %v2810_v24, %v2809_v59  ;;  %v1790_v10 = vmul.f32 0.5, %v4514_v15  ;;  %3787 = vtanh.f32 %v2435_v47 }
 0x151   :  { %v4646_v17 = vpop.f32.mrb[31].mxu0  ;;  %v4650_v23 = vpop.f32.mrb[31].mxu1  ;;  %v3544_v19 = vpack.c.bf16 %v2812_v13, %v2811_v32  ;;  %3789 = vtanh.f32 %v2434_v5  ;;  %v2053_v4 = vmul.f32 %v1925_v35, %v4616_v21  ;;  %v2813_v55 = vmul.f32 %v2685_v11, %v1789_v56 }
 0x152   :  { %v2436_v2 = vmul.f32 0.7978846, %v2308_v52  ;;  %v3782_v26 = vpop.eup %3781  ;;  %3315 = vst [vmem:[%s5877_s3 + $0x30] sm:$0xff] %v3543_v44  ;;  %v2687_v53 = vadd.f32 1.0, %v3780_v20  ;;  %v1793_v59 = vmul.f32 0.5, %v4563_v33  ;;  %v1795_v13 = vmul.f32 0.5, %v4572_v45 }
 0x153   :  { %v1927_v15 = vmul.f32 0.044715, %v4623_v37  ;;  %3316 = vst [vmem:[%s5877_s3 + $0x38] sm:$0xff] %v3544_v19  ;;  %v2686_v22 = vadd.f32 1.0, %v3782_v26  ;;  %v2181_v47 = vmul.f32 %v2053_v4, %v4616_v21  ;;  %v1926_v32 = vmul.f32 0.044715, %v4628_v27 }
 0x154   :  { %3791 = vtanh.f32 %v2436_v2  ;;  %v4667_v56 = vadd.f32 %v4318_v42, %v4440_v36  ;;  %v4671_v33 = vadd.f32 %v4312_v39, %v4444_v48  ;;  %v4681_v45 = vadd.f32 %v4314_v40, %v4446_v46 }
 0x155   :  { %v2055_v44 = vmul.f32 %v1927_v15, %v4623_v37  ;;  %v4673_v20 = vpop.f32.mrb[32].mxu0  ;;  %v4675_v28 = vpop.f32.mrb[32].mxu1  ;;  %v2814_v24 = vmul.f32 %v2686_v22, %v1790_v10  ;;  %v2309_v11 = vadd.f32 %v2181_v47, %v4616_v21  ;;  %v2054_v35 = vmul.f32 %v1926_v32, %v4628_v27 }
 0x156   :  { %5886 = vst [vmem:[#allocation11_spill] sm:$0xff] %v4675_v28  ;;  %v4683_v5 = vpop.f32.mrb[33].mxu0  ;;  %v4685_v36 = vpop.f32.mrb[33].mxu1  ;;  %v2815_v48 = vmul.f32 %v2687_v53, %v4604_v60  ;;  %v1794_v19 = vmul.f32 0.5, %v4576_v6  ;;  %v1928_v10 = vmul.f32 0.044715, %v4667_v56 }
 0x157   :  { %5887 = vst [vmem:[#allocation12_spill] sm:$0xff] %v4683_v5  ;;  %5888 = vst [vmem:[#allocation13_spill] sm:$0xff] %v4685_v36  ;;  %v3784_v52 = vpop.eup %3783  ;;  %v2183_v2 = vmul.f32 %v2055_v44, %v4623_v37  ;;  %v4691_v4 = vpop.f32.mrb[34].mxu0  ;;  %v3545_v15 = vpack.c.bf16 %v2814_v24, %v2813_v55  ;;  %v2437_v22 = vmul.f32 0.7978846, %v2309_v11  ;;  %v2182_v47 = vmul.f32 %v2054_v35, %v4628_v27 }
 0x158   :  { %5889 = vst [vmem:[#allocation14_spill] sm:$0xff] %v4691_v4  ;;  %v4693_v26 = vpop.f32.mrb[34].mxu1  ;;  %v2688_v46 = vadd.f32 1.0, %v3784_v52  ;;  %v4696_v32 = vpop.f32.mrb[35].mxu0  ;;  %v2056_v6 = vmul.f32 %v1928_v10, %v4667_v56  ;;  %v1929_v53 = vmul.f32 0.044715, %v4671_v33  ;;  %v4705_v44 = vadd.f32 %v4316_v41, %v4450_v63 }
 0x159   :  { %5890 = vst [vmem:[#allocation15_spill] sm:$0xff] %v4693_v26  ;;  %5891 = vst [vmem:[#allocation16_spill] sm:$0xff] %v4696_v32  ;;  %v4698_v36 = vpop.f32.mrb[35].mxu1  ;;  %v2311_v60 = vadd.f32 %v2183_v2, %v4623_v37  ;;  %v3786_v26 = vpop.eup %3785  ;;  %3793 = vtanh.f32 %v2437_v22  ;;  %v2310_v24 = vadd.f32 %v2182_v47, %v4628_v27  ;;  %v1931_v11 = vmul.f32 0.044715, %v4681_v45 }
 0x15a   :  { %5892 = vst [vmem:[#allocation17_spill] sm:$0xff] %v4698_v36  ;;  %3317 = vst [vmem:[%s5877_s3 + $0x40] sm:$0xff] %v3545_v15  ;;  %v2816_v55 = vmul.f32 %v2688_v46, %v1792_v3  ;;  %v3788_v35 = vpop.eup %3787  ;;  %v2689_v52 = vadd.f32 1.0, %v3786_v26  ;;  %v2184_v10 = vmul.f32 %v2056_v6, %v4667_v56  ;;  %v2057_v36 = vmul.f32 %v1929_v53, %v4671_v33 }
 0x15b   :  { %v2439_v2 = vmul.f32 0.7978846, %v2311_v60  ;;  %v3790_v63 = vpop.eup %3789  ;;  %v2691_v4 = vadd.f32 1.0, %v3788_v35  ;;  %v2438_v5 = vmul.f32 0.7978846, %v2310_v24  ;;  %v2059_v28 = vmul.f32 %v1931_v11, %v4681_v45 }
 0x15c   :  { %v3546_v32 = vpack.c.bf16 %v2816_v55, %v2815_v48  ;;  %v2817_v15 = vmul.f32 %v2689_v52, %v1793_v59  ;;  %v2690_v3 = vadd.f32 1.0, %v3790_v63  ;;  %v2312_v46 = vadd.f32 %v2184_v10, %v4667_v56 }
 0x15d   :  { %3795 = vtanh.f32 %v2439_v2  ;;  %v4716_v22 = vpop.f32.mrb[36].mxu0  ;;  %v4718_v47 = vpop.f32.mrb[36].mxu1  ;;  %v1796_v48 = vmul.f32 0.5, %v4585_v1  ;;  %v2185_v60 = vmul.f32 %v2057_v36, %v4671_v33  ;;  %v2187_v59 = vmul.f32 %v2059_v28, %v4681_v45 }
 0x15e   :  { %v3792_v26 = vpop.eup %3791  ;;  %3318 = vst [vmem:[%s5877_s3 + $0x48] sm:$0xff] %v3546_v32  ;;  %3797 = vtanh.f32 %v2438_v5  ;;  %v4726_v6 = vpop.f32.mrb[37].mxu0  ;;  %v2819_v55 = vmul.f32 %v2691_v4, %v1795_v13  ;;  %v2818_v24 = vmul.f32 %v2690_v3, %v1794_v19  ;;  %v2440_v35 = vmul.f32 0.7978846, %v2312_v46 }
 0x15f   :  { %v4728_v53 = vpop.f32.mrb[37].mxu1  ;;  %v2692_v11 = vadd.f32 1.0, %v3792_v26  ;;  %v4730_v52 = vpop.f32.mrb[38].mxu0  ;;  %v2313_v32 = vadd.f32 %v2185_v60, %v4671_v33  ;;  %v2315_v1 = vadd.f32 %v2187_v59, %v4681_v45  ;;  %v1930_v5 = vmul.f32 0.044715, %v4705_v44 }
 0x160   :  { %v4732_v2 = vpop.f32.mrb[38].mxu1  ;;  %v4739_v28 = vadd.f32 %v4318_v42, %v4452_v0  ;;  %v4741_v36 = vpop.f32.mrb[39].mxu0  ;;  %v3547_v19 = vpack.c.bf16 %v2818_v24, %v2817_v15  ;;  %3799 = vtanh.f32 %v2440_v35  ;;  %v4747_v10 = vadd.f32 %v4312_v39, %v4471_v25 }
 0x161   :  { %v4743_v13 = vpop.f32.mrb[39].mxu1  ;;  %v2820_v4 = vmul.f32 %v2692_v11, %v1796_v48  ;;  %v1797_v63 = vmul.f32 0.5, %v4616_v21  ;;  %v2441_v3 = vmul.f32 0.7978846, %v2313_v32  ;;  %v2443_v46 = vmul.f32 0.7978846, %v2315_v1 }
 0x162   :  { %5893 = vst [vmem:[#allocation18_spill] sm:$0xff] %v4743_v13  ;;  %v2058_v26 = vmul.f32 %v1930_v5, %v4705_v44  ;;  %3319 = vst [vmem:[%s5877_s3 + $0x50] sm:$0xff] %v3547_v19  ;;  %v1799_v60 = vmul.f32 0.5, %v4623_v37  ;;  %v1932_v15 = vmul.f32 0.044715, %v4739_v28  ;;  %v4760_v21 = vadd.f32 %v4314_v40, %v4473_v9 }
 0x163   :  { %v3548_v0 = vpack.c.bf16 %v2820_v4, %v2819_v55  ;;  %v1933_v48 = vmul.f32 0.044715, %v4747_v10  ;;  %v3794_v59 = vpop.eup %3793  ;;  %3801 = vtanh.f32 %v2441_v3  ;;  %v4764_v24 = vadd.f32 %v4316_v41, %v4484_v31 }
 0x164   :  { %v2186_v25 = vmul.f32 %v2058_v26, %v4705_v44  ;;  %v2693_v37 = vadd.f32 1.0, %v3794_v59  ;;  %v1798_v55 = vmul.f32 0.5, %v4628_v27  ;;  %v2060_v11 = vmul.f32 %v1932_v15, %v4739_v28 }
 0x165   :  { %3320 = vst [vmem:[%s5877_s3 + $0x58] sm:$0xff] %v3548_v0  ;;  %v2061_v35 = vmul.f32 %v1933_v48, %v4747_v10  ;;  %v4772_v32 = vpop.f32.mrb[40].mxu0  ;;  %v4774_v1 = vpop.f32.mrb[40].mxu1  ;;  %v1800_v9 = vmul.f32 0.5, %v4667_v56  ;;  %3803 = vtanh.f32 %v2443_v46  ;;  %v1935_v5 = vmul.f32 0.044715, %v4760_v21 }
 0x166   :  { %5894 = vst [vmem:[#allocation19_spill] sm:$0xff] %v4772_v32  ;;  %5895 = vst [vmem:[#allocation20_spill] sm:$0xff] %v4774_v1  ;;  %v2314_v31 = vadd.f32 %v2186_v25, %v4705_v44  ;;  %v4779_v19 = vpop.f32.mrb[41].mxu0  ;;  %v4781_v4 = vpop.f32.mrb[41].mxu1  ;;  %v2821_v3 = vmul.f32 %v2693_v37, %v1797_v63  ;;  %v2188_v26 = vmul.f32 %v2060_v11, %v4739_v28  ;;  %v1934_v15 = vmul.f32 0.044715, %v4764_v24 }
 0x167   :  { %5896 = vst [vmem:[#allocation21_spill] sm:$0xff] %v4779_v19  ;;  %5897 = vst [vmem:[#allocation22_spill] sm:$0xff] %v4781_v4  ;;  %v3796_v27 = vpop.eup %3795  ;;  %v2189_v0 = vmul.f32 %v2061_v35, %v4747_v10  ;;  %v4786_v48 = vpop.f32.mrb[42].mxu0  ;;  %v2063_v25 = vmul.f32 %v1935_v5, %v4760_v21  ;;  %v4791_v19 = vadd.f32 %v4318_v42, %v4486_v43 }
 0x168   :  { %5898 = vst [vmem:[#allocation23_spill] sm:$0xff] %v4786_v48  ;;  %v3798_v56 = vpop.eup %3797  ;;  %v2695_v46 = vadd.f32 1.0, %v3796_v27  ;;  %v2442_v59 = vmul.f32 0.7978846, %v2314_v31  ;;  %v2316_v63 = vadd.f32 %v2188_v26, %v4739_v28  ;;  %v2062_v11 = vmul.f32 %v1934_v15, %v4764_v24  ;;  %v4796_v35 = vpop.f32.mrb[42].mxu1 }
 0x169   :  { %v2694_v4 = vadd.f32 1.0, %v3798_v56  ;;  %v2317_v37 = vadd.f32 %v2189_v0, %v4747_v10  ;;  %v1801_v48 = vmul.f32 0.5, %v4671_v33  ;;  %v2191_v31 = vmul.f32 %v2063_v25, %v4760_v21  ;;  %v4801_v13 = vpop.f32.mrb[43].mxu0 }
 0x16a   :  { %v2823_v1 = vmul.f32 %v2695_v46, %v1799_v60  ;;  %3805 = vtanh.f32 %v2442_v59  ;;  %v3800_v5 = vpop.eup %3799  ;;  %v2444_v32 = vmul.f32 0.7978846, %v2316_v63  ;;  %v2190_v56 = vmul.f32 %v2062_v11, %v4764_v24 }
 0x16b   :  { %v2822_v27 = vmul.f32 %v2694_v4, %v1798_v55  ;;  %v2445_v43 = vmul.f32 0.7978846, %v2317_v37  ;;  %v2696_v26 = vadd.f32 1.0, %v3800_v5  ;;  %v2319_v0 = vadd.f32 %v2191_v31, %v4760_v21  ;;  %v4823_v5 = vpop.f32.mrb[43].mxu1 }
 0x16c   :  { %v1936_v15 = vmul.f32 0.044715, %v4791_v19  ;;  %v4807_v60 = vadd.f32 %v4312_v39, %v4491_v18  ;;  %3807 = vtanh.f32 %v2444_v32  ;;  %v2318_v46 = vadd.f32 %v2190_v56, %v4764_v24 }
 0x16d   :  { %v3549_v33 = vpack.c.bf16 %v2822_v27, %v2821_v3  ;;  %v4812_v55 = vadd.f32 %v4314_v40, %v4493_v34  ;;  %v3802_v4 = vpop.eup %3801  ;;  %v2824_v59 = vmul.f32 %v2696_v26, %v1800_v9  ;;  %3809 = vtanh.f32 %v2445_v43 }
 0x16e   :  { %v2447_v25 = vmul.f32 0.7978846, %v2319_v0  ;;  %v2064_v63 = vmul.f32 %v1936_v15, %v4791_v19  ;;  %v1803_v18 = vmul.f32 0.5, %v4681_v45  ;;  %v1802_v32 = vmul.f32 0.5, %v4705_v44 }
 0x16f   :  { %3321 = vst [vmem:[%s5877_s3 + $0x60] sm:$0xff] %v3549_v33  ;;  %v2446_v3 = vmul.f32 0.7978846, %v2318_v46  ;;  %v1937_v37 = vmul.f32 0.044715, %v4807_v60  ;;  %v3804_v11 = vpop.eup %3803  ;;  %v3550_v34 = vpack.c.bf16 %v2824_v59, %v2823_v1  ;;  %v1804_v31 = vmul.f32 0.5, %v4739_v28 }
 0x170   :  { %3811 = vtanh.f32 %v2447_v25  ;;  %v2192_v9 = vmul.f32 %v2064_v63, %v4791_v19  ;;  %v2697_v27 = vadd.f32 1.0, %v3802_v4  ;;  %v1805_v43 = vmul.f32 0.5, %v4747_v10 }
 0x171   :  { %3813 = vtanh.f32 %v2446_v3  ;;  %v2065_v45 = vmul.f32 %v1937_v37, %v4807_v60  ;;  %3322 = vst [vmem:[%s5877_s3 + $0x68] sm:$0xff] %v3550_v34  ;;  %v4831_v44 = vmul.f32 0.5, %v4760_v21  ;;  %v1939_v1 = vmul.f32 0.044715, %v4812_v55 }
 0x172   :  { %v2320_v28 = vadd.f32 %v2192_v9, %v4791_v19  ;;  %v4837_v56 = vadd.f32 %v4316_v41, %v4501_v58  ;;  %v1806_v10 = vmul.f32 0.5, %v4764_v24  ;;  %v4843_v0 = vadd.f32 %v4318_v42, %v4505_v8 }
 0x173   :  { %v2193_v26 = vmul.f32 %v2065_v45, %v4807_v60  ;;  %v4847_v21 = vadd.f32 %v4312_v39, %v4525_v29  ;;  %v2699_v33 = vadd.f32 1.0, %v3804_v11  ;;  %v2067_v4 = vmul.f32 %v1939_v1, %v4812_v55 }
 0x174   :  { %v3806_v15 = vpop.eup %3805  ;;  %v2448_v46 = vmul.f32 0.7978846, %v2320_v28  ;;  %v1938_v58 = vmul.f32 0.044715, %v4837_v56  ;;  %v2825_v59 = vmul.f32 %v2697_v27, %v1801_v48  ;;  %v1940_v63 = vmul.f32 0.044715, %v4843_v0 }
 0x175   :  { %v2698_v25 = vadd.f32 1.0, %v3806_v15  ;;  %v2321_v24 = vadd.f32 %v2193_v26, %v4807_v60  ;;  %v2195_v8 = vmul.f32 %v2067_v4, %v4812_v55  ;;  %v4857_v29 = vadd.f32 %v4314_v40, %v4527_v30  ;;  %v4864_v4 = vpop.f32.mrb[44].mxu0 }
 0x176   :  { %3815 = vtanh.f32 %v2448_v46  ;;  %v2066_v3 = vmul.f32 %v1938_v58, %v4837_v56  ;;  %v3808_v37 = vpop.eup %3807  ;;  %v2068_v9 = vmul.f32 %v1940_v63, %v4843_v0  ;;  %v1941_v48 = vmul.f32 0.044715, %v4847_v21 }
 0x177   :  { %v2826_v11 = vmul.f32 %v2698_v25, %v1802_v32  ;;  %v2449_v34 = vmul.f32 0.7978846, %v2321_v24  ;;  %v3810_v27 = vpop.eup %3809  ;;  %v2827_v45 = vmul.f32 %v2699_v33, %v1803_v18  ;;  %v2700_v28 = vadd.f32 1.0, %v3808_v37  ;;  %v4866_v32 = vpop.f32.mrb[44].mxu1 }
 0x178   :  { %v2323_v1 = vadd.f32 %v2195_v8, %v4812_v55  ;;  %v2194_v26 = vmul.f32 %v2066_v3, %v4837_v56  ;;  %v2701_v46 = vadd.f32 1.0, %v3810_v27  ;;  %v2196_v30 = vmul.f32 %v2068_v9, %v4843_v0  ;;  %v4870_v33 = vpop.f32.mrb[45].mxu0  ;;  %v4872_v8 = vpop.f32.mrb[45].mxu1 }
 0x179   :  { %v3551_v15 = vpack.c.bf16 %v2826_v11, %v2825_v59  ;;  %3817 = vtanh.f32 %v2449_v34  ;;  %v2828_v25 = vmul.f32 %v2700_v28, %v1804_v31  ;;  %v2069_v18 = vmul.f32 %v1941_v48, %v4847_v21  ;;  %5899 = vst [vmem:[#allocation24_spill] sm:$0xff] %v4872_v8  ;;  %v4882_v8 = vpop.f32.mrb[46].mxu0 }
 0x17a   :  { %v3812_v58 = vpop.eup %3811  ;;  %v2451_v24 = vmul.f32 0.7978846, %v2323_v1  ;;  %v2322_v63 = vadd.f32 %v2194_v26, %v4837_v56  ;;  %v2829_v3 = vmul.f32 %v2701_v46, %v1805_v43  ;;  %v2324_v11 = vadd.f32 %v2196_v30, %v4843_v0 }
 0x17b   :  { %v3814_v59 = vpop.eup %3813  ;;  %3323 = vst [vmem:[%s5877_s3 + $0x70] sm:$0xff] %v3551_v15  ;;  %v2703_v37 = vadd.f32 1.0, %v3812_v58  ;;  %v1943_v31 = vmul.f32 0.044715, %v4857_v29  ;;  %v3552_v34 = vpack.c.bf16 %v2828_v25, %v2827_v45  ;;  %v1808_v48 = vmul.f32 0.5, %v4791_v19  ;;  %v4895_v15 = vpop.f32.mrb[46].mxu1 }
 0x17c   :  { %v2702_v9 = vadd.f32 1.0, %v3814_v59  ;;  %3819 = vtanh.f32 %v2451_v24  ;;  %v2450_v27 = vmul.f32 0.7978846, %v2322_v63  ;;  %v2452_v28 = vmul.f32 0.7978846, %v2324_v11 }
 0x17d   :  { %v2197_v1 = vmul.f32 %v2069_v18, %v4847_v21  ;;  %v2071_v26 = vmul.f32 %v1943_v31, %v4857_v29  ;;  %3324 = vst [vmem:[%s5877_s3 + $0x78] sm:$0xff] %v3552_v34  ;;  %v4889_v45 = vadd.f32 %v4316_v41, %v4532_v57  ;;  %v4893_v19 = vadd.f32 %v4318_v42, %v4534_v51 }
 0x17e   :  { %v2830_v43 = vmul.f32 %v2702_v9, %v1806_v10  ;;  %3821 = vtanh.f32 %v2450_v27  ;;  %v4901_v58 = vadd.f32 %v4312_v39, %v4542_v61  ;;  %v2831_v25 = vmul.f32 %v2703_v37, %v4831_v44 }
 0x17f   :  { %3823 = vtanh.f32 %v2452_v28  ;;  %v2325_v46 = vadd.f32 %v2197_v1, %v4847_v21  ;;  %v2199_v30 = vmul.f32 %v2071_v26, %v4857_v29  ;;  %v1809_v24 = vmul.f32 0.5, %v4807_v60  ;;  %v4922_v26 = vpop.f32.mrb[47].mxu0 }
 0x180   :  { %v3816_v10 = vpop.eup %3815  ;;  %v3553_v57 = vpack.c.bf16 %v2830_v43, %v2829_v3  ;;  %v1942_v51 = vmul.f32 0.044715, %v4889_v45  ;;  %v1944_v11 = vmul.f32 0.044715, %v4893_v19  ;;  %v1811_v61 = vmul.f32 0.5, %v4812_v55  ;;  %v4924_v43 = vpop.f32.mrb[47].mxu1 }
 0x181   :  { %v2704_v63 = vadd.f32 1.0, %v3816_v10  ;;  %v2453_v18 = vmul.f32 0.7978846, %v2325_v46  ;;  %v2327_v59 = vadd.f32 %v2199_v30, %v4857_v29  ;;  %v1945_v44 = vmul.f32 0.044715, %v4901_v58 }
 0x182   :  { %3325 = vst [vmem:[%s5877_s3 + $0x80] sm:$0xff] %v3553_v57  ;;  %v2070_v31 = vmul.f32 %v1942_v51, %v4889_v45  ;;  %v4916_v60 = vadd.f32 %v4314_v40, %v4544_v7  ;;  %v2072_v9 = vmul.f32 %v1944_v11, %v4893_v19  ;;  %v1810_v28 = vmul.f32 0.5, %v4837_v56 }
 0x183   :  { %v3818_v3 = vpop.eup %3817  ;;  %v2832_v37 = vmul.f32 %v2704_v63, %v1808_v48  ;;  %3825 = vtanh.f32 %v2453_v18  ;;  %v2455_v34 = vmul.f32 0.7978846, %v2327_v59  ;;  %v2073_v55 = vmul.f32 %v1945_v44, %v4901_v58 }
 0x184   :  { %v2705_v27 = vadd.f32 1.0, %v3818_v3  ;;  %v2198_v1 = vmul.f32 %v2070_v31, %v4889_v45  ;;  %v2200_v7 = vmul.f32 %v2072_v9, %v4893_v19  ;;  %v1947_v48 = vmul.f32 0.044715, %v4916_v60 }
 0x185   :  { %v3554_v46 = vpack.c.bf16 %v2832_v37, %v2831_v25  ;;  %3827 = vtanh.f32 %v2455_v34  ;;  %v1812_v10 = vmul.f32 0.5, %v4843_v0  ;;  %v2201_v56 = vmul.f32 %v2073_v55, %v4901_v58 }
 0x186   :  { %v3820_v30 = vpop.eup %3819  ;;  %v2326_v57 = vadd.f32 %v2198_v1, %v4889_v45  ;;  %v4933_v51 = vadd.f32 %v4316_v41, %v4547_v16  ;;  %v2833_v25 = vmul.f32 %v2705_v27, %v1809_v24  ;;  %v2328_v18 = vadd.f32 %v2200_v7, %v4893_v19  ;;  %v4950_v7 = vpop.f32.mrb[48].mxu1 }
 0x187   :  { %3326 = vst [vmem:[%s5877_s3 + $0x88] sm:$0xff] %v3554_v46  ;;  %v2707_v63 = vadd.f32 1.0, %v3820_v30  ;;  %v2075_v59 = vmul.f32 %v1947_v48, %v4916_v60  ;;  %v2329_v31 = vadd.f32 %v2201_v56, %v4901_v58  ;;  %v4944_v16 = vadd.f32 %v4318_v42, %v4549_v38  ;;  %v4948_v46 = vpop.f32.mrb[48].mxu0 }
 0x188   :  { %v3822_v11 = vpop.eup %3821  ;;  %v2454_v0 = vmul.f32 0.7978846, %v2326_v57  ;;  %v1946_v44 = vmul.f32 0.044715, %v4933_v51  ;;  %v2456_v9 = vmul.f32 0.7978846, %v2328_v18 }
 0x189   :  { %v3824_v3 = vpop.eup %3823  ;;  %v2835_v37 = vmul.f32 %v2707_v63, %v1811_v61  ;;  %v2706_v34 = vadd.f32 1.0, %v3822_v11  ;;  %v2203_v24 = vmul.f32 %v2075_v59, %v4916_v60  ;;  %v2457_v1 = vmul.f32 0.7978846, %v2329_v31  ;;  %v4954_v61 = vpop.f32.mrb[49].mxu0 }
 0x18a   :  { %v2708_v27 = vadd.f32 1.0, %v3824_v3  ;;  %3829 = vtanh.f32 %v2454_v0  ;;  %v2074_v55 = vmul.f32 %v1946_v44, %v4933_v51  ;;  %v1813_v30 = vmul.f32 0.5, %v4847_v21 }
 0x18b   :  { %v2834_v48 = vmul.f32 %v2706_v34, %v1810_v28  ;;  %3831 = vtanh.f32 %v2456_v9  ;;  %v2331_v38 = vadd.f32 %v2203_v24, %v4916_v60  ;;  %v1948_v63 = vmul.f32 0.044715, %v4944_v16  ;;  %v4975_v34 = vpop.f32.mrb[49].mxu1 }
 0x18c   :  { %v2836_v57 = vmul.f32 %v2708_v27, %v1812_v10  ;;  %3833 = vtanh.f32 %v2457_v1  ;;  %v2202_v56 = vmul.f32 %v2074_v55, %v4933_v51  ;;  %v4960_v0 = vadd.f32 %v4312_v39, %v4578_v54 }
 0x18d   :  { %v3826_v18 = vpop.eup %3825  ;;  %v3555_v59 = vpack.c.bf16 %v2834_v48, %v2833_v25  ;;  %v2459_v11 = vmul.f32 0.7978846, %v2331_v38  ;;  %v4964_v21 = vadd.f32 %v4314_v40, %v4580_v62  ;;  %v1815_v31 = vmul.f32 0.5, %v4857_v29  ;;  %v5900_v38 = vld [vmem:[#allocation3_spill] sm:$0xff] }
 0x18e   :  { %v3556_v28 = vpack.c.bf16 %v2836_v57, %v2835_v37  ;;  %v2330_v10 = vadd.f32 %v2202_v56, %v4933_v51  ;;  %v2076_v44 = vmul.f32 %v1948_v63, %v4944_v16  ;;  %v1814_v25 = vmul.f32 0.5, %v4889_v45  ;;  %v4997_v56 = vpop.f32.mrb[50].mxu0 }
 0x18f   :  { %v3828_v3 = vpop.eup %3827  ;;  %3327 = vst [vmem:[%s5877_s3 + $0x90] sm:$0xff] %v3555_v59  ;;  %v1816_v54 = vmul.f32 0.5, %v4893_v19  ;;  %3835 = vtanh.f32 %v2459_v11  ;;  %v1949_v62 = vmul.f32 0.044715, %v4960_v0  ;;  %v2709_v29 = vadd.f32 1.0, %v3826_v18  ;;  %5901 = vst [vmem:[#allocation3_spill] sm:$0xff] %v4997_v56 }
 0x190   :  { %3328 = vst [vmem:[%s5877_s3 + $0x98] sm:$0xff] %v3556_v28  ;;  %v2711_v37 = vadd.f32 1.0, %v3828_v3  ;;  %v2458_v9 = vmul.f32 0.7978846, %v2330_v10  ;;  %v2204_v24 = vmul.f32 %v2076_v44, %v4944_v16  ;;  %v1951_v45 = vmul.f32 0.044715, %v4964_v21 }
 0x191   :  { %v2077_v27 = vmul.f32 %v1949_v62, %v4960_v0  ;;  %v4985_v19 = vadd.f32 %v4316_v41, %v4587_v14  ;;  %v4989_v1 = vadd.f32 %v4318_v42, %v4589_v49  ;;  %v1817_v55 = vmul.f32 0.5, %v4901_v58 }
 0x192   :  { %3837 = vtanh.f32 %v2458_v9  ;;  %v2332_v48 = vadd.f32 %v2204_v24, %v4944_v16  ;;  %v4995_v57 = vadd.f32 %v4312_v39, %v5900_v38  ;;  %v1819_v63 = vmul.f32 0.5, %v4916_v60  ;;  %v5007_v24 = vpop.f32.mrb[50].mxu1 }
 0x193   :  { %v2205_v14 = vmul.f32 %v2077_v27, %v4960_v0  ;;  %v2079_v18 = vmul.f32 %v1951_v45, %v4964_v21  ;;  %v1950_v49 = vmul.f32 0.044715, %v4985_v19  ;;  %v2837_v11 = vmul.f32 %v2709_v29, %v1813_v30  ;;  %5902 = vst [vmem:[#allocation25_spill] sm:$0xff] %v5007_v24 }
 0x194   :  { %v3830_v59 = vpop.eup %3829  ;;  %v2839_v58 = vmul.f32 %v2711_v37, %v1815_v31  ;;  %v2460_v28 = vmul.f32 0.7978846, %v2332_v48  ;;  %v1952_v10 = vmul.f32 0.044715, %v4989_v1  ;;  %v1953_v30 = vmul.f32 0.044715, %v4995_v57 }
 0x195   :  { %v3832_v44 = vpop.eup %3831  ;;  %v2710_v3 = vadd.f32 1.0, %v3830_v59  ;;  %v2333_v62 = vadd.f32 %v2205_v14, %v4960_v0  ;;  %v2207_v9 = vmul.f32 %v2079_v18, %v4964_v21  ;;  %v2078_v60 = vmul.f32 %v1950_v49, %v4985_v19  ;;  %v5013_v14 = vpop.f32.mrb[51].mxu0 }
 0x196   :  { %v3834_v27 = vpop.eup %3833  ;;  %v2712_v45 = vadd.f32 1.0, %v3832_v44  ;;  %3839 = vtanh.f32 %v2460_v28  ;;  %v2080_v38 = vmul.f32 %v1952_v10, %v4989_v1  ;;  %v1818_v29 = vmul.f32 0.5, %v4933_v51  ;;  %v5015_v18 = vpop.f32.mrb[51].mxu1 }
 0x197   :  { %v2838_v31 = vmul.f32 %v2710_v3, %v1814_v25  ;;  %v2461_v37 = vmul.f32 0.7978846, %v2333_v62  ;;  %v2335_v48 = vadd.f32 %v2207_v9, %v4964_v21  ;;  %v2206_v59 = vmul.f32 %v2078_v60, %v4985_v19  ;;  %v5903_v60 = vld [vmem:[#allocation4_spill] sm:$0xff] }
 0x198   :  { %v2840_v49 = vmul.f32 %v2712_v45, %v1816_v54  ;;  %v2208_v44 = vmul.f32 %v2080_v38, %v4989_v1  ;;  %v2081_v28 = vmul.f32 %v1953_v30, %v4995_v57  ;;  %v2713_v56 = vadd.f32 1.0, %v3834_v27 }
 0x199   :  { %v3836_v10 = vpop.eup %3835  ;;  %v3557_v24 = vpack.c.bf16 %v2838_v31, %v2837_v11  ;;  %3841 = vtanh.f32 %v2461_v37  ;;  %v2463_v25 = vmul.f32 0.7978846, %v2335_v48  ;;  %v2334_v62 = vadd.f32 %v2206_v59, %v4985_v19  ;;  %v5904_v11 = vld [vmem:[#allocation5_spill] sm:$0xff]  ;;  %v5905_v31 = vld [vmem:[#allocation6_spill] sm:$0xff] }
 0x19a   :  { %v3558_v51 = vpack.c.bf16 %v2840_v49, %v2839_v58  ;;  %v2715_v3 = vadd.f32 1.0, %v3836_v10  ;;  %v2336_v9 = vadd.f32 %v2208_v44, %v4989_v1  ;;  %v2209_v54 = vmul.f32 %v2081_v28, %v4995_v57 }
 0x19b   :  { %3329 = vst [vmem:[%s5877_s3 + $0xa0] sm:$0xff] %v3557_v24  ;;  %3843 = vtanh.f32 %v2463_v25  ;;  %v5028_v45 = vadd.f32 %v4314_v40, %v5903_v60  ;;  %v5032_v27 = vadd.f32 %v4316_v41, %v5904_v11  ;;  %v1820_v38 = vmul.f32 0.5, %v4944_v16 }
 0x19c   :  { %v3838_v58 = vpop.eup %3837  ;;  %3330 = vst [vmem:[%s5877_s3 + $0xa8] sm:$0xff] %v3558_v51  ;;  %v2462_v30 = vmul.f32 0.7978846, %v2334_v62  ;;  %v2464_v24 = vmul.f32 0.7978846, %v2336_v9  ;;  %v5040_v37 = vadd.f32 %v4318_v42, %v5905_v31  ;;  %v2841_v48 = vmul.f32 %v2713_v56, %v1817_v55  ;;  %v5906_v56 = vld [vmem:[#allocation7_spill] sm:$0xff] }
 0x19d   :  { %v2714_v49 = vadd.f32 1.0, %v3838_v58  ;;  %v2337_v59 = vadd.f32 %v2209_v54, %v4995_v57  ;;  %v1955_v44 = vmul.f32 0.044715, %v5028_v45  ;;  %v2843_v28 = vmul.f32 %v2715_v3, %v1819_v63  ;;  %v5907_v63 = vld [vmem:[#allocation8_spill] sm:$0xff]  ;;  %v5058_v58 = vpop.f32.mrb[52].mxu0 }
 0x19e   :  { %v1821_v10 = vmul.f32 0.5, %v4960_v0  ;;  %3845 = vtanh.f32 %v2462_v30  ;;  %v1954_v25 = vmul.f32 0.044715, %v5032_v27  ;;  %v1956_v55 = vmul.f32 0.044715, %v5040_v37  ;;  %v5060_v30 = vpop.f32.mrb[52].mxu1 }
 0x19f   :  { %v2842_v51 = vmul.f32 %v2714_v49, %v1818_v29  ;;  %3847 = vtanh.f32 %v2464_v24  ;;  %v2465_v16 = vmul.f32 0.7978846, %v2337_v59  ;;  %v2083_v62 = vmul.f32 %v1955_v44, %v5028_v45  ;;  %5908 = vst [vmem:[#allocation4_spill] sm:$0xff] %v5060_v30 }
 0x1a0   :  { %v3840_v9 = vpop.eup %3839  ;;  %v2082_v60 = vmul.f32 %v1954_v25, %v5032_v27  ;;  %v5051_v54 = vadd.f32 %v4312_v39, %v5906_v56  ;;  %v5055_v0 = vadd.f32 %v4314_v40, %v5907_v63  ;;  %v1823_v24 = vmul.f32 0.5, %v4964_v21  ;;  %v5074_v21 = vpop.f32.mrb[53].mxu1 }
 0x1a1   :  { %v3559_v3 = vpack.c.bf16 %v2842_v51, %v2841_v48  ;;  %v2716_v11 = vadd.f32 1.0, %v3840_v9  ;;  %3849 = vtanh.f32 %v2465_v16  ;;  %v2211_v29 = vmul.f32 %v2083_v62, %v5028_v45  ;;  %v5072_v62 = vpop.f32.mrb[53].mxu0  ;;  %5910 = vst [vmem:[#allocation6_spill] sm:$0xff] %v5074_v21 }
 0x1a2   :  { %v2210_v31 = vmul.f32 %v2082_v60, %v5032_v27  ;;  %v2084_v49 = vmul.f32 %v1956_v55, %v5040_v37  ;;  %v1957_v59 = vmul.f32 0.044715, %v5051_v54  ;;  %v1822_v25 = vmul.f32 0.5, %v4985_v19  ;;  %5909 = vst [vmem:[#allocation5_spill] sm:$0xff] %v5072_v62  ;;  %v5084_v30 = vpop.f32.mrb[54].mxu0 }
 0x1a3   :  { %v3842_v44 = vpop.eup %3841  ;;  %3331 = vst [vmem:[%s5877_s3 + $0xb0] sm:$0xff] %v3559_v3  ;;  %v2844_v48 = vmul.f32 %v2716_v11, %v1820_v38  ;;  %v2339_v51 = vadd.f32 %v2211_v29, %v5028_v45  ;;  %v1959_v16 = vmul.f32 0.044715, %v5055_v0  ;;  %v5911_v11 = vld [vmem:[#allocation9_spill] sm:$0xff]  ;;  %5912 = vst [vmem:[#allocation7_spill] sm:$0xff] %v5084_v30 }
 0x1a4   :  { %v2717_v9 = vadd.f32 1.0, %v3842_v44  ;;  %v2338_v60 = vadd.f32 %v2210_v31, %v5032_v27  ;;  %v2212_v55 = vmul.f32 %v2084_v49, %v5040_v37  ;;  %v2085_v56 = vmul.f32 %v1957_v59, %v5051_v54 }
 0x1a5   :  { %v3844_v63 = vpop.eup %3843  ;;  %v3560_v3 = vpack.c.bf16 %v2844_v48, %v2843_v28  ;;  %v2467_v38 = vmul.f32 0.7978846, %v2339_v51  ;;  %v2087_v19 = vmul.f32 %v1959_v16, %v5055_v0  ;;  %v5082_v29 = vadd.f32 %v4316_v41, %v5911_v11 }
 0x1a6   :  { %v2719_v62 = vadd.f32 1.0, %v3844_v63  ;;  %v1824_v44 = vmul.f32 0.5, %v4989_v1  ;;  %v2466_v21 = vmul.f32 0.7978846, %v2338_v60  ;;  %v2340_v31 = vadd.f32 %v2212_v55, %v5040_v37  ;;  %v5094_v1 = vpop.f32.mrb[54].mxu1 }
 0x1a7   :  { %3332 = vst [vmem:[%s5877_s3 + $0xb8] sm:$0xff] %v3560_v3  ;;  %v2845_v28 = vmul.f32 %v2717_v9, %v1821_v10  ;;  %3851 = vtanh.f32 %v2467_v38  ;;  %v2213_v49 = vmul.f32 %v2085_v56, %v5051_v54  ;;  %v2215_v59 = vmul.f32 %v2087_v19, %v5055_v0  ;;  %5913 = vst [vmem:[#allocation8_spill] sm:$0xff] %v5094_v1  ;;  %v5914_v10 = vld [vmem:[#allocation10_spill] sm:$0xff] }
 0x1a8   :  { %v3846_v48 = vpop.eup %3845  ;;  %v2847_v51 = vmul.f32 %v2719_v62, %v1823_v24  ;;  %3853 = vtanh.f32 %v2466_v21  ;;  %v2468_v16 = vmul.f32 0.7978846, %v2340_v31  ;;  %v1958_v63 = vmul.f32 0.044715, %v5082_v29 }
 0x1a9   :  { %v3848_v60 = vpop.eup %3847  ;;  %v2718_v55 = vadd.f32 1.0, %v3846_v48  ;;  %v2341_v11 = vadd.f32 %v2213_v49, %v5051_v54  ;;  %v2343_v3 = vadd.f32 %v2215_v59, %v5055_v0  ;;  %v5100_v9 = vadd.f32 %v4318_v42, %v5914_v10 }
 0x1aa   :  { %v2720_v56 = vadd.f32 1.0, %v3848_v60  ;;  %3855 = vtanh.f32 %v2468_v16  ;;  %v2086_v24 = vmul.f32 %v1958_v63, %v5082_v29  ;;  %v5105_v62 = vadd.f32 %v4312_v39, %v4641_v50  ;;  %v5112_v50 = vpop.f32.mrb[55].mxu0 }
 0x1ab   :  { %v3850_v21 = vpop.eup %3849  ;;  %v2846_v38 = vmul.f32 %v2718_v55, %v1822_v25  ;;  %v1825_v19 = vmul.f32 0.5, %v4995_v57  ;;  %v2469_v31 = vmul.f32 0.7978846, %v2341_v11  ;;  %v2471_v49 = vmul.f32 0.7978846, %v2343_v3 }
 0x1ac   :  { %v2848_v48 = vmul.f32 %v2720_v56, %v1824_v44  ;;  %v1827_v59 = vmul.f32 0.5, %v5028_v45  ;;  %v2214_v10 = vmul.f32 %v2086_v24, %v5082_v29  ;;  %v1960_v60 = vmul.f32 0.044715, %v5100_v9 }
 0x1ad   :  { %v3561_v16 = vpack.c.bf16 %v2846_v38, %v2845_v28  ;;  %v2721_v1 = vadd.f32 1.0, %v3850_v21  ;;  %3857 = vtanh.f32 %v2469_v31  ;;  %v1961_v63 = vmul.f32 0.044715, %v5105_v62 }
 0x1ae   :  { %v3562_v30 = vpack.c.bf16 %v2848_v48, %v2847_v51  ;;  %v1826_v25 = vmul.f32 0.5, %v5032_v27  ;;  %3859 = vtanh.f32 %v2471_v49  ;;  %v2342_v57 = vadd.f32 %v2214_v10, %v5082_v29  ;;  %v5129_v27 = vpop.f32.mrb[55].mxu1 }
 0x1af   :  { %3333 = vst [vmem:[%s5877_s3 + $0xc0] sm:$0xff] %v3561_v16  ;;  %v2088_v45 = vmul.f32 %v1960_v60, %v5100_v9  ;;  %v2089_v44 = vmul.f32 %v1961_v63, %v5105_v62  ;;  %v5123_v28 = vadd.f32 %v4314_v40, %v4644_v12  ;;  %v5127_v51 = vadd.f32 %v4316_v41, %v4646_v17 }
 0x1b0   :  { %3334 = vst [vmem:[%s5877_s3 + $0xc8] sm:$0xff] %v3562_v30  ;;  %v1828_v55 = vmul.f32 0.5, %v5040_v37  ;;  %v1829_v11 = vmul.f32 0.5, %v5051_v54  ;;  %v2470_v3 = vmul.f32 0.7978846, %v2342_v57  ;;  %v5138_v56 = vadd.f32 %v4318_v42, %v4650_v23 }
 0x1b1   :  { %v3852_v12 = vpop.eup %3851  ;;  %v2849_v24 = vmul.f32 %v2721_v1, %v1825_v19  ;;  %v2216_v17 = vmul.f32 %v2088_v45, %v5100_v9  ;;  %v2217_v21 = vmul.f32 %v2089_v44, %v5105_v62  ;;  %v1963_v38 = vmul.f32 0.044715, %v5123_v28 }
 0x1b2   :  { %v3854_v31 = vpop.eup %3853  ;;  %v2723_v49 = vadd.f32 1.0, %v3852_v12  ;;  %3861 = vtanh.f32 %v2470_v3  ;;  %v1962_v37 = vmul.f32 0.044715, %v5127_v51  ;;  %v5146_v54 = vadd.f32 %v4312_v39, %v4673_v20  ;;  %v5154_v3 = vpop.f32.mrb[56].mxu0 }
 0x1b3   :  { %v2722_v30 = vadd.f32 1.0, %v3854_v31  ;;  %v2344_v23 = vadd.f32 %v2216_v17, %v5100_v9  ;;  %v2345_v1 = vadd.f32 %v2217_v21, %v5105_v62  ;;  %v2091_v19 = vmul.f32 %v1963_v38, %v5123_v28  ;;  %v5915_v38 = vld [vmem:[#allocation11_spill] sm:$0xff]  ;;  %v5165_v31 = vpop.f32.mrb[57].mxu0 }
 0x1b4   :  { %v3856_v48 = vpop.eup %3855  ;;  %v2851_v10 = vmul.f32 %v2723_v49, %v1827_v59  ;;  %v1831_v60 = vmul.f32 0.5, %v5055_v0  ;;  %v2090_v16 = vmul.f32 %v1962_v37, %v5127_v51  ;;  %v1964_v63 = vmul.f32 0.044715, %v5138_v56  ;;  %v5163_v0 = vpop.f32.mrb[56].mxu1 }
 0x1b5   :  { %v2850_v57 = vmul.f32 %v2722_v30, %v1826_v25  ;;  %v2724_v45 = vadd.f32 1.0, %v3856_v48  ;;  %v2472_v44 = vmul.f32 0.7978846, %v2344_v23  ;;  %v2473_v20 = vmul.f32 0.7978846, %v2345_v1 }
 0x1b6   :  { %v2219_v12 = vmul.f32 %v2091_v19, %v5123_v28  ;;  %v2218_v17 = vmul.f32 %v2090_v16, %v5127_v51  ;;  %v2092_v21 = vmul.f32 %v1964_v63, %v5138_v56  ;;  %v5161_v59 = vadd.f32 %v4314_v40, %v5915_v38 }
 0x1b7   :  { %v3858_v25 = vpop.eup %3857  ;;  %v3563_v49 = vpack.c.bf16 %v2850_v57, %v2849_v24  ;;  %v2852_v37 = vmul.f32 %v2724_v45, %v1828_v55  ;;  %3863 = vtanh.f32 %v2472_v44  ;;  %v1965_v30 = vmul.f32 0.044715, %v5146_v54  ;;  %v5176_v57 = vpop.f32.mrb[57].mxu1 }
 0x1b8   :  { %v3860_v23 = vpop.eup %3859  ;;  %v2725_v1 = vadd.f32 1.0, %v3858_v25  ;;  %3865 = vtanh.f32 %v2473_v20  ;;  %v2347_v19 = vadd.f32 %v2219_v12, %v5123_v28  ;;  %v2346_v48 = vadd.f32 %v2218_v17, %v5127_v51  ;;  %5916 = vst [vmem:[#allocation9_spill] sm:$0xff] %v5176_v57  ;;  %v5917_v25 = vld [vmem:[#allocation12_spill] sm:$0xff]  ;;  %v5922_v57 = vld [vmem:[#allocation15_spill] sm:$0xff] }
 0x1b9   :  { %3335 = vst [vmem:[%s5877_s3 + $0xd0] sm:$0xff] %v3563_v49  ;;  %v3564_v16 = vpack.c.bf16 %v2852_v37, %v2851_v10  ;;  %v1830_v63 = vmul.f32 0.5, %v5082_v29  ;;  %v2220_v24 = vmul.f32 %v2092_v21, %v5138_v56  ;;  %v2093_v55 = vmul.f32 %v1965_v30, %v5146_v54  ;;  %v5919_v30 = vld [vmem:[#allocation14_spill] sm:$0xff] }
 0x1ba   :  { %v2727_v45 = vadd.f32 1.0, %v3860_v23  ;;  %v1832_v44 = vmul.f32 0.5, %v5100_v9  ;;  %v2475_v20 = vmul.f32 0.7978846, %v2347_v19  ;;  %v2474_v12 = vmul.f32 0.7978846, %v2346_v48 }
 0x1bb   :  { %3336 = vst [vmem:[%s5877_s3 + $0xd8] sm:$0xff] %v3564_v16  ;;  %v2853_v17 = vmul.f32 %v2725_v1, %v1829_v11  ;;  %v2348_v10 = vadd.f32 %v2220_v24, %v5138_v56  ;;  %v2221_v29 = vmul.f32 %v2093_v55, %v5146_v54  ;;  %v1967_v21 = vmul.f32 0.044715, %v5161_v59  ;;  %v5918_v9 = vld [vmem:[#allocation13_spill] sm:$0xff]  ;;  %v5197_v11 = vpop.f32.mrb[58].mxu0 }
 0x1bc   :  { %v3862_v38 = vpop.eup %3861  ;;  %3867 = vtanh.f32 %v2475_v20  ;;  %v5187_v49 = vadd.f32 %v4316_v41, %v5917_v25  ;;  %v5191_v37 = vadd.f32 %v4318_v42, %v5918_v9  ;;  %v5195_v23 = vadd.f32 %v4312_v39, %v5919_v30  ;;  %5920 = vst [vmem:[#allocation10_spill] sm:$0xff] %v5197_v11  ;;  %v5204_v25 = vpop.f32.mrb[58].mxu1 }
 0x1bd   :  { %v2726_v1 = vadd.f32 1.0, %v3862_v38  ;;  %3869 = vtanh.f32 %v2474_v12  ;;  %v2476_v19 = vmul.f32 0.7978846, %v2348_v10  ;;  %v2349_v48 = vadd.f32 %v2221_v29, %v5146_v54  ;;  %5921 = vst [vmem:[#allocation11_spill] sm:$0xff] %v5204_v25 }
 0x1be   :  { %v1833_v16 = vmul.f32 0.5, %v5105_v62  ;;  %v1835_v24 = vmul.f32 0.5, %v5123_v28  ;;  %v2095_v55 = vmul.f32 %v1967_v21, %v5161_v59  ;;  %v1966_v20 = vmul.f32 0.044715, %v5187_v49 }
 0x1bf   :  { %v2854_v9 = vmul.f32 %v2726_v1, %v1830_v63  ;;  %3871 = vtanh.f32 %v2476_v19  ;;  %v2477_v30 = vmul.f32 0.7978846, %v2349_v48  ;;  %v1968_v11 = vmul.f32 0.044715, %v5191_v37  ;;  %v5215_v63 = vpop.f32.mrb[59].mxu0 }
 0x1c0   :  { %v2855_v38 = vmul.f32 %v2727_v45, %v1831_v60  ;;  %v2223_v12 = vmul.f32 %v2095_v55, %v5161_v59  ;;  %v2094_v10 = vmul.f32 %v1966_v20, %v5187_v49  ;;  %v1969_v62 = vmul.f32 0.044715, %v5195_v23  ;;  %5923 = vst [vmem:[#allocation12_spill] sm:$0xff] %v5215_v63  ;;  %v5220_v55 = vpop.f32.mrb[59].mxu1 }
 0x1c1   :  { %v3864_v29 = vpop.eup %3863  ;;  %v3565_v28 = vpack.c.bf16 %v2854_v9, %v2853_v17  ;;  %3873 = vtanh.f32 %v2477_v30  ;;  %v2096_v21 = vmul.f32 %v1968_v11, %v5191_v37  ;;  %v5213_v25 = vadd.f32 %v4314_v40, %v5922_v57  ;;  %5924 = vst [vmem:[#allocation13_spill] sm:$0xff] %v5220_v55 }
 0x1c2   :  { %v3866_v1 = vpop.eup %3865  ;;  %v2728_v19 = vadd.f32 1.0, %v3864_v29  ;;  %v2351_v60 = vadd.f32 %v2223_v12, %v5161_v59  ;;  %v2222_v45 = vmul.f32 %v2094_v10, %v5187_v49  ;;  %v2097_v48 = vmul.f32 %v1969_v62, %v5195_v23 }
 0x1c3   :  { %3337 = vst [vmem:[%s5877_s3 + $0xe0] sm:$0xff] %v3565_v28  ;;  %v2729_v17 = vadd.f32 1.0, %v3866_v1  ;;  %v1834_v57 = vmul.f32 0.5, %v5127_v51  ;;  %v2224_v11 = vmul.f32 %v2096_v21, %v5191_v37  ;;  %v1971_v20 = vmul.f32 0.044715, %v5213_v25  ;;  %v5925_v28 = vld [vmem:[#allocation16_spill] sm:$0xff] }
 0x1c4   :  { %v2856_v9 = vmul.f32 %v2728_v19, %v1832_v44  ;;  %v2479_v30 = vmul.f32 0.7978846, %v2351_v60  ;;  %v2350_v12 = vadd.f32 %v2222_v45, %v5187_v49  ;;  %v2225_v10 = vmul.f32 %v2097_v48, %v5195_v23 }
 0x1c5   :  { %v1836_v62 = vmul.f32 0.5, %v5138_v56  ;;  %v2352_v29 = vadd.f32 %v2224_v11, %v5191_v37  ;;  %v2099_v55 = vmul.f32 %v1971_v20, %v5213_v25  ;;  %v5235_v1 = vadd.f32 %v4316_v41, %v5925_v28 }
 0x1c6   :  { %v3868_v51 = vpop.eup %3867  ;;  %v3566_v21 = vpack.c.bf16 %v2856_v9, %v2855_v38  ;;  %3875 = vtanh.f32 %v2479_v30  ;;  %v2478_v63 = vmul.f32 0.7978846, %v2350_v12  ;;  %v2353_v44 = vadd.f32 %v2225_v10, %v5195_v23  ;;  %v5243_v38 = vpop.f32.mrb[60].mxu0 }
 0x1c7   :  { %v3870_v19 = vpop.eup %3869  ;;  %v2857_v60 = vmul.f32 %v2729_v17, %v1833_v16  ;;  %v2731_v45 = vadd.f32 1.0, %v3868_v51  ;;  %v2480_v48 = vmul.f32 0.7978846, %v2352_v29  ;;  %v2227_v56 = vmul.f32 %v2099_v55, %v5213_v25  ;;  %v5926_v17 = vld [vmem:[#allocation17_spill] sm:$0xff]  ;;  %v5252_v51 = vpop.f32.mrb[60].mxu1 }
 0x1c8   :  { %3338 = vst [vmem:[%s5877_s3 + $0xe8] sm:$0xff] %v3566_v21  ;;  %v2730_v11 = vadd.f32 1.0, %v3870_v19  ;;  %3877 = vtanh.f32 %v2478_v63  ;;  %v2481_v20 = vmul.f32 0.7978846, %v2353_v44  ;;  %v1970_v28 = vmul.f32 0.044715, %v5235_v1 }
 0x1c9   :  { %v3872_v9 = vpop.eup %3871  ;;  %v1837_v30 = vmul.f32 0.5, %v5146_v54  ;;  %3879 = vtanh.f32 %v2480_v48  ;;  %v2355_v16 = vadd.f32 %v2227_v56, %v5213_v25  ;;  %v5249_v55 = vadd.f32 %v4318_v42, %v5926_v17 }
 0x1ca   :  { %v2859_v12 = vmul.f32 %v2731_v45, %v1835_v24  ;;  %v2858_v10 = vmul.f32 %v2730_v11, %v1834_v57  ;;  %v2732_v29 = vadd.f32 1.0, %v3872_v9  ;;  %v2098_v63 = vmul.f32 %v1970_v28, %v5235_v1  ;;  %v5266_v28 = vpop.f32.mrb[61].mxu1 }
 0x1cb   :  { %v3874_v21 = vpop.eup %3873  ;;  %3881 = vtanh.f32 %v2481_v20  ;;  %v2483_v44 = vmul.f32 0.7978846, %v2355_v16  ;;  %v1972_v19 = vmul.f32 0.044715, %v5249_v55  ;;  %v5257_v54 = vadd.f32 %v4312_v39, %v4716_v22  ;;  %v5264_v20 = vpop.f32.mrb[61].mxu0 }
 0x1cc   :  { %v3567_v48 = vpack.c.bf16 %v2858_v10, %v2857_v60  ;;  %v2860_v56 = vmul.f32 %v2732_v29, %v1836_v62  ;;  %v1839_v17 = vmul.f32 0.5, %v5161_v59  ;;  %v2226_v24 = vmul.f32 %v2098_v63, %v5235_v1 }
 0x1cd   :  { %v1838_v57 = vmul.f32 0.5, %v5187_v49  ;;  %3883 = vtanh.f32 %v2483_v44  ;;  %v2100_v45 = vmul.f32 %v1972_v19, %v5249_v55  ;;  %v1973_v11 = vmul.f32 0.044715, %v5257_v54 }
 0x1ce   :  { %3339 = vst [vmem:[%s5877_s3 + $0xf0] sm:$0xff] %v3567_v48  ;;  %v3568_v22 = vpack.c.bf16 %v2860_v56, %v2859_v12  ;;  %v2733_v62 = vadd.f32 1.0, %v3874_v21  ;;  %v2354_v59 = vadd.f32 %v2226_v24, %v5235_v1  ;;  %v5274_v49 = vadd.f32 %v4314_v40, %v4718_v47  ;;  %v5292_v21 = vpop.f32.mrb[62].mxu0 }
 0x1cf   :  { %v1840_v60 = vmul.f32 0.5, %v5191_v37  ;;  %v2228_v9 = vmul.f32 %v2100_v45, %v5249_v55  ;;  %v2101_v16 = vmul.f32 %v1973_v11, %v5257_v54  ;;  %v5281_v10 = vadd.f32 %v4316_v41, %v4726_v6  ;;  %5927 = vst [vmem:[#allocation14_spill] sm:$0xff] %v5292_v21  ;;  %v5299_v11 = vpop.f32.mrb[62].mxu1 }
 0x1d0   :  { %v3876_v29 = vpop.eup %3875  ;;  %3340 = vst [vmem:[%s5877_s3 + $0xf8] sm:$0xff] %v3568_v22  ;;  %v1841_v12 = vmul.f32 0.5, %v5195_v23  ;;  %v2482_v63 = vmul.f32 0.7978846, %v2354_v59  ;;  %v1975_v47 = vmul.f32 0.044715, %v5274_v49  ;;  %v5290_v37 = vadd.f32 %v4318_v42, %v4728_v53 }
 0x1d1   :  { %v2735_v44 = vadd.f32 1.0, %v3876_v29  ;;  %v1843_v6 = vmul.f32 0.5, %v5213_v25  ;;  %v2356_v19 = vadd.f32 %v2228_v9, %v5249_v55  ;;  %v2229_v48 = vmul.f32 %v2101_v16, %v5257_v54  ;;  %5928 = vst [vmem:[#allocation15_spill] sm:$0xff] %v5299_v11 }
 0x1d2   :  { %v3878_v56 = vpop.eup %3877  ;;  %v2861_v24 = vmul.f32 %v2733_v62, %v1837_v30  ;;  %3885 = vtanh.f32 %v2482_v63  ;;  %v2103_v23 = vmul.f32 %v1975_v47, %v5274_v49  ;;  %v1974_v45 = vmul.f32 0.044715, %v5281_v10 }
 0x1d3   :  { %v3880_v53 = vpop.eup %3879  ;;  %v2863_v22 = vmul.f32 %v2735_v44, %v1839_v17  ;;  %v2734_v59 = vadd.f32 1.0, %v3878_v56  ;;  %v2484_v21 = vmul.f32 0.7978846, %v2356_v19  ;;  %v2357_v29 = vadd.f32 %v2229_v48, %v5257_v54 }
 0x1d4   :  { %v2736_v25 = vadd.f32 1.0, %v3880_v53  ;;  %v2231_v9 = vmul.f32 %v2103_v23, %v5274_v49  ;;  %v2102_v16 = vmul.f32 %v1974_v45, %v5281_v10  ;;  %v1976_v30 = vmul.f32 0.044715, %v5290_v37 }
 0x1d5   :  { %v3882_v62 = vpop.eup %3881  ;;  %v2862_v63 = vmul.f32 %v2734_v59, %v1838_v57  ;;  %3887 = vtanh.f32 %v2484_v21  ;;  %v2485_v47 = vmul.f32 0.7978846, %v2357_v29  ;;  %v5307_v11 = vadd.f32 %v4312_v39, %v4730_v52  ;;  %v5314_v57 = vpop.f32.mrb[63].mxu0 }
 0x1d6   :  { %v2864_v17 = vmul.f32 %v2736_v25, %v1840_v60  ;;  %v2359_v44 = vadd.f32 %v2231_v9, %v5274_v49  ;;  %v2230_v19 = vmul.f32 %v2102_v16, %v5281_v10  ;;  %v2104_v48 = vmul.f32 %v1976_v30, %v5290_v37  ;;  %v5317_v29 = vpop.f32.mrb[63].mxu1  ;;  %v5929_v16 = vld [vmem:[#allocation18_spill] sm:$0xff] }
 0x1d7   :  { %v3884_v56 = vpop.eup %3883  ;;  %v3569_v23 = vpack.c.bf16 %v2862_v63, %v2861_v24  ;;  %v1842_v45 = vmul.f32 0.5, %v5235_v1  ;;  %v1844_v53 = vmul.f32 0.5, %v5249_v55  ;;  %3889 = vtanh.f32 %v2485_v47 }
 0x1d8   :  { %v3570_v21 = vpack.c.bf16 %v2864_v17, %v2863_v22  ;;  %v2737_v59 = vadd.f32 1.0, %v3882_v62  ;;  %v2487_v52 = vmul.f32 0.7978846, %v2359_v44  ;;  %v2358_v60 = vadd.f32 %v2230_v19, %v5281_v10 }
 0x1d9   :  { %3341 = vst [vmem:[%s5877_s3 + $0x100] sm:$0xff] %v3569_v23  ;;  %v2232_v24 = vmul.f32 %v2104_v48, %v5290_v37  ;;  %v1977_v1 = vmul.f32 0.044715, %v5307_v11  ;;  %v5326_v55 = vadd.f32 %v4314_v40, %v4732_v2  ;;  %v5330_v22 = vadd.f32 %v4316_v41, %v4741_v36 }
 0x1da   :  { %3342 = vst [vmem:[%s5877_s3 + $0x108] sm:$0xff] %v3570_v21  ;;  %v2739_v25 = vadd.f32 1.0, %v3884_v56  ;;  %3891 = vtanh.f32 %v2487_v52  ;;  %v2486_v9 = vmul.f32 0.7978846, %v2358_v60  ;;  %v5337_v30 = vadd.f32 %v4318_v42, %v5929_v16 }
 0x1db   :  { %v1845_v62 = vmul.f32 0.5, %v5257_v54  ;;  %v2360_v2 = vadd.f32 %v2232_v24, %v5290_v37  ;;  %v2105_v63 = vmul.f32 %v1977_v1, %v5307_v11  ;;  %v1979_v36 = vmul.f32 0.044715, %v5326_v55  ;;  %v5930_v24 = vld [vmem:[#allocation19_spill] sm:$0xff] }
 0x1dc   :  { %v3886_v47 = vpop.eup %3885  ;;  %v2865_v17 = vmul.f32 %v2737_v59, %v1841_v12  ;;  %v1847_v44 = vmul.f32 0.5, %v5274_v49  ;;  %3893 = vtanh.f32 %v2486_v9  ;;  %v1978_v19 = vmul.f32 0.044715, %v5330_v22 }
 0x1dd   :  { %v2738_v48 = vadd.f32 1.0, %v3886_v47  ;;  %v2488_v56 = vmul.f32 0.7978846, %v2360_v2  ;;  %v2233_v23 = vmul.f32 %v2105_v63, %v5307_v11  ;;  %v2107_v21 = vmul.f32 %v1979_v36, %v5326_v55 }
 0x1de   :  { %v2867_v54 = vmul.f32 %v2739_v25, %v1843_v6  ;;  %v2106_v52 = vmul.f32 %v1978_v19, %v5330_v22  ;;  %v1980_v60 = vmul.f32 0.044715, %v5337_v30  ;;  %v5351_v1 = vadd.f32 %v4312_v39, %v5930_v24  ;;  %v5931_v25 = vld [vmem:[#allocation20_spill] sm:$0xff] }
 0x1df   :  { %v3888_v12 = vpop.eup %3887  ;;  %v2866_v49 = vmul.f32 %v2738_v48, %v1842_v45  ;;  %3895 = vtanh.f32 %v2488_v56  ;;  %v2361_v59 = vadd.f32 %v2233_v23, %v5307_v11  ;;  %v2235_v9 = vmul.f32 %v2107_v21, %v5326_v55 }
 0x1e0   :  { %v2740_v16 = vadd.f32 1.0, %v3888_v12  ;;  %v2234_v2 = vmul.f32 %v2106_v52, %v5330_v22  ;;  %v2108_v6 = vmul.f32 %v1980_v60, %v5337_v30  ;;  %v5359_v63 = vadd.f32 %v4314_v40, %v5931_v25 }
 0x1e1   :  { %v3890_v36 = vpop.eup %3889  ;;  %v3571_v47 = vpack.c.bf16 %v2866_v49, %v2865_v17  ;;  %v2489_v19 = vmul.f32 0.7978846, %v2361_v59  ;;  %v2363_v24 = vadd.f32 %v2235_v9, %v5326_v55  ;;  %v1981_v45 = vmul.f32 0.044715, %v5351_v1 }
 0x1e2   :  { %v2868_v48 = vmul.f32 %v2740_v16, %v1844_v53  ;;  %v1846_v56 = vmul.f32 0.5, %v5281_v10  ;;  %v2362_v23 = vadd.f32 %v2234_v2, %v5330_v22  ;;  %v2236_v21 = vmul.f32 %v2108_v6, %v5337_v30 }
 0x1e3   :  { %3343 = vst [vmem:[%s5877_s3 + $0x110] sm:$0xff] %v3571_v47  ;;  %v2741_v52 = vadd.f32 1.0, %v3890_v36  ;;  %3897 = vtanh.f32 %v2489_v19  ;;  %v2491_v60 = vmul.f32 0.7978846, %v2363_v24  ;;  %v2109_v17 = vmul.f32 %v1981_v45, %v5351_v1  ;;  %v5932_v36 = vld [vmem:[#allocation21_spill] sm:$0xff] }
 0x1e4   :  { %v3892_v12 = vpop.eup %3891  ;;  %v3572_v49 = vpack.c.bf16 %v2868_v48, %v2867_v54  ;;  %v1848_v59 = vmul.f32 0.5, %v5290_v37  ;;  %v2490_v53 = vmul.f32 0.7978846, %v2362_v23  ;;  %v2364_v10 = vadd.f32 %v2236_v21, %v5337_v30  ;;  %v5933_v37 = vld [vmem:[#allocation22_spill] sm:$0xff] }
 0x1e5   :  { %v2743_v9 = vadd.f32 1.0, %v3892_v12  ;;  %3899 = vtanh.f32 %v2491_v60  ;;  %v2237_v16 = vmul.f32 %v2109_v17, %v5351_v1  ;;  %v1983_v2 = vmul.f32 0.044715, %v5359_v63 }
 0x1e6   :  { %v3894_v6 = vpop.eup %3893  ;;  %3344 = vst [vmem:[%s5877_s3 + $0x118] sm:$0xff] %v3572_v49  ;;  %3901 = vtanh.f32 %v2490_v53  ;;  %v2492_v25 = vmul.f32 0.7978846, %v2364_v10  ;;  %v5379_v54 = vadd.f32 %v4316_v41, %v5932_v36  ;;  %v5383_v47 = vadd.f32 %v4318_v42, %v5933_v37 }
 0x1e7   :  { %v2869_v19 = vmul.f32 %v2741_v52, %v1845_v62  ;;  %v2742_v24 = vadd.f32 1.0, %v3894_v6  ;;  %v2365_v45 = vadd.f32 %v2237_v16, %v5351_v1  ;;  %v2111_v48 = vmul.f32 %v1983_v2, %v5359_v63  ;;  %v5934_v52 = vld [vmem:[#allocation23_spill] sm:$0xff] }
 0x1e8   :  { %v2871_v23 = vmul.f32 %v2743_v9, %v1847_v44  ;;  %v1849_v21 = vmul.f32 0.5, %v5307_v11  ;;  %3903 = vtanh.f32 %v2492_v25  ;;  %v1982_v60 = vmul.f32 0.044715, %v5379_v54 }
 0x1e9   :  { %v3896_v17 = vpop.eup %3895  ;;  %v2870_v12 = vmul.f32 %v2742_v24, %v1846_v56  ;;  %v2493_v49 = vmul.f32 0.7978846, %v2365_v45  ;;  %v2239_v53 = vmul.f32 %v2111_v48, %v5359_v63  ;;  %v1984_v10 = vmul.f32 0.044715, %v5383_v47 }
 0x1ea   :  { %v2744_v36 = vadd.f32 1.0, %v3896_v17  ;;  %v2110_v62 = vmul.f32 %v1982_v60, %v5379_v54  ;;  %v5394_v16 = vadd.f32 %v4312_v39, %v5934_v52  ;;  %v5398_v11 = vadd.f32 %v4314_v40, %v4796_v35 }
 0x1eb   :  { %v3573_v44 = vpack.c.bf16 %v2870_v12, %v2869_v19  ;;  %3905 = vtanh.f32 %v2493_v49  ;;  %v2367_v56 = vadd.f32 %v2239_v53, %v5359_v63  ;;  %v2112_v9 = vmul.f32 %v1984_v10, %v5383_v47 }
 0x1ec   :  { %v2872_v2 = vmul.f32 %v2744_v36, %v1848_v59  ;;  %v1851_v6 = vmul.f32 0.5, %v5326_v55  ;;  %v2238_v25 = vmul.f32 %v2110_v62, %v5379_v54  ;;  %v1985_v37 = vmul.f32 0.044715, %v5394_v16 }
 0x1ed   :  { %v3898_v24 = vpop.eup %3897  ;;  %3345 = vst [vmem:[%s5877_s3 + $0x120] sm:$0xff] %v3573_v44  ;;  %v1850_v35 = vmul.f32 0.5, %v5330_v22  ;;  %v2495_v19 = vmul.f32 0.7978846, %v2367_v56  ;;  %v2240_v45 = vmul.f32 %v2112_v9, %v5383_v47  ;;  %v1987_v48 = vmul.f32 0.044715, %v5398_v11 }
 0x1ee   :  { %v3574_v60 = vpack.c.bf16 %v2872_v2, %v2871_v23  ;;  %v2745_v59 = vadd.f32 1.0, %v3898_v24  ;;  %v2366_v55 = vadd.f32 %v2238_v25, %v5379_v54  ;;  %v2113_v17 = vmul.f32 %v1985_v37, %v5394_v16 }
 0x1ef   :  { %v3900_v12 = vpop.eup %3899  ;;  %3907 = vtanh.f32 %v2495_v19  ;;  %v2368_v49 = vadd.f32 %v2240_v45, %v5383_v47  ;;  %v2115_v53 = vmul.f32 %v1987_v48, %v5398_v11  ;;  %v5417_v22 = vadd.f32 %v4316_v41, %v4801_v13 }
 0x1f0   :  { %v3902_v10 = vpop.eup %3901  ;;  %3346 = vst [vmem:[%s5877_s3 + $0x128] sm:$0xff] %v3574_v60  ;;  %v2747_v23 = vadd.f32 1.0, %v3900_v12  ;;  %v1852_v36 = vmul.f32 0.5, %v5337_v30  ;;  %v2494_v62 = vmul.f32 0.7978846, %v2366_v55  ;;  %v2241_v52 = vmul.f32 %v2113_v17, %v5394_v16 }
 0x1f1   :  { %v2873_v44 = vmul.f32 %v2745_v59, %v1849_v21  ;;  %v2746_v56 = vadd.f32 1.0, %v3902_v10  ;;  %v2496_v9 = vmul.f32 0.7978846, %v2368_v49  ;;  %v2243_v2 = vmul.f32 %v2115_v53, %v5398_v11 }
 0x1f2   :  { %v3904_v25 = vpop.eup %3903  ;;  %v2875_v37 = vmul.f32 %v2747_v23, %v1851_v6  ;;  %3909 = vtanh.f32 %v2494_v62  ;;  %v2369_v13 = vadd.f32 %v2241_v52, %v5394_v16  ;;  %v1986_v24 = vmul.f32 0.044715, %v5417_v22 }
 0x1f3   :  { %v2874_v19 = vmul.f32 %v2746_v56, %v1850_v35  ;;  %v2748_v45 = vadd.f32 1.0, %v3904_v25  ;;  %3911 = vtanh.f32 %v2496_v9  ;;  %v2371_v30 = vadd.f32 %v2243_v2, %v5398_v11  ;;  %v5935_v25 = vld [vmem:[#allocation24_spill] sm:$0xff] }
 0x1f4   :  { %v2497_v48 = vmul.f32 0.7978846, %v2369_v13  ;;  %v2114_v60 = vmul.f32 %v1986_v24, %v5417_v22  ;;  %v5431_v21 = vadd.f32 %v4318_v42, %v4823_v5  ;;  %v5435_v6 = vadd.f32 %v4312_v39, %v4864_v4 }
 0x1f5   :  { %v3906_v59 = vpop.eup %3905  ;;  %v3575_v55 = vpack.c.bf16 %v2874_v19, %v2873_v44  ;;  %v2876_v17 = vmul.f32 %v2748_v45, %v1852_v36  ;;  %v2499_v12 = vmul.f32 0.7978846, %v2371_v30  ;;  %v5439_v35 = vadd.f32 %v4314_v40, %v4866_v32 }
 0x1f6   :  { %v1853_v49 = vmul.f32 0.5, %v5351_v1  ;;  %v1855_v53 = vmul.f32 0.5, %v5359_v63  ;;  %3913 = vtanh.f32 %v2497_v48  ;;  %v2242_v5 = vmul.f32 %v2114_v60, %v5417_v22 }
 0x1f7   :  { %3347 = vst [vmem:[%s5877_s3 + $0x130] sm:$0xff] %v3575_v55  ;;  %v3576_v4 = vpack.c.bf16 %v2876_v17, %v2875_v37  ;;  %v1854_v10 = vmul.f32 0.5, %v5379_v54  ;;  %v1856_v23 = vmul.f32 0.5, %v5383_v47  ;;  %v1988_v36 = vmul.f32 0.044715, %v5431_v21 }
 0x1f8   :  { %v2749_v32 = vadd.f32 1.0, %v3906_v59  ;;  %3915 = vtanh.f32 %v2499_v12  ;;  %v2370_v1 = vadd.f32 %v2242_v5, %v5417_v22  ;;  %v1989_v63 = vmul.f32 0.044715, %v5435_v6 }
 0x1f9   :  { %v3908_v62 = vpop.eup %3907  ;;  %3348 = vst [vmem:[%s5877_s3 + $0x138] sm:$0xff] %v3576_v4  ;;  %v1857_v52 = vmul.f32 0.5, %v5394_v16  ;;  %v2116_v44 = vmul.f32 %v1988_v36, %v5431_v21  ;;  %v1991_v54 = vmul.f32 0.044715, %v5439_v35  ;;  %v5460_v47 = vadd.f32 %v4316_v41, %v4870_v33 }
 0x1fa   :  { %v2751_v56 = vadd.f32 1.0, %v3908_v62  ;;  %v2498_v9 = vmul.f32 0.7978846, %v2370_v1  ;;  %v2117_v2 = vmul.f32 %v1989_v63, %v5435_v6  ;;  %v5465_v37 = vadd.f32 %v4318_v42, %v5935_v25 }
 0x1fb   :  { %v5468_v13 = vmul.f32 0.5, %v5398_v11  ;;  %v2244_v16 = vmul.f32 %v2116_v44, %v5431_v21  ;;  %v2119_v24 = vmul.f32 %v1991_v54, %v5439_v35  ;;  %v1990_v19 = vmul.f32 0.044715, %v5460_v47 }
 0x1fc   :  { %v3910_v45 = vpop.eup %3909  ;;  %v2877_v33 = vmul.f32 %v2749_v32, %v1853_v49  ;;  %3917 = vtanh.f32 %v2498_v9  ;;  %v2245_v30 = vmul.f32 %v2117_v2, %v5435_v6  ;;  %v5476_v48 = vadd.f32 %v4312_v39, %v4882_v8 }
 0x1fd   :  { %v3912_v60 = vpop.eup %3911  ;;  %v2750_v59 = vadd.f32 1.0, %v3910_v45  ;;  %v2372_v11 = vadd.f32 %v2244_v16, %v5431_v21  ;;  %v2247_v55 = vmul.f32 %v2119_v24, %v5439_v35  ;;  %v2118_v17 = vmul.f32 %v1990_v19, %v5460_v47 }
 0x1fe   :  { %v2879_v12 = vmul.f32 %v2751_v56, %v1855_v53  ;;  %v2752_v5 = vadd.f32 1.0, %v3912_v60  ;;  %v2373_v4 = vadd.f32 %v2245_v30, %v5435_v6  ;;  %v1992_v49 = vmul.f32 0.044715, %v5465_v37 }
 0x1ff   :  { %v2878_v36 = vmul.f32 %v2750_v59, %v1854_v10  ;;  %v2500_v32 = vmul.f32 0.7978846, %v2372_v11  ;;  %v2375_v1 = vadd.f32 %v2247_v55, %v5439_v35  ;;  %v2246_v8 = vmul.f32 %v2118_v17, %v5460_v47 }
 0x200   :  { %v3914_v63 = vpop.eup %3913  ;;  %v2880_v62 = vmul.f32 %v2752_v5, %v1856_v23  ;;  %v2501_v44 = vmul.f32 0.7978846, %v2373_v4  ;;  %v2120_v54 = vmul.f32 %v1992_v49, %v5465_v37  ;;  %v1993_v9 = vmul.f32 0.044715, %v5476_v48 }
 0x201   :  { %v3577_v2 = vpack.c.bf16 %v2878_v36, %v2877_v33  ;;  %v1858_v53 = vmul.f32 0.5, %v5417_v22  ;;  %3919 = vtanh.f32 %v2500_v32  ;;  %v2503_v56 = vmul.f32 0.7978846, %v2375_v1 }
 0x202   :  { %v3916_v25 = vpop.eup %3915  ;;  %v3578_v16 = vpack.c.bf16 %v2880_v62, %v2879_v12  ;;  %v2753_v10 = vadd.f32 1.0, %v3914_v63  ;;  %3921 = vtanh.f32 %v2501_v44  ;;  %v2374_v24 = vadd.f32 %v2246_v8, %v5460_v47 }
 0x203   :  { %3349 = vst [vmem:[%s5877_s3 + $0x140] sm:$0xff] %v3577_v2  ;;  %v1860_v23 = vmul.f32 0.5, %v5431_v21  ;;  %3923 = vtanh.f32 %v2503_v56  ;;  %v2248_v19 = vmul.f32 %v2120_v54, %v5465_v37  ;;  %v2121_v45 = vmul.f32 %v1993_v9, %v5476_v48 }
 0x204   :  { %3350 = vst [vmem:[%s5877_s3 + $0x148] sm:$0xff] %v3578_v16  ;;  %v1861_v22 = vmul.f32 0.5, %v5435_v6  ;;  %v2502_v33 = vmul.f32 0.7978846, %v2374_v24  ;;  %v5501_v30 = vadd.f32 %v4314_v40, %v4895_v15  ;;  %v5505_v60 = vadd.f32 %v4316_v41, %v4922_v26 }
 0x205   :  { %v2755_v21 = vadd.f32 1.0, %v3916_v25  ;;  %v2376_v59 = vadd.f32 %v2248_v19, %v5465_v37  ;;  %v2249_v11 = vmul.f32 %v2121_v45, %v5476_v48  ;;  %v5511_v55 = vadd.f32 %v4318_v42, %v4924_v43 }
 0x206   :  { %v3918_v17 = vpop.eup %3917  ;;  %v2881_v6 = vmul.f32 %v2753_v10, %v1857_v52  ;;  %3925 = vtanh.f32 %v2502_v33  ;;  %v1995_v12 = vmul.f32 0.044715, %v5501_v30  ;;  %v5516_v15 = vadd.f32 %v4312_v39, %v4948_v46 }
 0x207   :  { %v2754_v26 = vadd.f32 1.0, %v3918_v17  ;;  %v2504_v5 = vmul.f32 0.7978846, %v2376_v59  ;;  %v2377_v4 = vadd.f32 %v2249_v11, %v5476_v48  ;;  %v1994_v49 = vmul.f32 0.044715, %v5505_v60 }
 0x208   :  { %v1863_v36 = vmul.f32 0.5, %v5439_v35  ;;  %v1862_v43 = vmul.f32 0.5, %v5460_v47  ;;  %v2123_v32 = vmul.f32 %v1995_v12, %v5501_v30  ;;  %v1996_v52 = vmul.f32 0.044715, %v5511_v55 }
 0x209   :  { %v2882_v1 = vmul.f32 %v2754_v26, %v1858_v53  ;;  %3927 = vtanh.f32 %v2504_v5  ;;  %v2505_v8 = vmul.f32 0.7978846, %v2377_v4  ;;  %v2122_v46 = vmul.f32 %v1994_v49, %v5505_v60 }
 0x20a   :  { %v2251_v63 = vmul.f32 %v2123_v32, %v5501_v30  ;;  %v2124_v62 = vmul.f32 %v1996_v52, %v5511_v55  ;;  %v1997_v44 = vmul.f32 0.044715, %v5516_v15  ;;  %v5530_v35 = vadd.f32 %v4314_v40, %v4950_v7 }
 0x20b   :  { %v3920_v47 = vpop.eup %3919  ;;  %v2883_v54 = vmul.f32 %v2755_v21, %v5468_v13  ;;  %v3579_v9 = vpack.c.bf16 %v2882_v1, %v2881_v6  ;;  %3929 = vtanh.f32 %v2505_v8  ;;  %v2250_v2 = vmul.f32 %v2122_v46, %v5505_v60 }
 0x20c   :  { %v3922_v53 = vpop.eup %3921  ;;  %v2756_v56 = vadd.f32 1.0, %v3920_v47  ;;  %v2379_v25 = vadd.f32 %v2251_v63, %v5501_v30  ;;  %v2252_v16 = vmul.f32 %v2124_v62, %v5511_v55  ;;  %v2125_v10 = vmul.f32 %v1997_v44, %v5516_v15  ;;  %v5936_v44 = vld [vmem:[#allocation3_spill] sm:$0xff] }
 0x20d   :  { %v3924_v24 = vpop.eup %3923  ;;  %3351 = vst [vmem:[%s5877_s3 + $0x150] sm:$0xff] %v3579_v9  ;;  %v2757_v7 = vadd.f32 1.0, %v3922_v53  ;;  %v1864_v13 = vmul.f32 0.5, %v5465_v37  ;;  %v2378_v19 = vadd.f32 %v2250_v2, %v5505_v60  ;;  %v1999_v45 = vmul.f32 0.044715, %v5530_v35 }
 0x20e   :  { %v2884_v33 = vmul.f32 %v2756_v56, %v1860_v23  ;;  %v2507_v21 = vmul.f32 0.7978846, %v2379_v25  ;;  %v2380_v59 = vadd.f32 %v2252_v16, %v5511_v55  ;;  %v5546_v11 = vadd.f32 %v4316_v41, %v4954_v61 }
 0x20f   :  { %v2759_v17 = vadd.f32 1.0, %v3924_v24  ;;  %v2506_v6 = vmul.f32 0.7978846, %v2378_v19  ;;  %v2253_v12 = vmul.f32 %v2125_v10, %v5516_v15  ;;  %v2127_v26 = vmul.f32 %v1999_v45, %v5530_v35 }
 0x210   :  { %v3926_v5 = vpop.eup %3925  ;;  %v3580_v37 = vpack.c.bf16 %v2884_v33, %v2883_v54  ;;  %v2885_v4 = vmul.f32 %v2757_v7, %v1861_v22  ;;  %3931 = vtanh.f32 %v2507_v21  ;;  %v2508_v49 = vmul.f32 0.7978846, %v2380_v59  ;;  %v5937_v7 = vld [vmem:[#allocation25_spill] sm:$0xff] }
 0x211   :  { %v2758_v32 = vadd.f32 1.0, %v3926_v5  ;;  %3933 = vtanh.f32 %v2506_v6  ;;  %v2381_v23 = vadd.f32 %v2253_v12, %v5516_v15  ;;  %v2255_v52 = vmul.f32 %v2127_v26, %v5530_v35 }
 0x212   :  { %3352 = vst [vmem:[%s5877_s3 + $0x158] sm:$0xff] %v3580_v37  ;;  %v1865_v61 = vmul.f32 0.5, %v5476_v48  ;;  %3935 = vtanh.f32 %v2508_v49  ;;  %v1998_v1 = vmul.f32 0.044715, %v5546_v11  ;;  %v5559_v22 = vadd.f32 %v4318_v42, %v4975_v34 }
 0x213   :  { %v3928_v8 = vpop.eup %3927  ;;  %v2886_v46 = vmul.f32 %v2758_v32, %v1862_v43  ;;  %v2509_v63 = vmul.f32 0.7978846, %v2381_v23  ;;  %v2383_v62 = vadd.f32 %v2255_v52, %v5530_v35  ;;  %v5564_v47 = vadd.f32 %v4312_v39, %v5936_v44 }
 0x214   :  { %v2887_v54 = vmul.f32 %v2759_v17, %v1863_v36  ;;  %v2760_v9 = vadd.f32 1.0, %v3928_v8  ;;  %v2126_v48 = vmul.f32 %v1998_v1, %v5546_v11  ;;  %v2000_v2 = vmul.f32 0.044715, %v5559_v22 }
 0x215   :  { %v3930_v53 = vpop.eup %3929  ;;  %v3581_v56 = vpack.c.bf16 %v2886_v46, %v2885_v4  ;;  %v1867_v34 = vmul.f32 0.5, %v5501_v30  ;;  %3937 = vtanh.f32 %v2509_v63  ;;  %v2511_v25 = vmul.f32 0.7978846, %v2383_v62 }
 0x216   :  { %v2888_v43 = vmul.f32 %v2760_v9, %v1864_v13  ;;  %v2761_v16 = vadd.f32 1.0, %v3930_v53  ;;  %v2254_v10 = vmul.f32 %v2126_v48, %v5546_v11  ;;  %v2128_v24 = vmul.f32 %v2000_v2, %v5559_v22 }
 0x217   :  { %3353 = vst [vmem:[%s5877_s3 + $0x160] sm:$0xff] %v3581_v56  ;;  %3939 = vtanh.f32 %v2511_v25  ;;  %v2001_v36 = vmul.f32 0.044715, %v5564_v47  ;;  %v1747_v19 = vadd.f32 %v4314_v40, %v5937_v7  ;;  %v5579_v30 = vadd.f32 %v4316_v41, %v5013_v14 }
 0x218   :  { %v3582_v13 = vpack.c.bf16 %v2888_v43, %v2887_v54  ;;  %v1866_v45 = vmul.f32 0.5, %v5505_v60  ;;  %v2382_v33 = vadd.f32 %v2254_v10, %v5546_v11  ;;  %v2256_v21 = vmul.f32 %v2128_v24, %v5559_v22 }
 0x219   :  { %v1868_v59 = vmul.f32 0.5, %v5511_v55  ;;  %v1869_v17 = vmul.f32 0.5, %v5516_v15  ;;  %v2129_v6 = vmul.f32 %v2001_v36, %v5564_v47  ;;  %v2003_v12 = vmul.f32 0.044715, %v1747_v19 }
 0x21a   :  { %v3932_v26 = vpop.eup %3931  ;;  %3354 = vst [vmem:[%s5877_s3 + $0x168] sm:$0xff] %v3582_v13  ;;  %v2889_v14 = vmul.f32 %v2761_v16, %v1865_v61  ;;  %v2510_v5 = vmul.f32 0.7978846, %v2382_v33  ;;  %v2384_v60 = vadd.f32 %v2256_v21, %v5559_v22  ;;  %v2002_v37 = vmul.f32 0.044715, %v5579_v30  ;;  %v5938_v33 = vld [vmem:[#allocation4_spill] sm:$0xff] }
 0x21b   :  { %v3934_v4 = vpop.eup %3933  ;;  %v2763_v49 = vadd.f32 1.0, %v3932_v26  ;;  %v2257_v55 = vmul.f32 %v2129_v6, %v5564_v47  ;;  %v2131_v32 = vmul.f32 %v2003_v12, %v1747_v19  ;;  %v5595_v15 = vadd.f32 %v4318_v42, %v5015_v18  ;;  %v5940_v26 = vld [vmem:[#allocation6_spill] sm:$0xff] }
 0x21c   :  { %v3936_v23 = vpop.eup %3935  ;;  %v2762_v52 = vadd.f32 1.0, %v3934_v4  ;;  %3941 = vtanh.f32 %v2510_v5  ;;  %v2512_v1 = vmul.f32 0.7978846, %v2384_v60  ;;  %v2130_v61 = vmul.f32 %v2002_v37, %v5579_v30 }
 0x21d   :  { %v2891_v8 = vmul.f32 %v2763_v49, %v1867_v34  ;;  %v2764_v46 = vadd.f32 1.0, %v3936_v23  ;;  %v2385_v63 = vadd.f32 %v2257_v55, %v5564_v47  ;;  %v2259_v62 = vmul.f32 %v2131_v32, %v1747_v19 }
 0x21e   :  { %v2890_v44 = vmul.f32 %v2762_v52, %v1866_v45  ;;  %3943 = vtanh.f32 %v2512_v1  ;;  %v2258_v54 = vmul.f32 %v2130_v61, %v5579_v30  ;;  %v5602_v9 = vadd.f32 %v4312_v39, %v5058_v58 }
 0x21f   :  { %v3938_v18 = vpop.eup %3937  ;;  %v2892_v48 = vmul.f32 %v2764_v46, %v1868_v59  ;;  %v2513_v2 = vmul.f32 0.7978846, %v2385_v63  ;;  %v2387_v53 = vadd.f32 %v2259_v62, %v1747_v19  ;;  %v2004_v56 = vmul.f32 0.044715, %v5595_v15  ;;  %v5939_v59 = vld [vmem:[#allocation5_spill] sm:$0xff]  ;;  %v5941_v46 = vld [vmem:[#allocation7_spill] sm:$0xff] }
 0x220   :  { %v3583_v25 = vpack.c.bf16 %v2890_v44, %v2889_v14  ;;  %v1871_v34 = vmul.f32 0.5, %v5530_v35  ;;  %v1870_v43 = vmul.f32 0.5, %v5546_v11  ;;  %v2386_v16 = vadd.f32 %v2258_v54, %v5579_v30 }
 0x221   :  { %v3940_v10 = vpop.eup %3939  ;;  %v3584_v24 = vpack.c.bf16 %v2892_v48, %v2891_v8  ;;  %3945 = vtanh.f32 %v2513_v2  ;;  %v2515_v36 = vmul.f32 0.7978846, %v2387_v53  ;;  %v2132_v58 = vmul.f32 %v2004_v56, %v5595_v15 }
 0x222   :  { %3355 = vst [vmem:[%s5877_s3 + $0x170] sm:$0xff] %v3583_v25  ;;  %v2765_v7 = vadd.f32 1.0, %v3938_v18  ;;  %v1872_v13 = vmul.f32 0.5, %v5559_v22  ;;  %v2514_v45 = vmul.f32 0.7978846, %v2386_v16  ;;  %v5620_v21 = vadd.f32 %v4314_v40, %v5938_v33  ;;  %v5942_v25 = vld [vmem:[#allocation8_spill] sm:$0xff] }
 0x223   :  { %v2005_v35 = vmul.f32 0.044715, %v5602_v9  ;;  %3356 = vst [vmem:[%s5877_s3 + $0x178] sm:$0xff] %v3584_v24  ;;  %3947 = vtanh.f32 %v2515_v36  ;;  %v2260_v11 = vmul.f32 %v2132_v58, %v5595_v15  ;;  %v5624_v6 = vadd.f32 %v4316_v41, %v5939_v59 }
 0x224   :  { %v2767_v12 = vadd.f32 1.0, %v3940_v10  ;;  %3949 = vtanh.f32 %v2514_v45  ;;  %v5629_v14 = vadd.f32 %v4318_v42, %v5940_v26  ;;  %v1873_v5 = vmul.f32 0.5, %v5564_v47 }
 0x225   :  { %v2133_v22 = vmul.f32 %v2005_v35, %v5602_v9  ;;  %v1875_v60 = vmul.f32 0.5, %v1747_v19  ;;  %v2388_v37 = vadd.f32 %v2260_v11, %v5595_v15  ;;  %v2007_v4 = vmul.f32 0.044715, %v5620_v21 }
 0x226   :  { %v3942_v49 = vpop.eup %3941  ;;  %v2893_v55 = vmul.f32 %v2765_v7, %v1869_v17  ;;  %v2006_v23 = vmul.f32 0.044715, %v5624_v6  ;;  %v2008_v52 = vmul.f32 0.044715, %v5629_v14  ;;  %v5640_v47 = vadd.f32 %v4312_v39, %v5941_v46 }
 0x227   :  { %v2261_v32 = vmul.f32 %v2133_v22, %v5602_v9  ;;  %v2766_v1 = vadd.f32 1.0, %v3942_v49  ;;  %v2516_v61 = vmul.f32 0.7978846, %v2388_v37  ;;  %v2135_v8 = vmul.f32 %v2007_v4, %v5620_v21 }
 0x228   :  { %v3944_v19 = vpop.eup %3943  ;;  %v2895_v63 = vmul.f32 %v2767_v12, %v1871_v34  ;;  %v2134_v17 = vmul.f32 %v2006_v23, %v5624_v6  ;;  %v2136_v44 = vmul.f32 %v2008_v52, %v5629_v14  ;;  %v5650_v16 = vadd.f32 %v4314_v40, %v5942_v25 }
 0x229   :  { %v2389_v62 = vadd.f32 %v2261_v32, %v5602_v9  ;;  %v2894_v54 = vmul.f32 %v2766_v1, %v1870_v43  ;;  %v2768_v18 = vadd.f32 1.0, %v3944_v19  ;;  %3951 = vtanh.f32 %v2516_v61 }
 0x22a   :  { %v2263_v48 = vmul.f32 %v2135_v8, %v5620_v21  ;;  %v2262_v53 = vmul.f32 %v2134_v17, %v5624_v6  ;;  %v2264_v56 = vmul.f32 %v2136_v44, %v5629_v14  ;;  %v2009_v43 = vmul.f32 0.044715, %v5640_v47 }
 0x22b   :  { %v2517_v2 = vmul.f32 0.7978846, %v2389_v62  ;;  %v3946_v34 = vpop.eup %3945  ;;  %v3585_v10 = vpack.c.bf16 %v2894_v54, %v2893_v55  ;;  %v2896_v24 = vmul.f32 %v2768_v18, %v1872_v13  ;;  %v1874_v33 = vmul.f32 0.5, %v5579_v30 }
 0x22c   :  { %v2391_v36 = vadd.f32 %v2263_v48, %v5620_v21  ;;  %v2769_v58 = vadd.f32 1.0, %v3946_v34  ;;  %v2390_v7 = vadd.f32 %v2262_v53, %v5624_v6  ;;  %v2392_v45 = vadd.f32 %v2264_v56, %v5629_v14 }
 0x22d   :  { %3953 = vtanh.f32 %v2517_v2  ;;  %v3948_v35 = vpop.eup %3947  ;;  %3357 = vst [vmem:[%s5877_s3 + $0x180] sm:$0xff] %v3585_v10  ;;  %v3586_v11 = vpack.c.bf16 %v2896_v24, %v2895_v63  ;;  %v2137_v13 = vmul.f32 %v2009_v43, %v5640_v47  ;;  %v2011_v32 = vmul.f32 0.044715, %v5650_v16 }
 0x22e   :  { %v2519_v59 = vmul.f32 0.7978846, %v2391_v36  ;;  %v3950_v12 = vpop.eup %3949  ;;  %v2897_v22 = vmul.f32 %v2769_v58, %v1873_v5  ;;  %v2771_v26 = vadd.f32 1.0, %v3948_v35  ;;  %v2518_v37 = vmul.f32 0.7978846, %v2390_v7 }
 0x22f   :  { %v2520_v4 = vmul.f32 0.7978846, %v2392_v45  ;;  %3358 = vst [vmem:[%s5877_s3 + $0x188] sm:$0xff] %v3586_v11  ;;  %v2770_v49 = vadd.f32 1.0, %v3950_v12  ;;  %v2265_v55 = vmul.f32 %v2137_v13, %v5640_v47  ;;  %v1876_v30 = vmul.f32 0.5, %v5595_v15 }
 0x230   :  { %3955 = vtanh.f32 %v2519_v59  ;;  %v5669_v23 = vadd.f32 %v4316_v41, %v5112_v50  ;;  %v5673_v5 = vadd.f32 %v4318_v42, %v5129_v27  ;;  %v2139_v61 = vmul.f32 %v2011_v32, %v5650_v16  ;;  %v5943_v32 = vld [vmem:[#allocation9_spill] sm:$0xff] }
 0x231   :  { %3957 = vtanh.f32 %v2518_v37  ;;  %v2898_v52 = vmul.f32 %v2770_v49, %v1874_v33  ;;  %v2393_v1 = vadd.f32 %v2265_v55, %v5640_v47  ;;  %v2899_v8 = vmul.f32 %v2771_v26, %v1875_v60 }
 0x232   :  { %3959 = vtanh.f32 %v2520_v4  ;;  %v1877_v46 = vmul.f32 0.5, %v5602_v9  ;;  %v2010_v15 = vmul.f32 0.044715, %v5669_v23  ;;  %v2012_v19 = vmul.f32 0.044715, %v5673_v5 }
 0x233   :  { %v3952_v63 = vpop.eup %3951  ;;  %v3587_v50 = vpack.c.bf16 %v2898_v52, %v2897_v22  ;;  %v2521_v62 = vmul.f32 0.7978846, %v2393_v1  ;;  %v2267_v17 = vmul.f32 %v2139_v61, %v5650_v16  ;;  %v5683_v27 = vadd.f32 %v4312_v39, %v5154_v3 }
 0x234   :  { %v2772_v44 = vadd.f32 1.0, %v3952_v63  ;;  %v2138_v54 = vmul.f32 %v2010_v15, %v5669_v23  ;;  %v2140_v60 = vmul.f32 %v2012_v19, %v5673_v5  ;;  %v5689_v9 = vadd.f32 %v4314_v40, %v5163_v0 }
 0x235   :  { %3359 = vst [vmem:[%s5877_s3 + $0x190] sm:$0xff] %v3587_v50  ;;  %v1879_v18 = vmul.f32 0.5, %v5620_v21  ;;  %3961 = vtanh.f32 %v2521_v62  ;;  %v2395_v48 = vadd.f32 %v2267_v17, %v5650_v16  ;;  %v2013_v3 = vmul.f32 0.044715, %v5683_v27  ;;  %v5944_v17 = vld [vmem:[#allocation10_spill] sm:$0xff] }
 0x236   :  { %v2900_v53 = vmul.f32 %v2772_v44, %v1876_v30  ;;  %v1878_v56 = vmul.f32 0.5, %v5624_v6  ;;  %v2266_v25 = vmul.f32 %v2138_v54, %v5669_v23  ;;  %v2268_v0 = vmul.f32 %v2140_v60, %v5673_v5 }
 0x237   :  { %v3954_v2 = vpop.eup %3953  ;;  %v2523_v10 = vmul.f32 0.7978846, %v2395_v48  ;;  %v2141_v24 = vmul.f32 %v2013_v3, %v5683_v27  ;;  %v2015_v36 = vmul.f32 0.044715, %v5689_v9  ;;  %v5706_v7 = vadd.f32 %v4316_v41, %v5165_v31 }
 0x238   :  { %v2773_v34 = vadd.f32 1.0, %v3954_v2  ;;  %v3588_v21 = vpack.c.bf16 %v2900_v53, %v2899_v8  ;;  %v2394_v43 = vadd.f32 %v2266_v25, %v5669_v23  ;;  %v2396_v58 = vadd.f32 %v2268_v0, %v5673_v5  ;;  %v5945_v2 = vld [vmem:[#allocation11_spill] sm:$0xff]  ;;  %v5946_v0 = vld [vmem:[#allocation12_spill] sm:$0xff] }
 0x239   :  { %v1880_v45 = vmul.f32 0.5, %v5629_v14  ;;  %3963 = vtanh.f32 %v2523_v10  ;;  %v2269_v35 = vmul.f32 %v2141_v24, %v5683_v27  ;;  %v2143_v11 = vmul.f32 %v2015_v36, %v5689_v9 }
 0x23a   :  { %v3956_v6 = vpop.eup %3955  ;;  %3360 = vst [vmem:[%s5877_s3 + $0x198] sm:$0xff] %v3588_v21  ;;  %v2901_v59 = vmul.f32 %v2773_v34, %v1877_v46  ;;  %v2522_v12 = vmul.f32 0.7978846, %v2394_v43  ;;  %v2524_v22 = vmul.f32 0.7978846, %v2396_v58  ;;  %v5719_v30 = vadd.f32 %v4318_v42, %v5943_v32  ;;  %v5947_v43 = vld [vmem:[#allocation13_spill] sm:$0xff] }
 0x23b   :  { %v3958_v33 = vpop.eup %3957  ;;  %v2775_v13 = vadd.f32 1.0, %v3956_v6  ;;  %v2397_v37 = vadd.f32 %v2269_v35, %v5683_v27  ;;  %v2271_v14 = vmul.f32 %v2143_v11, %v5689_v9  ;;  %v2014_v4 = vmul.f32 0.044715, %v5706_v7 }
 0x23c   :  { %v3960_v26 = vpop.eup %3959  ;;  %v2774_v31 = vadd.f32 1.0, %v3958_v33  ;;  %3965 = vtanh.f32 %v2522_v12  ;;  %v1881_v46 = vmul.f32 0.5, %v5640_v47  ;;  %v2016_v19 = vmul.f32 0.044715, %v5719_v30 }
 0x23d   :  { %v2903_v49 = vmul.f32 %v2775_v13, %v1879_v18  ;;  %v2776_v55 = vadd.f32 1.0, %v3960_v26  ;;  %3967 = vtanh.f32 %v2524_v22  ;;  %v2525_v1 = vmul.f32 0.7978846, %v2397_v37 }
 0x23e   :  { %v2902_v52 = vmul.f32 %v2774_v31, %v1878_v56  ;;  %v2399_v61 = vadd.f32 %v2271_v14, %v5689_v9  ;;  %v2142_v15 = vmul.f32 %v2014_v4, %v5706_v7  ;;  %v5727_v44 = vadd.f32 %v4312_v39, %v5944_v17 }
 0x23f   :  { %v2904_v8 = vmul.f32 %v2776_v55, %v1880_v45  ;;  %v3962_v63 = vpop.eup %3961  ;;  %3969 = vtanh.f32 %v2525_v1  ;;  %v1883_v60 = vmul.f32 0.5, %v5650_v16  ;;  %v2144_v48 = vmul.f32 %v2016_v19, %v5719_v30 }
 0x240   :  { %v3589_v50 = vpack.c.bf16 %v2902_v52, %v2901_v59  ;;  %v2527_v62 = vmul.f32 0.7978846, %v2399_v61  ;;  %v2270_v18 = vmul.f32 %v2142_v15, %v5706_v7  ;;  %v2777_v47 = vadd.f32 1.0, %v3962_v63 }
 0x241   :  { %v3590_v54 = vpack.c.bf16 %v2904_v8, %v2903_v49  ;;  %v2017_v3 = vmul.f32 0.044715, %v5727_v44  ;;  %v5738_v53 = vadd.f32 %v4314_v40, %v5945_v2  ;;  %v1882_v16 = vmul.f32 0.5, %v5669_v23 }
 0x242   :  { %3361 = vst [vmem:[%s5877_s3 + $0x1a0] sm:$0xff] %v3589_v50  ;;  %3971 = vtanh.f32 %v2527_v62  ;;  %v2398_v56 = vadd.f32 %v2270_v18, %v5706_v7  ;;  %v2272_v25 = vmul.f32 %v2144_v48, %v5719_v30  ;;  %v5748_v34 = vadd.f32 %v4316_v41, %v5946_v0 }
 0x243   :  { %3362 = vst [vmem:[%s5877_s3 + $0x1a8] sm:$0xff] %v3590_v54  ;;  %v3964_v10 = vpop.eup %3963  ;;  %v1884_v24 = vmul.f32 0.5, %v5673_v5  ;;  %v2145_v36 = vmul.f32 %v2017_v3, %v5727_v44  ;;  %v2019_v21 = vmul.f32 0.044715, %v5738_v53  ;;  %v5755_v58 = vadd.f32 %v4318_v42, %v5947_v43 }
 0x244   :  { %v2779_v23 = vadd.f32 1.0, %v3964_v10  ;;  %v1885_v6 = vmul.f32 0.5, %v5683_v27  ;;  %v2526_v45 = vmul.f32 0.7978846, %v2398_v56  ;;  %v2400_v35 = vadd.f32 %v2272_v25, %v5719_v30 }
 0x245   :  { %v2905_v11 = vmul.f32 %v2777_v47, %v1881_v46  ;;  %v2273_v33 = vmul.f32 %v2145_v36, %v5727_v44  ;;  %v2147_v59 = vmul.f32 %v2019_v21, %v5738_v53  ;;  %v2018_v5 = vmul.f32 0.044715, %v5748_v34 }
 0x246   :  { %v3966_v13 = vpop.eup %3965  ;;  %v2907_v12 = vmul.f32 %v2779_v23, %v1883_v60  ;;  %3973 = vtanh.f32 %v2526_v45  ;;  %v2528_v22 = vmul.f32 0.7978846, %v2400_v35  ;;  %v2020_v26 = vmul.f32 0.044715, %v5755_v58 }
 0x247   :  { %v3968_v31 = vpop.eup %3967  ;;  %v2778_v37 = vadd.f32 1.0, %v3966_v13  ;;  %v2401_v27 = vadd.f32 %v2273_v33, %v5727_v44  ;;  %v2275_v14 = vmul.f32 %v2147_v59, %v5738_v53  ;;  %v2146_v4 = vmul.f32 %v2018_v5, %v5748_v34  ;;  %v5948_v33 = vld [vmem:[#allocation14_spill] sm:$0xff] }
 0x248   :  { %v2780_v49 = vadd.f32 1.0, %v3968_v31  ;;  %3975 = vtanh.f32 %v2528_v22  ;;  %v2148_v55 = vmul.f32 %v2020_v26, %v5755_v58  ;;  %v5769_v32 = vadd.f32 %v4312_v39, %v5243_v38  ;;  %v5949_v31 = vld [vmem:[#allocation15_spill] sm:$0xff] }
 0x249   :  { %v3970_v52 = vpop.eup %3969  ;;  %v2906_v1 = vmul.f32 %v2778_v37, %v1882_v16  ;;  %v2529_v61 = vmul.f32 0.7978846, %v2401_v27  ;;  %v2403_v8 = vadd.f32 %v2275_v14, %v5738_v53  ;;  %v2274_v46 = vmul.f32 %v2146_v4, %v5748_v34 }
 0x24a   :  { %v2908_v15 = vmul.f32 %v2780_v49, %v1884_v24  ;;  %v1887_v19 = vmul.f32 0.5, %v5689_v9  ;;  %v1886_v63 = vmul.f32 0.5, %v5706_v7  ;;  %v2276_v50 = vmul.f32 %v2148_v55, %v5755_v58 }
 0x24b   :  { %v3591_v17 = vpack.c.bf16 %v2906_v1, %v2905_v11  ;;  %3977 = vtanh.f32 %v2529_v61  ;;  %v2531_v54 = vmul.f32 0.7978846, %v2403_v8  ;;  %v2402_v38 = vadd.f32 %v2274_v46, %v5748_v34 }
 0x24c   :  { %v3972_v62 = vpop.eup %3971  ;;  %v3592_v60 = vpack.c.bf16 %v2908_v15, %v2907_v12  ;;  %v2781_v18 = vadd.f32 1.0, %v3970_v52  ;;  %v1888_v48 = vmul.f32 0.5, %v5719_v30  ;;  %v2404_v47 = vadd.f32 %v2276_v50, %v5755_v58 }
 0x24d   :  { %3363 = vst [vmem:[%s5877_s3 + $0x1b0] sm:$0xff] %v3591_v17  ;;  %3979 = vtanh.f32 %v2531_v54  ;;  %v2530_v9 = vmul.f32 0.7978846, %v2402_v38  ;;  %v2021_v7 = vmul.f32 0.044715, %v5769_v32  ;;  %v5785_v3 = vadd.f32 %v4314_v40, %v5252_v51 }
 0x24e   :  { %3364 = vst [vmem:[%s5877_s3 + $0x1b8] sm:$0xff] %v3592_v60  ;;  %v2783_v2 = vadd.f32 1.0, %v3972_v62  ;;  %v2532_v30 = vmul.f32 0.7978846, %v2404_v47  ;;  %v5792_v16 = vadd.f32 %v4316_v41, %v5264_v20  ;;  %v5796_v56 = vadd.f32 %v4318_v42, %v5266_v28 }
 0x24f   :  { %v1889_v25 = vmul.f32 0.5, %v5727_v44  ;;  %3981 = vtanh.f32 %v2530_v9  ;;  %v2149_v51 = vmul.f32 %v2021_v7, %v5769_v32  ;;  %v2023_v0 = vmul.f32 0.044715, %v5785_v3 }
 0x250   :  { %v3974_v10 = vpop.eup %3973  ;;  %v2909_v24 = vmul.f32 %v2781_v18, %v1885_v6  ;;  %v1891_v36 = vmul.f32 0.5, %v5738_v53  ;;  %3983 = vtanh.f32 %v2532_v30  ;;  %v2022_v21 = vmul.f32 0.044715, %v5792_v16 }
 0x251   :  { %v2782_v20 = vadd.f32 1.0, %v3974_v10  ;;  %v2277_v43 = vmul.f32 %v2149_v51, %v5769_v32  ;;  %v2151_v28 = vmul.f32 %v2023_v0, %v5785_v3  ;;  %v2024_v23 = vmul.f32 0.044715, %v5796_v56 }
 0x252   :  { %v3976_v44 = vpop.eup %3975  ;;  %v2911_v45 = vmul.f32 %v2783_v2, %v1887_v19  ;;  %v1890_v35 = vmul.f32 0.5, %v5748_v34  ;;  %v2150_v11 = vmul.f32 %v2022_v21, %v5792_v16  ;;  %v5810_v6 = vadd.f32 %v4312_v39, %v5948_v33 }
 0x253   :  { %v2910_v53 = vmul.f32 %v2782_v20, %v1886_v63  ;;  %v2784_v59 = vadd.f32 1.0, %v3976_v44  ;;  %v2405_v5 = vadd.f32 %v2277_v43, %v5769_v32  ;;  %v2279_v13 = vmul.f32 %v2151_v28, %v5785_v3 }
 0x254   :  { %v2278_v12 = vmul.f32 %v2150_v11, %v5792_v16  ;;  %v2152_v22 = vmul.f32 %v2024_v23, %v5796_v56  ;;  %v2025_v26 = vmul.f32 0.044715, %v5810_v6  ;;  %v5819_v34 = vadd.f32 %v4314_v40, %v5949_v31 }
 0x255   :  { %v3978_v37 = vpop.eup %3977  ;;  %v3593_v27 = vpack.c.bf16 %v2910_v53, %v2909_v24  ;;  %v2912_v39 = vmul.f32 %v2784_v59, %v1888_v48  ;;  %v2533_v14 = vmul.f32 0.7978846, %v2405_v5  ;;  %v2407_v4 = vadd.f32 %v2279_v13, %v5785_v3 }
 0x256   :  { %v2785_v49 = vadd.f32 1.0, %v3978_v37  ;;  %v2406_v55 = vadd.f32 %v2278_v12, %v5792_v16  ;;  %v2280_v52 = vmul.f32 %v2152_v22, %v5796_v56  ;;  %v2153_v1 = vmul.f32 %v2025_v26, %v5810_v6 }
 0x257   :  { %v3980_v61 = vpop.eup %3979  ;;  %3365 = vst [vmem:[%s5877_s3 + $0x1c0] sm:$0xff] %v3593_v27  ;;  %v3594_v40 = vpack.c.bf16 %v2912_v39, %v2911_v45  ;;  %3985 = vtanh.f32 %v2533_v14  ;;  %v2535_v8 = vmul.f32 0.7978846, %v2407_v4  ;;  %v5830_v46 = vadd.f32 %v4316_v41, %v5314_v57 }
 0x258   :  { %v2787_v15 = vadd.f32 1.0, %v3980_v61  ;;  %v1892_v19 = vmul.f32 0.5, %v5755_v58  ;;  %v2534_v63 = vmul.f32 0.7978846, %v2406_v55  ;;  %v2408_v50 = vadd.f32 %v2280_v52, %v5796_v56 }
 0x259   :  { %v3982_v62 = vpop.eup %3981  ;;  %3366 = vst [vmem:[%s5877_s3 + $0x1c8] sm:$0xff] %v3594_v40  ;;  %v2913_v17 = vmul.f32 %v2785_v49, %v1889_v25  ;;  %3987 = vtanh.f32 %v2535_v8  ;;  %v2281_v54 = vmul.f32 %v2153_v1, %v5810_v6  ;;  %v2027_v38 = vmul.f32 0.044715, %v5819_v34 }
 0x25a   :  { %v3984_v60 = vpop.eup %3983  ;;  %v2915_v41 = vmul.f32 %v2787_v15, %v1891_v36  ;;  %v2786_v57 = vadd.f32 1.0, %v3982_v62  ;;  %3989 = vtanh.f32 %v2534_v63  ;;  %v2536_v18 = vmul.f32 0.7978846, %v2408_v50 }
 0x25b   :  { %v2788_v58 = vadd.f32 1.0, %v3984_v60  ;;  %v2409_v48 = vadd.f32 %v2281_v54, %v5810_v6  ;;  %v2155_v47 = vmul.f32 %v2027_v38, %v5819_v34  ;;  %v2026_v9 = vmul.f32 0.044715, %v5830_v46 }
 0x25c   :  { %v2914_v7 = vmul.f32 %v2786_v57, %v1890_v35  ;;  %3991 = vtanh.f32 %v2536_v18  ;;  %v1772_v2 = vadd.f32 %v4318_v42, %v5317_v29  ;;  %v1893_v35 = vmul.f32 0.5, %v5769_v32 }
 0x25d   :  { %v2916_v30 = vmul.f32 %v2788_v58, %v1892_v19  ;;  %v2537_v25 = vmul.f32 0.7978846, %v2409_v48  ;;  %v2283_v51 = vmul.f32 %v2155_v47, %v5819_v34  ;;  %v2154_v0 = vmul.f32 %v2026_v9, %v5830_v46 }
 0x25e   :  { %v3595_v10 = vpack.c.bf16 %v2914_v7, %v2913_v17  ;;  %v2028_v24 = vmul.f32 0.044715, %v1772_v2  ;;  %v1895_v53 = vmul.f32 0.5, %v5785_v3  ;;  %v1894_v12 = vmul.f32 0.5, %v5792_v16 }
 0x25f   :  { %v3596_v36 = vpack.c.bf16 %v2916_v30, %v2915_v41  ;;  %3993 = vtanh.f32 %v2537_v25  ;;  %v2411_v21 = vadd.f32 %v2283_v51, %v5819_v34  ;;  %v2282_v20 = vmul.f32 %v2154_v0, %v5830_v46 }
 0x260   :  { %3367 = vst [vmem:[%s5877_s3 + $0x1d0] sm:$0xff] %v3595_v10  ;;  %v2156_v43 = vmul.f32 %v2028_v24, %v1772_v2  ;;  %v1896_v39 = vmul.f32 0.5, %v5796_v56  ;;  %v1897_v52 = vmul.f32 0.5, %v5810_v6  ;;  %v1898_v40 = vmul.f32 0.5, %v5830_v46 }
 0x261   :  { %v3986_v42 = vpop.eup %3985  ;;  %3368 = vst [vmem:[%s5877_s3 + $0x1d8] sm:$0xff] %v3596_v36  ;;  %v2539_v29 = vmul.f32 0.7978846, %v2411_v21  ;;  %v2410_v28 = vadd.f32 %v2282_v20, %v5830_v46  ;;  %v1899_v15 = vmul.f32 0.5, %v5819_v34  ;;  %v1900_v62 = vmul.f32 0.5, %v1772_v2 }
 0x262   :  { %v2789_v23 = vadd.f32 1.0, %v3986_v42  ;;  %v2284_v44 = vmul.f32 %v2156_v43, %v1772_v2 }
 0x263   :  { %v3988_v45 = vpop.eup %3987  ;;  %3995 = vtanh.f32 %v2539_v29  ;;  %v2538_v11 = vmul.f32 0.7978846, %v2410_v28 }
 0x264   :  { %v3990_v33 = vpop.eup %3989  ;;  %v2791_v59 = vadd.f32 1.0, %v3988_v45  ;;  %v2412_v5 = vadd.f32 %v2284_v44, %v1772_v2  ;;  %v2917_v13 = vmul.f32 %v2789_v23, %v1893_v35 }
 0x265   :  { %v2790_v22 = vadd.f32 1.0, %v3990_v33  ;;  %3997 = vtanh.f32 %v2538_v11 }
 0x266   :  { %v3992_v26 = vpop.eup %3991  ;;  %v2540_v31 = vmul.f32 0.7978846, %v2412_v5  ;;  %v2919_v37 = vmul.f32 %v2791_v59, %v1895_v53 }
 0x267   :  { %v2918_v27 = vmul.f32 %v2790_v22, %v1894_v12  ;;  %v2792_v14 = vadd.f32 1.0, %v3992_v26 }
 0x268   :  { %3999 = vtanh.f32 %v2540_v31 }
 0x269   :  { %v3994_v32 = vpop.eup %3993  ;;  %v3597_v4 = vpack.c.bf16 %v2918_v27, %v2917_v13  ;;  %v2920_v49 = vmul.f32 %v2792_v14, %v1896_v39 }
 0x26a   :  { %v2793_v55 = vadd.f32 1.0, %v3994_v32 }
 0x26b   :  { %3369 = vst [vmem:[%s5877_s3 + $0x1e0] sm:$0xff] %v3597_v4  ;;  %v3598_v3 = vpack.c.bf16 %v2920_v49, %v2919_v37 }
 0x26c   :  { %v2921_v61 = vmul.f32 %v2793_v55, %v1897_v52 }
 0x26d   :  { %v3996_v16 = vpop.eup %3995  ;;  %3370 = vst [vmem:[%s5877_s3 + $0x1e8] sm:$0xff] %v3598_v3 }
 0x26e   :  { %v2795_v56 = vadd.f32 1.0, %v3996_v16 }
 0x26f   :  { %v3998_v1 = vpop.eup %3997 }
 0x270   :  { %v2794_v8 = vadd.f32 1.0, %v3998_v1  ;;  %v2923_v50 = vmul.f32 %v2795_v56, %v1899_v15 }
 0x272   :  { %v4000_v19 = vpop.eup %3999  ;;  %v2922_v63 = vmul.f32 %v2794_v8, %v1898_v40 }
 0x273   :  { %v2796_v17 = vadd.f32 1.0, %v4000_v19 }
 0x274   :  { %v3599_v54 = vpack.c.bf16 %v2922_v63, %v2921_v61 }
 0x275   :  { %v2924_v38 = vmul.f32 %v2796_v17, %v1900_v62 }
 0x276   :  { %3371 = vst [vmem:[%s5877_s3 + $0x1f0] sm:$0xff] %v3599_v54 }
 0x277   :  { %v3600_v6 = vpack.c.bf16 %v2924_v38, %v2923_v50 }
 0x279   :  { %3372 = vst [vmem:[%s5877_s3 + $0x1f8] sm:$0xff] %v3600_v6 }

</bundles_post_ra>
